<compile_context>
chip_gen: v6e
topology: v6e:2x2x1
jax: 0.10.0
libtpu: 0.0.40
codegen_flags: <defaults>
</compile_context>

<pallas_src>
import functools
import math

import jax
import jax.numpy as jnp
from jax.experimental import pallas as pl
from jax.experimental.pallas import tpu as pltpu

NUM_CLASSES = 40  # len(classes) in the reference script
_VMEM_LIMIT = 32 * 1024 * 1024


def _round_up(x, m):
    return (x + m - 1) // m * m


# ----------------------------- GEMM + BN kernels ---------------------------

def _matmul_bn_kernel(x_ref, w_ref, scale_ref, shift_ref, o_ref, acc_ref, *, relu):
    """K-accumulating GEMM; grid = (M, N, K) with K innermost."""
    k = pl.program_id(2)

    @pl.when(k == 0)
    def _():
        acc_ref[...] = jnp.zeros_like(acc_ref)

    acc_ref[...] += jnp.dot(x_ref[...], w_ref[...],
                            preferred_element_type=jnp.float32)

    @pl.when(k == pl.num_programs(2) - 1)
    def _():
        y = acc_ref[...] * scale_ref[...] + shift_ref[...]
        if relu:
            y = jnp.maximum(y, 0.0)
        o_ref[...] = y


def _matmul_bn_single_k_kernel(x_ref, w_ref, scale_ref, shift_ref, o_ref, *, relu):
    """Whole K in one tile: no accumulator scratch, write the epilogue directly."""
    y = jnp.dot(x_ref[...], w_ref[...], preferred_element_type=jnp.float32)
    y = y * scale_ref[...] + shift_ref[...]
    if relu:
        y = jnp.maximum(y, 0.0)
    o_ref[...] = y


def _gemm_tiles(M, N, K):
    # M tile: don't pad tiny layers up to 128 rows (bf16 second-minor tile = 16).
    if M <= 256:
        tm = _round_up(M, 16)
    elif M <= 4096:
        tm = 256
    else:
        tm = 512
    Mp = _round_up(M, tm)
    # N tile: 256-wide for the big layers, pad small N to one 128-lane group.
    tn = 256 if N > 256 else _round_up(N, 128)
    Np = _round_up(N, tn)
    # K tile: keep small K un-padded (full-dim block), otherwise 128/512-aligned.
    if K < 128:
        tk = Kp = _round_up(K, 16)
    elif K <= 2048:
        tk = Kp = _round_up(K, 128)
    else:
        tk = 512
        Kp = _round_up(K, 512)
    return tm, tn, tk, Mp, Np, Kp


def matmul_bn(x, w, scale, shift, relu):
    """y = maybe_relu((x @ w) * scale + shift). x:(M,K) w:(K,N) scale/shift:(N,).

    bf16 operands on the MXU, f32 accumulation + f32 BN/ReLU epilogue.
    """
    M, K = x.shape
    _, N = w.shape
    tm, tn, tk, Mp, Np, Kp = _gemm_tiles(M, N, K)
    xp = jnp.pad(x.astype(jnp.bfloat16), ((0, Mp - M), (0, Kp - K)))
    wp = jnp.pad(w.astype(jnp.bfloat16), ((0, Kp - K), (0, Np - N)))
    sp = jnp.pad(scale.astype(jnp.float32), (0, Np - N)).reshape(1, Np)
    bp = jnp.pad(shift.astype(jnp.float32), (0, Np - N)).reshape(1, Np)

    if Kp == tk:
        # Whole reduction fits in one tile — skip the accumulator round-trip.
        out = pl.pallas_call(
            functools.partial(_matmul_bn_single_k_kernel, relu=relu),
            out_shape=jax.ShapeDtypeStruct((Mp, Np), jnp.float32),
            grid_spec=pltpu.PrefetchScalarGridSpec(
                num_scalar_prefetch=0,
                grid=(Mp // tm, Np // tn),
                in_specs=[
                    pl.BlockSpec((tm, tk), lambda i, j: (i, 0)),
                    pl.BlockSpec((tk, tn), lambda i, j: (0, j)),
                    pl.BlockSpec((1, tn), lambda i, j: (0, j)),
                    pl.BlockSpec((1, tn), lambda i, j: (0, j)),
                ],
                out_specs=pl.BlockSpec((tm, tn), lambda i, j: (i, j)),
            ),
            compiler_params=pltpu.CompilerParams(
                dimension_semantics=("parallel", "parallel"),
                vmem_limit_bytes=_VMEM_LIMIT),
        )(xp, wp, sp, bp)
    else:
        out = pl.pallas_call(
            functools.partial(_matmul_bn_kernel, relu=relu),
            out_shape=jax.ShapeDtypeStruct((Mp, Np), jnp.float32),
            grid_spec=pltpu.PrefetchScalarGridSpec(
                num_scalar_prefetch=0,
                grid=(Mp // tm, Np // tn, Kp // tk),
                in_specs=[
                    pl.BlockSpec((tm, tk), lambda i, j, k: (i, k)),
                    pl.BlockSpec((tk, tn), lambda i, j, k: (k, j)),
                    pl.BlockSpec((1, tn), lambda i, j, k: (0, j)),
                    pl.BlockSpec((1, tn), lambda i, j, k: (0, j)),
                ],
                out_specs=pl.BlockSpec((tm, tn), lambda i, j, k: (i, j)),
                scratch_shapes=[pltpu.VMEM((tm, tn), jnp.float32)],
            ),
            compiler_params=pltpu.CompilerParams(
                dimension_semantics=("parallel", "parallel", "arbitrary"),
                vmem_limit_bytes=_VMEM_LIMIT),
        )(xp, wp, sp, bp)
    return out[:M, :N]


# ------------------- depthwise 3x3 / maxpool Pallas kernels ----------------
# One grid step = one image; the 9 taps are formed with in-VMEM slices, so the
# activation is read from HBM ~once instead of materializing a 9x im2col copy.

def _dw_s1_kernel(x_ref, w_ref, scale_ref, shift_ref, o_ref):
    # x_ref: (H+2, W+2, C) zero-padded slab; o_ref: (H, W, C)
    Ho, Wo, _ = o_ref.shape
    w = w_ref[...]                                    # (9, C)
    acc = x_ref[0:Ho, 0:Wo, :] * w[0:1, :]
    for kh in range(3):
        for kw in range(3):
            if kh == 0 and kw == 0:
                continue
            k = 3 * kh + kw
            acc = acc + x_ref[kh:kh + Ho, kw:kw + Wo, :] * w[k:k + 1, :]
    o_ref[...] = acc * scale_ref[...] + shift_ref[...]


def _dw_s2_kernel(pee_ref, peo_ref, poe_ref, poo_ref,
                  w_ref, scale_ref, shift_ref, o_ref):
    # phase refs: even/odd rows x even/odd cols of the zero-padded slab.
    Ho, Wo, _ = o_ref.shape
    w = w_ref[...]                                    # (9, C)
    phase = ((pee_ref, peo_ref), (poe_ref, poo_ref))
    acc = None
    for kh in range(3):
        for kw in range(3):
            ref = phase[kh % 2][kw % 2]
            ro, co = kh // 2, kw // 2
            k = 3 * kh + kw
            tap = ref[ro:ro + Ho, co:co + Wo, :] * w[k:k + 1, :]
            acc = tap if acc is None else acc + tap
    o_ref[...] = acc * scale_ref[...] + shift_ref[...]


def _maxpool_s2_kernel(pee_ref, peo_ref, poe_ref, poo_ref, o_ref):
    Ho, Wo, _ = o_ref.shape
    phase = ((pee_ref, peo_ref), (poe_ref, poo_ref))
    m = None
    for kh in range(3):
        for kw in range(3):
            ref = phase[kh % 2][kw % 2]
            tap = ref[kh // 2:kh // 2 + Ho, kw // 2:kw // 2 + Wo, :]
            m = tap if m is None else jnp.maximum(m, tap)
    o_ref[...] = m


def _per_image_spec(arr):
    """Block = full spatial slab of one image, batch dim squeezed."""
    return pl.BlockSpec((None,) + arr.shape[1:], lambda b: (b, 0, 0, 0))


def _phase_split(xp):
    """Even/odd row x even/odd col phases of a padded NHWC tensor (for stride 2)."""
    return (xp[:, 0::2, 0::2, :], xp[:, 0::2, 1::2, :],
            xp[:, 1::2, 0::2, :], xp[:, 1::2, 1::2, :])


def dwconv3x3_bn(x, w, scale, shift, stride):
    """Depthwise 3x3 conv (groups=C, padding=1) + folded BN affine (no ReLU)."""
    B, H, W, C = x.shape
    wk = w.reshape(9, C).astype(jnp.float32)
    sp = scale.astype(jnp.float32).reshape(1, C)
    bp = shift.astype(jnp.float32).reshape(1, C)
    xp = jnp.pad(x, ((0, 0), (1, 1), (1, 1), (0, 0)))
    cparams = pltpu.CompilerParams(dimension_semantics=("parallel",),
                                   vmem_limit_bytes=_VMEM_LIMIT)
    small_specs = [pl.BlockSpec(wk.shape, lambda b: (0, 0)),
                   pl.BlockSpec(sp.shape, lambda b: (0, 0)),
                   pl.BlockSpec(bp.shape, lambda b: (0, 0))]
    if stride == 1:
        Ho, Wo = H, W
        return pl.pallas_call(
            _dw_s1_kernel,
            out_shape=jax.ShapeDtypeStruct((B, Ho, Wo, C), jnp.float32),
            grid=(B,),
            in_specs=[_per_image_spec(xp)] + small_specs,
            out_specs=pl.BlockSpec((None, Ho, Wo, C), lambda b: (b, 0, 0, 0)),
            compiler_params=cparams,
        )(xp, wk, sp, bp)
    Ho = (H - 1) // 2 + 1
    Wo = (W - 1) // 2 + 1
    phases = _phase_split(xp)
    return pl.pallas_call(
        _dw_s2_kernel,
        out_shape=jax.ShapeDtypeStruct((B, Ho, Wo, C), jnp.float32),
        grid=(B,),
        in_specs=[_per_image_spec(p) for p in phases] + small_specs,
        out_specs=pl.BlockSpec((None, Ho, Wo, C), lambda b: (b, 0, 0, 0)),
        compiler_params=cparams,
    )(*phases, wk, sp, bp)


def maxpool3x3_s2(x):
    """MaxPool2d(kernel=3, stride=2, padding=1)."""
    B, H, W, C = x.shape
    xp = jnp.pad(x, ((0, 0), (1, 1), (1, 1), (0, 0)),
                 constant_values=float("-inf"))
    Ho = (H - 1) // 2 + 1
    Wo = (W - 1) // 2 + 1
    phases = _phase_split(xp)
    return pl.pallas_call(
        _maxpool_s2_kernel,
        out_shape=jax.ShapeDtypeStruct((B, Ho, Wo, C), jnp.float32),
        grid=(B,),
        in_specs=[_per_image_spec(p) for p in phases],
        out_specs=pl.BlockSpec((None, Ho, Wo, C), lambda b: (b, 0, 0, 0)),
        compiler_params=pltpu.CompilerParams(
            dimension_semantics=("parallel",),
            vmem_limit_bytes=_VMEM_LIMIT),
    )(*phases)


# ----------------------------- conv wrappers ------------------------------

def _extract_patches(x, stride):
    """x:(B,H,W,C) -> ((B,Ho,Wo,9*C), Ho, Wo) im2col for a 3x3 window, pad=1."""
    B, H, W, C = x.shape
    xp = jnp.pad(x, ((0, 0), (1, 1), (1, 1), (0, 0)))
    Ho = (H + 2 - 3) // stride + 1
    Wo = (W + 2 - 3) // stride + 1
    cols = []
    for kh in range(3):
        for kw in range(3):
            cols.append(xp[:, kh:kh + stride * (Ho - 1) + 1:stride,
                           kw:kw + stride * (Wo - 1) + 1:stride, :])
    patches = jnp.stack(cols, axis=3)                 # (B,Ho,Wo,9,C)
    return patches.reshape(B, Ho, Wo, 9 * C), Ho, Wo


def conv1x1_bn(x, w, scale, shift, relu=True):
    B, H, W, C = x.shape
    y = matmul_bn(x.reshape(B * H * W, C), w, scale, shift, relu)
    return y.reshape(B, H, W, w.shape[1])


def conv3x3_dense(x, w, scale, shift, stride, relu):
    """Dense 3x3 conv via im2col + Pallas GEMM. w:(3,3,Cin,Cout)."""
    B, H, W, C = x.shape
    patches, Ho, Wo = _extract_patches(x, stride)
    Cout = w.shape[-1]
    y = matmul_bn(patches.reshape(B * Ho * Wo, 9 * C), w.reshape(9 * C, Cout),
                  scale, shift, relu)
    return y.reshape(B, Ho, Wo, Cout)


# ----------------------------- model definition ---------------------------

def channel_shuffle(x, groups=2):
    # TODO(synk): fold this static channel permutation (and the split/concat
    # below) into the adjacent 1x1 conv weights to remove the XLA relayouts.
    B, H, W, C = x.shape
    x = x.reshape(B, H, W, groups, C // groups)
    x = jnp.swapaxes(x, 3, 4)
    return x.reshape(B, H, W, C)


def shuffle_block(x, blk):
    if "b1_dw_w" in blk:  # downsample block
        b1 = dwconv3x3_bn(x, blk["b1_dw_w"], *blk["b1_dw_bn"], stride=2)
        b1 = conv1x1_bn(b1, blk["b1_pw_w"], *blk["b1_pw_bn"], relu=True)
        b2 = conv1x1_bn(x, blk["b2_pw1_w"], *blk["b2_pw1_bn"], relu=True)
        b2 = dwconv3x3_bn(b2, blk["b2_dw_w"], *blk["b2_dw_bn"], stride=2)
        b2 = conv1x1_bn(b2, blk["b2_pw2_w"], *blk["b2_pw2_bn"], relu=True)
        out = jnp.concatenate([b1, b2], axis=-1)
    else:
        C = x.shape[-1]
        half = C // 2
        x1, x2 = x[..., :half], x[..., half:]
        b2 = conv1x1_bn(x2, blk["b2_pw1_w"], *blk["b2_pw1_bn"], relu=True)
        b2 = dwconv3x3_bn(b2, blk["b2_dw_w"], *blk["b2_dw_bn"], stride=1)
        b2 = conv1x1_bn(b2, blk["b2_pw2_w"], *blk["b2_pw2_bn"], relu=True)
        out = jnp.concatenate([x1, b2], axis=-1)
    return channel_shuffle(out, 2)


def shufflenet2_forward(params, x_nchw):
    x = jnp.transpose(x_nchw, (0, 2, 3, 1)).astype(jnp.float32)  # NCHW -> NHWC
    # conv1: plain 3x3 conv, stride 2, bias, no BN / no ReLU
    c1 = params["conv1_w"].shape[-1]
    x = conv3x3_dense(x, params["conv1_w"],
                      jnp.ones((c1,), jnp.float32), params["conv1_b"],
                      stride=2, relu=False)
    x = maxpool3x3_s2(x)
    for blk in params["blocks"]:
        x = shuffle_block(x, blk)
    x = conv3x3_dense(x, params["extra_w"], *params["extra_bn"],
                      stride=1, relu=True)
    x = conv1x1_bn(x, params["conv5_w"], *params["conv5_bn"], relu=True)
    x = jnp.mean(x, axis=(1, 2))  # AdaptiveAvgPool2d((1,1)) + flatten
    # dropout: identity in inference mode
    logits = matmul_bn(x, params["fc_w"],
                       jnp.ones((params["fc_w"].shape[1],), jnp.float32),
                       params["fc_b"], relu=False)
    return logits


# ----------------------------- parameter init -----------------------------

class _KeyGen:
    def __init__(self, seed):
        self._key = jax.random.PRNGKey(seed)

    def __call__(self):
        self._key, sub = jax.random.split(self._key)
        return sub


def _conv_w(kg, shape, fan_in):
    return jax.random.normal(kg(), shape, jnp.float32) * math.sqrt(2.0 / fan_in)


def _bn(kg, c):
    # folded eval-mode BatchNorm: per-channel scale / shift
    scale = 1.0 + 0.05 * jax.random.normal(kg(), (c,), jnp.float32)
    shift = 0.05 * jax.random.normal(kg(), (c,), jnp.float32)
    return scale, shift


def init_params(seed=0, num_classes=NUM_CLASSES):
    kg = _KeyGen(seed)
    oc = [3, 24, 244, 488, 976, 2048]  # net_type = 2
    repeats = [6, 10, 6]

    def mm_w(shape, fan_in):
        # GEMM / MXU weights are pre-cast to bf16 once at init.
        return _conv_w(kg, shape, fan_in).astype(jnp.bfloat16)

    p = {}
    p["conv1_w"] = mm_w((3, 3, 3, oc[1]), 27)
    p["conv1_b"] = 0.05 * jax.random.normal(kg(), (oc[1],), jnp.float32)
    blocks = []
    in_c = oc[1]
    for si, rep in enumerate(repeats):
        out_c = oc[2 + si]
        half = out_c // 2
        for i in range(rep):
            down = (i == 0)
            blk = {}
            if down:
                blk["b1_dw_w"] = _conv_w(kg, (3, 3, in_c), 9)   # VPU, keep f32
                blk["b1_dw_bn"] = _bn(kg, in_c)
                blk["b1_pw_w"] = mm_w((in_c, half), in_c)
                blk["b1_pw_bn"] = _bn(kg, half)
                blk["b2_pw1_w"] = mm_w((in_c, half), in_c)
            else:
                blk["b2_pw1_w"] = mm_w((half, half), half)
            blk["b2_pw1_bn"] = _bn(kg, half)
            blk["b2_dw_w"] = _conv_w(kg, (3, 3, half), 9)       # VPU, keep f32
            blk["b2_dw_bn"] = _bn(kg, half)
            blk["b2_pw2_w"] = mm_w((half, half), half)
            blk["b2_pw2_bn"] = _bn(kg, half)
            blocks.append(blk)
            in_c = out_c
    p["blocks"] = blocks
    p["extra_w"] = mm_w((3, 3, oc[4], oc[4] * 2), 9 * oc[4])
    p["extra_bn"] = _bn(kg, oc[4] * 2)
    p["conv5_w"] = mm_w((oc[4] * 2, oc[5]), oc[4] * 2)
    p["conv5_bn"] = _bn(kg, oc[5])
    p["fc_w"] = mm_w((oc[5], num_classes), oc[5])
    p["fc_b"] = jnp.zeros((num_classes,), jnp.float32)
    return p


# ----------------------------------- main ----------------------------------

if __name__ == "__main__":
    params = init_params(seed=0)
    # smallest legal input_size (must be a multiple of 32); input is NCHW like PyTorch
    x = jax.random.normal(jax.random.PRNGKey(0), (2, 3, 32, 32), jnp.float32)
    fwd = jax.jit(shufflenet2_forward)
    out = jax.block_until_ready(fwd(params, x))
    assert out.shape == (2, NUM_CLASSES), out.shape
    print("KERNEL_OK")
</pallas_src>

<mosaic_0001>
module attributes {stable_mosaic.version = 11 : i64} {
  func.func @_matmul_bn_single_k_kernel(%arg0: i32, %arg1: i32, %arg2: memref<256x32xbf16, #tpu.memory_space<vmem>>, %arg3: memref<32x128xbf16, #tpu.memory_space<vmem>>, %arg4: memref<1x128xf32, #tpu.memory_space<vmem>>, %arg5: memref<1x128xf32, #tpu.memory_space<vmem>>, %arg6: memref<256x128xf32, #tpu.memory_space<vmem>>) attributes {dimension_semantics = [#tpu.dimension_semantics<parallel>, #tpu.dimension_semantics<parallel>], iteration_bounds = array<i64: 2, 1>, scalar_prefetch = 0 : i64, scratch_operands = 0 : i64, tpu.core_type = #tpu.core_type<tc>, window_params = [{transform_indices = @transform_0, window_bounds = array<i64: 256, 32>}, {transform_indices = @transform_1, window_bounds = array<i64: 32, 128>}, {transform_indices = @transform_2, window_bounds = array<i64: 1, 128>}, {transform_indices = @transform_3, window_bounds = array<i64: 1, 128>}, {transform_indices = @transform_4, window_bounds = array<i64: 256, 128>}]} {
    %c0 = arith.constant 0 : index
    %c0_0 = arith.constant 0 : index
    %0 = vector.load %arg2[%c0, %c0_0] : memref<256x32xbf16, #tpu.memory_space<vmem>>, vector<256x32xbf16>
    %c0_1 = arith.constant 0 : index
    %c0_2 = arith.constant 0 : index
    %1 = vector.load %arg3[%c0_1, %c0_2] : memref<32x128xbf16, #tpu.memory_space<vmem>>, vector<32x128xbf16>
    %cst = arith.constant dense<0.000000e+00> : vector<256x128xf32>
    %2 = tpu.matmul %0, %1, %cst {dimension_numbers = #tpu.dot_dimension_numbers<[1], [0], [0], [1], [0, 0, 1, 1], [], []>} : vector<256x32xbf16>, vector<32x128xbf16>, vector<256x128xf32> -> vector<256x128xf32>
    %c0_3 = arith.constant 0 : index
    %c0_4 = arith.constant 0 : index
    %3 = vector.load %arg4[%c0_3, %c0_4] : memref<1x128xf32, #tpu.memory_space<vmem>>, vector<1x128xf32>
    %4 = vector.broadcast %3 : vector<1x128xf32> to vector<256x128xf32>
    %5 = arith.mulf %2, %4 : vector<256x128xf32>
    %c0_5 = arith.constant 0 : index
    %c0_6 = arith.constant 0 : index
    %6 = vector.load %arg5[%c0_5, %c0_6] : memref<1x128xf32, #tpu.memory_space<vmem>>, vector<1x128xf32>
    %7 = vector.broadcast %6 : vector<1x128xf32> to vector<256x128xf32>
    %8 = arith.addf %5, %7 : vector<256x128xf32>
    %c0_7 = arith.constant 0 : index
    %c0_8 = arith.constant 0 : index
    %9 = vector.load %arg6[%c0_7, %c0_8] : memref<256x128xf32, #tpu.memory_space<vmem>>, vector<256x128xf32>
    tpu.vector_store %arg6[%c0_7, %c0_8], %8 {strides = array<i32>} : memref<256x128xf32, #tpu.memory_space<vmem>>, vector<256x128xf32>,
    return
  }
  func.func @transform_0(%arg0: i32, %arg1: i32) -> (i32, i32) {
    %c0_i32 = arith.constant 0 : i32
    %c0_i32_0 = arith.constant 0 : i32
    return %arg0, %c0_i32 : i32, i32
  }
  func.func @transform_1(%arg0: i32, %arg1: i32) -> (i32, i32) {
    %c0_i32 = arith.constant 0 : i32
    %c0_i32_0 = arith.constant 0 : i32
    return %c0_i32, %arg1 : i32, i32
  }
  func.func @transform_2(%arg0: i32, %arg1: i32) -> (i32, i32) {
    %c0_i32 = arith.constant 0 : i32
    %c0_i32_0 = arith.constant 0 : i32
    return %c0_i32, %arg1 : i32, i32
  }
  func.func @transform_3(%arg0: i32, %arg1: i32) -> (i32, i32) {
    %c0_i32 = arith.constant 0 : i32
    %c0_i32_0 = arith.constant 0 : i32
    return %c0_i32, %arg1 : i32, i32
  }
  func.func @transform_4(%arg0: i32, %arg1: i32) -> (i32, i32) {
    %c0_i32 = arith.constant 0 : i32
    return %arg0, %arg1 : i32, i32
  }
}

module attributes {stable_mosaic.version = 11 : i64} {
  func.func @_maxpool_s2_kernel(%arg0: i32, %arg1: memref<1x9x9x24xf32, #tpu.memory_space<vmem>>, %arg2: memref<1x9x9x24xf32, #tpu.memory_space<vmem>>, %arg3: memref<1x9x9x24xf32, #tpu.memory_space<vmem>>, %arg4: memref<1x9x9x24xf32, #tpu.memory_space<vmem>>, %arg5: memref<1x8x8x24xf32, #tpu.memory_space<vmem>>) attributes {dimension_semantics = [#tpu.dimension_semantics<parallel>], iteration_bounds = array<i64: 2>, scalar_prefetch = 0 : i64, scratch_operands = 0 : i64, tpu.core_type = #tpu.core_type<tc>, window_params = [{transform_indices = @transform_0, window_bounds = array<i64: 1, 9, 9, 24>}, {transform_indices = @transform_1, window_bounds = array<i64: 1, 9, 9, 24>}, {transform_indices = @transform_2, window_bounds = array<i64: 1, 9, 9, 24>}, {transform_indices = @transform_3, window_bounds = array<i64: 1, 9, 9, 24>}, {transform_indices = @transform_4, window_bounds = array<i64: 1, 8, 8, 24>}]} {
    %c0 = arith.constant 0 : index
    %c0_0 = arith.constant 0 : index
    %c0_1 = arith.constant 0 : index
    %c0_2 = arith.constant 0 : index
    %0 = vector.load %arg1[%c0, %c0_0, %c0_1, %c0_2] : memref<1x9x9x24xf32, #tpu.memory_space<vmem>>, vector<1x8x8x24xf32>
    %1 = vector.shape_cast %0 : vector<1x8x8x24xf32> to vector<8x8x24xf32>
    %c0_3 = arith.constant 0 : index
    %c0_4 = arith.constant 0 : index
    %c0_5 = arith.constant 0 : index
    %c0_6 = arith.constant 0 : index
    %2 = vector.load %arg2[%c0_3, %c0_4, %c0_5, %c0_6] : memref<1x9x9x24xf32, #tpu.memory_space<vmem>>, vector<1x8x8x24xf32>
    %3 = vector.shape_cast %2 : vector<1x8x8x24xf32> to vector<8x8x24xf32>
    %4 = arith.maximumf %1, %3 : vector<8x8x24xf32>
    %c0_7 = arith.constant 0 : index
    %c0_8 = arith.constant 0 : index
    %c1 = arith.constant 1 : index
    %c0_9 = arith.constant 0 : index
    %5 = vector.load %arg1[%c0_7, %c0_8, %c1, %c0_9] : memref<1x9x9x24xf32, #tpu.memory_space<vmem>>, vector<1x8x8x24xf32>
    %6 = vector.shape_cast %5 : vector<1x8x8x24xf32> to vector<8x8x24xf32>
    %7 = arith.maximumf %4, %6 : vector<8x8x24xf32>
    %c0_10 = arith.constant 0 : index
    %c0_11 = arith.constant 0 : index
    %c0_12 = arith.constant 0 : index
    %c0_13 = arith.constant 0 : index
    %8 = vector.load %arg3[%c0_10, %c0_11, %c0_12, %c0_13] : memref<1x9x9x24xf32, #tpu.memory_space<vmem>>, vector<1x8x8x24xf32>
    %9 = vector.shape_cast %8 : vector<1x8x8x24xf32> to vector<8x8x24xf32>
    %10 = arith.maximumf %7, %9 : vector<8x8x24xf32>
    %c0_14 = arith.constant 0 : index
    %c0_15 = arith.constant 0 : index
    %c0_16 = arith.constant 0 : index
    %c0_17 = arith.constant 0 : index
    %11 = vector.load %arg4[%c0_14, %c0_15, %c0_16, %c0_17] : memref<1x9x9x24xf32, #tpu.memory_space<vmem>>, vector<1x8x8x24xf32>
    %12 = vector.shape_cast %11 : vector<1x8x8x24xf32> to vector<8x8x24xf32>
    %13 = arith.maximumf %10, %12 : vector<8x8x24xf32>
    %c0_18 = arith.constant 0 : index
    %c0_19 = arith.constant 0 : index
    %c1_20 = arith.constant 1 : index
    %c0_21 = arith.constant 0 : index
    %14 = vector.load %arg3[%c0_18, %c0_19, %c1_20, %c0_21] : memref<1x9x9x24xf32, #tpu.memory_space<vmem>>, vector<1x8x8x24xf32>
    %15 = vector.shape_cast %14 : vector<1x8x8x24xf32> to vector<8x8x24xf32>
    %16 = arith.maximumf %13, %15 : vector<8x8x24xf32>
    %c0_22 = arith.constant 0 : index
    %c1_23 = arith.constant 1 : index
    %c0_24 = arith.constant 0 : index
    %c0_25 = arith.constant 0 : index
    %17 = vector.load %arg1[%c0_22, %c1_23, %c0_24, %c0_25] : memref<1x9x9x24xf32, #tpu.memory_space<vmem>>, vector<1x8x8x24xf32>
    %18 = vector.shape_cast %17 : vector<1x8x8x24xf32> to vector<8x8x24xf32>
    %19 = arith.maximumf %16, %18 : vector<8x8x24xf32>
    %c0_26 = arith.constant 0 : index
    %c1_27 = arith.constant 1 : index
    %c0_28 = arith.constant 0 : index
    %c0_29 = arith.constant 0 : index
    %20 = vector.load %arg2[%c0_26, %c1_27, %c0_28, %c0_29] : memref<1x9x9x24xf32, #tpu.memory_space<vmem>>, vector<1x8x8x24xf32>
    %21 = vector.shape_cast %20 : vector<1x8x8x24xf32> to vector<8x8x24xf32>
    %22 = arith.maximumf %19, %21 : vector<8x8x24xf32>
    %c0_30 = arith.constant 0 : index
    %c1_31 = arith.constant 1 : index
    %c1_32 = arith.constant 1 : index
    %c0_33 = arith.constant 0 : index
    %23 = vector.load %arg1[%c0_30, %c1_31, %c1_32, %c0_33] : memref<1x9x9x24xf32, #tpu.memory_space<vmem>>, vector<1x8x8x24xf32>
    %24 = vector.shape_cast %23 : vector<1x8x8x24xf32> to vector<8x8x24xf32>
    %25 = arith.maximumf %22, %24 : vector<8x8x24xf32>
    %c0_34 = arith.constant 0 : index
    %c0_35 = arith.constant 0 : index
    %c0_36 = arith.constant 0 : index
    %c0_37 = arith.constant 0 : index
    %26 = vector.load %arg5[%c0_34, %c0_35, %c0_36, %c0_37] : memref<1x8x8x24xf32, #tpu.memory_space<vmem>>, vector<1x8x8x24xf32>
    %27 = vector.shape_cast %26 : vector<1x8x8x24xf32> to vector<8x8x24xf32>
    %28 = vector.shape_cast %25 : vector<8x8x24xf32> to vector<1x8x8x24xf32>
    tpu.vector_store %arg5[%c0_34, %c0_35, %c0_36, %c0_37], %28 {strides = array<i32>} : memref<1x8x8x24xf32, #tpu.memory_space<vmem>>, vector<1x8x8x24xf32>,
    return
  }
  func.func @transform_0(%arg0: i32) -> (i32, i32, i32, i32) {
    %c0_i32 = arith.constant 0 : i32
    %c0_i32_0 = arith.constant 0 : i32
    %c0_i32_1 = arith.constant 0 : i32
    %c0_i32_2 = arith.constant 0 : i32
    return %arg0, %c0_i32, %c0_i32_0, %c0_i32_1 : i32, i32, i32, i32
  }
  func.func @transform_1(%arg0: i32) -> (i32, i32, i32, i32) {
    %c0_i32 = arith.constant 0 : i32
    %c0_i32_0 = arith.constant 0 : i32
    %c0_i32_1 = arith.constant 0 : i32
    %c0_i32_2 = arith.constant 0 : i32
    return %arg0, %c0_i32, %c0_i32_0, %c0_i32_1 : i32, i32, i32, i32
  }
  func.func @transform_2(%arg0: i32) -> (i32, i32, i32, i32) {
    %c0_i32 = arith.constant 0 : i32
    %c0_i32_0 = arith.constant 0 : i32
    %c0_i32_1 = arith.constant 0 : i32
    %c0_i32_2 = arith.constant 0 : i32
    return %arg0, %c0_i32, %c0_i32_0, %c0_i32_1 : i32, i32, i32, i32
  }
  func.func @transform_3(%arg0: i32) -> (i32, i32, i32, i32) {
    %c0_i32 = arith.constant 0 : i32
    %c0_i32_0 = arith.constant 0 : i32
    %c0_i32_1 = arith.constant 0 : i32
    %c0_i32_2 = arith.constant 0 : i32
    return %arg0, %c0_i32, %c0_i32_0, %c0_i32_1 : i32, i32, i32, i32
  }
  func.func @transform_4(%arg0: i32) -> (i32, i32, i32, i32) {
    %c0_i32 = arith.constant 0 : i32
    %c0_i32_0 = arith.constant 0 : i32
    %c0_i32_1 = arith.constant 0 : i32
    %c0_i32_2 = arith.constant 0 : i32
    return %arg0, %c0_i32, %c0_i32_0, %c0_i32_1 : i32, i32, i32, i32
  }
}

module attributes {stable_mosaic.version = 11 : i64} {
  func.func @_matmul_bn_single_k_kernel(%arg0: i32, %arg1: i32, %arg2: memref<32x32xbf16, #tpu.memory_space<vmem>>, %arg3: memref<32x128xbf16, #tpu.memory_space<vmem>>, %arg4: memref<1x128xf32, #tpu.memory_space<vmem>>, %arg5: memref<1x128xf32, #tpu.memory_space<vmem>>, %arg6: memref<32x128xf32, #tpu.memory_space<vmem>>) attributes {dimension_semantics = [#tpu.dimension_semantics<parallel>, #tpu.dimension_semantics<parallel>], iteration_bounds = array<i64: 1, 1>, scalar_prefetch = 0 : i64, scratch_operands = 0 : i64, tpu.core_type = #tpu.core_type<tc>, window_params = [{transform_indices = @transform_0, window_bounds = array<i64: 32, 32>}, {transform_indices = @transform_1, window_bounds = array<i64: 32, 128>}, {transform_indices = @transform_2, window_bounds = array<i64: 1, 128>}, {transform_indices = @transform_3, window_bounds = array<i64: 1, 128>}, {transform_indices = @transform_4, window_bounds = array<i64: 32, 128>}]} {
    %c0 = arith.constant 0 : index
    %c0_0 = arith.constant 0 : index
    %0 = vector.load %arg2[%c0, %c0_0] : memref<32x32xbf16, #tpu.memory_space<vmem>>, vector<32x32xbf16>
    %c0_1 = arith.constant 0 : index
    %c0_2 = arith.constant 0 : index
    %1 = vector.load %arg3[%c0_1, %c0_2] : memref<32x128xbf16, #tpu.memory_space<vmem>>, vector<32x128xbf16>
    %cst = arith.constant dense<0.000000e+00> : vector<32x128xf32>
    %2 = tpu.matmul %0, %1, %cst {dimension_numbers = #tpu.dot_dimension_numbers<[1], [0], [0], [1], [0, 0, 1, 1], [], []>} : vector<32x32xbf16>, vector<32x128xbf16>, vector<32x128xf32> -> vector<32x128xf32>
    %c0_3 = arith.constant 0 : index
    %c0_4 = arith.constant 0 : index
    %3 = vector.load %arg4[%c0_3, %c0_4] : memref<1x128xf32, #tpu.memory_space<vmem>>, vector<1x128xf32>
    %4 = vector.broadcast %3 : vector<1x128xf32> to vector<32x128xf32>
    %5 = arith.mulf %2, %4 : vector<32x128xf32>
    %c0_5 = arith.constant 0 : index
    %c0_6 = arith.constant 0 : index
    %6 = vector.load %arg5[%c0_5, %c0_6] : memref<1x128xf32, #tpu.memory_space<vmem>>, vector<1x128xf32>
    %7 = vector.broadcast %6 : vector<1x128xf32> to vector<32x128xf32>
    %8 = arith.addf %5, %7 : vector<32x128xf32>
    %cst_7 = arith.constant 0.000000e+00 : f32
    %9 = vector.broadcast %cst_7 : f32 to vector<32x128xf32>
    %10 = arith.maximumf %8, %9 : vector<32x128xf32>
    %c0_8 = arith.constant 0 : index
    %c0_9 = arith.constant 0 : index
    %11 = vector.load %arg6[%c0_8, %c0_9] : memref<32x128xf32, #tpu.memory_space<vmem>>, vector<32x128xf32>
    tpu.vector_store %arg6[%c0_8, %c0_9], %10 {strides = array<i32>} : memref<32x128xf32, #tpu.memory_space<vmem>>, vector<32x128xf32>,
    return
  }
  func.func @transform_0(%arg0: i32, %arg1: i32) -> (i32, i32) {
    %c0_i32 = arith.constant 0 : i32
    %c0_i32_0 = arith.constant 0 : i32
    return %arg0, %c0_i32 : i32, i32
  }
  func.func @transform_1(%arg0: i32, %arg1: i32) -> (i32, i32) {
    %c0_i32 = arith.constant 0 : i32
    %c0_i32_0 = arith.constant 0 : i32
    return %c0_i32, %arg1 : i32, i32
  }
  func.func @transform_2(%arg0: i32, %arg1: i32) -> (i32, i32) {
    %c0_i32 = arith.constant 0 : i32
    %c0_i32_0 = arith.constant 0 : i32
    return %c0_i32, %arg1 : i32, i32
  }
  func.func @transform_3(%arg0: i32, %arg1: i32) -> (i32, i32) {
    %c0_i32 = arith.constant 0 : i32
    %c0_i32_0 = arith.constant 0 : i32
    return %c0_i32, %arg1 : i32, i32
  }
  func.func @transform_4(%arg0: i32, %arg1: i32) -> (i32, i32) {
    %c0_i32 = arith.constant 0 : i32
    return %arg0, %arg1 : i32, i32
  }
}

module attributes {stable_mosaic.version = 11 : i64} {
  func.func @_dw_s2_kernel(%arg0: i32, %arg1: memref<1x5x5x24xf32, #tpu.memory_space<vmem>>, %arg2: memref<1x5x5x24xf32, #tpu.memory_space<vmem>>, %arg3: memref<1x5x5x24xf32, #tpu.memory_space<vmem>>, %arg4: memref<1x5x5x24xf32, #tpu.memory_space<vmem>>, %arg5: memref<9x24xf32, #tpu.memory_space<vmem>>, %arg6: memref<1x24xf32, #tpu.memory_space<vmem>>, %arg7: memref<1x24xf32, #tpu.memory_space<vmem>>, %arg8: memref<1x4x4x24xf32, #tpu.memory_space<vmem>>) attributes {dimension_semantics = [#tpu.dimension_semantics<parallel>], iteration_bounds = array<i64: 2>, scalar_prefetch = 0 : i64, scratch_operands = 0 : i64, tpu.core_type = #tpu.core_type<tc>, window_params = [{transform_indices = @transform_0, window_bounds = array<i64: 1, 5, 5, 24>}, {transform_indices = @transform_1, window_bounds = array<i64: 1, 5, 5, 24>}, {transform_indices = @transform_2, window_bounds = array<i64: 1, 5, 5, 24>}, {transform_indices = @transform_3, window_bounds = array<i64: 1, 5, 5, 24>}, {pipeline_mode = #tpu.pipeline_mode<synchronous>, transform_indices = @transform_4, window_bounds = array<i64: 9, 24>}, {pipeline_mode = #tpu.pipeline_mode<synchronous>, transform_indices = @transform_5, window_bounds = array<i64: 1, 24>}, {pipeline_mode = #tpu.pipeline_mode<synchronous>, transform_indices = @transform_6, window_bounds = array<i64: 1, 24>}, {transform_indices = @transform_7, window_bounds = array<i64: 1, 4, 4, 24>}]} {
    %c0 = arith.constant 0 : index
    %c0_0 = arith.constant 0 : index
    %0 = vector.load %arg5[%c0, %c0_0] : memref<9x24xf32, #tpu.memory_space<vmem>>, vector<9x24xf32>
    %c0_1 = arith.constant 0 : index
    %c0_2 = arith.constant 0 : index
    %c0_3 = arith.constant 0 : index
    %c0_4 = arith.constant 0 : index
    %1 = vector.load %arg1[%c0_1, %c0_2, %c0_3, %c0_4] : memref<1x5x5x24xf32, #tpu.memory_space<vmem>>, vector<1x4x4x24xf32>
    %2 = vector.shape_cast %1 : vector<1x4x4x24xf32> to vector<4x4x24xf32>
    %3 = vector.extract_strided_slice %0 {offsets = [0, 0], sizes = [1, 24], strides = [1, 1]} : vector<9x24xf32> to vector<1x24xf32>
    %4 = vector.shape_cast %3 : vector<1x24xf32> to vector<1x1x24xf32>
    %5 = vector.broadcast %4 : vector<1x1x24xf32> to vector<4x4x24xf32>
    %6 = arith.mulf %2, %5 : vector<4x4x24xf32>
    %c0_5 = arith.constant 0 : index
    %c0_6 = arith.constant 0 : index
    %c0_7 = arith.constant 0 : index
    %c0_8 = arith.constant 0 : index
    %7 = vector.load %arg2[%c0_5, %c0_6, %c0_7, %c0_8] : memref<1x5x5x24xf32, #tpu.memory_space<vmem>>, vector<1x4x4x24xf32>
    %8 = vector.shape_cast %7 : vector<1x4x4x24xf32> to vector<4x4x24xf32>
    %9 = vector.extract_strided_slice %0 {offsets = [1, 0], sizes = [1, 24], strides = [1, 1]} : vector<9x24xf32> to vector<1x24xf32>
    %10 = vector.shape_cast %9 : vector<1x24xf32> to vector<1x1x24xf32>
    %11 = vector.broadcast %10 : vector<1x1x24xf32> to vector<4x4x24xf32>
    %12 = arith.mulf %8, %11 : vector<4x4x24xf32>
    %13 = arith.addf %6, %12 : vector<4x4x24xf32>
    %c0_9 = arith.constant 0 : index
    %c0_10 = arith.constant 0 : index
    %c1 = arith.constant 1 : index
    %c0_11 = arith.constant 0 : index
    %14 = vector.load %arg1[%c0_9, %c0_10, %c1, %c0_11] : memref<1x5x5x24xf32, #tpu.memory_space<vmem>>, vector<1x4x4x24xf32>
    %15 = vector.shape_cast %14 : vector<1x4x4x24xf32> to vector<4x4x24xf32>
    %16 = vector.extract_strided_slice %0 {offsets = [2, 0], sizes = [1, 24], strides = [1, 1]} : vector<9x24xf32> to vector<1x24xf32>
    %17 = vector.shape_cast %16 : vector<1x24xf32> to vector<1x1x24xf32>
    %18 = vector.broadcast %17 : vector<1x1x24xf32> to vector<4x4x24xf32>
    %19 = arith.mulf %15, %18 : vector<4x4x24xf32>
    %20 = arith.addf %13, %19 : vector<4x4x24xf32>
    %c0_12 = arith.constant 0 : index
    %c0_13 = arith.constant 0 : index
    %c0_14 = arith.constant 0 : index
    %c0_15 = arith.constant 0 : index
    %21 = vector.load %arg3[%c0_12, %c0_13, %c0_14, %c0_15] : memref<1x5x5x24xf32, #tpu.memory_space<vmem>>, vector<1x4x4x24xf32>
    %22 = vector.shape_cast %21 : vector<1x4x4x24xf32> to vector<4x4x24xf32>
    %23 = vector.extract_strided_slice %0 {offsets = [3, 0], sizes = [1, 24], strides = [1, 1]} : vector<9x24xf32> to vector<1x24xf32>
    %24 = vector.shape_cast %23 : vector<1x24xf32> to vector<1x1x24xf32>
    %25 = vector.broadcast %24 : vector<1x1x24xf32> to vector<4x4x24xf32>
    %26 = arith.mulf %22, %25 : vector<4x4x24xf32>
    %27 = arith.addf %20, %26 : vector<4x4x24xf32>
    %c0_16 = arith.constant 0 : index
    %c0_17 = arith.constant 0 : index
    %c0_18 = arith.constant 0 : index
    %c0_19 = arith.constant 0 : index
    %28 = vector.load %arg4[%c0_16, %c0_17, %c0_18, %c0_19] : memref<1x5x5x24xf32, #tpu.memory_space<vmem>>, vector<1x4x4x24xf32>
    %29 = vector.shape_cast %28 : vector<1x4x4x24xf32> to vector<4x4x24xf32>
    %30 = vector.extract_strided_slice %0 {offsets = [4, 0], sizes = [1, 24], strides = [1, 1]} : vector<9x24xf32> to vector<1x24xf32>
    %31 = vector.shape_cast %30 : vector<1x24xf32> to vector<1x1x24xf32>
    %32 = vector.broadcast %31 : vector<1x1x24xf32> to vector<4x4x24xf32>
    %33 = arith.mulf %29, %32 : vector<4x4x24xf32>
    %34 = arith.addf %27, %33 : vector<4x4x24xf32>
    %c0_20 = arith.constant 0 : index
    %c0_21 = arith.constant 0 : index
    %c1_22 = arith.constant 1 : index
    %c0_23 = arith.constant 0 : index
    %35 = vector.load %arg3[%c0_20, %c0_21, %c1_22, %c0_23] : memref<1x5x5x24xf32, #tpu.memory_space<vmem>>, vector<1x4x4x24xf32>
    %36 = vector.shape_cast %35 : vector<1x4x4x24xf32> to vector<4x4x24xf32>
    %37 = vector.extract_strided_slice %0 {offsets = [5, 0], sizes = [1, 24], strides = [1, 1]} : vector<9x24xf32> to vector<1x24xf32>
    %38 = vector.shape_cast %37 : vector<1x24xf32> to vector<1x1x24xf32>
    %39 = vector.broadcast %38 : vector<1x1x24xf32> to vector<4x4x24xf32>
    %40 = arith.mulf %36, %39 : vector<4x4x24xf32>
    %41 = arith.addf %34, %40 : vector<4x4x24xf32>
    %c0_24 = arith.constant 0 : index
    %c1_25 = arith.constant 1 : index
    %c0_26 = arith.constant 0 : index
    %c0_27 = arith.constant 0 : index
    %42 = vector.load %arg1[%c0_24, %c1_25, %c0_26, %c0_27] : memref<1x5x5x24xf32, #tpu.memory_space<vmem>>, vector<1x4x4x24xf32>
    %43 = vector.shape_cast %42 : vector<1x4x4x24xf32> to vector<4x4x24xf32>
    %44 = vector.extract_strided_slice %0 {offsets = [6, 0], sizes = [1, 24], strides = [1, 1]} : vector<9x24xf32> to vector<1x24xf32>
    %45 = vector.shape_cast %44 : vector<1x24xf32> to vector<1x1x24xf32>
    %46 = vector.broadcast %45 : vector<1x1x24xf32> to vector<4x4x24xf32>
    %47 = arith.mulf %43, %46 : vector<4x4x24xf32>
    %48 = arith.addf %41, %47 : vector<4x4x24xf32>
    %c0_28 = arith.constant 0 : index
    %c1_29 = arith.constant 1 : index
    %c0_30 = arith.constant 0 : index
    %c0_31 = arith.constant 0 : index
    %49 = vector.load %arg2[%c0_28, %c1_29, %c0_30, %c0_31] : memref<1x5x5x24xf32, #tpu.memory_space<vmem>>, vector<1x4x4x24xf32>
    %50 = vector.shape_cast %49 : vector<1x4x4x24xf32> to vector<4x4x24xf32>
    %51 = vector.extract_strided_slice %0 {offsets = [7, 0], sizes = [1, 24], strides = [1, 1]} : vector<9x24xf32> to vector<1x24xf32>
    %52 = vector.shape_cast %51 : vector<1x24xf32> to vector<1x1x24xf32>
    %53 = vector.broadcast %52 : vector<1x1x24xf32> to vector<4x4x24xf32>
    %54 = arith.mulf %50, %53 : vector<4x4x24xf32>
    %55 = arith.addf %48, %54 : vector<4x4x24xf32>
    %c0_32 = arith.constant 0 : index
    %c1_33 = arith.constant 1 : index
    %c1_34 = arith.constant 1 : index
    %c0_35 = arith.constant 0 : index
    %56 = vector.load %arg1[%c0_32, %c1_33, %c1_34, %c0_35] : memref<1x5x5x24xf32, #tpu.memory_space<vmem>>, vector<1x4x4x24xf32>
    %57 = vector.shape_cast %56 : vector<1x4x4x24xf32> to vector<4x4x24xf32>
    %58 = vector.extract_strided_slice %0 {offsets = [8, 0], sizes = [1, 24], strides = [1, 1]} : vector<9x24xf32> to vector<1x24xf32>
    %59 = vector.shape_cast %58 : vector<1x24xf32> to vector<1x1x24xf32>
    %60 = vector.broadcast %59 : vector<1x1x24xf32> to vector<4x4x24xf32>
    %61 = arith.mulf %57, %60 : vector<4x4x24xf32>
    %62 = arith.addf %55, %61 : vector<4x4x24xf32>
    %c0_36 = arith.constant 0 : index
    %c0_37 = arith.constant 0 : index
    %63 = vector.load %arg6[%c0_36, %c0_37] : memref<1x24xf32, #tpu.memory_space<vmem>>, vector<1x24xf32>
    %64 = vector.shape_cast %63 : vector<1x24xf32> to vector<1x1x24xf32>
    %65 = vector.broadcast %64 : vector<1x1x24xf32> to vector<4x4x24xf32>
    %66 = arith.mulf %62, %65 : vector<4x4x24xf32>
    %c0_38 = arith.constant 0 : index
    %c0_39 = arith.constant 0 : index
    %67 = vector.load %arg7[%c0_38, %c0_39] : memref<1x24xf32, #tpu.memory_space<vmem>>, vector<1x24xf32>
    %68 = vector.shape_cast %67 : vector<1x24xf32> to vector<1x1x24xf32>
    %69 = vector.broadcast %68 : vector<1x1x24xf32> to vector<4x4x24xf32>
    %70 = arith.addf %66, %69 : vector<4x4x24xf32>
    %c0_40 = arith.constant 0 : index
    %c0_41 = arith.constant 0 : index
    %c0_42 = arith.constant 0 : index
    %c0_43 = arith.constant 0 : index
    %71 = vector.load %arg8[%c0_40, %c0_41, %c0_42, %c0_43] : memref<1x4x4x24xf32, #tpu.memory_space<vmem>>, vector<1x4x4x24xf32>
    %72 = vector.shape_cast %71 : vector<1x4x4x24xf32> to vector<4x4x24xf32>
    %73 = vector.shape_cast %70 : vector<4x4x24xf32> to vector<1x4x4x24xf32>
    tpu.vector_store %arg8[%c0_40, %c0_41, %c0_42, %c0_43], %73 {strides = array<i32>} : memref<1x4x4x24xf32, #tpu.memory_space<vmem>>, vector<1x4x4x24xf32>,
    return
  }
  func.func @transform_0(%arg0: i32) -> (i32, i32, i32, i32) {
    %c0_i32 = arith.constant 0 : i32
    %c0_i32_0 = arith.constant 0 : i32
    %c0_i32_1 = arith.constant 0 : i32
    %c0_i32_2 = arith.constant 0 : i32
    return %arg0, %c0_i32, %c0_i32_0, %c0_i32_1 : i32, i32, i32, i32
  }
  func.func @transform_1(%arg0: i32) -> (i32, i32, i32, i32) {
    %c0_i32 = arith.constant 0 : i32
    %c0_i32_0 = arith.constant 0 : i32
    %c0_i32_1 = arith.constant 0 : i32
    %c0_i32_2 = arith.constant 0 : i32
    return %arg0, %c0_i32, %c0_i32_0, %c0_i32_1 : i32, i32, i32, i32
  }
  func.func @transform_2(%arg0: i32) -> (i32, i32, i32, i32) {
    %c0_i32 = arith.constant 0 : i32
    %c0_i32_0 = arith.constant 0 : i32
    %c0_i32_1 = arith.constant 0 : i32
    %c0_i32_2 = arith.constant 0 : i32
    return %arg0, %c0_i32, %c0_i32_0, %c0_i32_1 : i32, i32, i32, i32
  }
  func.func @transform_3(%arg0: i32) -> (i32, i32, i32, i32) {
    %c0_i32 = arith.constant 0 : i32
    %c0_i32_0 = arith.constant 0 : i32
    %c0_i32_1 = arith.constant 0 : i32
    %c0_i32_2 = arith.constant 0 : i32
    return %arg0, %c0_i32, %c0_i32_0, %c0_i32_1 : i32, i32, i32, i32
  }
  func.func @transform_4(%arg0: i32) -> (i32, i32) {
    %c0_i32 = arith.constant 0 : i32
    %c0_i32_0 = arith.constant 0 : i32
    %c0_i32_1 = arith.constant 0 : i32
    return %c0_i32, %c0_i32_0 : i32, i32
  }
  func.func @transform_5(%arg0: i32) -> (i32, i32) {
    %c0_i32 = arith.constant 0 : i32
    %c0_i32_0 = arith.constant 0 : i32
    %c0_i32_1 = arith.constant 0 : i32
    return %c0_i32, %c0_i32_0 : i32, i32
  }
  func.func @transform_6(%arg0: i32) -> (i32, i32) {
    %c0_i32 = arith.constant 0 : i32
    %c0_i32_0 = arith.constant 0 : i32
    %c0_i32_1 = arith.constant 0 : i32
    return %c0_i32, %c0_i32_0 : i32, i32
  }
  func.func @transform_7(%arg0: i32) -> (i32, i32, i32, i32) {
    %c0_i32 = arith.constant 0 : i32
    %c0_i32_0 = arith.constant 0 : i32
    %c0_i32_1 = arith.constant 0 : i32
    %c0_i32_2 = arith.constant 0 : i32
    return %arg0, %c0_i32, %c0_i32_0, %c0_i32_1 : i32, i32, i32, i32
  }
}

module attributes {stable_mosaic.version = 11 : i64} {
  func.func @_matmul_bn_single_k_kernel(%arg0: i32, %arg1: i32, %arg2: memref<128x32xbf16, #tpu.memory_space<vmem>>, %arg3: memref<32x128xbf16, #tpu.memory_space<vmem>>, %arg4: memref<1x128xf32, #tpu.memory_space<vmem>>, %arg5: memref<1x128xf32, #tpu.memory_space<vmem>>, %arg6: memref<128x128xf32, #tpu.memory_space<vmem>>) attributes {dimension_semantics = [#tpu.dimension_semantics<parallel>, #tpu.dimension_semantics<parallel>], iteration_bounds = array<i64: 1, 1>, scalar_prefetch = 0 : i64, scratch_operands = 0 : i64, tpu.core_type = #tpu.core_type<tc>, window_params = [{transform_indices = @transform_0, window_bounds = array<i64: 128, 32>}, {transform_indices = @transform_1, window_bounds = array<i64: 32, 128>}, {transform_indices = @transform_2, window_bounds = array<i64: 1, 128>}, {transform_indices = @transform_3, window_bounds = array<i64: 1, 128>}, {transform_indices = @transform_4, window_bounds = array<i64: 128, 128>}]} {
    %c0 = arith.constant 0 : index
    %c0_0 = arith.constant 0 : index
    %0 = vector.load %arg2[%c0, %c0_0] : memref<128x32xbf16, #tpu.memory_space<vmem>>, vector<128x32xbf16>
    %c0_1 = arith.constant 0 : index
    %c0_2 = arith.constant 0 : index
    %1 = vector.load %arg3[%c0_1, %c0_2] : memref<32x128xbf16, #tpu.memory_space<vmem>>, vector<32x128xbf16>
    %cst = arith.constant dense<0.000000e+00> : vector<128x128xf32>
    %2 = tpu.matmul %0, %1, %cst {dimension_numbers = #tpu.dot_dimension_numbers<[1], [0], [0], [1], [0, 0, 1, 1], [], []>} : vector<128x32xbf16>, vector<32x128xbf16>, vector<128x128xf32> -> vector<128x128xf32>
    %c0_3 = arith.constant 0 : index
    %c0_4 = arith.constant 0 : index
    %3 = vector.load %arg4[%c0_3, %c0_4] : memref<1x128xf32, #tpu.memory_space<vmem>>, vector<1x128xf32>
    %4 = vector.broadcast %3 : vector<1x128xf32> to vector<128x128xf32>
    %5 = arith.mulf %2, %4 : vector<128x128xf32>
    %c0_5 = arith.constant 0 : index
    %c0_6 = arith.constant 0 : index
    %6 = vector.load %arg5[%c0_5, %c0_6] : memref<1x128xf32, #tpu.memory_space<vmem>>, vector<1x128xf32>
    %7 = vector.broadcast %6 : vector<1x128xf32> to vector<128x128xf32>
    %8 = arith.addf %5, %7 : vector<128x128xf32>
    %cst_7 = arith.constant 0.000000e+00 : f32
    %9 = vector.broadcast %cst_7 : f32 to vector<128x128xf32>
    %10 = arith.maximumf %8, %9 : vector<128x128xf32>
    %c0_8 = arith.constant 0 : index
    %c0_9 = arith.constant 0 : index
    %11 = vector.load %arg6[%c0_8, %c0_9] : memref<128x128xf32, #tpu.memory_space<vmem>>, vector<128x128xf32>
    tpu.vector_store %arg6[%c0_8, %c0_9], %10 {strides = array<i32>} : memref<128x128xf32, #tpu.memory_space<vmem>>, vector<128x128xf32>,
    return
  }
  func.func @transform_0(%arg0: i32, %arg1: i32) -> (i32, i32) {
    %c0_i32 = arith.constant 0 : i32
    %c0_i32_0 = arith.constant 0 : i32
    return %arg0, %c0_i32 : i32, i32
  }
  func.func @transform_1(%arg0: i32, %arg1: i32) -> (i32, i32) {
    %c0_i32 = arith.constant 0 : i32
    %c0_i32_0 = arith.constant 0 : i32
    return %c0_i32, %arg1 : i32, i32
  }
  func.func @transform_2(%arg0: i32, %arg1: i32) -> (i32, i32) {
    %c0_i32 = arith.constant 0 : i32
    %c0_i32_0 = arith.constant 0 : i32
    return %c0_i32, %arg1 : i32, i32
  }
  func.func @transform_3(%arg0: i32, %arg1: i32) -> (i32, i32) {
    %c0_i32 = arith.constant 0 : i32
    %c0_i32_0 = arith.constant 0 : i32
    return %c0_i32, %arg1 : i32, i32
  }
  func.func @transform_4(%arg0: i32, %arg1: i32) -> (i32, i32) {
    %c0_i32 = arith.constant 0 : i32
    return %arg0, %arg1 : i32, i32
  }
}

module attributes {stable_mosaic.version = 11 : i64} {
  func.func @_dw_s2_kernel(%arg0: i32, %arg1: memref<1x5x5x122xf32, #tpu.memory_space<vmem>>, %arg2: memref<1x5x5x122xf32, #tpu.memory_space<vmem>>, %arg3: memref<1x5x5x122xf32, #tpu.memory_space<vmem>>, %arg4: memref<1x5x5x122xf32, #tpu.memory_space<vmem>>, %arg5: memref<9x122xf32, #tpu.memory_space<vmem>>, %arg6: memref<1x122xf32, #tpu.memory_space<vmem>>, %arg7: memref<1x122xf32, #tpu.memory_space<vmem>>, %arg8: memref<1x4x4x122xf32, #tpu.memory_space<vmem>>) attributes {dimension_semantics = [#tpu.dimension_semantics<parallel>], iteration_bounds = array<i64: 2>, scalar_prefetch = 0 : i64, scratch_operands = 0 : i64, tpu.core_type = #tpu.core_type<tc>, window_params = [{transform_indices = @transform_0, window_bounds = array<i64: 1, 5, 5, 122>}, {transform_indices = @transform_1, window_bounds = array<i64: 1, 5, 5, 122>}, {transform_indices = @transform_2, window_bounds = array<i64: 1, 5, 5, 122>}, {transform_indices = @transform_3, window_bounds = array<i64: 1, 5, 5, 122>}, {pipeline_mode = #tpu.pipeline_mode<synchronous>, transform_indices = @transform_4, window_bounds = array<i64: 9, 122>}, {pipeline_mode = #tpu.pipeline_mode<synchronous>, transform_indices = @transform_5, window_bounds = array<i64: 1, 122>}, {pipeline_mode = #tpu.pipeline_mode<synchronous>, transform_indices = @transform_6, window_bounds = array<i64: 1, 122>}, {transform_indices = @transform_7, window_bounds = array<i64: 1, 4, 4, 122>}]} {
    %c0 = arith.constant 0 : index
    %c0_0 = arith.constant 0 : index
    %0 = vector.load %arg5[%c0, %c0_0] : memref<9x122xf32, #tpu.memory_space<vmem>>, vector<9x122xf32>
    %c0_1 = arith.constant 0 : index
    %c0_2 = arith.constant 0 : index
    %c0_3 = arith.constant 0 : index
    %c0_4 = arith.constant 0 : index
    %1 = vector.load %arg1[%c0_1, %c0_2, %c0_3, %c0_4] : memref<1x5x5x122xf32, #tpu.memory_space<vmem>>, vector<1x4x4x122xf32>
    %2 = vector.shape_cast %1 : vector<1x4x4x122xf32> to vector<4x4x122xf32>
    %3 = vector.extract_strided_slice %0 {offsets = [0, 0], sizes = [1, 122], strides = [1, 1]} : vector<9x122xf32> to vector<1x122xf32>
    %4 = vector.shape_cast %3 : vector<1x122xf32> to vector<1x1x122xf32>
    %5 = vector.broadcast %4 : vector<1x1x122xf32> to vector<4x4x122xf32>
    %6 = arith.mulf %2, %5 : vector<4x4x122xf32>
    %c0_5 = arith.constant 0 : index
    %c0_6 = arith.constant 0 : index
    %c0_7 = arith.constant 0 : index
    %c0_8 = arith.constant 0 : index
    %7 = vector.load %arg2[%c0_5, %c0_6, %c0_7, %c0_8] : memref<1x5x5x122xf32, #tpu.memory_space<vmem>>, vector<1x4x4x122xf32>
    %8 = vector.shape_cast %7 : vector<1x4x4x122xf32> to vector<4x4x122xf32>
    %9 = vector.extract_strided_slice %0 {offsets = [1, 0], sizes = [1, 122], strides = [1, 1]} : vector<9x122xf32> to vector<1x122xf32>
    %10 = vector.shape_cast %9 : vector<1x122xf32> to vector<1x1x122xf32>
    %11 = vector.broadcast %10 : vector<1x1x122xf32> to vector<4x4x122xf32>
    %12 = arith.mulf %8, %11 : vector<4x4x122xf32>
    %13 = arith.addf %6, %12 : vector<4x4x122xf32>
    %c0_9 = arith.constant 0 : index
    %c0_10 = arith.constant 0 : index
    %c1 = arith.constant 1 : index
    %c0_11 = arith.constant 0 : index
    %14 = vector.load %arg1[%c0_9, %c0_10, %c1, %c0_11] : memref<1x5x5x122xf32, #tpu.memory_space<vmem>>, vector<1x4x4x122xf32>
    %15 = vector.shape_cast %14 : vector<1x4x4x122xf32> to vector<4x4x122xf32>
    %16 = vector.extract_strided_slice %0 {offsets = [2, 0], sizes = [1, 122], strides = [1, 1]} : vector<9x122xf32> to vector<1x122xf32>
    %17 = vector.shape_cast %16 : vector<1x122xf32> to vector<1x1x122xf32>
    %18 = vector.broadcast %17 : vector<1x1x122xf32> to vector<4x4x122xf32>
    %19 = arith.mulf %15, %18 : vector<4x4x122xf32>
    %20 = arith.addf %13, %19 : vector<4x4x122xf32>
    %c0_12 = arith.constant 0 : index
    %c0_13 = arith.constant 0 : index
    %c0_14 = arith.constant 0 : index
    %c0_15 = arith.constant 0 : index
    %21 = vector.load %arg3[%c0_12, %c0_13, %c0_14, %c0_15] : memref<1x5x5x122xf32, #tpu.memory_space<vmem>>, vector<1x4x4x122xf32>
    %22 = vector.shape_cast %21 : vector<1x4x4x122xf32> to vector<4x4x122xf32>
    %23 = vector.extract_strided_slice %0 {offsets = [3, 0], sizes = [1, 122], strides = [1, 1]} : vector<9x122xf32> to vector<1x122xf32>
    %24 = vector.shape_cast %23 : vector<1x122xf32> to vector<1x1x122xf32>
    %25 = vector.broadcast %24 : vector<1x1x122xf32> to vector<4x4x122xf32>
    %26 = arith.mulf %22, %25 : vector<4x4x122xf32>
    %27 = arith.addf %20, %26 : vector<4x4x122xf32>
    %c0_16 = arith.constant 0 : index
    %c0_17 = arith.constant 0 : index
    %c0_18 = arith.constant 0 : index
    %c0_19 = arith.constant 0 : index
    %28 = vector.load %arg4[%c0_16, %c0_17, %c0_18, %c0_19] : memref<1x5x5x122xf32, #tpu.memory_space<vmem>>, vector<1x4x4x122xf32>
    %29 = vector.shape_cast %28 : vector<1x4x4x122xf32> to vector<4x4x122xf32>
    %30 = vector.extract_strided_slice %0 {offsets = [4, 0], sizes = [1, 122], strides = [1, 1]} : vector<9x122xf32> to vector<1x122xf32>
    %31 = vector.shape_cast %30 : vector<1x122xf32> to vector<1x1x122xf32>
    %32 = vector.broadcast %31 : vector<1x1x122xf32> to vector<4x4x122xf32>
    %33 = arith.mulf %29, %32 : vector<4x4x122xf32>
    %34 = arith.addf %27, %33 : vector<4x4x122xf32>
    %c0_20 = arith.constant 0 : index
    %c0_21 = arith.constant 0 : index
    %c1_22 = arith.constant 1 : index
    %c0_23 = arith.constant 0 : index
    %35 = vector.load %arg3[%c0_20, %c0_21, %c1_22, %c0_23] : memref<1x5x5x122xf32, #tpu.memory_space<vmem>>, vector<1x4x4x122xf32>
    %36 = vector.shape_cast %35 : vector<1x4x4x122xf32> to vector<4x4x122xf32>
    %37 = vector.extract_strided_slice %0 {offsets = [5, 0], sizes = [1, 122], strides = [1, 1]} : vector<9x122xf32> to vector<1x122xf32>
    %38 = vector.shape_cast %37 : vector<1x122xf32> to vector<1x1x122xf32>
    %39 = vector.broadcast %38 : vector<1x1x122xf32> to vector<4x4x122xf32>
    %40 = arith.mulf %36, %39 : vector<4x4x122xf32>
    %41 = arith.addf %34, %40 : vector<4x4x122xf32>
    %c0_24 = arith.constant 0 : index
    %c1_25 = arith.constant 1 : index
    %c0_26 = arith.constant 0 : index
    %c0_27 = arith.constant 0 : index
    %42 = vector.load %arg1[%c0_24, %c1_25, %c0_26, %c0_27] : memref<1x5x5x122xf32, #tpu.memory_space<vmem>>, vector<1x4x4x122xf32>
    %43 = vector.shape_cast %42 : vector<1x4x4x122xf32> to vector<4x4x122xf32>
    %44 = vector.extract_strided_slice %0 {offsets = [6, 0], sizes = [1, 122], strides = [1, 1]} : vector<9x122xf32> to vector<1x122xf32>
    %45 = vector.shape_cast %44 : vector<1x122xf32> to vector<1x1x122xf32>
    %46 = vector.broadcast %45 : vector<1x1x122xf32> to vector<4x4x122xf32>
    %47 = arith.mulf %43, %46 : vector<4x4x122xf32>
    %48 = arith.addf %41, %47 : vector<4x4x122xf32>
    %c0_28 = arith.constant 0 : index
    %c1_29 = arith.constant 1 : index
    %c0_30 = arith.constant 0 : index
    %c0_31 = arith.constant 0 : index
    %49 = vector.load %arg2[%c0_28, %c1_29, %c0_30, %c0_31] : memref<1x5x5x122xf32, #tpu.memory_space<vmem>>, vector<1x4x4x122xf32>
    %50 = vector.shape_cast %49 : vector<1x4x4x122xf32> to vector<4x4x122xf32>
    %51 = vector.extract_strided_slice %0 {offsets = [7, 0], sizes = [1, 122], strides = [1, 1]} : vector<9x122xf32> to vector<1x122xf32>
    %52 = vector.shape_cast %51 : vector<1x122xf32> to vector<1x1x122xf32>
    %53 = vector.broadcast %52 : vector<1x1x122xf32> to vector<4x4x122xf32>
    %54 = arith.mulf %50, %53 : vector<4x4x122xf32>
    %55 = arith.addf %48, %54 : vector<4x4x122xf32>
    %c0_32 = arith.constant 0 : index
    %c1_33 = arith.constant 1 : index
    %c1_34 = arith.constant 1 : index
    %c0_35 = arith.constant 0 : index
    %56 = vector.load %arg1[%c0_32, %c1_33, %c1_34, %c0_35] : memref<1x5x5x122xf32, #tpu.memory_space<vmem>>, vector<1x4x4x122xf32>
    %57 = vector.shape_cast %56 : vector<1x4x4x122xf32> to vector<4x4x122xf32>
    %58 = vector.extract_strided_slice %0 {offsets = [8, 0], sizes = [1, 122], strides = [1, 1]} : vector<9x122xf32> to vector<1x122xf32>
    %59 = vector.shape_cast %58 : vector<1x122xf32> to vector<1x1x122xf32>
    %60 = vector.broadcast %59 : vector<1x1x122xf32> to vector<4x4x122xf32>
    %61 = arith.mulf %57, %60 : vector<4x4x122xf32>
    %62 = arith.addf %55, %61 : vector<4x4x122xf32>
    %c0_36 = arith.constant 0 : index
    %c0_37 = arith.constant 0 : index
    %63 = vector.load %arg6[%c0_36, %c0_37] : memref<1x122xf32, #tpu.memory_space<vmem>>, vector<1x122xf32>
    %64 = vector.shape_cast %63 : vector<1x122xf32> to vector<1x1x122xf32>
    %65 = vector.broadcast %64 : vector<1x1x122xf32> to vector<4x4x122xf32>
    %66 = arith.mulf %62, %65 : vector<4x4x122xf32>
    %c0_38 = arith.constant 0 : index
    %c0_39 = arith.constant 0 : index
    %67 = vector.load %arg7[%c0_38, %c0_39] : memref<1x122xf32, #tpu.memory_space<vmem>>, vector<1x122xf32>
    %68 = vector.shape_cast %67 : vector<1x122xf32> to vector<1x1x122xf32>
    %69 = vector.broadcast %68 : vector<1x1x122xf32> to vector<4x4x122xf32>
    %70 = arith.addf %66, %69 : vector<4x4x122xf32>
    %c0_40 = arith.constant 0 : index
    %c0_41 = arith.constant 0 : index
    %c0_42 = arith.constant 0 : index
    %c0_43 = arith.constant 0 : index
    %71 = vector.load %arg8[%c0_40, %c0_41, %c0_42, %c0_43] : memref<1x4x4x122xf32, #tpu.memory_space<vmem>>, vector<1x4x4x122xf32>
    %72 = vector.shape_cast %71 : vector<1x4x4x122xf32> to vector<4x4x122xf32>
    %73 = vector.shape_cast %70 : vector<4x4x122xf32> to vector<1x4x4x122xf32>
    tpu.vector_store %arg8[%c0_40, %c0_41, %c0_42, %c0_43], %73 {strides = array<i32>} : memref<1x4x4x122xf32, #tpu.memory_space<vmem>>, vector<1x4x4x122xf32>,
    return
  }
  func.func @transform_0(%arg0: i32) -> (i32, i32, i32, i32) {
    %c0_i32 = arith.constant 0 : i32
    %c0_i32_0 = arith.constant 0 : i32
    %c0_i32_1 = arith.constant 0 : i32
    %c0_i32_2 = arith.constant 0 : i32
    return %arg0, %c0_i32, %c0_i32_0, %c0_i32_1 : i32, i32, i32, i32
  }
  func.func @transform_1(%arg0: i32) -> (i32, i32, i32, i32) {
    %c0_i32 = arith.constant 0 : i32
    %c0_i32_0 = arith.constant 0 : i32
    %c0_i32_1 = arith.constant 0 : i32
    %c0_i32_2 = arith.constant 0 : i32
    return %arg0, %c0_i32, %c0_i32_0, %c0_i32_1 : i32, i32, i32, i32
  }
  func.func @transform_2(%arg0: i32) -> (i32, i32, i32, i32) {
    %c0_i32 = arith.constant 0 : i32
    %c0_i32_0 = arith.constant 0 : i32
    %c0_i32_1 = arith.constant 0 : i32
    %c0_i32_2 = arith.constant 0 : i32
    return %arg0, %c0_i32, %c0_i32_0, %c0_i32_1 : i32, i32, i32, i32
  }
  func.func @transform_3(%arg0: i32) -> (i32, i32, i32, i32) {
    %c0_i32 = arith.constant 0 : i32
    %c0_i32_0 = arith.constant 0 : i32
    %c0_i32_1 = arith.constant 0 : i32
    %c0_i32_2 = arith.constant 0 : i32
    return %arg0, %c0_i32, %c0_i32_0, %c0_i32_1 : i32, i32, i32, i32
  }
  func.func @transform_4(%arg0: i32) -> (i32, i32) {
    %c0_i32 = arith.constant 0 : i32
    %c0_i32_0 = arith.constant 0 : i32
    %c0_i32_1 = arith.constant 0 : i32
    return %c0_i32, %c0_i32_0 : i32, i32
  }
  func.func @transform_5(%arg0: i32) -> (i32, i32) {
    %c0_i32 = arith.constant 0 : i32
    %c0_i32_0 = arith.constant 0 : i32
    %c0_i32_1 = arith.constant 0 : i32
    return %c0_i32, %c0_i32_0 : i32, i32
  }
  func.func @transform_6(%arg0: i32) -> (i32, i32) {
    %c0_i32 = arith.constant 0 : i32
    %c0_i32_0 = arith.constant 0 : i32
    %c0_i32_1 = arith.constant 0 : i32
    return %c0_i32, %c0_i32_0 : i32, i32
  }
  func.func @transform_7(%arg0: i32) -> (i32, i32, i32, i32) {
    %c0_i32 = arith.constant 0 : i32
    %c0_i32_0 = arith.constant 0 : i32
    %c0_i32_1 = arith.constant 0 : i32
    %c0_i32_2 = arith.constant 0 : i32
    return %arg0, %c0_i32, %c0_i32_0, %c0_i32_1 : i32, i32, i32, i32
  }
}

module attributes {stable_mosaic.version = 11 : i64} {
  func.func @_matmul_bn_single_k_kernel(%arg0: i32, %arg1: i32, %arg2: memref<32x128xbf16, #tpu.memory_space<vmem>>, %arg3: memref<128x128xbf16, #tpu.memory_space<vmem>>, %arg4: memref<1x128xf32, #tpu.memory_space<vmem>>, %arg5: memref<1x128xf32, #tpu.memory_space<vmem>>, %arg6: memref<32x128xf32, #tpu.memory_space<vmem>>) attributes {dimension_semantics = [#tpu.dimension_semantics<parallel>, #tpu.dimension_semantics<parallel>], iteration_bounds = array<i64: 1, 1>, scalar_prefetch = 0 : i64, scratch_operands = 0 : i64, tpu.core_type = #tpu.core_type<tc>, window_params = [{transform_indices = @transform_0, window_bounds = array<i64: 32, 128>}, {transform_indices = @transform_1, window_bounds = array<i64: 128, 128>}, {transform_indices = @transform_2, window_bounds = array<i64: 1, 128>}, {transform_indices = @transform_3, window_bounds = array<i64: 1, 128>}, {transform_indices = @transform_4, window_bounds = array<i64: 32, 128>}]} {
    %c0 = arith.constant 0 : index
    %c0_0 = arith.constant 0 : index
    %0 = vector.load %arg2[%c0, %c0_0] : memref<32x128xbf16, #tpu.memory_space<vmem>>, vector<32x128xbf16>
    %c0_1 = arith.constant 0 : index
    %c0_2 = arith.constant 0 : index
    %1 = vector.load %arg3[%c0_1, %c0_2] : memref<128x128xbf16, #tpu.memory_space<vmem>>, vector<128x128xbf16>
    %cst = arith.constant dense<0.000000e+00> : vector<32x128xf32>
    %2 = tpu.matmul %0, %1, %cst {dimension_numbers = #tpu.dot_dimension_numbers<[1], [0], [0], [1], [0, 0, 1, 1], [], []>} : vector<32x128xbf16>, vector<128x128xbf16>, vector<32x128xf32> -> vector<32x128xf32>
    %c0_3 = arith.constant 0 : index
    %c0_4 = arith.constant 0 : index
    %3 = vector.load %arg4[%c0_3, %c0_4] : memref<1x128xf32, #tpu.memory_space<vmem>>, vector<1x128xf32>
    %4 = vector.broadcast %3 : vector<1x128xf32> to vector<32x128xf32>
    %5 = arith.mulf %2, %4 : vector<32x128xf32>
    %c0_5 = arith.constant 0 : index
    %c0_6 = arith.constant 0 : index
    %6 = vector.load %arg5[%c0_5, %c0_6] : memref<1x128xf32, #tpu.memory_space<vmem>>, vector<1x128xf32>
    %7 = vector.broadcast %6 : vector<1x128xf32> to vector<32x128xf32>
    %8 = arith.addf %5, %7 : vector<32x128xf32>
    %cst_7 = arith.constant 0.000000e+00 : f32
    %9 = vector.broadcast %cst_7 : f32 to vector<32x128xf32>
    %10 = arith.maximumf %8, %9 : vector<32x128xf32>
    %c0_8 = arith.constant 0 : index
    %c0_9 = arith.constant 0 : index
    %11 = vector.load %arg6[%c0_8, %c0_9] : memref<32x128xf32, #tpu.memory_space<vmem>>, vector<32x128xf32>
    tpu.vector_store %arg6[%c0_8, %c0_9], %10 {strides = array<i32>} : memref<32x128xf32, #tpu.memory_space<vmem>>, vector<32x128xf32>,
    return
  }
  func.func @transform_0(%arg0: i32, %arg1: i32) -> (i32, i32) {
    %c0_i32 = arith.constant 0 : i32
    %c0_i32_0 = arith.constant 0 : i32
    return %arg0, %c0_i32 : i32, i32
  }
  func.func @transform_1(%arg0: i32, %arg1: i32) -> (i32, i32) {
    %c0_i32 = arith.constant 0 : i32
    %c0_i32_0 = arith.constant 0 : i32
    return %c0_i32, %arg1 : i32, i32
  }
  func.func @transform_2(%arg0: i32, %arg1: i32) -> (i32, i32) {
    %c0_i32 = arith.constant 0 : i32
    %c0_i32_0 = arith.constant 0 : i32
    return %c0_i32, %arg1 : i32, i32
  }
  func.func @transform_3(%arg0: i32, %arg1: i32) -> (i32, i32) {
    %c0_i32 = arith.constant 0 : i32
    %c0_i32_0 = arith.constant 0 : i32
    return %c0_i32, %arg1 : i32, i32
  }
  func.func @transform_4(%arg0: i32, %arg1: i32) -> (i32, i32) {
    %c0_i32 = arith.constant 0 : i32
    return %arg0, %arg1 : i32, i32
  }
}

module attributes {stable_mosaic.version = 11 : i64} {
  func.func @_dw_s1_kernel(%arg0: i32, %arg1: memref<1x6x6x122xf32, #tpu.memory_space<vmem>>, %arg2: memref<9x122xf32, #tpu.memory_space<vmem>>, %arg3: memref<1x122xf32, #tpu.memory_space<vmem>>, %arg4: memref<1x122xf32, #tpu.memory_space<vmem>>, %arg5: memref<1x4x4x122xf32, #tpu.memory_space<vmem>>) attributes {dimension_semantics = [#tpu.dimension_semantics<parallel>], iteration_bounds = array<i64: 2>, scalar_prefetch = 0 : i64, scratch_operands = 0 : i64, tpu.core_type = #tpu.core_type<tc>, window_params = [{transform_indices = @transform_0, window_bounds = array<i64: 1, 6, 6, 122>}, {pipeline_mode = #tpu.pipeline_mode<synchronous>, transform_indices = @transform_1, window_bounds = array<i64: 9, 122>}, {pipeline_mode = #tpu.pipeline_mode<synchronous>, transform_indices = @transform_2, window_bounds = array<i64: 1, 122>}, {pipeline_mode = #tpu.pipeline_mode<synchronous>, transform_indices = @transform_3, window_bounds = array<i64: 1, 122>}, {transform_indices = @transform_4, window_bounds = array<i64: 1, 4, 4, 122>}]} {
    %c0 = arith.constant 0 : index
    %c0_0 = arith.constant 0 : index
    %0 = vector.load %arg2[%c0, %c0_0] : memref<9x122xf32, #tpu.memory_space<vmem>>, vector<9x122xf32>
    %c0_1 = arith.constant 0 : index
    %c0_2 = arith.constant 0 : index
    %c0_3 = arith.constant 0 : index
    %c0_4 = arith.constant 0 : index
    %1 = vector.load %arg1[%c0_1, %c0_2, %c0_3, %c0_4] : memref<1x6x6x122xf32, #tpu.memory_space<vmem>>, vector<1x4x4x122xf32>
    %2 = vector.shape_cast %1 : vector<1x4x4x122xf32> to vector<4x4x122xf32>
    %3 = vector.extract_strided_slice %0 {offsets = [0, 0], sizes = [1, 122], strides = [1, 1]} : vector<9x122xf32> to vector<1x122xf32>
    %4 = vector.shape_cast %3 : vector<1x122xf32> to vector<1x1x122xf32>
    %5 = vector.broadcast %4 : vector<1x1x122xf32> to vector<4x4x122xf32>
    %6 = arith.mulf %2, %5 : vector<4x4x122xf32>
    %c0_5 = arith.constant 0 : index
    %c0_6 = arith.constant 0 : index
    %c1 = arith.constant 1 : index
    %c0_7 = arith.constant 0 : index
    %7 = vector.load %arg1[%c0_5, %c0_6, %c1, %c0_7] : memref<1x6x6x122xf32, #tpu.memory_space<vmem>>, vector<1x4x4x122xf32>
    %8 = vector.shape_cast %7 : vector<1x4x4x122xf32> to vector<4x4x122xf32>
    %9 = vector.extract_strided_slice %0 {offsets = [1, 0], sizes = [1, 122], strides = [1, 1]} : vector<9x122xf32> to vector<1x122xf32>
    %10 = vector.shape_cast %9 : vector<1x122xf32> to vector<1x1x122xf32>
    %11 = vector.broadcast %10 : vector<1x1x122xf32> to vector<4x4x122xf32>
    %12 = arith.mulf %8, %11 : vector<4x4x122xf32>
    %13 = arith.addf %6, %12 : vector<4x4x122xf32>
    %c0_8 = arith.constant 0 : index
    %c0_9 = arith.constant 0 : index
    %c2 = arith.constant 2 : index
    %c0_10 = arith.constant 0 : index
    %14 = vector.load %arg1[%c0_8, %c0_9, %c2, %c0_10] : memref<1x6x6x122xf32, #tpu.memory_space<vmem>>, vector<1x4x4x122xf32>
    %15 = vector.shape_cast %14 : vector<1x4x4x122xf32> to vector<4x4x122xf32>
    %16 = vector.extract_strided_slice %0 {offsets = [2, 0], sizes = [1, 122], strides = [1, 1]} : vector<9x122xf32> to vector<1x122xf32>
    %17 = vector.shape_cast %16 : vector<1x122xf32> to vector<1x1x122xf32>
    %18 = vector.broadcast %17 : vector<1x1x122xf32> to vector<4x4x122xf32>
    %19 = arith.mulf %15, %18 : vector<4x4x122xf32>
    %20 = arith.addf %13, %19 : vector<4x4x122xf32>
    %c0_11 = arith.constant 0 : index
    %c1_12 = arith.constant 1 : index
    %c0_13 = arith.constant 0 : index
    %c0_14 = arith.constant 0 : index
    %21 = vector.load %arg1[%c0_11, %c1_12, %c0_13, %c0_14] : memref<1x6x6x122xf32, #tpu.memory_space<vmem>>, vector<1x4x4x122xf32>
    %22 = vector.shape_cast %21 : vector<1x4x4x122xf32> to vector<4x4x122xf32>
    %23 = vector.extract_strided_slice %0 {offsets = [3, 0], sizes = [1, 122], strides = [1, 1]} : vector<9x122xf32> to vector<1x122xf32>
    %24 = vector.shape_cast %23 : vector<1x122xf32> to vector<1x1x122xf32>
    %25 = vector.broadcast %24 : vector<1x1x122xf32> to vector<4x4x122xf32>
    %26 = arith.mulf %22, %25 : vector<4x4x122xf32>
    %27 = arith.addf %20, %26 : vector<4x4x122xf32>
    %c0_15 = arith.constant 0 : index
    %c1_16 = arith.constant 1 : index
    %c1_17 = arith.constant 1 : index
    %c0_18 = arith.constant 0 : index
    %28 = vector.load %arg1[%c0_15, %c1_16, %c1_17, %c0_18] : memref<1x6x6x122xf32, #tpu.memory_space<vmem>>, vector<1x4x4x122xf32>
    %29 = vector.shape_cast %28 : vector<1x4x4x122xf32> to vector<4x4x122xf32>
    %30 = vector.extract_strided_slice %0 {offsets = [4, 0], sizes = [1, 122], strides = [1, 1]} : vector<9x122xf32> to vector<1x122xf32>
    %31 = vector.shape_cast %30 : vector<1x122xf32> to vector<1x1x122xf32>
    %32 = vector.broadcast %31 : vector<1x1x122xf32> to vector<4x4x122xf32>
    %33 = arith.mulf %29, %32 : vector<4x4x122xf32>
    %34 = arith.addf %27, %33 : vector<4x4x122xf32>
    %c0_19 = arith.constant 0 : index
    %c1_20 = arith.constant 1 : index
    %c2_21 = arith.constant 2 : index
    %c0_22 = arith.constant 0 : index
    %35 = vector.load %arg1[%c0_19, %c1_20, %c2_21, %c0_22] : memref<1x6x6x122xf32, #tpu.memory_space<vmem>>, vector<1x4x4x122xf32>
    %36 = vector.shape_cast %35 : vector<1x4x4x122xf32> to vector<4x4x122xf32>
    %37 = vector.extract_strided_slice %0 {offsets = [5, 0], sizes = [1, 122], strides = [1, 1]} : vector<9x122xf32> to vector<1x122xf32>
    %38 = vector.shape_cast %37 : vector<1x122xf32> to vector<1x1x122xf32>
    %39 = vector.broadcast %38 : vector<1x1x122xf32> to vector<4x4x122xf32>
    %40 = arith.mulf %36, %39 : vector<4x4x122xf32>
    %41 = arith.addf %34, %40 : vector<4x4x122xf32>
    %c0_23 = arith.constant 0 : index
    %c2_24 = arith.constant 2 : index
    %c0_25 = arith.constant 0 : index
    %c0_26 = arith.constant 0 : index
    %42 = vector.load %arg1[%c0_23, %c2_24, %c0_25, %c0_26] : memref<1x6x6x122xf32, #tpu.memory_space<vmem>>, vector<1x4x4x122xf32>
    %43 = vector.shape_cast %42 : vector<1x4x4x122xf32> to vector<4x4x122xf32>
    %44 = vector.extract_strided_slice %0 {offsets = [6, 0], sizes = [1, 122], strides = [1, 1]} : vector<9x122xf32> to vector<1x122xf32>
    %45 = vector.shape_cast %44 : vector<1x122xf32> to vector<1x1x122xf32>
    %46 = vector.broadcast %45 : vector<1x1x122xf32> to vector<4x4x122xf32>
    %47 = arith.mulf %43, %46 : vector<4x4x122xf32>
    %48 = arith.addf %41, %47 : vector<4x4x122xf32>
    %c0_27 = arith.constant 0 : index
    %c2_28 = arith.constant 2 : index
    %c1_29 = arith.constant 1 : index
    %c0_30 = arith.constant 0 : index
    %49 = vector.load %arg1[%c0_27, %c2_28, %c1_29, %c0_30] : memref<1x6x6x122xf32, #tpu.memory_space<vmem>>, vector<1x4x4x122xf32>
    %50 = vector.shape_cast %49 : vector<1x4x4x122xf32> to vector<4x4x122xf32>
    %51 = vector.extract_strided_slice %0 {offsets = [7, 0], sizes = [1, 122], strides = [1, 1]} : vector<9x122xf32> to vector<1x122xf32>
    %52 = vector.shape_cast %51 : vector<1x122xf32> to vector<1x1x122xf32>
    %53 = vector.broadcast %52 : vector<1x1x122xf32> to vector<4x4x122xf32>
    %54 = arith.mulf %50, %53 : vector<4x4x122xf32>
    %55 = arith.addf %48, %54 : vector<4x4x122xf32>
    %c0_31 = arith.constant 0 : index
    %c2_32 = arith.constant 2 : index
    %c2_33 = arith.constant 2 : index
    %c0_34 = arith.constant 0 : index
    %56 = vector.load %arg1[%c0_31, %c2_32, %c2_33, %c0_34] : memref<1x6x6x122xf32, #tpu.memory_space<vmem>>, vector<1x4x4x122xf32>
    %57 = vector.shape_cast %56 : vector<1x4x4x122xf32> to vector<4x4x122xf32>
    %58 = vector.extract_strided_slice %0 {offsets = [8, 0], sizes = [1, 122], strides = [1, 1]} : vector<9x122xf32> to vector<1x122xf32>
    %59 = vector.shape_cast %58 : vector<1x122xf32> to vector<1x1x122xf32>
    %60 = vector.broadcast %59 : vector<1x1x122xf32> to vector<4x4x122xf32>
    %61 = arith.mulf %57, %60 : vector<4x4x122xf32>
    %62 = arith.addf %55, %61 : vector<4x4x122xf32>
    %c0_35 = arith.constant 0 : index
    %c0_36 = arith.constant 0 : index
    %63 = vector.load %arg3[%c0_35, %c0_36] : memref<1x122xf32, #tpu.memory_space<vmem>>, vector<1x122xf32>
    %64 = vector.shape_cast %63 : vector<1x122xf32> to vector<1x1x122xf32>
    %65 = vector.broadcast %64 : vector<1x1x122xf32> to vector<4x4x122xf32>
    %66 = arith.mulf %62, %65 : vector<4x4x122xf32>
    %c0_37 = arith.constant 0 : index
    %c0_38 = arith.constant 0 : index
    %67 = vector.load %arg4[%c0_37, %c0_38] : memref<1x122xf32, #tpu.memory_space<vmem>>, vector<1x122xf32>
    %68 = vector.shape_cast %67 : vector<1x122xf32> to vector<1x1x122xf32>
    %69 = vector.broadcast %68 : vector<1x1x122xf32> to vector<4x4x122xf32>
    %70 = arith.addf %66, %69 : vector<4x4x122xf32>
    %c0_39 = arith.constant 0 : index
    %c0_40 = arith.constant 0 : index
    %c0_41 = arith.constant 0 : index
    %c0_42 = arith.constant 0 : index
    %71 = vector.load %arg5[%c0_39, %c0_40, %c0_41, %c0_42] : memref<1x4x4x122xf32, #tpu.memory_space<vmem>>, vector<1x4x4x122xf32>
    %72 = vector.shape_cast %71 : vector<1x4x4x122xf32> to vector<4x4x122xf32>
    %73 = vector.shape_cast %70 : vector<4x4x122xf32> to vector<1x4x4x122xf32>
    tpu.vector_store %arg5[%c0_39, %c0_40, %c0_41, %c0_42], %73 {strides = array<i32>} : memref<1x4x4x122xf32, #tpu.memory_space<vmem>>, vector<1x4x4x122xf32>,
    return
  }
  func.func @transform_0(%arg0: i32) -> (i32, i32, i32, i32) {
    %c0_i32 = arith.constant 0 : i32
    %c0_i32_0 = arith.constant 0 : i32
    %c0_i32_1 = arith.constant 0 : i32
    %c0_i32_2 = arith.constant 0 : i32
    return %arg0, %c0_i32, %c0_i32_0, %c0_i32_1 : i32, i32, i32, i32
  }
  func.func @transform_1(%arg0: i32) -> (i32, i32) {
    %c0_i32 = arith.constant 0 : i32
    %c0_i32_0 = arith.constant 0 : i32
    %c0_i32_1 = arith.constant 0 : i32
    return %c0_i32, %c0_i32_0 : i32, i32
  }
  func.func @transform_2(%arg0: i32) -> (i32, i32) {
    %c0_i32 = arith.constant 0 : i32
    %c0_i32_0 = arith.constant 0 : i32
    %c0_i32_1 = arith.constant 0 : i32
    return %c0_i32, %c0_i32_0 : i32, i32
  }
  func.func @transform_3(%arg0: i32) -> (i32, i32) {
    %c0_i32 = arith.constant 0 : i32
    %c0_i32_0 = arith.constant 0 : i32
    %c0_i32_1 = arith.constant 0 : i32
    return %c0_i32, %c0_i32_0 : i32, i32
  }
  func.func @transform_4(%arg0: i32) -> (i32, i32, i32, i32) {
    %c0_i32 = arith.constant 0 : i32
    %c0_i32_0 = arith.constant 0 : i32
    %c0_i32_1 = arith.constant 0 : i32
    %c0_i32_2 = arith.constant 0 : i32
    return %arg0, %c0_i32, %c0_i32_0, %c0_i32_1 : i32, i32, i32, i32
  }
}

module attributes {stable_mosaic.version = 11 : i64} {
  func.func @_dw_s2_kernel(%arg0: i32, %arg1: memref<1x3x3x244xf32, #tpu.memory_space<vmem>>, %arg2: memref<1x3x3x244xf32, #tpu.memory_space<vmem>>, %arg3: memref<1x3x3x244xf32, #tpu.memory_space<vmem>>, %arg4: memref<1x3x3x244xf32, #tpu.memory_space<vmem>>, %arg5: memref<9x244xf32, #tpu.memory_space<vmem>>, %arg6: memref<1x244xf32, #tpu.memory_space<vmem>>, %arg7: memref<1x244xf32, #tpu.memory_space<vmem>>, %arg8: memref<1x2x2x244xf32, #tpu.memory_space<vmem>>) attributes {dimension_semantics = [#tpu.dimension_semantics<parallel>], iteration_bounds = array<i64: 2>, scalar_prefetch = 0 : i64, scratch_operands = 0 : i64, tpu.core_type = #tpu.core_type<tc>, window_params = [{transform_indices = @transform_0, window_bounds = array<i64: 1, 3, 3, 244>}, {transform_indices = @transform_1, window_bounds = array<i64: 1, 3, 3, 244>}, {transform_indices = @transform_2, window_bounds = array<i64: 1, 3, 3, 244>}, {transform_indices = @transform_3, window_bounds = array<i64: 1, 3, 3, 244>}, {pipeline_mode = #tpu.pipeline_mode<synchronous>, transform_indices = @transform_4, window_bounds = array<i64: 9, 244>}, {pipeline_mode = #tpu.pipeline_mode<synchronous>, transform_indices = @transform_5, window_bounds = array<i64: 1, 244>}, {pipeline_mode = #tpu.pipeline_mode<synchronous>, transform_indices = @transform_6, window_bounds = array<i64: 1, 244>}, {transform_indices = @transform_7, window_bounds = array<i64: 1, 2, 2, 244>}]} {
    %c0 = arith.constant 0 : index
    %c0_0 = arith.constant 0 : index
    %0 = vector.load %arg5[%c0, %c0_0] : memref<9x244xf32, #tpu.memory_space<vmem>>, vector<9x244xf32>
    %c0_1 = arith.constant 0 : index
    %c0_2 = arith.constant 0 : index
    %c0_3 = arith.constant 0 : index
    %c0_4 = arith.constant 0 : index
    %1 = vector.load %arg1[%c0_1, %c0_2, %c0_3, %c0_4] : memref<1x3x3x244xf32, #tpu.memory_space<vmem>>, vector<1x2x2x244xf32>
    %2 = vector.shape_cast %1 : vector<1x2x2x244xf32> to vector<2x2x244xf32>
    %3 = vector.extract_strided_slice %0 {offsets = [0, 0], sizes = [1, 244], strides = [1, 1]} : vector<9x244xf32> to vector<1x244xf32>
    %4 = vector.shape_cast %3 : vector<1x244xf32> to vector<1x1x244xf32>
    %5 = vector.broadcast %4 : vector<1x1x244xf32> to vector<2x2x244xf32>
    %6 = arith.mulf %2, %5 : vector<2x2x244xf32>
    %c0_5 = arith.constant 0 : index
    %c0_6 = arith.constant 0 : index
    %c0_7 = arith.constant 0 : index
    %c0_8 = arith.constant 0 : index
    %7 = vector.load %arg2[%c0_5, %c0_6, %c0_7, %c0_8] : memref<1x3x3x244xf32, #tpu.memory_space<vmem>>, vector<1x2x2x244xf32>
    %8 = vector.shape_cast %7 : vector<1x2x2x244xf32> to vector<2x2x244xf32>
    %9 = vector.extract_strided_slice %0 {offsets = [1, 0], sizes = [1, 244], strides = [1, 1]} : vector<9x244xf32> to vector<1x244xf32>
    %10 = vector.shape_cast %9 : vector<1x244xf32> to vector<1x1x244xf32>
    %11 = vector.broadcast %10 : vector<1x1x244xf32> to vector<2x2x244xf32>
    %12 = arith.mulf %8, %11 : vector<2x2x244xf32>
    %13 = arith.addf %6, %12 : vector<2x2x244xf32>
    %c0_9 = arith.constant 0 : index
    %c0_10 = arith.constant 0 : index
    %c1 = arith.constant 1 : index
    %c0_11 = arith.constant 0 : index
    %14 = vector.load %arg1[%c0_9, %c0_10, %c1, %c0_11] : memref<1x3x3x244xf32, #tpu.memory_space<vmem>>, vector<1x2x2x244xf32>
    %15 = vector.shape_cast %14 : vector<1x2x2x244xf32> to vector<2x2x244xf32>
    %16 = vector.extract_strided_slice %0 {offsets = [2, 0], sizes = [1, 244], strides = [1, 1]} : vector<9x244xf32> to vector<1x244xf32>
    %17 = vector.shape_cast %16 : vector<1x244xf32> to vector<1x1x244xf32>
    %18 = vector.broadcast %17 : vector<1x1x244xf32> to vector<2x2x244xf32>
    %19 = arith.mulf %15, %18 : vector<2x2x244xf32>
    %20 = arith.addf %13, %19 : vector<2x2x244xf32>
    %c0_12 = arith.constant 0 : index
    %c0_13 = arith.constant 0 : index
    %c0_14 = arith.constant 0 : index
    %c0_15 = arith.constant 0 : index
    %21 = vector.load %arg3[%c0_12, %c0_13, %c0_14, %c0_15] : memref<1x3x3x244xf32, #tpu.memory_space<vmem>>, vector<1x2x2x244xf32>
    %22 = vector.shape_cast %21 : vector<1x2x2x244xf32> to vector<2x2x244xf32>
    %23 = vector.extract_strided_slice %0 {offsets = [3, 0], sizes = [1, 244], strides = [1, 1]} : vector<9x244xf32> to vector<1x244xf32>
    %24 = vector.shape_cast %23 : vector<1x244xf32> to vector<1x1x244xf32>
    %25 = vector.broadcast %24 : vector<1x1x244xf32> to vector<2x2x244xf32>
    %26 = arith.mulf %22, %25 : vector<2x2x244xf32>
    %27 = arith.addf %20, %26 : vector<2x2x244xf32>
    %c0_16 = arith.constant 0 : index
    %c0_17 = arith.constant 0 : index
    %c0_18 = arith.constant 0 : index
    %c0_19 = arith.constant 0 : index
    %28 = vector.load %arg4[%c0_16, %c0_17, %c0_18, %c0_19] : memref<1x3x3x244xf32, #tpu.memory_space<vmem>>, vector<1x2x2x244xf32>
    %29 = vector.shape_cast %28 : vector<1x2x2x244xf32> to vector<2x2x244xf32>
    %30 = vector.extract_strided_slice %0 {offsets = [4, 0], sizes = [1, 244], strides = [1, 1]} : vector<9x244xf32> to vector<1x244xf32>
    %31 = vector.shape_cast %30 : vector<1x244xf32> to vector<1x1x244xf32>
    %32 = vector.broadcast %31 : vector<1x1x244xf32> to vector<2x2x244xf32>
    %33 = arith.mulf %29, %32 : vector<2x2x244xf32>
    %34 = arith.addf %27, %33 : vector<2x2x244xf32>
    %c0_20 = arith.constant 0 : index
    %c0_21 = arith.constant 0 : index
    %c1_22 = arith.constant 1 : index
    %c0_23 = arith.constant 0 : index
    %35 = vector.load %arg3[%c0_20, %c0_21, %c1_22, %c0_23] : memref<1x3x3x244xf32, #tpu.memory_space<vmem>>, vector<1x2x2x244xf32>
    %36 = vector.shape_cast %35 : vector<1x2x2x244xf32> to vector<2x2x244xf32>
    %37 = vector.extract_strided_slice %0 {offsets = [5, 0], sizes = [1, 244], strides = [1, 1]} : vector<9x244xf32> to vector<1x244xf32>
    %38 = vector.shape_cast %37 : vector<1x244xf32> to vector<1x1x244xf32>
    %39 = vector.broadcast %38 : vector<1x1x244xf32> to vector<2x2x244xf32>
    %40 = arith.mulf %36, %39 : vector<2x2x244xf32>
    %41 = arith.addf %34, %40 : vector<2x2x244xf32>
    %c0_24 = arith.constant 0 : index
    %c1_25 = arith.constant 1 : index
    %c0_26 = arith.constant 0 : index
    %c0_27 = arith.constant 0 : index
    %42 = vector.load %arg1[%c0_24, %c1_25, %c0_26, %c0_27] : memref<1x3x3x244xf32, #tpu.memory_space<vmem>>, vector<1x2x2x244xf32>
    %43 = vector.shape_cast %42 : vector<1x2x2x244xf32> to vector<2x2x244xf32>
    %44 = vector.extract_strided_slice %0 {offsets = [6, 0], sizes = [1, 244], strides = [1, 1]} : vector<9x244xf32> to vector<1x244xf32>
    %45 = vector.shape_cast %44 : vector<1x244xf32> to vector<1x1x244xf32>
    %46 = vector.broadcast %45 : vector<1x1x244xf32> to vector<2x2x244xf32>
    %47 = arith.mulf %43, %46 : vector<2x2x244xf32>
    %48 = arith.addf %41, %47 : vector<2x2x244xf32>
    %c0_28 = arith.constant 0 : index
    %c1_29 = arith.constant 1 : index
    %c0_30 = arith.constant 0 : index
    %c0_31 = arith.constant 0 : index
    %49 = vector.load %arg2[%c0_28, %c1_29, %c0_30, %c0_31] : memref<1x3x3x244xf32, #tpu.memory_space<vmem>>, vector<1x2x2x244xf32>
    %50 = vector.shape_cast %49 : vector<1x2x2x244xf32> to vector<2x2x244xf32>
    %51 = vector.extract_strided_slice %0 {offsets = [7, 0], sizes = [1, 244], strides = [1, 1]} : vector<9x244xf32> to vector<1x244xf32>
    %52 = vector.shape_cast %51 : vector<1x244xf32> to vector<1x1x244xf32>
    %53 = vector.broadcast %52 : vector<1x1x244xf32> to vector<2x2x244xf32>
    %54 = arith.mulf %50, %53 : vector<2x2x244xf32>
    %55 = arith.addf %48, %54 : vector<2x2x244xf32>
    %c0_32 = arith.constant 0 : index
    %c1_33 = arith.constant 1 : index
    %c1_34 = arith.constant 1 : index
    %c0_35 = arith.constant 0 : index
    %56 = vector.load %arg1[%c0_32, %c1_33, %c1_34, %c0_35] : memref<1x3x3x244xf32, #tpu.memory_space<vmem>>, vector<1x2x2x244xf32>
    %57 = vector.shape_cast %56 : vector<1x2x2x244xf32> to vector<2x2x244xf32>
    %58 = vector.extract_strided_slice %0 {offsets = [8, 0], sizes = [1, 244], strides = [1, 1]} : vector<9x244xf32> to vector<1x244xf32>
    %59 = vector.shape_cast %58 : vector<1x244xf32> to vector<1x1x244xf32>
    %60 = vector.broadcast %59 : vector<1x1x244xf32> to vector<2x2x244xf32>
    %61 = arith.mulf %57, %60 : vector<2x2x244xf32>
    %62 = arith.addf %55, %61 : vector<2x2x244xf32>
    %c0_36 = arith.constant 0 : index
    %c0_37 = arith.constant 0 : index
    %63 = vector.load %arg6[%c0_36, %c0_37] : memref<1x244xf32, #tpu.memory_space<vmem>>, vector<1x244xf32>
    %64 = vector.shape_cast %63 : vector<1x244xf32> to vector<1x1x244xf32>
    %65 = vector.broadcast %64 : vector<1x1x244xf32> to vector<2x2x244xf32>
    %66 = arith.mulf %62, %65 : vector<2x2x244xf32>
    %c0_38 = arith.constant 0 : index
    %c0_39 = arith.constant 0 : index
    %67 = vector.load %arg7[%c0_38, %c0_39] : memref<1x244xf32, #tpu.memory_space<vmem>>, vector<1x244xf32>
    %68 = vector.shape_cast %67 : vector<1x244xf32> to vector<1x1x244xf32>
    %69 = vector.broadcast %68 : vector<1x1x244xf32> to vector<2x2x244xf32>
    %70 = arith.addf %66, %69 : vector<2x2x244xf32>
    %c0_40 = arith.constant 0 : index
    %c0_41 = arith.constant 0 : index
    %c0_42 = arith.constant 0 : index
    %c0_43 = arith.constant 0 : index
    %71 = vector.load %arg8[%c0_40, %c0_41, %c0_42, %c0_43] : memref<1x2x2x244xf32, #tpu.memory_space<vmem>>, vector<1x2x2x244xf32>
    %72 = vector.shape_cast %71 : vector<1x2x2x244xf32> to vector<2x2x244xf32>
    %73 = vector.shape_cast %70 : vector<2x2x244xf32> to vector<1x2x2x244xf32>
    tpu.vector_store %arg8[%c0_40, %c0_41, %c0_42, %c0_43], %73 {strides = array<i32>} : memref<1x2x2x244xf32, #tpu.memory_space<vmem>>, vector<1x2x2x244xf32>,
    return
  }
  func.func @transform_0(%arg0: i32) -> (i32, i32, i32, i32) {
    %c0_i32 = arith.constant 0 : i32
    %c0_i32_0 = arith.constant 0 : i32
    %c0_i32_1 = arith.constant 0 : i32
    %c0_i32_2 = arith.constant 0 : i32
    return %arg0, %c0_i32, %c0_i32_0, %c0_i32_1 : i32, i32, i32, i32
  }
  func.func @transform_1(%arg0: i32) -> (i32, i32, i32, i32) {
    %c0_i32 = arith.constant 0 : i32
    %c0_i32_0 = arith.constant 0 : i32
    %c0_i32_1 = arith.constant 0 : i32
    %c0_i32_2 = arith.constant 0 : i32
    return %arg0, %c0_i32, %c0_i32_0, %c0_i32_1 : i32, i32, i32, i32
  }
  func.func @transform_2(%arg0: i32) -> (i32, i32, i32, i32) {
    %c0_i32 = arith.constant 0 : i32
    %c0_i32_0 = arith.constant 0 : i32
    %c0_i32_1 = arith.constant 0 : i32
    %c0_i32_2 = arith.constant 0 : i32
    return %arg0, %c0_i32, %c0_i32_0, %c0_i32_1 : i32, i32, i32, i32
  }
  func.func @transform_3(%arg0: i32) -> (i32, i32, i32, i32) {
    %c0_i32 = arith.constant 0 : i32
    %c0_i32_0 = arith.constant 0 : i32
    %c0_i32_1 = arith.constant 0 : i32
    %c0_i32_2 = arith.constant 0 : i32
    return %arg0, %c0_i32, %c0_i32_0, %c0_i32_1 : i32, i32, i32, i32
  }
  func.func @transform_4(%arg0: i32) -> (i32, i32) {
    %c0_i32 = arith.constant 0 : i32
    %c0_i32_0 = arith.constant 0 : i32
    %c0_i32_1 = arith.constant 0 : i32
    return %c0_i32, %c0_i32_0 : i32, i32
  }
  func.func @transform_5(%arg0: i32) -> (i32, i32) {
    %c0_i32 = arith.constant 0 : i32
    %c0_i32_0 = arith.constant 0 : i32
    %c0_i32_1 = arith.constant 0 : i32
    return %c0_i32, %c0_i32_0 : i32, i32
  }
  func.func @transform_6(%arg0: i32) -> (i32, i32) {
    %c0_i32 = arith.constant 0 : i32
    %c0_i32_0 = arith.constant 0 : i32
    %c0_i32_1 = arith.constant 0 : i32
    return %c0_i32, %c0_i32_0 : i32, i32
  }
  func.func @transform_7(%arg0: i32) -> (i32, i32, i32, i32) {
    %c0_i32 = arith.constant 0 : i32
    %c0_i32_0 = arith.constant 0 : i32
    %c0_i32_1 = arith.constant 0 : i32
    %c0_i32_2 = arith.constant 0 : i32
    return %arg0, %c0_i32, %c0_i32_0, %c0_i32_1 : i32, i32, i32, i32
  }
}

module attributes {stable_mosaic.version = 11 : i64} {
  func.func @_matmul_bn_single_k_kernel(%arg0: i32, %arg1: i32, %arg2: memref<16x256xbf16, #tpu.memory_space<vmem>>, %arg3: memref<256x256xbf16, #tpu.memory_space<vmem>>, %arg4: memref<1x256xf32, #tpu.memory_space<vmem>>, %arg5: memref<1x256xf32, #tpu.memory_space<vmem>>, %arg6: memref<16x256xf32, #tpu.memory_space<vmem>>) attributes {dimension_semantics = [#tpu.dimension_semantics<parallel>, #tpu.dimension_semantics<parallel>], iteration_bounds = array<i64: 1, 1>, scalar_prefetch = 0 : i64, scratch_operands = 0 : i64, tpu.core_type = #tpu.core_type<tc>, window_params = [{transform_indices = @transform_0, window_bounds = array<i64: 16, 256>}, {transform_indices = @transform_1, window_bounds = array<i64: 256, 256>}, {transform_indices = @transform_2, window_bounds = array<i64: 1, 256>}, {transform_indices = @transform_3, window_bounds = array<i64: 1, 256>}, {transform_indices = @transform_4, window_bounds = array<i64: 16, 256>}]} {
    %c0 = arith.constant 0 : index
    %c0_0 = arith.constant 0 : index
    %0 = vector.load %arg2[%c0, %c0_0] : memref<16x256xbf16, #tpu.memory_space<vmem>>, vector<16x256xbf16>
    %c0_1 = arith.constant 0 : index
    %c0_2 = arith.constant 0 : index
    %1 = vector.load %arg3[%c0_1, %c0_2] : memref<256x256xbf16, #tpu.memory_space<vmem>>, vector<256x256xbf16>
    %cst = arith.constant dense<0.000000e+00> : vector<16x256xf32>
    %2 = tpu.matmul %0, %1, %cst {dimension_numbers = #tpu.dot_dimension_numbers<[1], [0], [0], [1], [0, 0, 1, 1], [], []>} : vector<16x256xbf16>, vector<256x256xbf16>, vector<16x256xf32> -> vector<16x256xf32>
    %c0_3 = arith.constant 0 : index
    %c0_4 = arith.constant 0 : index
    %3 = vector.load %arg4[%c0_3, %c0_4] : memref<1x256xf32, #tpu.memory_space<vmem>>, vector<1x256xf32>
    %4 = vector.broadcast %3 : vector<1x256xf32> to vector<16x256xf32>
    %5 = arith.mulf %2, %4 : vector<16x256xf32>
    %c0_5 = arith.constant 0 : index
    %c0_6 = arith.constant 0 : index
    %6 = vector.load %arg5[%c0_5, %c0_6] : memref<1x256xf32, #tpu.memory_space<vmem>>, vector<1x256xf32>
    %7 = vector.broadcast %6 : vector<1x256xf32> to vector<16x256xf32>
    %8 = arith.addf %5, %7 : vector<16x256xf32>
    %cst_7 = arith.constant 0.000000e+00 : f32
    %9 = vector.broadcast %cst_7 : f32 to vector<16x256xf32>
    %10 = arith.maximumf %8, %9 : vector<16x256xf32>
    %c0_8 = arith.constant 0 : index
    %c0_9 = arith.constant 0 : index
    %11 = vector.load %arg6[%c0_8, %c0_9] : memref<16x256xf32, #tpu.memory_space<vmem>>, vector<16x256xf32>
    tpu.vector_store %arg6[%c0_8, %c0_9], %10 {strides = array<i32>} : memref<16x256xf32, #tpu.memory_space<vmem>>, vector<16x256xf32>,
    return
  }
  func.func @transform_0(%arg0: i32, %arg1: i32) -> (i32, i32) {
    %c0_i32 = arith.constant 0 : i32
    %c0_i32_0 = arith.constant 0 : i32
    return %arg0, %c0_i32 : i32, i32
  }
  func.func @transform_1(%arg0: i32, %arg1: i32) -> (i32, i32) {
    %c0_i32 = arith.constant 0 : i32
    %c0_i32_0 = arith.constant 0 : i32
    return %c0_i32, %arg1 : i32, i32
  }
  func.func @transform_2(%arg0: i32, %arg1: i32) -> (i32, i32) {
    %c0_i32 = arith.constant 0 : i32
    %c0_i32_0 = arith.constant 0 : i32
    return %c0_i32, %arg1 : i32, i32
  }
  func.func @transform_3(%arg0: i32, %arg1: i32) -> (i32, i32) {
    %c0_i32 = arith.constant 0 : i32
    %c0_i32_0 = arith.constant 0 : i32
    return %c0_i32, %arg1 : i32, i32
  }
  func.func @transform_4(%arg0: i32, %arg1: i32) -> (i32, i32) {
    %c0_i32 = arith.constant 0 : i32
    return %arg0, %arg1 : i32, i32
  }
}

module attributes {stable_mosaic.version = 11 : i64} {
  func.func @_matmul_bn_single_k_kernel(%arg0: i32, %arg1: i32, %arg2: memref<32x256xbf16, #tpu.memory_space<vmem>>, %arg3: memref<256x256xbf16, #tpu.memory_space<vmem>>, %arg4: memref<1x256xf32, #tpu.memory_space<vmem>>, %arg5: memref<1x256xf32, #tpu.memory_space<vmem>>, %arg6: memref<32x256xf32, #tpu.memory_space<vmem>>) attributes {dimension_semantics = [#tpu.dimension_semantics<parallel>, #tpu.dimension_semantics<parallel>], iteration_bounds = array<i64: 1, 1>, scalar_prefetch = 0 : i64, scratch_operands = 0 : i64, tpu.core_type = #tpu.core_type<tc>, window_params = [{transform_indices = @transform_0, window_bounds = array<i64: 32, 256>}, {transform_indices = @transform_1, window_bounds = array<i64: 256, 256>}, {transform_indices = @transform_2, window_bounds = array<i64: 1, 256>}, {transform_indices = @transform_3, window_bounds = array<i64: 1, 256>}, {transform_indices = @transform_4, window_bounds = array<i64: 32, 256>}]} {
    %c0 = arith.constant 0 : index
    %c0_0 = arith.constant 0 : index
    %0 = vector.load %arg2[%c0, %c0_0] : memref<32x256xbf16, #tpu.memory_space<vmem>>, vector<32x256xbf16>
    %c0_1 = arith.constant 0 : index
    %c0_2 = arith.constant 0 : index
    %1 = vector.load %arg3[%c0_1, %c0_2] : memref<256x256xbf16, #tpu.memory_space<vmem>>, vector<256x256xbf16>
    %cst = arith.constant dense<0.000000e+00> : vector<32x256xf32>
    %2 = tpu.matmul %0, %1, %cst {dimension_numbers = #tpu.dot_dimension_numbers<[1], [0], [0], [1], [0, 0, 1, 1], [], []>} : vector<32x256xbf16>, vector<256x256xbf16>, vector<32x256xf32> -> vector<32x256xf32>
    %c0_3 = arith.constant 0 : index
    %c0_4 = arith.constant 0 : index
    %3 = vector.load %arg4[%c0_3, %c0_4] : memref<1x256xf32, #tpu.memory_space<vmem>>, vector<1x256xf32>
    %4 = vector.broadcast %3 : vector<1x256xf32> to vector<32x256xf32>
    %5 = arith.mulf %2, %4 : vector<32x256xf32>
    %c0_5 = arith.constant 0 : index
    %c0_6 = arith.constant 0 : index
    %6 = vector.load %arg5[%c0_5, %c0_6] : memref<1x256xf32, #tpu.memory_space<vmem>>, vector<1x256xf32>
    %7 = vector.broadcast %6 : vector<1x256xf32> to vector<32x256xf32>
    %8 = arith.addf %5, %7 : vector<32x256xf32>
    %cst_7 = arith.constant 0.000000e+00 : f32
    %9 = vector.broadcast %cst_7 : f32 to vector<32x256xf32>
    %10 = arith.maximumf %8, %9 : vector<32x256xf32>
    %c0_8 = arith.constant 0 : index
    %c0_9 = arith.constant 0 : index
    %11 = vector.load %arg6[%c0_8, %c0_9] : memref<32x256xf32, #tpu.memory_space<vmem>>, vector<32x256xf32>
    tpu.vector_store %arg6[%c0_8, %c0_9], %10 {strides = array<i32>} : memref<32x256xf32, #tpu.memory_space<vmem>>, vector<32x256xf32>,
    return
  }
  func.func @transform_0(%arg0: i32, %arg1: i32) -> (i32, i32) {
    %c0_i32 = arith.constant 0 : i32
    %c0_i32_0 = arith.constant 0 : i32
    return %arg0, %c0_i32 : i32, i32
  }
  func.func @transform_1(%arg0: i32, %arg1: i32) -> (i32, i32) {
    %c0_i32 = arith.constant 0 : i32
    %c0_i32_0 = arith.constant 0 : i32
    return %c0_i32, %arg1 : i32, i32
  }
  func.func @transform_2(%arg0: i32, %arg1: i32) -> (i32, i32) {
    %c0_i32 = arith.constant 0 : i32
    %c0_i32_0 = arith.constant 0 : i32
    return %c0_i32, %arg1 : i32, i32
  }
  func.func @transform_3(%arg0: i32, %arg1: i32) -> (i32, i32) {
    %c0_i32 = arith.constant 0 : i32
    %c0_i32_0 = arith.constant 0 : i32
    return %c0_i32, %arg1 : i32, i32
  }
  func.func @transform_4(%arg0: i32, %arg1: i32) -> (i32, i32) {
    %c0_i32 = arith.constant 0 : i32
    return %arg0, %arg1 : i32, i32
  }
}

module attributes {stable_mosaic.version = 11 : i64} {
  func.func @_dw_s1_kernel(%arg0: i32, %arg1: memref<1x4x4x244xf32, #tpu.memory_space<vmem>>, %arg2: memref<9x244xf32, #tpu.memory_space<vmem>>, %arg3: memref<1x244xf32, #tpu.memory_space<vmem>>, %arg4: memref<1x244xf32, #tpu.memory_space<vmem>>, %arg5: memref<1x2x2x244xf32, #tpu.memory_space<vmem>>) attributes {dimension_semantics = [#tpu.dimension_semantics<parallel>], iteration_bounds = array<i64: 2>, scalar_prefetch = 0 : i64, scratch_operands = 0 : i64, tpu.core_type = #tpu.core_type<tc>, window_params = [{transform_indices = @transform_0, window_bounds = array<i64: 1, 4, 4, 244>}, {pipeline_mode = #tpu.pipeline_mode<synchronous>, transform_indices = @transform_1, window_bounds = array<i64: 9, 244>}, {pipeline_mode = #tpu.pipeline_mode<synchronous>, transform_indices = @transform_2, window_bounds = array<i64: 1, 244>}, {pipeline_mode = #tpu.pipeline_mode<synchronous>, transform_indices = @transform_3, window_bounds = array<i64: 1, 244>}, {transform_indices = @transform_4, window_bounds = array<i64: 1, 2, 2, 244>}]} {
    %c0 = arith.constant 0 : index
    %c0_0 = arith.constant 0 : index
    %0 = vector.load %arg2[%c0, %c0_0] : memref<9x244xf32, #tpu.memory_space<vmem>>, vector<9x244xf32>
    %c0_1 = arith.constant 0 : index
    %c0_2 = arith.constant 0 : index
    %c0_3 = arith.constant 0 : index
    %c0_4 = arith.constant 0 : index
    %1 = vector.load %arg1[%c0_1, %c0_2, %c0_3, %c0_4] : memref<1x4x4x244xf32, #tpu.memory_space<vmem>>, vector<1x2x2x244xf32>
    %2 = vector.shape_cast %1 : vector<1x2x2x244xf32> to vector<2x2x244xf32>
    %3 = vector.extract_strided_slice %0 {offsets = [0, 0], sizes = [1, 244], strides = [1, 1]} : vector<9x244xf32> to vector<1x244xf32>
    %4 = vector.shape_cast %3 : vector<1x244xf32> to vector<1x1x244xf32>
    %5 = vector.broadcast %4 : vector<1x1x244xf32> to vector<2x2x244xf32>
    %6 = arith.mulf %2, %5 : vector<2x2x244xf32>
    %c0_5 = arith.constant 0 : index
    %c0_6 = arith.constant 0 : index
    %c1 = arith.constant 1 : index
    %c0_7 = arith.constant 0 : index
    %7 = vector.load %arg1[%c0_5, %c0_6, %c1, %c0_7] : memref<1x4x4x244xf32, #tpu.memory_space<vmem>>, vector<1x2x2x244xf32>
    %8 = vector.shape_cast %7 : vector<1x2x2x244xf32> to vector<2x2x244xf32>
    %9 = vector.extract_strided_slice %0 {offsets = [1, 0], sizes = [1, 244], strides = [1, 1]} : vector<9x244xf32> to vector<1x244xf32>
    %10 = vector.shape_cast %9 : vector<1x244xf32> to vector<1x1x244xf32>
    %11 = vector.broadcast %10 : vector<1x1x244xf32> to vector<2x2x244xf32>
    %12 = arith.mulf %8, %11 : vector<2x2x244xf32>
    %13 = arith.addf %6, %12 : vector<2x2x244xf32>
    %c0_8 = arith.constant 0 : index
    %c0_9 = arith.constant 0 : index
    %c2 = arith.constant 2 : index
    %c0_10 = arith.constant 0 : index
    %14 = vector.load %arg1[%c0_8, %c0_9, %c2, %c0_10] : memref<1x4x4x244xf32, #tpu.memory_space<vmem>>, vector<1x2x2x244xf32>
    %15 = vector.shape_cast %14 : vector<1x2x2x244xf32> to vector<2x2x244xf32>
    %16 = vector.extract_strided_slice %0 {offsets = [2, 0], sizes = [1, 244], strides = [1, 1]} : vector<9x244xf32> to vector<1x244xf32>
    %17 = vector.shape_cast %16 : vector<1x244xf32> to vector<1x1x244xf32>
    %18 = vector.broadcast %17 : vector<1x1x244xf32> to vector<2x2x244xf32>
    %19 = arith.mulf %15, %18 : vector<2x2x244xf32>
    %20 = arith.addf %13, %19 : vector<2x2x244xf32>
    %c0_11 = arith.constant 0 : index
    %c1_12 = arith.constant 1 : index
    %c0_13 = arith.constant 0 : index
    %c0_14 = arith.constant 0 : index
    %21 = vector.load %arg1[%c0_11, %c1_12, %c0_13, %c0_14] : memref<1x4x4x244xf32, #tpu.memory_space<vmem>>, vector<1x2x2x244xf32>
    %22 = vector.shape_cast %21 : vector<1x2x2x244xf32> to vector<2x2x244xf32>
    %23 = vector.extract_strided_slice %0 {offsets = [3, 0], sizes = [1, 244], strides = [1, 1]} : vector<9x244xf32> to vector<1x244xf32>
    %24 = vector.shape_cast %23 : vector<1x244xf32> to vector<1x1x244xf32>
    %25 = vector.broadcast %24 : vector<1x1x244xf32> to vector<2x2x244xf32>
    %26 = arith.mulf %22, %25 : vector<2x2x244xf32>
    %27 = arith.addf %20, %26 : vector<2x2x244xf32>
    %c0_15 = arith.constant 0 : index
    %c1_16 = arith.constant 1 : index
    %c1_17 = arith.constant 1 : index
    %c0_18 = arith.constant 0 : index
    %28 = vector.load %arg1[%c0_15, %c1_16, %c1_17, %c0_18] : memref<1x4x4x244xf32, #tpu.memory_space<vmem>>, vector<1x2x2x244xf32>
    %29 = vector.shape_cast %28 : vector<1x2x2x244xf32> to vector<2x2x244xf32>
    %30 = vector.extract_strided_slice %0 {offsets = [4, 0], sizes = [1, 244], strides = [1, 1]} : vector<9x244xf32> to vector<1x244xf32>
    %31 = vector.shape_cast %30 : vector<1x244xf32> to vector<1x1x244xf32>
    %32 = vector.broadcast %31 : vector<1x1x244xf32> to vector<2x2x244xf32>
    %33 = arith.mulf %29, %32 : vector<2x2x244xf32>
    %34 = arith.addf %27, %33 : vector<2x2x244xf32>
    %c0_19 = arith.constant 0 : index
    %c1_20 = arith.constant 1 : index
    %c2_21 = arith.constant 2 : index
    %c0_22 = arith.constant 0 : index
    %35 = vector.load %arg1[%c0_19, %c1_20, %c2_21, %c0_22] : memref<1x4x4x244xf32, #tpu.memory_space<vmem>>, vector<1x2x2x244xf32>
    %36 = vector.shape_cast %35 : vector<1x2x2x244xf32> to vector<2x2x244xf32>
    %37 = vector.extract_strided_slice %0 {offsets = [5, 0], sizes = [1, 244], strides = [1, 1]} : vector<9x244xf32> to vector<1x244xf32>
    %38 = vector.shape_cast %37 : vector<1x244xf32> to vector<1x1x244xf32>
    %39 = vector.broadcast %38 : vector<1x1x244xf32> to vector<2x2x244xf32>
    %40 = arith.mulf %36, %39 : vector<2x2x244xf32>
    %41 = arith.addf %34, %40 : vector<2x2x244xf32>
    %c0_23 = arith.constant 0 : index
    %c2_24 = arith.constant 2 : index
    %c0_25 = arith.constant 0 : index
    %c0_26 = arith.constant 0 : index
    %42 = vector.load %arg1[%c0_23, %c2_24, %c0_25, %c0_26] : memref<1x4x4x244xf32, #tpu.memory_space<vmem>>, vector<1x2x2x244xf32>
    %43 = vector.shape_cast %42 : vector<1x2x2x244xf32> to vector<2x2x244xf32>
    %44 = vector.extract_strided_slice %0 {offsets = [6, 0], sizes = [1, 244], strides = [1, 1]} : vector<9x244xf32> to vector<1x244xf32>
    %45 = vector.shape_cast %44 : vector<1x244xf32> to vector<1x1x244xf32>
    %46 = vector.broadcast %45 : vector<1x1x244xf32> to vector<2x2x244xf32>
    %47 = arith.mulf %43, %46 : vector<2x2x244xf32>
    %48 = arith.addf %41, %47 : vector<2x2x244xf32>
    %c0_27 = arith.constant 0 : index
    %c2_28 = arith.constant 2 : index
    %c1_29 = arith.constant 1 : index
    %c0_30 = arith.constant 0 : index
    %49 = vector.load %arg1[%c0_27, %c2_28, %c1_29, %c0_30] : memref<1x4x4x244xf32, #tpu.memory_space<vmem>>, vector<1x2x2x244xf32>
    %50 = vector.shape_cast %49 : vector<1x2x2x244xf32> to vector<2x2x244xf32>
    %51 = vector.extract_strided_slice %0 {offsets = [7, 0], sizes = [1, 244], strides = [1, 1]} : vector<9x244xf32> to vector<1x244xf32>
    %52 = vector.shape_cast %51 : vector<1x244xf32> to vector<1x1x244xf32>
    %53 = vector.broadcast %52 : vector<1x1x244xf32> to vector<2x2x244xf32>
    %54 = arith.mulf %50, %53 : vector<2x2x244xf32>
    %55 = arith.addf %48, %54 : vector<2x2x244xf32>
    %c0_31 = arith.constant 0 : index
    %c2_32 = arith.constant 2 : index
    %c2_33 = arith.constant 2 : index
    %c0_34 = arith.constant 0 : index
    %56 = vector.load %arg1[%c0_31, %c2_32, %c2_33, %c0_34] : memref<1x4x4x244xf32, #tpu.memory_space<vmem>>, vector<1x2x2x244xf32>
    %57 = vector.shape_cast %56 : vector<1x2x2x244xf32> to vector<2x2x244xf32>
    %58 = vector.extract_strided_slice %0 {offsets = [8, 0], sizes = [1, 244], strides = [1, 1]} : vector<9x244xf32> to vector<1x244xf32>
    %59 = vector.shape_cast %58 : vector<1x244xf32> to vector<1x1x244xf32>
    %60 = vector.broadcast %59 : vector<1x1x244xf32> to vector<2x2x244xf32>
    %61 = arith.mulf %57, %60 : vector<2x2x244xf32>
    %62 = arith.addf %55, %61 : vector<2x2x244xf32>
    %c0_35 = arith.constant 0 : index
    %c0_36 = arith.constant 0 : index
    %63 = vector.load %arg3[%c0_35, %c0_36] : memref<1x244xf32, #tpu.memory_space<vmem>>, vector<1x244xf32>
    %64 = vector.shape_cast %63 : vector<1x244xf32> to vector<1x1x244xf32>
    %65 = vector.broadcast %64 : vector<1x1x244xf32> to vector<2x2x244xf32>
    %66 = arith.mulf %62, %65 : vector<2x2x244xf32>
    %c0_37 = arith.constant 0 : index
    %c0_38 = arith.constant 0 : index
    %67 = vector.load %arg4[%c0_37, %c0_38] : memref<1x244xf32, #tpu.memory_space<vmem>>, vector<1x244xf32>
    %68 = vector.shape_cast %67 : vector<1x244xf32> to vector<1x1x244xf32>
    %69 = vector.broadcast %68 : vector<1x1x244xf32> to vector<2x2x244xf32>
    %70 = arith.addf %66, %69 : vector<2x2x244xf32>
    %c0_39 = arith.constant 0 : index
    %c0_40 = arith.constant 0 : index
    %c0_41 = arith.constant 0 : index
    %c0_42 = arith.constant 0 : index
    %71 = vector.load %arg5[%c0_39, %c0_40, %c0_41, %c0_42] : memref<1x2x2x244xf32, #tpu.memory_space<vmem>>, vector<1x2x2x244xf32>
    %72 = vector.shape_cast %71 : vector<1x2x2x244xf32> to vector<2x2x244xf32>
    %73 = vector.shape_cast %70 : vector<2x2x244xf32> to vector<1x2x2x244xf32>
    tpu.vector_store %arg5[%c0_39, %c0_40, %c0_41, %c0_42], %73 {strides = array<i32>} : memref<1x2x2x244xf32, #tpu.memory_space<vmem>>, vector<1x2x2x244xf32>,
    return
  }
  func.func @transform_0(%arg0: i32) -> (i32, i32, i32, i32) {
    %c0_i32 = arith.constant 0 : i32
    %c0_i32_0 = arith.constant 0 : i32
    %c0_i32_1 = arith.constant 0 : i32
    %c0_i32_2 = arith.constant 0 : i32
    return %arg0, %c0_i32, %c0_i32_0, %c0_i32_1 : i32, i32, i32, i32
  }
  func.func @transform_1(%arg0: i32) -> (i32, i32) {
    %c0_i32 = arith.constant 0 : i32
    %c0_i32_0 = arith.constant 0 : i32
    %c0_i32_1 = arith.constant 0 : i32
    return %c0_i32, %c0_i32_0 : i32, i32
  }
  func.func @transform_2(%arg0: i32) -> (i32, i32) {
    %c0_i32 = arith.constant 0 : i32
    %c0_i32_0 = arith.constant 0 : i32
    %c0_i32_1 = arith.constant 0 : i32
    return %c0_i32, %c0_i32_0 : i32, i32
  }
  func.func @transform_3(%arg0: i32) -> (i32, i32) {
    %c0_i32 = arith.constant 0 : i32
    %c0_i32_0 = arith.constant 0 : i32
    %c0_i32_1 = arith.constant 0 : i32
    return %c0_i32, %c0_i32_0 : i32, i32
  }
  func.func @transform_4(%arg0: i32) -> (i32, i32, i32, i32) {
    %c0_i32 = arith.constant 0 : i32
    %c0_i32_0 = arith.constant 0 : i32
    %c0_i32_1 = arith.constant 0 : i32
    %c0_i32_2 = arith.constant 0 : i32
    return %arg0, %c0_i32, %c0_i32_0, %c0_i32_1 : i32, i32, i32, i32
  }
}

module attributes {stable_mosaic.version = 11 : i64} {
  func.func @_dw_s2_kernel(%arg0: i32, %arg1: memref<1x2x2x488xf32, #tpu.memory_space<vmem>>, %arg2: memref<1x2x2x488xf32, #tpu.memory_space<vmem>>, %arg3: memref<1x2x2x488xf32, #tpu.memory_space<vmem>>, %arg4: memref<1x2x2x488xf32, #tpu.memory_space<vmem>>, %arg5: memref<9x488xf32, #tpu.memory_space<vmem>>, %arg6: memref<1x488xf32, #tpu.memory_space<vmem>>, %arg7: memref<1x488xf32, #tpu.memory_space<vmem>>, %arg8: memref<1x1x1x488xf32, #tpu.memory_space<vmem>>) attributes {dimension_semantics = [#tpu.dimension_semantics<parallel>], iteration_bounds = array<i64: 2>, scalar_prefetch = 0 : i64, scratch_operands = 0 : i64, tpu.core_type = #tpu.core_type<tc>, window_params = [{transform_indices = @transform_0, window_bounds = array<i64: 1, 2, 2, 488>}, {transform_indices = @transform_1, window_bounds = array<i64: 1, 2, 2, 488>}, {transform_indices = @transform_2, window_bounds = array<i64: 1, 2, 2, 488>}, {transform_indices = @transform_3, window_bounds = array<i64: 1, 2, 2, 488>}, {pipeline_mode = #tpu.pipeline_mode<synchronous>, transform_indices = @transform_4, window_bounds = array<i64: 9, 488>}, {pipeline_mode = #tpu.pipeline_mode<synchronous>, transform_indices = @transform_5, window_bounds = array<i64: 1, 488>}, {pipeline_mode = #tpu.pipeline_mode<synchronous>, transform_indices = @transform_6, window_bounds = array<i64: 1, 488>}, {transform_indices = @transform_7, window_bounds = array<i64: 1, 1, 1, 488>}]} {
    %c0 = arith.constant 0 : index
    %c0_0 = arith.constant 0 : index
    %0 = vector.load %arg5[%c0, %c0_0] : memref<9x488xf32, #tpu.memory_space<vmem>>, vector<9x488xf32>
    %c0_1 = arith.constant 0 : index
    %c0_2 = arith.constant 0 : index
    %c0_3 = arith.constant 0 : index
    %c0_4 = arith.constant 0 : index
    %1 = vector.load %arg1[%c0_1, %c0_2, %c0_3, %c0_4] : memref<1x2x2x488xf32, #tpu.memory_space<vmem>>, vector<1x1x1x488xf32>
    %2 = vector.shape_cast %1 : vector<1x1x1x488xf32> to vector<1x1x488xf32>
    %3 = vector.extract_strided_slice %0 {offsets = [0, 0], sizes = [1, 488], strides = [1, 1]} : vector<9x488xf32> to vector<1x488xf32>
    %4 = vector.shape_cast %3 : vector<1x488xf32> to vector<1x1x488xf32>
    %5 = arith.mulf %2, %4 : vector<1x1x488xf32>
    %c0_5 = arith.constant 0 : index
    %c0_6 = arith.constant 0 : index
    %c0_7 = arith.constant 0 : index
    %c0_8 = arith.constant 0 : index
    %6 = vector.load %arg2[%c0_5, %c0_6, %c0_7, %c0_8] : memref<1x2x2x488xf32, #tpu.memory_space<vmem>>, vector<1x1x1x488xf32>
    %7 = vector.shape_cast %6 : vector<1x1x1x488xf32> to vector<1x1x488xf32>
    %8 = vector.extract_strided_slice %0 {offsets = [1, 0], sizes = [1, 488], strides = [1, 1]} : vector<9x488xf32> to vector<1x488xf32>
    %9 = vector.shape_cast %8 : vector<1x488xf32> to vector<1x1x488xf32>
    %10 = arith.mulf %7, %9 : vector<1x1x488xf32>
    %11 = arith.addf %5, %10 : vector<1x1x488xf32>
    %c0_9 = arith.constant 0 : index
    %c0_10 = arith.constant 0 : index
    %c1 = arith.constant 1 : index
    %c0_11 = arith.constant 0 : index
    %12 = vector.load %arg1[%c0_9, %c0_10, %c1, %c0_11] : memref<1x2x2x488xf32, #tpu.memory_space<vmem>>, vector<1x1x1x488xf32>
    %13 = vector.shape_cast %12 : vector<1x1x1x488xf32> to vector<1x1x488xf32>
    %14 = vector.extract_strided_slice %0 {offsets = [2, 0], sizes = [1, 488], strides = [1, 1]} : vector<9x488xf32> to vector<1x488xf32>
    %15 = vector.shape_cast %14 : vector<1x488xf32> to vector<1x1x488xf32>
    %16 = arith.mulf %13, %15 : vector<1x1x488xf32>
    %17 = arith.addf %11, %16 : vector<1x1x488xf32>
    %c0_12 = arith.constant 0 : index
    %c0_13 = arith.constant 0 : index
    %c0_14 = arith.constant 0 : index
    %c0_15 = arith.constant 0 : index
    %18 = vector.load %arg3[%c0_12, %c0_13, %c0_14, %c0_15] : memref<1x2x2x488xf32, #tpu.memory_space<vmem>>, vector<1x1x1x488xf32>
    %19 = vector.shape_cast %18 : vector<1x1x1x488xf32> to vector<1x1x488xf32>
    %20 = vector.extract_strided_slice %0 {offsets = [3, 0], sizes = [1, 488], strides = [1, 1]} : vector<9x488xf32> to vector<1x488xf32>
    %21 = vector.shape_cast %20 : vector<1x488xf32> to vector<1x1x488xf32>
    %22 = arith.mulf %19, %21 : vector<1x1x488xf32>
    %23 = arith.addf %17, %22 : vector<1x1x488xf32>
    %c0_16 = arith.constant 0 : index
    %c0_17 = arith.constant 0 : index
    %c0_18 = arith.constant 0 : index
    %c0_19 = arith.constant 0 : index
    %24 = vector.load %arg4[%c0_16, %c0_17, %c0_18, %c0_19] : memref<1x2x2x488xf32, #tpu.memory_space<vmem>>, vector<1x1x1x488xf32>
    %25 = vector.shape_cast %24 : vector<1x1x1x488xf32> to vector<1x1x488xf32>
    %26 = vector.extract_strided_slice %0 {offsets = [4, 0], sizes = [1, 488], strides = [1, 1]} : vector<9x488xf32> to vector<1x488xf32>
    %27 = vector.shape_cast %26 : vector<1x488xf32> to vector<1x1x488xf32>
    %28 = arith.mulf %25, %27 : vector<1x1x488xf32>
    %29 = arith.addf %23, %28 : vector<1x1x488xf32>
    %c0_20 = arith.constant 0 : index
    %c0_21 = arith.constant 0 : index
    %c1_22 = arith.constant 1 : index
    %c0_23 = arith.constant 0 : index
    %30 = vector.load %arg3[%c0_20, %c0_21, %c1_22, %c0_23] : memref<1x2x2x488xf32, #tpu.memory_space<vmem>>, vector<1x1x1x488xf32>
    %31 = vector.shape_cast %30 : vector<1x1x1x488xf32> to vector<1x1x488xf32>
    %32 = vector.extract_strided_slice %0 {offsets = [5, 0], sizes = [1, 488], strides = [1, 1]} : vector<9x488xf32> to vector<1x488xf32>
    %33 = vector.shape_cast %32 : vector<1x488xf32> to vector<1x1x488xf32>
    %34 = arith.mulf %31, %33 : vector<1x1x488xf32>
    %35 = arith.addf %29, %34 : vector<1x1x488xf32>
    %c0_24 = arith.constant 0 : index
    %c1_25 = arith.constant 1 : index
    %c0_26 = arith.constant 0 : index
    %c0_27 = arith.constant 0 : index
    %36 = vector.load %arg1[%c0_24, %c1_25, %c0_26, %c0_27] : memref<1x2x2x488xf32, #tpu.memory_space<vmem>>, vector<1x1x1x488xf32>
    %37 = vector.shape_cast %36 : vector<1x1x1x488xf32> to vector<1x1x488xf32>
    %38 = vector.extract_strided_slice %0 {offsets = [6, 0], sizes = [1, 488], strides = [1, 1]} : vector<9x488xf32> to vector<1x488xf32>
    %39 = vector.shape_cast %38 : vector<1x488xf32> to vector<1x1x488xf32>
    %40 = arith.mulf %37, %39 : vector<1x1x488xf32>
    %41 = arith.addf %35, %40 : vector<1x1x488xf32>
    %c0_28 = arith.constant 0 : index
    %c1_29 = arith.constant 1 : index
    %c0_30 = arith.constant 0 : index
    %c0_31 = arith.constant 0 : index
    %42 = vector.load %arg2[%c0_28, %c1_29, %c0_30, %c0_31] : memref<1x2x2x488xf32, #tpu.memory_space<vmem>>, vector<1x1x1x488xf32>
    %43 = vector.shape_cast %42 : vector<1x1x1x488xf32> to vector<1x1x488xf32>
    %44 = vector.extract_strided_slice %0 {offsets = [7, 0], sizes = [1, 488], strides = [1, 1]} : vector<9x488xf32> to vector<1x488xf32>
    %45 = vector.shape_cast %44 : vector<1x488xf32> to vector<1x1x488xf32>
    %46 = arith.mulf %43, %45 : vector<1x1x488xf32>
    %47 = arith.addf %41, %46 : vector<1x1x488xf32>
    %c0_32 = arith.constant 0 : index
    %c1_33 = arith.constant 1 : index
    %c1_34 = arith.constant 1 : index
    %c0_35 = arith.constant 0 : index
    %48 = vector.load %arg1[%c0_32, %c1_33, %c1_34, %c0_35] : memref<1x2x2x488xf32, #tpu.memory_space<vmem>>, vector<1x1x1x488xf32>
    %49 = vector.shape_cast %48 : vector<1x1x1x488xf32> to vector<1x1x488xf32>
    %50 = vector.extract_strided_slice %0 {offsets = [8, 0], sizes = [1, 488], strides = [1, 1]} : vector<9x488xf32> to vector<1x488xf32>
    %51 = vector.shape_cast %50 : vector<1x488xf32> to vector<1x1x488xf32>
    %52 = arith.mulf %49, %51 : vector<1x1x488xf32>
    %53 = arith.addf %47, %52 : vector<1x1x488xf32>
    %c0_36 = arith.constant 0 : index
    %c0_37 = arith.constant 0 : index
    %54 = vector.load %arg6[%c0_36, %c0_37] : memref<1x488xf32, #tpu.memory_space<vmem>>, vector<1x488xf32>
    %55 = vector.shape_cast %54 : vector<1x488xf32> to vector<1x1x488xf32>
    %56 = arith.mulf %53, %55 : vector<1x1x488xf32>
    %c0_38 = arith.constant 0 : index
    %c0_39 = arith.constant 0 : index
    %57 = vector.load %arg7[%c0_38, %c0_39] : memref<1x488xf32, #tpu.memory_space<vmem>>, vector<1x488xf32>
    %58 = vector.shape_cast %57 : vector<1x488xf32> to vector<1x1x488xf32>
    %59 = arith.addf %56, %58 : vector<1x1x488xf32>
    %c0_40 = arith.constant 0 : index
    %c0_41 = arith.constant 0 : index
    %c0_42 = arith.constant 0 : index
    %c0_43 = arith.constant 0 : index
    %60 = vector.load %arg8[%c0_40, %c0_41, %c0_42, %c0_43] : memref<1x1x1x488xf32, #tpu.memory_space<vmem>>, vector<1x1x1x488xf32>
    %61 = vector.shape_cast %60 : vector<1x1x1x488xf32> to vector<1x1x488xf32>
    %62 = vector.shape_cast %59 : vector<1x1x488xf32> to vector<1x1x1x488xf32>
    tpu.vector_store %arg8[%c0_40, %c0_41, %c0_42, %c0_43], %62 {strides = array<i32>} : memref<1x1x1x488xf32, #tpu.memory_space<vmem>>, vector<1x1x1x488xf32>,
    return
  }
  func.func @transform_0(%arg0: i32) -> (i32, i32, i32, i32) {
    %c0_i32 = arith.constant 0 : i32
    %c0_i32_0 = arith.constant 0 : i32
    %c0_i32_1 = arith.constant 0 : i32
    %c0_i32_2 = arith.constant 0 : i32
    return %arg0, %c0_i32, %c0_i32_0, %c0_i32_1 : i32, i32, i32, i32
  }
  func.func @transform_1(%arg0: i32) -> (i32, i32, i32, i32) {
    %c0_i32 = arith.constant 0 : i32
    %c0_i32_0 = arith.constant 0 : i32
    %c0_i32_1 = arith.constant 0 : i32
    %c0_i32_2 = arith.constant 0 : i32
    return %arg0, %c0_i32, %c0_i32_0, %c0_i32_1 : i32, i32, i32, i32
  }
  func.func @transform_2(%arg0: i32) -> (i32, i32, i32, i32) {
    %c0_i32 = arith.constant 0 : i32
    %c0_i32_0 = arith.constant 0 : i32
    %c0_i32_1 = arith.constant 0 : i32
    %c0_i32_2 = arith.constant 0 : i32
    return %arg0, %c0_i32, %c0_i32_0, %c0_i32_1 : i32, i32, i32, i32
  }
  func.func @transform_3(%arg0: i32) -> (i32, i32, i32, i32) {
    %c0_i32 = arith.constant 0 : i32
    %c0_i32_0 = arith.constant 0 : i32
    %c0_i32_1 = arith.constant 0 : i32
    %c0_i32_2 = arith.constant 0 : i32
    return %arg0, %c0_i32, %c0_i32_0, %c0_i32_1 : i32, i32, i32, i32
  }
  func.func @transform_4(%arg0: i32) -> (i32, i32) {
    %c0_i32 = arith.constant 0 : i32
    %c0_i32_0 = arith.constant 0 : i32
    %c0_i32_1 = arith.constant 0 : i32
    return %c0_i32, %c0_i32_0 : i32, i32
  }
  func.func @transform_5(%arg0: i32) -> (i32, i32) {
    %c0_i32 = arith.constant 0 : i32
    %c0_i32_0 = arith.constant 0 : i32
    %c0_i32_1 = arith.constant 0 : i32
    return %c0_i32, %c0_i32_0 : i32, i32
  }
  func.func @transform_6(%arg0: i32) -> (i32, i32) {
    %c0_i32 = arith.constant 0 : i32
    %c0_i32_0 = arith.constant 0 : i32
    %c0_i32_1 = arith.constant 0 : i32
    return %c0_i32, %c0_i32_0 : i32, i32
  }
  func.func @transform_7(%arg0: i32) -> (i32, i32, i32, i32) {
    %c0_i32 = arith.constant 0 : i32
    %c0_i32_0 = arith.constant 0 : i32
    %c0_i32_1 = arith.constant 0 : i32
    %c0_i32_2 = arith.constant 0 : i32
    return %arg0, %c0_i32, %c0_i32_0, %c0_i32_1 : i32, i32, i32, i32
  }
}

module attributes {stable_mosaic.version = 11 : i64} {
  func.func @_matmul_bn_single_k_kernel(%arg0: i32, %arg1: i32, %arg2: memref<16x512xbf16, #tpu.memory_space<vmem>>, %arg3: memref<512x256xbf16, #tpu.memory_space<vmem>>, %arg4: memref<1x256xf32, #tpu.memory_space<vmem>>, %arg5: memref<1x256xf32, #tpu.memory_space<vmem>>, %arg6: memref<16x256xf32, #tpu.memory_space<vmem>>) attributes {dimension_semantics = [#tpu.dimension_semantics<parallel>, #tpu.dimension_semantics<parallel>], iteration_bounds = array<i64: 1, 2>, scalar_prefetch = 0 : i64, scratch_operands = 0 : i64, tpu.core_type = #tpu.core_type<tc>, window_params = [{transform_indices = @transform_0, window_bounds = array<i64: 16, 512>}, {transform_indices = @transform_1, window_bounds = array<i64: 512, 256>}, {transform_indices = @transform_2, window_bounds = array<i64: 1, 256>}, {transform_indices = @transform_3, window_bounds = array<i64: 1, 256>}, {transform_indices = @transform_4, window_bounds = array<i64: 16, 256>}]} {
    %c0 = arith.constant 0 : index
    %c0_0 = arith.constant 0 : index
    %0 = vector.load %arg2[%c0, %c0_0] : memref<16x512xbf16, #tpu.memory_space<vmem>>, vector<16x512xbf16>
    %c0_1 = arith.constant 0 : index
    %c0_2 = arith.constant 0 : index
    %1 = vector.load %arg3[%c0_1, %c0_2] : memref<512x256xbf16, #tpu.memory_space<vmem>>, vector<512x256xbf16>
    %cst = arith.constant dense<0.000000e+00> : vector<16x256xf32>
    %2 = tpu.matmul %0, %1, %cst {dimension_numbers = #tpu.dot_dimension_numbers<[1], [0], [0], [1], [0, 0, 1, 1], [], []>} : vector<16x512xbf16>, vector<512x256xbf16>, vector<16x256xf32> -> vector<16x256xf32>
    %c0_3 = arith.constant 0 : index
    %c0_4 = arith.constant 0 : index
    %3 = vector.load %arg4[%c0_3, %c0_4] : memref<1x256xf32, #tpu.memory_space<vmem>>, vector<1x256xf32>
    %4 = vector.broadcast %3 : vector<1x256xf32> to vector<16x256xf32>
    %5 = arith.mulf %2, %4 : vector<16x256xf32>
    %c0_5 = arith.constant 0 : index
    %c0_6 = arith.constant 0 : index
    %6 = vector.load %arg5[%c0_5, %c0_6] : memref<1x256xf32, #tpu.memory_space<vmem>>, vector<1x256xf32>
    %7 = vector.broadcast %6 : vector<1x256xf32> to vector<16x256xf32>
    %8 = arith.addf %5, %7 : vector<16x256xf32>
    %cst_7 = arith.constant 0.000000e+00 : f32
    %9 = vector.broadcast %cst_7 : f32 to vector<16x256xf32>
    %10 = arith.maximumf %8, %9 : vector<16x256xf32>
    %c0_8 = arith.constant 0 : index
    %c0_9 = arith.constant 0 : index
    %11 = vector.load %arg6[%c0_8, %c0_9] : memref<16x256xf32, #tpu.memory_space<vmem>>, vector<16x256xf32>
    tpu.vector_store %arg6[%c0_8, %c0_9], %10 {strides = array<i32>} : memref<16x256xf32, #tpu.memory_space<vmem>>, vector<16x256xf32>,
    return
  }
  func.func @transform_0(%arg0: i32, %arg1: i32) -> (i32, i32) {
    %c0_i32 = arith.constant 0 : i32
    %c0_i32_0 = arith.constant 0 : i32
    return %arg0, %c0_i32 : i32, i32
  }
  func.func @transform_1(%arg0: i32, %arg1: i32) -> (i32, i32) {
    %c0_i32 = arith.constant 0 : i32
    %c0_i32_0 = arith.constant 0 : i32
    return %c0_i32, %arg1 : i32, i32
  }
  func.func @transform_2(%arg0: i32, %arg1: i32) -> (i32, i32) {
    %c0_i32 = arith.constant 0 : i32
    %c0_i32_0 = arith.constant 0 : i32
    return %c0_i32, %arg1 : i32, i32
  }
  func.func @transform_3(%arg0: i32, %arg1: i32) -> (i32, i32) {
    %c0_i32 = arith.constant 0 : i32
    %c0_i32_0 = arith.constant 0 : i32
    return %c0_i32, %arg1 : i32, i32
  }
  func.func @transform_4(%arg0: i32, %arg1: i32) -> (i32, i32) {
    %c0_i32 = arith.constant 0 : i32
    return %arg0, %arg1 : i32, i32
  }
}

module attributes {stable_mosaic.version = 11 : i64} {
  func.func @_dw_s1_kernel(%arg0: i32, %arg1: memref<1x3x3x488xf32, #tpu.memory_space<vmem>>, %arg2: memref<9x488xf32, #tpu.memory_space<vmem>>, %arg3: memref<1x488xf32, #tpu.memory_space<vmem>>, %arg4: memref<1x488xf32, #tpu.memory_space<vmem>>, %arg5: memref<1x1x1x488xf32, #tpu.memory_space<vmem>>) attributes {dimension_semantics = [#tpu.dimension_semantics<parallel>], iteration_bounds = array<i64: 2>, scalar_prefetch = 0 : i64, scratch_operands = 0 : i64, tpu.core_type = #tpu.core_type<tc>, window_params = [{transform_indices = @transform_0, window_bounds = array<i64: 1, 3, 3, 488>}, {pipeline_mode = #tpu.pipeline_mode<synchronous>, transform_indices = @transform_1, window_bounds = array<i64: 9, 488>}, {pipeline_mode = #tpu.pipeline_mode<synchronous>, transform_indices = @transform_2, window_bounds = array<i64: 1, 488>}, {pipeline_mode = #tpu.pipeline_mode<synchronous>, transform_indices = @transform_3, window_bounds = array<i64: 1, 488>}, {transform_indices = @transform_4, window_bounds = array<i64: 1, 1, 1, 488>}]} {
    %c0 = arith.constant 0 : index
    %c0_0 = arith.constant 0 : index
    %0 = vector.load %arg2[%c0, %c0_0] : memref<9x488xf32, #tpu.memory_space<vmem>>, vector<9x488xf32>
    %c0_1 = arith.constant 0 : index
    %c0_2 = arith.constant 0 : index
    %c0_3 = arith.constant 0 : index
    %c0_4 = arith.constant 0 : index
    %1 = vector.load %arg1[%c0_1, %c0_2, %c0_3, %c0_4] : memref<1x3x3x488xf32, #tpu.memory_space<vmem>>, vector<1x1x1x488xf32>
    %2 = vector.shape_cast %1 : vector<1x1x1x488xf32> to vector<1x1x488xf32>
    %3 = vector.extract_strided_slice %0 {offsets = [0, 0], sizes = [1, 488], strides = [1, 1]} : vector<9x488xf32> to vector<1x488xf32>
    %4 = vector.shape_cast %3 : vector<1x488xf32> to vector<1x1x488xf32>
    %5 = arith.mulf %2, %4 : vector<1x1x488xf32>
    %c0_5 = arith.constant 0 : index
    %c0_6 = arith.constant 0 : index
    %c1 = arith.constant 1 : index
    %c0_7 = arith.constant 0 : index
    %6 = vector.load %arg1[%c0_5, %c0_6, %c1, %c0_7] : memref<1x3x3x488xf32, #tpu.memory_space<vmem>>, vector<1x1x1x488xf32>
    %7 = vector.shape_cast %6 : vector<1x1x1x488xf32> to vector<1x1x488xf32>
    %8 = vector.extract_strided_slice %0 {offsets = [1, 0], sizes = [1, 488], strides = [1, 1]} : vector<9x488xf32> to vector<1x488xf32>
    %9 = vector.shape_cast %8 : vector<1x488xf32> to vector<1x1x488xf32>
    %10 = arith.mulf %7, %9 : vector<1x1x488xf32>
    %11 = arith.addf %5, %10 : vector<1x1x488xf32>
    %c0_8 = arith.constant 0 : index
    %c0_9 = arith.constant 0 : index
    %c2 = arith.constant 2 : index
    %c0_10 = arith.constant 0 : index
    %12 = vector.load %arg1[%c0_8, %c0_9, %c2, %c0_10] : memref<1x3x3x488xf32, #tpu.memory_space<vmem>>, vector<1x1x1x488xf32>
    %13 = vector.shape_cast %12 : vector<1x1x1x488xf32> to vector<1x1x488xf32>
    %14 = vector.extract_strided_slice %0 {offsets = [2, 0], sizes = [1, 488], strides = [1, 1]} : vector<9x488xf32> to vector<1x488xf32>
    %15 = vector.shape_cast %14 : vector<1x488xf32> to vector<1x1x488xf32>
    %16 = arith.mulf %13, %15 : vector<1x1x488xf32>
    %17 = arith.addf %11, %16 : vector<1x1x488xf32>
    %c0_11 = arith.constant 0 : index
    %c1_12 = arith.constant 1 : index
    %c0_13 = arith.constant 0 : index
    %c0_14 = arith.constant 0 : index
    %18 = vector.load %arg1[%c0_11, %c1_12, %c0_13, %c0_14] : memref<1x3x3x488xf32, #tpu.memory_space<vmem>>, vector<1x1x1x488xf32>
    %19 = vector.shape_cast %18 : vector<1x1x1x488xf32> to vector<1x1x488xf32>
    %20 = vector.extract_strided_slice %0 {offsets = [3, 0], sizes = [1, 488], strides = [1, 1]} : vector<9x488xf32> to vector<1x488xf32>
    %21 = vector.shape_cast %20 : vector<1x488xf32> to vector<1x1x488xf32>
    %22 = arith.mulf %19, %21 : vector<1x1x488xf32>
    %23 = arith.addf %17, %22 : vector<1x1x488xf32>
    %c0_15 = arith.constant 0 : index
    %c1_16 = arith.constant 1 : index
    %c1_17 = arith.constant 1 : index
    %c0_18 = arith.constant 0 : index
    %24 = vector.load %arg1[%c0_15, %c1_16, %c1_17, %c0_18] : memref<1x3x3x488xf32, #tpu.memory_space<vmem>>, vector<1x1x1x488xf32>
    %25 = vector.shape_cast %24 : vector<1x1x1x488xf32> to vector<1x1x488xf32>
    %26 = vector.extract_strided_slice %0 {offsets = [4, 0], sizes = [1, 488], strides = [1, 1]} : vector<9x488xf32> to vector<1x488xf32>
    %27 = vector.shape_cast %26 : vector<1x488xf32> to vector<1x1x488xf32>
    %28 = arith.mulf %25, %27 : vector<1x1x488xf32>
    %29 = arith.addf %23, %28 : vector<1x1x488xf32>
    %c0_19 = arith.constant 0 : index
    %c1_20 = arith.constant 1 : index
    %c2_21 = arith.constant 2 : index
    %c0_22 = arith.constant 0 : index
    %30 = vector.load %arg1[%c0_19, %c1_20, %c2_21, %c0_22] : memref<1x3x3x488xf32, #tpu.memory_space<vmem>>, vector<1x1x1x488xf32>
    %31 = vector.shape_cast %30 : vector<1x1x1x488xf32> to vector<1x1x488xf32>
    %32 = vector.extract_strided_slice %0 {offsets = [5, 0], sizes = [1, 488], strides = [1, 1]} : vector<9x488xf32> to vector<1x488xf32>
    %33 = vector.shape_cast %32 : vector<1x488xf32> to vector<1x1x488xf32>
    %34 = arith.mulf %31, %33 : vector<1x1x488xf32>
    %35 = arith.addf %29, %34 : vector<1x1x488xf32>
    %c0_23 = arith.constant 0 : index
    %c2_24 = arith.constant 2 : index
    %c0_25 = arith.constant 0 : index
    %c0_26 = arith.constant 0 : index
    %36 = vector.load %arg1[%c0_23, %c2_24, %c0_25, %c0_26] : memref<1x3x3x488xf32, #tpu.memory_space<vmem>>, vector<1x1x1x488xf32>
    %37 = vector.shape_cast %36 : vector<1x1x1x488xf32> to vector<1x1x488xf32>
    %38 = vector.extract_strided_slice %0 {offsets = [6, 0], sizes = [1, 488], strides = [1, 1]} : vector<9x488xf32> to vector<1x488xf32>
    %39 = vector.shape_cast %38 : vector<1x488xf32> to vector<1x1x488xf32>
    %40 = arith.mulf %37, %39 : vector<1x1x488xf32>
    %41 = arith.addf %35, %40 : vector<1x1x488xf32>
    %c0_27 = arith.constant 0 : index
    %c2_28 = arith.constant 2 : index
    %c1_29 = arith.constant 1 : index
    %c0_30 = arith.constant 0 : index
    %42 = vector.load %arg1[%c0_27, %c2_28, %c1_29, %c0_30] : memref<1x3x3x488xf32, #tpu.memory_space<vmem>>, vector<1x1x1x488xf32>
    %43 = vector.shape_cast %42 : vector<1x1x1x488xf32> to vector<1x1x488xf32>
    %44 = vector.extract_strided_slice %0 {offsets = [7, 0], sizes = [1, 488], strides = [1, 1]} : vector<9x488xf32> to vector<1x488xf32>
    %45 = vector.shape_cast %44 : vector<1x488xf32> to vector<1x1x488xf32>
    %46 = arith.mulf %43, %45 : vector<1x1x488xf32>
    %47 = arith.addf %41, %46 : vector<1x1x488xf32>
    %c0_31 = arith.constant 0 : index
    %c2_32 = arith.constant 2 : index
    %c2_33 = arith.constant 2 : index
    %c0_34 = arith.constant 0 : index
    %48 = vector.load %arg1[%c0_31, %c2_32, %c2_33, %c0_34] : memref<1x3x3x488xf32, #tpu.memory_space<vmem>>, vector<1x1x1x488xf32>
    %49 = vector.shape_cast %48 : vector<1x1x1x488xf32> to vector<1x1x488xf32>
    %50 = vector.extract_strided_slice %0 {offsets = [8, 0], sizes = [1, 488], strides = [1, 1]} : vector<9x488xf32> to vector<1x488xf32>
    %51 = vector.shape_cast %50 : vector<1x488xf32> to vector<1x1x488xf32>
    %52 = arith.mulf %49, %51 : vector<1x1x488xf32>
    %53 = arith.addf %47, %52 : vector<1x1x488xf32>
    %c0_35 = arith.constant 0 : index
    %c0_36 = arith.constant 0 : index
    %54 = vector.load %arg3[%c0_35, %c0_36] : memref<1x488xf32, #tpu.memory_space<vmem>>, vector<1x488xf32>
    %55 = vector.shape_cast %54 : vector<1x488xf32> to vector<1x1x488xf32>
    %56 = arith.mulf %53, %55 : vector<1x1x488xf32>
    %c0_37 = arith.constant 0 : index
    %c0_38 = arith.constant 0 : index
    %57 = vector.load %arg4[%c0_37, %c0_38] : memref<1x488xf32, #tpu.memory_space<vmem>>, vector<1x488xf32>
    %58 = vector.shape_cast %57 : vector<1x488xf32> to vector<1x1x488xf32>
    %59 = arith.addf %56, %58 : vector<1x1x488xf32>
    %c0_39 = arith.constant 0 : index
    %c0_40 = arith.constant 0 : index
    %c0_41 = arith.constant 0 : index
    %c0_42 = arith.constant 0 : index
    %60 = vector.load %arg5[%c0_39, %c0_40, %c0_41, %c0_42] : memref<1x1x1x488xf32, #tpu.memory_space<vmem>>, vector<1x1x1x488xf32>
    %61 = vector.shape_cast %60 : vector<1x1x1x488xf32> to vector<1x1x488xf32>
    %62 = vector.shape_cast %59 : vector<1x1x488xf32> to vector<1x1x1x488xf32>
    tpu.vector_store %arg5[%c0_39, %c0_40, %c0_41, %c0_42], %62 {strides = array<i32>} : memref<1x1x1x488xf32, #tpu.memory_space<vmem>>, vector<1x1x1x488xf32>,
    return
  }
  func.func @transform_0(%arg0: i32) -> (i32, i32, i32, i32) {
    %c0_i32 = arith.constant 0 : i32
    %c0_i32_0 = arith.constant 0 : i32
    %c0_i32_1 = arith.constant 0 : i32
    %c0_i32_2 = arith.constant 0 : i32
    return %arg0, %c0_i32, %c0_i32_0, %c0_i32_1 : i32, i32, i32, i32
  }
  func.func @transform_1(%arg0: i32) -> (i32, i32) {
    %c0_i32 = arith.constant 0 : i32
    %c0_i32_0 = arith.constant 0 : i32
    %c0_i32_1 = arith.constant 0 : i32
    return %c0_i32, %c0_i32_0 : i32, i32
  }
  func.func @transform_2(%arg0: i32) -> (i32, i32) {
    %c0_i32 = arith.constant 0 : i32
    %c0_i32_0 = arith.constant 0 : i32
    %c0_i32_1 = arith.constant 0 : i32
    return %c0_i32, %c0_i32_0 : i32, i32
  }
  func.func @transform_3(%arg0: i32) -> (i32, i32) {
    %c0_i32 = arith.constant 0 : i32
    %c0_i32_0 = arith.constant 0 : i32
    %c0_i32_1 = arith.constant 0 : i32
    return %c0_i32, %c0_i32_0 : i32, i32
  }
  func.func @transform_4(%arg0: i32) -> (i32, i32, i32, i32) {
    %c0_i32 = arith.constant 0 : i32
    %c0_i32_0 = arith.constant 0 : i32
    %c0_i32_1 = arith.constant 0 : i32
    %c0_i32_2 = arith.constant 0 : i32
    return %arg0, %c0_i32, %c0_i32_0, %c0_i32_1 : i32, i32, i32, i32
  }
}

module attributes {stable_mosaic.version = 11 : i64} {
  func.func @_matmul_bn_kernel(%arg0: i32, %arg1: i32, %arg2: i32, %arg3: memref<16x512xbf16, #tpu.memory_space<vmem>>, %arg4: memref<512x256xbf16, #tpu.memory_space<vmem>>, %arg5: memref<1x256xf32, #tpu.memory_space<vmem>>, %arg6: memref<1x256xf32, #tpu.memory_space<vmem>>, %arg7: memref<16x256xf32, #tpu.memory_space<vmem>>, %arg8: memref<16x256xf32, #tpu.memory_space<vmem>>) attributes {dimension_semantics = [#tpu.dimension_semantics<parallel>, #tpu.dimension_semantics<parallel>, #tpu.dimension_semantics<arbitrary>], iteration_bounds = array<i64: 1, 8, 18>, scalar_prefetch = 0 : i64, scratch_operands = 1 : i64, tpu.core_type = #tpu.core_type<tc>, window_params = [{transform_indices = @transform_0, window_bounds = array<i64: 16, 512>}, {transform_indices = @transform_1, window_bounds = array<i64: 512, 256>}, {transform_indices = @transform_2, window_bounds = array<i64: 1, 256>}, {transform_indices = @transform_3, window_bounds = array<i64: 1, 256>}, {transform_indices = @transform_4, window_bounds = array<i64: 16, 256>}]} {
    %c0_i32 = arith.constant 0 : i32
    %0 = arith.cmpi eq, %arg2, %c0_i32 : i32
    %1 = arith.extui %0 : i1 to i32
    %c0_i32_0 = arith.constant 0 : i32
    %2 = arith.cmpi ne, %1, %c0_i32_0 : i32
    scf.if %2 {
      %cst_9 = arith.constant 0.000000e+00 : f32
      %12 = vector.broadcast %cst_9 : f32 to vector<16x256xf32>
      %c0_10 = arith.constant 0 : index
      %c0_11 = arith.constant 0 : index
      %13 = vector.load %arg8[%c0_10, %c0_11] : memref<16x256xf32, #tpu.memory_space<vmem>>, vector<16x256xf32>
      tpu.vector_store %arg8[%c0_10, %c0_11], %12 {strides = array<i32>} : memref<16x256xf32, #tpu.memory_space<vmem>>, vector<16x256xf32>,
    } else {
    }
    %c0 = arith.constant 0 : index
    %c0_1 = arith.constant 0 : index
    %3 = vector.load %arg8[%c0, %c0_1] : memref<16x256xf32, #tpu.memory_space<vmem>>, vector<16x256xf32>
    %c0_2 = arith.constant 0 : index
    %c0_3 = arith.constant 0 : index
    %4 = vector.load %arg3[%c0_2, %c0_3] : memref<16x512xbf16, #tpu.memory_space<vmem>>, vector<16x512xbf16>
    %c0_4 = arith.constant 0 : index
    %c0_5 = arith.constant 0 : index
    %5 = vector.load %arg4[%c0_4, %c0_5] : memref<512x256xbf16, #tpu.memory_space<vmem>>, vector<512x256xbf16>
    %cst = arith.constant dense<0.000000e+00> : vector<16x256xf32>
    %6 = tpu.matmul %4, %5, %cst {dimension_numbers = #tpu.dot_dimension_numbers<[1], [0], [0], [1], [0, 0, 1, 1], [], []>} : vector<16x512xbf16>, vector<512x256xbf16>, vector<16x256xf32> -> vector<16x256xf32>
    %7 = arith.addf %3, %6 : vector<16x256xf32>
    %c0_6 = arith.constant 0 : index
    %c0_7 = arith.constant 0 : index
    %8 = vector.load %arg8[%c0_6, %c0_7] : memref<16x256xf32, #tpu.memory_space<vmem>>, vector<16x256xf32>
    tpu.vector_store %arg8[%c0_6, %c0_7], %7 {strides = array<i32>} : memref<16x256xf32, #tpu.memory_space<vmem>>, vector<16x256xf32>,
    %c17_i32 = arith.constant 17 : i32
    %9 = arith.cmpi eq, %arg2, %c17_i32 : i32
    %10 = arith.extui %9 : i1 to i32
    %c0_i32_8 = arith.constant 0 : i32
    %11 = arith.cmpi ne, %10, %c0_i32_8 : i32
    scf.if %11 {
      %c0_9 = arith.constant 0 : index
      %c0_10 = arith.constant 0 : index
      %12 = vector.load %arg8[%c0_9, %c0_10] : memref<16x256xf32, #tpu.memory_space<vmem>>, vector<16x256xf32>
      %c0_11 = arith.constant 0 : index
      %c0_12 = arith.constant 0 : index
      %13 = vector.load %arg5[%c0_11, %c0_12] : memref<1x256xf32, #tpu.memory_space<vmem>>, vector<1x256xf32>
      %14 = vector.broadcast %13 : vector<1x256xf32> to vector<16x256xf32>
      %15 = arith.mulf %12, %14 : vector<16x256xf32>
      %c0_13 = arith.constant 0 : index
      %c0_14 = arith.constant 0 : index
      %16 = vector.load %arg6[%c0_13, %c0_14] : memref<1x256xf32, #tpu.memory_space<vmem>>, vector<1x256xf32>
      %17 = vector.broadcast %16 : vector<1x256xf32> to vector<16x256xf32>
      %18 = arith.addf %15, %17 : vector<16x256xf32>
      %cst_15 = arith.constant 0.000000e+00 : f32
      %19 = vector.broadcast %cst_15 : f32 to vector<16x256xf32>
      %20 = arith.maximumf %18, %19 : vector<16x256xf32>
      %c0_16 = arith.constant 0 : index
      %c0_17 = arith.constant 0 : index
      %21 = vector.load %arg7[%c0_16, %c0_17] : memref<16x256xf32, #tpu.memory_space<vmem>>, vector<16x256xf32>
      tpu.vector_store %arg7[%c0_16, %c0_17], %20 {strides = array<i32>} : memref<16x256xf32, #tpu.memory_space<vmem>>, vector<16x256xf32>,
    } else {
    }
    return
  }
  func.func @transform_0(%arg0: i32, %arg1: i32, %arg2: i32) -> (i32, i32) {
    %c0_i32 = arith.constant 0 : i32
    return %arg0, %arg2 : i32, i32
  }
  func.func @transform_1(%arg0: i32, %arg1: i32, %arg2: i32) -> (i32, i32) {
    %c0_i32 = arith.constant 0 : i32
    return %arg2, %arg1 : i32, i32
  }
  func.func @transform_2(%arg0: i32, %arg1: i32, %arg2: i32) -> (i32, i32) {
    %c0_i32 = arith.constant 0 : i32
    %c0_i32_0 = arith.constant 0 : i32
    return %c0_i32, %arg1 : i32, i32
  }
  func.func @transform_3(%arg0: i32, %arg1: i32, %arg2: i32) -> (i32, i32) {
    %c0_i32 = arith.constant 0 : i32
    %c0_i32_0 = arith.constant 0 : i32
    return %c0_i32, %arg1 : i32, i32
  }
  func.func @transform_4(%arg0: i32, %arg1: i32, %arg2: i32) -> (i32, i32) {
    %c0_i32 = arith.constant 0 : i32
    return %arg0, %arg1 : i32, i32
  }
}

module attributes {stable_mosaic.version = 11 : i64} {
  func.func @_matmul_bn_single_k_kernel(%arg0: i32, %arg1: i32, %arg2: memref<16x2048xbf16, #tpu.memory_space<vmem>>, %arg3: memref<2048x256xbf16, #tpu.memory_space<vmem>>, %arg4: memref<1x256xf32, #tpu.memory_space<vmem>>, %arg5: memref<1x256xf32, #tpu.memory_space<vmem>>, %arg6: memref<16x256xf32, #tpu.memory_space<vmem>>) attributes {dimension_semantics = [#tpu.dimension_semantics<parallel>, #tpu.dimension_semantics<parallel>], iteration_bounds = array<i64: 1, 8>, scalar_prefetch = 0 : i64, scratch_operands = 0 : i64, tpu.core_type = #tpu.core_type<tc>, window_params = [{transform_indices = @transform_0, window_bounds = array<i64: 16, 2048>}, {transform_indices = @transform_1, window_bounds = array<i64: 2048, 256>}, {transform_indices = @transform_2, window_bounds = array<i64: 1, 256>}, {transform_indices = @transform_3, window_bounds = array<i64: 1, 256>}, {transform_indices = @transform_4, window_bounds = array<i64: 16, 256>}]} {
    %c0 = arith.constant 0 : index
    %c0_0 = arith.constant 0 : index
    %0 = vector.load %arg2[%c0, %c0_0] : memref<16x2048xbf16, #tpu.memory_space<vmem>>, vector<16x2048xbf16>
    %c0_1 = arith.constant 0 : index
    %c0_2 = arith.constant 0 : index
    %1 = vector.load %arg3[%c0_1, %c0_2] : memref<2048x256xbf16, #tpu.memory_space<vmem>>, vector<2048x256xbf16>
    %cst = arith.constant dense<0.000000e+00> : vector<16x256xf32>
    %2 = tpu.matmul %0, %1, %cst {dimension_numbers = #tpu.dot_dimension_numbers<[1], [0], [0], [1], [0, 0, 1, 1], [], []>} : vector<16x2048xbf16>, vector<2048x256xbf16>, vector<16x256xf32> -> vector<16x256xf32>
    %c0_3 = arith.constant 0 : index
    %c0_4 = arith.constant 0 : index
    %3 = vector.load %arg4[%c0_3, %c0_4] : memref<1x256xf32, #tpu.memory_space<vmem>>, vector<1x256xf32>
    %4 = vector.broadcast %3 : vector<1x256xf32> to vector<16x256xf32>
    %5 = arith.mulf %2, %4 : vector<16x256xf32>
    %c0_5 = arith.constant 0 : index
    %c0_6 = arith.constant 0 : index
    %6 = vector.load %arg5[%c0_5, %c0_6] : memref<1x256xf32, #tpu.memory_space<vmem>>, vector<1x256xf32>
    %7 = vector.broadcast %6 : vector<1x256xf32> to vector<16x256xf32>
    %8 = arith.addf %5, %7 : vector<16x256xf32>
    %cst_7 = arith.constant 0.000000e+00 : f32
    %9 = vector.broadcast %cst_7 : f32 to vector<16x256xf32>
    %10 = arith.maximumf %8, %9 : vector<16x256xf32>
    %c0_8 = arith.constant 0 : index
    %c0_9 = arith.constant 0 : index
    %11 = vector.load %arg6[%c0_8, %c0_9] : memref<16x256xf32, #tpu.memory_space<vmem>>, vector<16x256xf32>
    tpu.vector_store %arg6[%c0_8, %c0_9], %10 {strides = array<i32>} : memref<16x256xf32, #tpu.memory_space<vmem>>, vector<16x256xf32>,
    return
  }
  func.func @transform_0(%arg0: i32, %arg1: i32) -> (i32, i32) {
    %c0_i32 = arith.constant 0 : i32
    %c0_i32_0 = arith.constant 0 : i32
    return %arg0, %c0_i32 : i32, i32
  }
  func.func @transform_1(%arg0: i32, %arg1: i32) -> (i32, i32) {
    %c0_i32 = arith.constant 0 : i32
    %c0_i32_0 = arith.constant 0 : i32
    return %c0_i32, %arg1 : i32, i32
  }
  func.func @transform_2(%arg0: i32, %arg1: i32) -> (i32, i32) {
    %c0_i32 = arith.constant 0 : i32
    %c0_i32_0 = arith.constant 0 : i32
    return %c0_i32, %arg1 : i32, i32
  }
  func.func @transform_3(%arg0: i32, %arg1: i32) -> (i32, i32) {
    %c0_i32 = arith.constant 0 : i32
    %c0_i32_0 = arith.constant 0 : i32
    return %c0_i32, %arg1 : i32, i32
  }
  func.func @transform_4(%arg0: i32, %arg1: i32) -> (i32, i32) {
    %c0_i32 = arith.constant 0 : i32
    return %arg0, %arg1 : i32, i32
  }
}

module attributes {stable_mosaic.version = 11 : i64} {
  func.func @_matmul_bn_single_k_kernel(%arg0: i32, %arg1: i32, %arg2: memref<16x2048xbf16, #tpu.memory_space<vmem>>, %arg3: memref<2048x128xbf16, #tpu.memory_space<vmem>>, %arg4: memref<1x128xf32, #tpu.memory_space<vmem>>, %arg5: memref<1x128xf32, #tpu.memory_space<vmem>>, %arg6: memref<16x128xf32, #tpu.memory_space<vmem>>) attributes {dimension_semantics = [#tpu.dimension_semantics<parallel>, #tpu.dimension_semantics<parallel>], iteration_bounds = array<i64: 1, 1>, scalar_prefetch = 0 : i64, scratch_operands = 0 : i64, tpu.core_type = #tpu.core_type<tc>, window_params = [{transform_indices = @transform_0, window_bounds = array<i64: 16, 2048>}, {transform_indices = @transform_1, window_bounds = array<i64: 2048, 128>}, {transform_indices = @transform_2, window_bounds = array<i64: 1, 128>}, {transform_indices = @transform_3, window_bounds = array<i64: 1, 128>}, {transform_indices = @transform_4, window_bounds = array<i64: 16, 128>}]} {
    %c0 = arith.constant 0 : index
    %c0_0 = arith.constant 0 : index
    %0 = vector.load %arg2[%c0, %c0_0] : memref<16x2048xbf16, #tpu.memory_space<vmem>>, vector<16x2048xbf16>
    %c0_1 = arith.constant 0 : index
    %c0_2 = arith.constant 0 : index
    %1 = vector.load %arg3[%c0_1, %c0_2] : memref<2048x128xbf16, #tpu.memory_space<vmem>>, vector<2048x128xbf16>
    %cst = arith.constant dense<0.000000e+00> : vector<16x128xf32>
    %2 = tpu.matmul %0, %1, %cst {dimension_numbers = #tpu.dot_dimension_numbers<[1], [0], [0], [1], [0, 0, 1, 1], [], []>} : vector<16x2048xbf16>, vector<2048x128xbf16>, vector<16x128xf32> -> vector<16x128xf32>
    %c0_3 = arith.constant 0 : index
    %c0_4 = arith.constant 0 : index
    %3 = vector.load %arg4[%c0_3, %c0_4] : memref<1x128xf32, #tpu.memory_space<vmem>>, vector<1x128xf32>
    %4 = vector.broadcast %3 : vector<1x128xf32> to vector<16x128xf32>
    %5 = arith.mulf %2, %4 : vector<16x128xf32>
    %c0_5 = arith.constant 0 : index
    %c0_6 = arith.constant 0 : index
    %6 = vector.load %arg5[%c0_5, %c0_6] : memref<1x128xf32, #tpu.memory_space<vmem>>, vector<1x128xf32>
    %7 = vector.broadcast %6 : vector<1x128xf32> to vector<16x128xf32>
    %8 = arith.addf %5, %7 : vector<16x128xf32>
    %c0_7 = arith.constant 0 : index
    %c0_8 = arith.constant 0 : index
    %9 = vector.load %arg6[%c0_7, %c0_8] : memref<16x128xf32, #tpu.memory_space<vmem>>, vector<16x128xf32>
    tpu.vector_store %arg6[%c0_7, %c0_8], %8 {strides = array<i32>} : memref<16x128xf32, #tpu.memory_space<vmem>>, vector<16x128xf32>,
    return
  }
  func.func @transform_0(%arg0: i32, %arg1: i32) -> (i32, i32) {
    %c0_i32 = arith.constant 0 : i32
    %c0_i32_0 = arith.constant 0 : i32
    return %arg0, %c0_i32 : i32, i32
  }
  func.func @transform_1(%arg0: i32, %arg1: i32) -> (i32, i32) {
    %c0_i32 = arith.constant 0 : i32
    %c0_i32_0 = arith.constant 0 : i32
    return %c0_i32, %arg1 : i32, i32
  }
  func.func @transform_2(%arg0: i32, %arg1: i32) -> (i32, i32) {
    %c0_i32 = arith.constant 0 : i32
    %c0_i32_0 = arith.constant 0 : i32
    return %c0_i32, %arg1 : i32, i32
  }
  func.func @transform_3(%arg0: i32, %arg1: i32) -> (i32, i32) {
    %c0_i32 = arith.constant 0 : i32
    %c0_i32_0 = arith.constant 0 : i32
    return %c0_i32, %arg1 : i32, i32
  }
  func.func @transform_4(%arg0: i32, %arg1: i32) -> (i32, i32) {
    %c0_i32 = arith.constant 0 : i32
    return %arg0, %arg1 : i32, i32
  }
}

</mosaic_0001>

<bundles_post_ra>
// kernel: shufflenet2_forward.77
= control target key start
LH: loop header
LB: loop body
LE: loop exit
PB: predicated region body
PF: predicated region fallthrough
CT: control target
= control target key end

     0   :  { %s1028_s15 = smov 0   ;;  %s1030_s16 = smov 0   ;;  %s1213_s0 = inlined_call_operand.vmem [shape: bf16[512,32], index: 0, kind: input, shape index: {}]   ;;  %s1214_s1 = inlined_call_operand.vmem [shape: bf16[32,128], index: 1, kind: input, shape index: {}]   ;;  %s1215_s2 = inlined_call_operand.vmem [shape: f32[1,128], index: 2, kind: input, shape index: {}]   ;;  %s1216_s3 = inlined_call_operand.vmem [shape: f32[1,128], index: 3, kind: input, shape index: {}]   ;;  %s1217_s4 = inlined_call_operand.vmem [shape: f32[512,128], index: 4, kind: output, shape index: {}]  }
   0x1   :  { %s1032_s17 = smov 0  }
   0x2 LB: > { %s26_s18 = sadd.s32 1, %s997_s16  ;;  %p836_p0 = scmp.ge.s32.totalorder %s1001_s17, 1  ;;  %s1001_s17 = sphi %s1032_s17, %s14_s17   ;;  %s997_s16 = sphi %s1030_s16, %s1219_s16   ;;  %s993_s15 = sphi %s1028_s15, %s1218_s15  }
   0x3   : > { %p28_p1 = scmp.ge.s32.totalorder %s26_s18, 2  ;;  %p202_p2 = scmp.lt.s32.totalorder %s1001_s17, 3 }
   0x5   : > { %s1221_s18 = smov (%p28_p1, %s26_s18), 0  ;;  %p203_p3 = pnand %p836_p0, %p202_p2 }
   0x6   : > { %s837_s21 = sshll.u32 (!%p203_p3), %s993_s15, 5 }
   0x7   : > { %206 = sbr.rel (%p203_p3) target bundleno = 249 (0xf9), region = 36  ;;  %p242_p4 = scmp.lt.s32.totalorder (!%p203_p3), %s837_s21, 63 }
   0xc   : > { %v961_v0 = vld [vmem:[%s1214_s1 + $0x8] sm:$0xff]   ;;  %v962_v1 = vld [vmem:[%s1214_s1] sm:$0xff]   ;;  %s1223_s21 = smov (!%p242_p4, %s837_s21), 63  ;;  %vm395_vm0 = vcmask 261120  }
   0xd   : > { %897 = vmatprep.subr.bf16.mxu0 %v961_v0  ;;  %933 = vmatprep.subr.bf16.mxu1 %v961_v0  ;;  %s838_s24 = sshll.u32 %s1223_s21, 2  ;;  %v1095_v18 = vld [vmem:[%s1215_s2] ss:$0 sm:$0xff]  ;;  %s840_s30 = sshll.u32 %s1223_s21, 3 }
   0xe   : > { %898 = vmatpush3.bf16.msra.mxu0 %v961_v0  ;;  %935 = vmatpush3.bf16.msra.mxu1 %v961_v0  ;;  %s1058_s27 = scalar_lea.vmem %s1213_s0, %s838_s24  ;;  %v1101_v20 = vld [vmem:[%s1216_s3] ss:$0 sm:$0xff]  ;;  %s1107_s9 = scalar_lea.vmem %s1217_s4, %s840_s30 }
   0xf   : > { %899 = vmatprep.subr.bf16.mxu0 %v962_v1  ;;  %934 = vmatprep.subr.bf16.mxu1 %v962_v1  ;;  %v963_v2 = vld [vmem:[%s1058_s27] sm:$0xff]   ;;  %v965_v4 = vld [vmem:[%s1058_s27 + $0x8] sm:$0xff]   ;;  %v967_v6 = vld [vmem:[%s1058_s27 + $0x10] sm:$0xff]  }
  0x10   : > { %v964_v3 = vld [vmem:[%s1058_s27 + $0x40] sm:$0xff]   ;;  %901 = vmatprep.mubr.msk.bf16.mxu0 %vm395_vm0, %v963_v2  ;;  %v966_v5 = vld [vmem:[%s1058_s27 + $0x48] sm:$0xff]   ;;  %v968_v7 = vld [vmem:[%s1058_s27 + $0x50] sm:$0xff]  }
  0x11   : > { %917 = vmatprep.mubr.msk.bf16.mxu1 %vm395_vm0, %v964_v3  ;;  %v969_v8 = vld [vmem:[%s1058_s27 + $0x18] sm:$0xff]   ;;  %v971_v10 = vld [vmem:[%s1058_s27 + $0x20] sm:$0xff]   ;;  %v973_v12 = vld [vmem:[%s1058_s27 + $0x28] sm:$0xff]  }
  0x12   : > { %900 = vmatpush3.bf16.msra.mxu0 %v962_v1  ;;  %936 = vmatpush3.bf16.msra.mxu1 %v962_v1  ;;  %v970_v9 = vld [vmem:[%s1058_s27 + $0x58] sm:$0xff]   ;;  %v972_v11 = vld [vmem:[%s1058_s27 + $0x60] sm:$0xff]   ;;  %v974_v13 = vld [vmem:[%s1058_s27 + $0x68] sm:$0xff]  }
  0x13   : > { %v975_v14 = vld [vmem:[%s1058_s27 + $0x30] sm:$0xff]   ;;  %v977_v16 = vld [vmem:[%s1058_s27 + $0x38] sm:$0xff]  }
  0x14   : > { %v976_v15 = vld [vmem:[%s1058_s27 + $0x70] sm:$0xff]   ;;  %v978_v17 = vld [vmem:[%s1058_s27 + $0x78] sm:$0xff]  }
  0x15   : > { %902 = vmatmul.mubr.msk.bf16.vlgmr.msra.gmra.mxu0 %vm395_vm0, %v965_v4  ;;  %918 = vmatmul.mubr.msk.bf16.vlgmr.msra.gmra.mxu1 %vm395_vm0, %v966_v5 }
  0x16   : > { %905 = vmatprep.mubr.msk.bf16.mxu0 %vm395_vm0, %v967_v6  ;;  %921 = vmatprep.mubr.msk.bf16.mxu1 %vm395_vm0, %v968_v7 }
  0x1d   : > { %906 = vmatmul.mubr.msk.bf16.gmra.mxu0 %vm395_vm0, %v969_v8  ;;  %922 = vmatmul.mubr.msk.bf16.gmra.mxu1 %vm395_vm0, %v970_v9 }
  0x1e   : > { %909 = vmatprep.mubr.msk.bf16.mxu0 %vm395_vm0, %v971_v10  ;;  %925 = vmatprep.mubr.msk.bf16.mxu1 %vm395_vm0, %v972_v11 }
  0x25   : > { %910 = vmatmul.mubr.msk.bf16.gmra.mxu0 %vm395_vm0, %v973_v12  ;;  %926 = vmatmul.mubr.msk.bf16.gmra.mxu1 %vm395_vm0, %v974_v13 }
  0x26   : > { %913 = vmatprep.mubr.msk.bf16.mxu0 %vm395_vm0, %v975_v14  ;;  %929 = vmatprep.mubr.msk.bf16.mxu1 %vm395_vm0, %v976_v15 }
  0x2d   : > { %914 = vmatmul.mubr.msk.bf16.gmra.mxu0 %vm395_vm0, %v977_v16  ;;  %930 = vmatmul.mubr.msk.bf16.gmra.mxu1 %vm395_vm0, %v978_v17 }
  0xd5   : > { %v903_v19 = vpop.f32.mrf.mxu0  ;;  %v919_v22 = vpop.f32.mrf.mxu1 }
  0xd6   : > { %v614_v21 = vmul.f32 %v903_v19, %v1095_v18  ;;  %v630_v23 = vmul.f32 %v919_v22, %v1095_v18 }
  0xd7   : > { %v478_v24 = vpop.f32.mrf.mxu0  ;;  %v542_v27 = vpop.f32.mrf.mxu1 }
  0xd8   : > { %v653_v25 = vadd.f32 %v1101_v20, %v614_v21  ;;  %v612_v26 = vmul.f32 %v1095_v18, %v478_v24  ;;  %v669_v28 = vadd.f32 %v1101_v20, %v630_v23  ;;  %v628_v29 = vmul.f32 %v1095_v18, %v542_v27 }
  0xd9   : > { %v904_v30 = vpop.f32.mrf.mxu0  ;;  %v920_v33 = vpop.f32.mrf.mxu1 }
  0xda   : > { %685 = vst [vmem:[%s1107_s9 + $0x10] sm:$0xff] %v653_v25  ;;  %v651_v31 = vadd.f32 %v1101_v20, %v612_v26  ;;  %v615_v32 = vmul.f32 %v904_v30, %v1095_v18  ;;  %701 = vst [vmem:[%s1107_s9 + $0x90] sm:$0xff] %v669_v28  ;;  %v667_v34 = vadd.f32 %v1101_v20, %v628_v29 }
  0xdb   : > { %v631_v35 = vmul.f32 %v920_v33, %v1095_v18  ;;  %v481_v36 = vpop.f32.mrf.mxu0  ;;  %v545_v39 = vpop.f32.mrf.mxu1 }
  0xdc   : > { %683 = vst [vmem:[%s1107_s9] sm:$0xff] %v651_v31  ;;  %v654_v37 = vadd.f32 %v1101_v20, %v615_v32  ;;  %v613_v38 = vmul.f32 %v1095_v18, %v481_v36  ;;  %699 = vst [vmem:[%s1107_s9 + $0x80] sm:$0xff] %v667_v34  ;;  %v629_v41 = vmul.f32 %v1095_v18, %v545_v39 }
  0xdd   : > { %v670_v40 = vadd.f32 %v1101_v20, %v631_v35  ;;  %v907_v42 = vpop.f32.mrf.mxu0  ;;  %v923_v45 = vpop.f32.mrf.mxu1 }
  0xde   : > { %686 = vst [vmem:[%s1107_s9 + $0x18] sm:$0xff] %v654_v37  ;;  %v652_v43 = vadd.f32 %v1101_v20, %v613_v38  ;;  %v618_v44 = vmul.f32 %v907_v42, %v1095_v18  ;;  %v668_v46 = vadd.f32 %v1101_v20, %v629_v41  ;;  %v634_v47 = vmul.f32 %v923_v45, %v1095_v18 }
  0xdf   : > { %702 = vst [vmem:[%s1107_s9 + $0x98] sm:$0xff] %v670_v40  ;;  %v494_v48 = vpop.f32.mrf.mxu0  ;;  %v558_v51 = vpop.f32.mrf.mxu1 }
  0xe0   : > { %684 = vst [vmem:[%s1107_s9 + $0x8] sm:$0xff] %v652_v43  ;;  %v657_v49 = vadd.f32 %v1101_v20, %v618_v44  ;;  %v616_v50 = vmul.f32 %v1095_v18, %v494_v48  ;;  %700 = vst [vmem:[%s1107_s9 + $0x88] sm:$0xff] %v668_v46  ;;  %v673_v52 = vadd.f32 %v1101_v20, %v634_v47 }
  0xe1   : > { %v632_v53 = vmul.f32 %v1095_v18, %v558_v51  ;;  %v908_v54 = vpop.f32.mrf.mxu0  ;;  %v924_v57 = vpop.f32.mrf.mxu1 }
  0xe2   : > { %689 = vst [vmem:[%s1107_s9 + $0x30] sm:$0xff] %v657_v49  ;;  %v655_v55 = vadd.f32 %v1101_v20, %v616_v50  ;;  %v619_v56 = vmul.f32 %v908_v54, %v1095_v18  ;;  %705 = vst [vmem:[%s1107_s9 + $0xb0] sm:$0xff] %v673_v52  ;;  %v635_v59 = vmul.f32 %v924_v57, %v1095_v18 }
  0xe3   : > { %v671_v58 = vadd.f32 %v1101_v20, %v632_v53  ;;  %v497_v60 = vpop.f32.mrf.mxu0  ;;  %v561_v63 = vpop.f32.mrf.mxu1 }
  0xe4   : > { %687 = vst [vmem:[%s1107_s9 + $0x20] sm:$0xff] %v655_v55  ;;  %v658_v61 = vadd.f32 %v1101_v20, %v619_v56  ;;  %v617_v62 = vmul.f32 %v1095_v18, %v497_v60  ;;  %v674_v0 = vadd.f32 %v1101_v20, %v635_v59  ;;  %v633_v1 = vmul.f32 %v1095_v18, %v561_v63 }
  0xe5   : > { %703 = vst [vmem:[%s1107_s9 + $0xa0] sm:$0xff] %v671_v58  ;;  %v911_v2 = vpop.f32.mrf.mxu0  ;;  %v927_v5 = vpop.f32.mrf.mxu1 }
  0xe6   : > { %690 = vst [vmem:[%s1107_s9 + $0x38] sm:$0xff] %v658_v61  ;;  %v656_v3 = vadd.f32 %v1101_v20, %v617_v62  ;;  %v622_v4 = vmul.f32 %v911_v2, %v1095_v18  ;;  %706 = vst [vmem:[%s1107_s9 + $0xb8] sm:$0xff] %v674_v0  ;;  %v672_v6 = vadd.f32 %v1101_v20, %v633_v1 }
  0xe7   : > { %v638_v7 = vmul.f32 %v927_v5, %v1095_v18  ;;  %v510_v8 = vpop.f32.mrf.mxu0  ;;  %v574_v11 = vpop.f32.mrf.mxu1 }
  0xe8   : > { %688 = vst [vmem:[%s1107_s9 + $0x28] sm:$0xff] %v656_v3  ;;  %v661_v9 = vadd.f32 %v1101_v20, %v622_v4  ;;  %v620_v10 = vmul.f32 %v1095_v18, %v510_v8  ;;  %704 = vst [vmem:[%s1107_s9 + $0xa8] sm:$0xff] %v672_v6  ;;  %v636_v13 = vmul.f32 %v1095_v18, %v574_v11 }
  0xe9   : > { %v677_v12 = vadd.f32 %v1101_v20, %v638_v7  ;;  %v912_v14 = vpop.f32.mrf.mxu0  ;;  %v928_v17 = vpop.f32.mrf.mxu1 }
  0xea   : > { %693 = vst [vmem:[%s1107_s9 + $0x50] sm:$0xff] %v661_v9  ;;  %v659_v15 = vadd.f32 %v1101_v20, %v620_v10  ;;  %v623_v16 = vmul.f32 %v912_v14, %v1095_v18  ;;  %v675_v19 = vadd.f32 %v1101_v20, %v636_v13  ;;  %v639_v21 = vmul.f32 %v928_v17, %v1095_v18 }
  0xeb   : > { %709 = vst [vmem:[%s1107_s9 + $0xd0] sm:$0xff] %v677_v12  ;;  %v513_v22 = vpop.f32.mrf.mxu0  ;;  %v577_v25 = vpop.f32.mrf.mxu1 }
  0xec   : > { %691 = vst [vmem:[%s1107_s9 + $0x40] sm:$0xff] %v659_v15  ;;  %v662_v23 = vadd.f32 %v1101_v20, %v623_v16  ;;  %v621_v24 = vmul.f32 %v1095_v18, %v513_v22  ;;  %707 = vst [vmem:[%s1107_s9 + $0xc0] sm:$0xff] %v675_v19  ;;  %v678_v26 = vadd.f32 %v1101_v20, %v639_v21 }
  0xed   : > { %v637_v27 = vmul.f32 %v1095_v18, %v577_v25  ;;  %v915_v28 = vpop.f32.mrf.mxu0  ;;  %v931_v31 = vpop.f32.mrf.mxu1 }
  0xee   : > { %694 = vst [vmem:[%s1107_s9 + $0x58] sm:$0xff] %v662_v23  ;;  %v660_v29 = vadd.f32 %v1101_v20, %v621_v24  ;;  %v626_v30 = vmul.f32 %v915_v28, %v1095_v18  ;;  %710 = vst [vmem:[%s1107_s9 + $0xd8] sm:$0xff] %v678_v26  ;;  %v642_v33 = vmul.f32 %v931_v31, %v1095_v18 }
  0xef   : > { %v676_v32 = vadd.f32 %v1101_v20, %v637_v27  ;;  %v526_v34 = vpop.f32.mrf.mxu0  ;;  %v590_v37 = vpop.f32.mrf.mxu1 }
  0xf0   : > { %692 = vst [vmem:[%s1107_s9 + $0x48] sm:$0xff] %v660_v29  ;;  %v665_v35 = vadd.f32 %v1101_v20, %v626_v30  ;;  %v624_v36 = vmul.f32 %v1095_v18, %v526_v34  ;;  %v681_v38 = vadd.f32 %v1101_v20, %v642_v33  ;;  %v640_v39 = vmul.f32 %v1095_v18, %v590_v37 }
  0xf1   : > { %708 = vst [vmem:[%s1107_s9 + $0xc8] sm:$0xff] %v676_v32  ;;  %v916_v40 = vpop.f32.mrf.mxu0  ;;  %v932_v43 = vpop.f32.mrf.mxu1 }
  0xf2   : > { %697 = vst [vmem:[%s1107_s9 + $0x70] sm:$0xff] %v665_v35  ;;  %v663_v41 = vadd.f32 %v1101_v20, %v624_v36  ;;  %v627_v42 = vmul.f32 %v916_v40, %v1095_v18  ;;  %713 = vst [vmem:[%s1107_s9 + $0xf0] sm:$0xff] %v681_v38  ;;  %v679_v44 = vadd.f32 %v1101_v20, %v640_v39 }
  0xf3   : > { %v643_v45 = vmul.f32 %v932_v43, %v1095_v18  ;;  %v529_v46 = vpop.f32.mrf.mxu0  ;;  %v593_v49 = vpop.f32.mrf.mxu1 }
  0xf4   : > { %695 = vst [vmem:[%s1107_s9 + $0x60] sm:$0xff] %v663_v41  ;;  %v666_v47 = vadd.f32 %v1101_v20, %v627_v42  ;;  %v625_v48 = vmul.f32 %v1095_v18, %v529_v46  ;;  %711 = vst [vmem:[%s1107_s9 + $0xe0] sm:$0xff] %v679_v44  ;;  %v641_v51 = vmul.f32 %v1095_v18, %v593_v49 }
  0xf5   : > { %v682_v50 = vadd.f32 %v1101_v20, %v643_v45 }
  0xf6   : > { %698 = vst [vmem:[%s1107_s9 + $0x78] sm:$0xff] %v666_v47  ;;  %v664_v52 = vadd.f32 %v1101_v20, %v625_v48  ;;  %v680_v53 = vadd.f32 %v1101_v20, %v641_v51 }
  0xf7   : > { %714 = vst [vmem:[%s1107_s9 + $0xf8] sm:$0xff] %v682_v50 }
  0xf8   : > { %696 = vst [vmem:[%s1107_s9 + $0x68] sm:$0xff] %v664_v52  ;;  %712 = vst [vmem:[%s1107_s9 + $0xe8] sm:$0xff] %v680_v53 }
  0xf9 PF: > { %s14_s17 = sadd.s32 1, %s1001_s17   ;;  %s1218_s15 = smov %s997_s16 }
  0xfa   : > { %p11_p5 = scmp.ge.s32.totalorder %s14_s17, 4   ;;  %s1219_s16 = smov %s1221_s18 }
  0xfc   :  { %13 = sbr.rel (!%p11_p5) target bundleno = 2 (0x2), region = 75 }

// kernel: shufflenet2_forward.78
= control target key start
LH: loop header
LB: loop body
LE: loop exit
PB: predicated region body
PF: predicated region fallthrough
CT: control target
= control target key end

     0   :  { %s576_s15 = smov 0   ;;  %s723_s0 = inlined_call_operand.vmem [shape: f32[2,9,9,24], index: 0, kind: input, shape index: {}]   ;;  %s724_s1 = inlined_call_operand.vmem [shape: f32[2,9,9,24], index: 1, kind: input, shape index: {}]   ;;  %s725_s2 = inlined_call_operand.vmem [shape: f32[2,9,9,24], index: 2, kind: input, shape index: {}]   ;;  %s726_s3 = inlined_call_operand.vmem [shape: f32[2,9,9,24], index: 3, kind: input, shape index: {}]   ;;  %s727_s4 = inlined_call_operand.vmem [shape: f32[2,8,8,24], index: 4, kind: output, shape index: {}]  }
   0x1 LB: > { %s496_s16 = sadd.s32 4294967295, %s549_s15   ;;  %p500_p0 = scmp.ge.s32.totalorder %s549_s15, 1  ;;  %s549_s15 = sphi %s576_s15, %s14_s15  }
   0x2   : > { %p192_p1 = scmp.lt.s32.totalorder %s549_s15, 3 }
   0x4   : > { %p193_p2 = pnand %p500_p0, %p192_p1 }
   0x5   : > { %p233_p3 = scmp.lt.s32.totalorder (!%p193_p2), %s496_s16, 1 }
   0x6   : > { %196 = sbr.rel (%p193_p2) target bundleno = 50 (0x32), region = 36 }
   0xb   : > { %s729_s16 = smov (!%p233_p3, %s496_s16), 1  ;;  %vm396_vm0 = vcmask 195584  }
   0xc   : > { %s534_s17 = smul.u32 144, %s729_s16  ;;  %s533_s30 = sshll.u32 %s729_s16, 6 }
   0xd   : > { %s677_s7 = scalar_lea.vmem %s727_s4, %s533_s30 }
   0xe   : > { %s590_s20 = scalar_lea.vmem %s723_s0, %s534_s17  ;;  %s595_s23 = scalar_lea.vmem %s724_s1, %s534_s17 }
   0xf   : > { %s600_s26 = scalar_lea.vmem %s725_s2, %s534_s17  ;;  %s605_s29 = scalar_lea.vmem %s726_s3, %s534_s17  ;;  %v258_v0 = vld [vmem:[%s590_s20] sm:$0xff]  ;;  %v507_v5 = vld [vmem:[%s590_s20 + $0x10] sm:$0xff] }
  0x10   : > { %v266_v1 = vld [vmem:[%s595_s23] sm:$0xff]  ;;  %v613_v6 = vld [vmem:[%s595_s23 + $0x10] sm:$0xff] }
  0x11   : > { %v282_v2 = vld [vmem:[%s590_s20 + $0x1] sm:$0xff]  ;;  %v274_v3 = vmax.f32 %v258_v0, %v266_v1  ;;  %v616_v7 = vld [vmem:[%s590_s20 + $0x11] sm:$0xff]  ;;  %v275_v10 = vmax.f32 %v507_v5, %v613_v6 }
  0x12   : > { %v298_v4 = vld [vmem:[%s600_s26] sm:$0xff]  ;;  %v299_v11 = vld [vmem:[%s600_s26 + $0x10] sm:$0xff] }
  0x13   : > { %v290_v8 = vmax.f32 %v274_v3, %v282_v2  ;;  %v314_v9 = vld [vmem:[%s605_s29] sm:$0xff]  ;;  %v291_v17 = vmax.f32 %v275_v10, %v616_v7  ;;  %v315_v18 = vld [vmem:[%s605_s29 + $0x10] sm:$0xff] }
  0x14   : > { %v508_v12 = vld [vmem:[%s590_s20 + $0x20] sm:$0xff]  ;;  %v509_v21 = vld [vmem:[%s590_s20 + $0x30] sm:$0xff] }
  0x15   : > { %v623_v13 = vld [vmem:[%s595_s23 + $0x20] sm:$0xff]  ;;  %v306_v15 = vmax.f32 %v290_v8, %v298_v4  ;;  %v635_v22 = vld [vmem:[%s595_s23 + $0x30] sm:$0xff]  ;;  %v307_v25 = vmax.f32 %v291_v17, %v299_v11 }
  0x16   : > { %v626_v14 = vld [vmem:[%s590_s20 + $0x21] sm:$0xff]  ;;  %v276_v19 = vmax.f32 %v508_v12, %v623_v13  ;;  %v638_v23 = vld [vmem:[%s590_s20 + $0x31] sm:$0xff]  ;;  %v277_v29 = vmax.f32 %v509_v21, %v635_v22 }
  0x17   : > { %v330_v16 = vld [vmem:[%s600_s26 + $0x1] sm:$0xff]  ;;  %v322_v24 = vmax.f32 %v306_v15, %v314_v9  ;;  %v331_v26 = vld [vmem:[%s600_s26 + $0x11] sm:$0xff]  ;;  %v323_v34 = vmax.f32 %v307_v25, %v315_v18 }
  0x18   : > { %v300_v20 = vld [vmem:[%s600_s26 + $0x20] sm:$0xff]  ;;  %v292_v27 = vmax.f32 %v276_v19, %v626_v14  ;;  %v301_v30 = vld [vmem:[%s600_s26 + $0x30] sm:$0xff]  ;;  %v293_v37 = vmax.f32 %v277_v29, %v638_v23 }
  0x19   : > { %v316_v28 = vld [vmem:[%s605_s29 + $0x20] sm:$0xff]  ;;  %v338_v33 = vmax.f32 %v322_v24, %v330_v16  ;;  %v317_v39 = vld [vmem:[%s605_s29 + $0x30] sm:$0xff]  ;;  %v339_v44 = vmax.f32 %v323_v34, %v331_v26 }
  0x1a   : > { %v510_v31 = vld [vmem:[%s590_s20 + $0x40] sm:$0xff]  ;;  %v308_v35 = vmax.f32 %v292_v27, %v300_v20  ;;  %v511_v41 = vld [vmem:[%s590_s20 + $0x50] sm:$0xff]  ;;  %v309_v46 = vmax.f32 %v293_v37, %v301_v30 }
  0x1b   : > { %v647_v32 = vld [vmem:[%s595_s23 + $0x40] sm:$0xff]  ;;  %v658_v42 = vld [vmem:[%s595_s23 + $0x50] sm:$0xff]  ;;  %v355_v43 = vmax.f32 %v338_v33, %v507_v5  ;;  %v356_v55 = vmax.f32 %v339_v44, %v508_v12 }
  0x1c   : > { %v332_v36 = vld [vmem:[%s600_s26 + $0x21] sm:$0xff]  ;;  %v278_v40 = vmax.f32 %v510_v31, %v647_v32  ;;  %v324_v45 = vmax.f32 %v308_v35, %v316_v28  ;;  %v527_v48 = vld [vmem:[%s590_s20 + $0x51] sm:$0xff]  ;;  %v279_v51 = vmax.f32 %v511_v41, %v658_v42  ;;  %v325_v57 = vmax.f32 %v309_v46, %v317_v39 }
  0x1d   : > { %v652_v38 = vld [vmem:[%s590_s20 + $0x41] sm:$0xff]  ;;  %v333_v49 = vld [vmem:[%s600_s26 + $0x31] sm:$0xff]  ;;  %v372_v54 = vmax.f32 %v355_v43, %v613_v6  ;;  %v373_v4 = vmax.f32 %v356_v55, %v623_v13 }
  0x1e   : > { %v302_v47 = vld [vmem:[%s600_s26 + $0x40] sm:$0xff]  ;;  %v294_v50 = vmax.f32 %v278_v40, %v652_v38  ;;  %v340_v56 = vmax.f32 %v324_v45, %v332_v36  ;;  %v303_v59 = vld [vmem:[%s600_s26 + $0x50] sm:$0xff]  ;;  %v295_v63 = vmax.f32 %v279_v51, %v527_v48  ;;  %v341_v6 = vmax.f32 %v325_v57, %v333_v49 }
  0x1f   : > { %v512_v52 = vld [vmem:[%s590_s20 + $0x60] sm:$0xff]  ;;  %v513_v1 = vld [vmem:[%s590_s20 + $0x70] sm:$0xff]  ;;  %v388_v3 = vmax.f32 %v372_v54, %v616_v7  ;;  %v389_v7 = vmax.f32 %v373_v4, %v626_v14 }
  0x20   : > { %v668_v53 = vld [vmem:[%s595_s23 + $0x60] sm:$0xff]  ;;  %v310_v61 = vmax.f32 %v294_v50, %v302_v47  ;;  %v521_v2 = vld [vmem:[%s595_s23 + $0x70] sm:$0xff]  ;;  %v357_v5 = vmax.f32 %v340_v56, %v509_v21  ;;  %v311_v12 = vmax.f32 %v295_v63, %v303_v59  ;;  %v358_v13 = vmax.f32 %v341_v6, %v510_v31 }
  0x21   : > { %v318_v58 = vld [vmem:[%s605_s29 + $0x40] sm:$0xff]  ;;  %v280_v0 = vmax.f32 %v512_v52, %v668_v53  ;;  %v319_v8 = vld [vmem:[%s605_s29 + $0x50] sm:$0xff]  ;;  %v281_v16 = vmax.f32 %v513_v1, %v521_v2  ;;  %397 = vst.msk [vmem:[%s677_s7] sm:$0xff] %vm396_vm0, %v388_v3  ;;  %398 = vst.msk [vmem:[%s677_s7 + $0x8] sm:$0xff] %vm396_vm0, %v389_v7 }
  0x22   : > { %v528_v60 = vld [vmem:[%s590_s20 + $0x61] sm:$0xff]  ;;  %v529_v10 = vld [vmem:[%s590_s20 + $0x71] sm:$0xff]  ;;  %v326_v11 = vmax.f32 %v310_v61, %v318_v58  ;;  %v374_v17 = vmax.f32 %v357_v5, %v635_v22  ;;  %v327_v24 = vmax.f32 %v311_v12, %v319_v8  ;;  %v375_v14 = vmax.f32 %v358_v13, %v647_v32 }
  0x23   : > { %v334_v62 = vld [vmem:[%s600_s26 + $0x41] sm:$0xff]  ;;  %v296_v15 = vmax.f32 %v280_v0, %v528_v60  ;;  %v335_v18 = vld [vmem:[%s600_s26 + $0x51] sm:$0xff]  ;;  %v297_v26 = vmax.f32 %v281_v16, %v529_v10 }
  0x24   : > { %v304_v9 = vld [vmem:[%s600_s26 + $0x60] sm:$0xff]  ;;  %v305_v20 = vld [vmem:[%s600_s26 + $0x70] sm:$0xff]  ;;  %v342_v21 = vmax.f32 %v326_v11, %v334_v62  ;;  %v390_v27 = vmax.f32 %v374_v17, %v638_v23  ;;  %v343_v30 = vmax.f32 %v327_v24, %v335_v18  ;;  %v391_v34 = vmax.f32 %v375_v14, %v652_v38 }
  0x25   : > { %v320_v19 = vld [vmem:[%s605_s29 + $0x60] sm:$0xff]  ;;  %v312_v25 = vmax.f32 %v296_v15, %v304_v9  ;;  %v321_v22 = vld [vmem:[%s605_s29 + $0x70] sm:$0xff]  ;;  %v313_v33 = vmax.f32 %v297_v26, %v305_v20 }
  0x26   : > { %v336_v28 = vld [vmem:[%s600_s26 + $0x61] sm:$0xff]  ;;  %v359_v29 = vmax.f32 %v342_v21, %v511_v41  ;;  %399 = vst.msk [vmem:[%s677_s7 + $0x10] sm:$0xff] %vm396_vm0, %v390_v27  ;;  %v337_v35 = vld [vmem:[%s600_s26 + $0x71] sm:$0xff]  ;;  %v360_v23 = vmax.f32 %v343_v30, %v512_v52  ;;  %400 = vst.msk [vmem:[%s677_s7 + $0x18] sm:$0xff] %vm396_vm0, %v391_v34 }
  0x27   : > { %v328_v31 = vmax.f32 %v312_v25, %v320_v19  ;;  %v329_v32 = vmax.f32 %v313_v33, %v321_v22  ;;  %v514_v39 = vld [vmem:[%s590_s20 + $0x80] sm:$0xff] }
  0x28   : > { %v376_v36 = vmax.f32 %v359_v29, %v658_v42  ;;  %v377_v41 = vmax.f32 %v360_v23, %v668_v53  ;;  %v522_v45 = vld [vmem:[%s595_s23 + $0x80] sm:$0xff] }
  0x29   : > { %v344_v37 = vmax.f32 %v328_v31, %v336_v28  ;;  %v345_v44 = vmax.f32 %v329_v32, %v337_v35  ;;  %v530_v47 = vld [vmem:[%s590_s20 + $0x81] sm:$0xff] }
  0x2a   : > { %v392_v40 = vmax.f32 %v376_v36, %v527_v48  ;;  %v393_v38 = vmax.f32 %v377_v41, %v528_v60 }
  0x2b   : > { %v361_v43 = vmax.f32 %v344_v37, %v513_v1  ;;  %v362_v42 = vmax.f32 %v345_v44, %v514_v39 }
  0x2c   : > { %401 = vst.msk [vmem:[%s677_s7 + $0x20] sm:$0xff] %vm396_vm0, %v392_v40  ;;  %402 = vst.msk [vmem:[%s677_s7 + $0x28] sm:$0xff] %vm396_vm0, %v393_v38 }
  0x2d   : > { %v378_v46 = vmax.f32 %v361_v43, %v521_v2  ;;  %v379_v50 = vmax.f32 %v362_v42, %v522_v45 }
  0x2f   : > { %v394_v49 = vmax.f32 %v378_v46, %v529_v10  ;;  %v395_v51 = vmax.f32 %v379_v50, %v530_v47 }
  0x31   : > { %403 = vst.msk [vmem:[%s677_s7 + $0x30] sm:$0xff] %vm396_vm0, %v394_v49  ;;  %404 = vst.msk [vmem:[%s677_s7 + $0x38] sm:$0xff] %vm396_vm0, %v395_v51 }
  0x32 PF: > { %s14_s15 = sadd.s32 1, %s549_s15  }
  0x33   : > { %p11_p4 = scmp.ge.s32.totalorder %s14_s15, 4  }
  0x35   :  { %13 = sbr.rel (!%p11_p4) target bundleno = 1 (0x1), region = 77 }

// kernel: shufflenet2_forward.80
= control target key start
LH: loop header
LB: loop body
LE: loop exit
PB: predicated region body
PF: predicated region fallthrough
CT: control target
= control target key end

     0   :  { %vm48_vm0 = vcmask 261120   ;;  %s217_s1 = inlined_call_operand.vmem [shape: bf16[32,128], index: 1, kind: input, shape index: {}]   ;;  %s218_s0 = inlined_call_operand.vmem [shape: bf16[32,32], index: 0, kind: input, shape index: {}]   ;;  %s219_s2 = inlined_call_operand.vmem [shape: f32[1,128], index: 2, kind: input, shape index: {}]   ;;  %s220_s3 = inlined_call_operand.vmem [shape: f32[1,128], index: 3, kind: input, shape index: {}]   ;;  %s221_s4 = inlined_call_operand.vmem [shape: f32[32,128], index: 4, kind: output, shape index: {}]  }
   0x1   :  { %v158_v0 = vld [vmem:[%s217_s1 + $0x8] sm:$0xff]   ;;  %v159_v1 = vld [vmem:[%s217_s1] sm:$0xff]  }
   0x2   :  { %150 = vmatprep.subr.bf16.mxu0 %v158_v0  ;;  %v160_v2 = vld [vmem:[%s218_s0] sm:$0xff]   ;;  %v161_v3 = vld [vmem:[%s218_s0 + $0x8] sm:$0xff]  }
   0x3   :  { %151 = vmatpush3.bf16.msra.mxu0 %v158_v0  ;;  %154 = vmatprep.mubr.msk.bf16.mxu0 %vm48_vm0, %v160_v2  ;;  %v144_v4 = vld [vmem:[%s219_s2] ss:$0 sm:$0xff] }
   0x4   :  { %152 = vmatprep.subr.bf16.mxu0 %v159_v1  ;;  %v145_v6 = vld [vmem:[%s220_s3] ss:$0 sm:$0xff] }
   0x7   :  { %153 = vmatpush3.bf16.msra.mxu0 %v159_v1 }
   0xa   :  { %155 = vmatmul.mubr.msk.bf16.vlgmr.msra.gmra.mxu0 %vm48_vm0, %v161_v3 }
  0xca   :  { %v156_v5 = vpop.f32.mrf.mxu0 }
  0xcb   :  { %v113_v7 = vmul.f32 %v156_v5, %v144_v4 }
  0xcc   :  { %v89_v8 = vpop.f32.mrf.mxu0 }
  0xcd   :  { %v124_v9 = vadd.f32 %v145_v6, %v113_v7  ;;  %v111_v10 = vmul.f32 %v144_v4, %v89_v8 }
  0xce   :  { %v157_v11 = vpop.f32.mrf.mxu0 }
  0xcf   :  { %v128_v12 = vmax.f32 %v124_v9, 0.0  ;;  %v122_v13 = vadd.f32 %v145_v6, %v111_v10  ;;  %v114_v14 = vmul.f32 %v157_v11, %v144_v4 }
  0xd0   :  { %v92_v15 = vpop.f32.mrf.mxu0 }
  0xd1   :  { %132 = vst [vmem:[%s221_s4 + $0x10] sm:$0xff] %v128_v12  ;;  %v126_v16 = vmax.f32 %v122_v13, 0.0  ;;  %v125_v17 = vadd.f32 %v145_v6, %v114_v14  ;;  %v112_v18 = vmul.f32 %v144_v4, %v92_v15 }
  0xd3   :  { %130 = vst [vmem:[%s221_s4] sm:$0xff] %v126_v16  ;;  %v129_v19 = vmax.f32 %v125_v17, 0.0  ;;  %v123_v20 = vadd.f32 %v145_v6, %v112_v18 }
  0xd5   :  { %133 = vst [vmem:[%s221_s4 + $0x18] sm:$0xff] %v129_v19  ;;  %v127_v21 = vmax.f32 %v123_v20, 0.0 }
  0xd7   :  { %131 = vst [vmem:[%s221_s4 + $0x8] sm:$0xff] %v127_v21 }

// kernel: shufflenet2_forward.79
= control target key start
LH: loop header
LB: loop body
LE: loop exit
PB: predicated region body
PF: predicated region fallthrough
CT: control target
= control target key end

     0   :  { %12 = vsyncpa [#allocation3], 0  ;;  %s981_s0 = inlined_call_operand.vmem [shape: f32[2,5,5,24], index: 0, kind: input, shape index: {}]   ;;  %s982_s1 = inlined_call_operand.vmem [shape: f32[2,5,5,24], index: 1, kind: input, shape index: {}]   ;;  %s983_s2 = inlined_call_operand.vmem [shape: f32[2,5,5,24], index: 2, kind: input, shape index: {}]   ;;  %s984_s3 = inlined_call_operand.vmem [shape: f32[2,5,5,24], index: 3, kind: input, shape index: {}]   ;;  %s985_s4 = inlined_call_operand.vmem [shape: f32[9,24], index: 4, kind: input, shape index: {}]   ;;  %s986_s5 = inlined_call_operand.hbm [shape: f32[1,24], index: 5, kind: input, shape index: {}]   ;;  %s987_s6 = inlined_call_operand.hbm [shape: f32[1,24], index: 6, kind: input, shape index: {}]   ;;  %s988_s7 = inlined_call_operand.vmem [shape: f32[2,4,4,24], index: 7, kind: output, shape index: {}]  }
   0x1   :  { %13 = vsyncpa [#allocation5], 0  ;;  %s822_s24 = smov 0  }
   0x2 LB: > { %s828_s25 = sadd.s32 4294967295, %s778_s24   ;;  %p651_p0 = scmp.ge.s32.totalorder %s778_s24, 1  ;;  %s778_s24 = sphi %s822_s24, %s19_s24  }
   0x3   : > { %p217_p1 = scmp.lt.s32.totalorder %s778_s24, 3  ;;  %p989_p2 = scmp.eq.s32.totalorder %s828_s25, 0 }
   0x4   : > { %s780_s27 = smov [#allocation2]   ;;  %s781_s29 = smov [#allocation4]  }
   0x5   : > { %p833_p3 = pnand %p651_p0, %p217_p1  ;;  %s233_s28 = sshll.u32 %s780_s27, 4  ;;  %s234_s28 = int_to_ptr.vmem [resolvable:$true] %s233_s28 }
   0x6   : > { %s244_s30 = sshll.u32 %s781_s29, 4  ;;  %s723_s9 = scalar_lea.vmem %s234_s28, 16  ;;  %s245_s30 = int_to_ptr.vmem [resolvable:$true] %s244_s30 }
   0x7   : > { %p691_p4 = pneg %p833_p3  ;;  %p724_p7 = scmp.ne.s32.totalorder %s234_s28, %s723_s9 }
   0x8   : > { %s730_s10 = scalar_lea.vmem %s234_s28, 32  ;;  %p731_p10 = scmp.lt.s32.totalorder %s234_s28, %s234_s28 }
   0x9   : > { %p841_p5 = pnand %p989_p2, %p691_p4  ;;  %p732_p11 = scmp.lt.s32.totalorder %s730_s10, %s723_s9 }
   0xb   : > { %p714_p6 = pneg %p841_p5  ;;  %p733_p12 = por %p732_p11, %p731_p10 }
   0xd   : > { %p726_p8 = pnand %p724_p7, %p714_p6 }
   0xf   : > { %p727_p9 = pneg %p726_p8 }
  0x11   : > { %p734_p13 = pnand %p733_p12, %p727_p9 }
  0x13   : > { %737 = shalt.err (!%p734_p13)
}
  0x14   : > { %694 = dma.hbm_to_vmem [thread:$0]  (!%p841_p5), %s986_s5, 16, %s234_s28, [#allocation3]  }
  0x15   : > { %s749_s13 = scalar_lea.vmem %s245_s30, 16  ;;  %s756_s14 = scalar_lea.vmem %s245_s30, 32 }
  0x16   : > { %p750_p0 = scmp.ne.s32.totalorder %s245_s30, %s749_s13  ;;  %p757_p7 = scmp.lt.s32.totalorder %s245_s30, %s245_s30 }
  0x17   : > { %p758_p8 = scmp.lt.s32.totalorder %s756_s14, %s749_s13 }
  0x18   : > { %p752_p1 = pnand %p750_p0, %p714_p6 }
  0x19   : > { %p759_p2 = por %p758_p8, %p757_p7 }
  0x1a   : > { %p753_p4 = pneg %p752_p1 }
  0x1c   : > { %p760_p10 = pnand %p759_p2, %p753_p4 }
  0x1e   : > { %763 = shalt.err (!%p760_p10)
}
  0x1f   : > { %697 = dma.hbm_to_vmem [thread:$0]  (!%p841_p5), %s987_s6, 16, %s245_s30, [#allocation5]  }
  0x20   : > { %289 = sbr.rel (%p833_p3) target bundleno = 79 (0x4f), region = 48  ;;  %p992_p9 = scmp.eq.s32.totalorder (!%p833_p3), %s828_s25, 0 }
  0x25   : > { %769 = dma.done.wait (%p992_p9), [#allocation3], 16   ;;  %p993_p6 = pmov %p992_p9 }
  0x27   : > { %771 = vsyncadd (%p993_p6), [#allocation3], 4294967280  ;;  %p994_p11 = pmov %p993_p6 }
  0x28   : > { %p995_p2 = pmov %p993_p6 }
  0x29   : > { %773 = dma.done.wait (%p994_p11), [#allocation5], 16  }
  0x2a   : > { %775 = vsyncadd (%p995_p2), [#allocation5], 4294967280  ;;  %p340_p12 = scmp.lt.s32.totalorder %s828_s25, 1  ;;  %v371_v0 = vlaneseq  ;;  %v365_v7 = vld [vmem:[%s985_s4] sm:$0xff]  ;;  %vm531_vm0 = vcmask 191488  }
  0x2c   : > { %s997_s25 = smov (!%p340_p12, %s828_s25), 1  ;;  %v372_v1 = vshrl.u32 %v371_v0, 7 }
  0x2d   : > { %s682_s17 = smul.u32 40, %s997_s25  ;;  %s681_s13 = sshll.u32 %s997_s25, 4 }
  0x2e   : > { %v373_v2 = vsub.s32 0, %v372_v1  ;;  %v385_v3 = vsub.s32 1, %v372_v1  ;;  %v401_v4 = vsub.s32 2, %v372_v1  ;;  %v417_v5 = vsub.s32 3, %v372_v1  ;;  %s364_s16 = scalar_lea.vmem %s988_s7, %s681_s13 }
  0x2f   : > { %s881_s20 = scalar_lea.vmem %s981_s0, %s682_s17  ;;  %s886_s23 = scalar_lea.vmem %s982_s1, %s682_s17  ;;  %v433_v6 = vsub.s32 4, %v372_v1  ;;  %v449_v9 = vsub.s32 5, %v372_v1  ;;  %v466_v17 = vsub.s32 6, %v372_v1  ;;  %v483_v24 = vsub.s32 7, %v372_v1 }
  0x30   : > { %s891_s28 = scalar_lea.vmem %s983_s2, %s682_s17  ;;  %v367_v8 = vld [vmem:[%s881_s20] sm:$0xf]  ;;  %s900_s10 = scalar_lea.vmem %s984_s3, %s682_s17  ;;  %v374_v10 = vrot.slane %v365_v7, %v373_v2  ;;  %v386_v12 = vrot.slane %v365_v7, %v385_v3  ;;  %v402_v14 = vrot.slane %v365_v7, %v401_v4  ;;  %v904_v15 = vrot.slane %v365_v7, %v417_v5  ;;  %v368_v28 = vld [vmem:[%s881_s20 + $0x8] sm:$0xf]  ;;  %v369_v45 = vld [vmem:[%s881_s20 + $0x10] sm:$0xf] }
  0x31   : > { %v379_v11 = vld [vmem:[%s886_s23] sm:$0xf]  ;;  %v907_v21 = vrot.slane %v365_v7, %v433_v6  ;;  %v910_v23 = vrot.slane %v365_v7, %v449_v9  ;;  %v380_v29 = vld [vmem:[%s886_s23 + $0x8] sm:$0xf]  ;;  %v916_v30 = vrot.slane %v365_v7, %v466_v17  ;;  %v925_v42 = vrot.slane %v365_v7, %v483_v24  ;;  %v381_v46 = vld [vmem:[%s886_s23 + $0x10] sm:$0xf] }
  0x32   : > { %v395_v13 = vld [vmem:[%s881_s20 + $0x1] sm:$0xf]  ;;  %v375_v18 = vmul.f32 %v374_v10, %v367_v8  ;;  %v387_v19 = vmul.f32 %v386_v12, %v379_v11  ;;  %v376_v31 = vmul.f32 %v374_v10, %v368_v28  ;;  %v388_v32 = vmul.f32 %v386_v12, %v380_v29  ;;  %v396_v33 = vld [vmem:[%s881_s20 + $0x9] sm:$0xf]  ;;  %v397_v47 = vld [vmem:[%s881_s20 + $0x11] sm:$0xf] }
  0x33   : > { %v411_v16 = vld [vmem:[%s891_s28] sm:$0xf]  ;;  %v403_v20 = vmul.f32 %v402_v14, %v395_v13  ;;  %v412_v34 = vld [vmem:[%s891_s28 + $0x8] sm:$0xf]  ;;  %v404_v39 = vmul.f32 %v402_v14, %v396_v33  ;;  %v429_v49 = vld [vmem:[%s900_s10 + $0x10] sm:$0xf]  ;;  %v377_v50 = vmul.f32 %v374_v10, %v369_v45  ;;  %v389_v51 = vmul.f32 %v386_v12, %v381_v46 }
  0x34   : > { %v427_v22 = vld [vmem:[%s900_s10] sm:$0xf]  ;;  %v391_v25 = vadd.f32 %v387_v19, %v375_v18  ;;  %v419_v26 = vmul.f32 %v904_v15, %v411_v16  ;;  %v428_v36 = vld [vmem:[%s900_s10 + $0x8] sm:$0xf]  ;;  %v392_v43 = vadd.f32 %v388_v32, %v376_v31  ;;  %v420_v44 = vmul.f32 %v904_v15, %v412_v34  ;;  %v413_v53 = vld [vmem:[%s891_s28 + $0x10] sm:$0xf] }
  0x35   : > { %v443_v27 = vld [vmem:[%s891_s28 + $0x1] sm:$0xf]  ;;  %v435_v37 = vmul.f32 %v907_v21, %v427_v22  ;;  %v664_v38 = vld [vmem:[%s881_s20 + $0x8] sm:$0xf]  ;;  %v405_v52 = vmul.f32 %v402_v14, %v397_v47  ;;  %v436_v54 = vmul.f32 %v907_v21, %v428_v36  ;;  %v665_v58 = vld [vmem:[%s881_s20 + $0x10] sm:$0xf]  ;;  %v393_v62 = vadd.f32 %v389_v51, %v377_v50 }
  0x36   : > { %v407_v35 = vadd.f32 %v403_v20, %v391_v25  ;;  %v444_v40 = vld [vmem:[%s891_s28 + $0x9] sm:$0xf]  ;;  %v451_v41 = vmul.f32 %v910_v23, %v443_v27  ;;  %v468_v55 = vmul.f32 %v664_v38, %v916_v30  ;;  %v408_v57 = vadd.f32 %v404_v39, %v392_v43  ;;  %v370_v59 = vld [vmem:[%s881_s20 + $0x18] sm:$0xf]  ;;  %v676_v3 = vld [vmem:[%s985_s4 + $0x8] ss:$0 sm:$0xff] }
  0x37   : > { %v668_v56 = vld [vmem:[%s886_s23 + $0x8] sm:$0xf]  ;;  %v452_v61 = vmul.f32 %v910_v23, %v444_v40  ;;  %v421_v63 = vmul.f32 %v904_v15, %v413_v53  ;;  %v382_v0 = vld [vmem:[%s886_s23 + $0x18] sm:$0xf]  ;;  %v445_v6 = vld [vmem:[%s891_s28 + $0x11] sm:$0xf]  ;;  %v378_v7 = vmul.f32 %v374_v10, %v370_v59  ;;  %v437_v13 = vmul.f32 %v907_v21, %v429_v49 }
  0x38   : > { %v423_v48 = vadd.f32 %v419_v26, %v407_v35  ;;  %v398_v1 = vld [vmem:[%s881_s20 + $0x19] sm:$0xf]  ;;  %v672_v4 = vld [vmem:[%s881_s20 + $0x9] sm:$0xf]  ;;  %v424_v5 = vadd.f32 %v420_v44, %v408_v57  ;;  %v390_v8 = vmul.f32 %v386_v12, %v382_v0  ;;  %v485_v17 = vmul.f32 %v668_v56, %v925_v42  ;;  %v669_v18 = vld [vmem:[%s886_s23 + $0x10] sm:$0xf] }
  0x39   : > { %v414_v2 = vld [vmem:[%s891_s28 + $0x18] sm:$0xf]  ;;  %v406_v9 = vmul.f32 %v402_v14, %v398_v1  ;;  %v409_v19 = vadd.f32 %v405_v52, %v393_v62  ;;  %v469_v22 = vmul.f32 %v665_v58, %v916_v30  ;;  %v501_v14 = vmul.f32 %v676_v3, %v672_v4  ;;  %v673_v26 = vld [vmem:[%s881_s20 + $0x11] sm:$0xf]  ;;  %v667_v38 = vld [vmem:[%s881_s20 + $0x20] sm:$0xf] }
  0x3a   : > { %v439_v60 = vadd.f32 %v435_v37, %v423_v48  ;;  %v430_v11 = vld [vmem:[%s900_s10 + $0x18] sm:$0xf]  ;;  %v440_v20 = vadd.f32 %v436_v54, %v424_v5  ;;  %v394_v25 = vadd.f32 %v390_v8, %v378_v7  ;;  %v422_v10 = vmul.f32 %v904_v15, %v414_v2  ;;  %v677_v39 = vld [vmem:[#allocation2] ss:$0 sm:$0xff]  ;;  %v678_v49 = vld [vmem:[#allocation4] ss:$0 sm:$0xff] }
  0x3b   : > { %v666_v24 = vld [vmem:[%s881_s20 + $0x18] sm:$0xf]  ;;  %v425_v27 = vadd.f32 %v421_v63, %v409_v19  ;;  %v453_v28 = vmul.f32 %v910_v23, %v445_v6  ;;  %v438_v31 = vmul.f32 %v907_v21, %v430_v11  ;;  %v486_v33 = vmul.f32 %v669_v18, %v925_v42  ;;  %v671_v48 = vld [vmem:[%s886_s23 + $0x20] sm:$0xf] }
  0x3c   : > { %v455_v16 = vadd.f32 %v451_v41, %v439_v60  ;;  %v446_v29 = vld [vmem:[%s891_s28 + $0x19] sm:$0xf]  ;;  %v456_v32 = vadd.f32 %v452_v61, %v440_v20  ;;  %v410_v35 = vadd.f32 %v406_v9, %v394_v25  ;;  %v470_v15 = vmul.f32 %v666_v24, %v916_v30  ;;  %v675_v56 = vld [vmem:[%s881_s20 + $0x21] sm:$0xf] }
  0x3d   : > { %v670_v34 = vld [vmem:[%s886_s23 + $0x18] sm:$0xf]  ;;  %v441_v37 = vadd.f32 %v437_v13, %v425_v27  ;;  %v502_v41 = vmul.f32 %v676_v3, %v673_v26  ;;  %v454_v45 = vmul.f32 %v910_v23, %v446_v29  ;;  %v471_v52 = vmul.f32 %v667_v38, %v916_v30 }
  0x3e   : > { %v472_v12 = vadd.f32 %v468_v55, %v455_v16  ;;  %v473_v40 = vadd.f32 %v469_v22, %v456_v32  ;;  %v674_v43 = vld [vmem:[%s881_s20 + $0x19] sm:$0xf]  ;;  %v426_v44 = vadd.f32 %v422_v10, %v410_v35  ;;  %v487_v47 = vmul.f32 %v670_v34, %v925_v42 }
  0x3f   : > { %v457_v46 = vadd.f32 %v453_v28, %v441_v37  ;;  %v503_v55 = vmul.f32 %v676_v3, %v674_v43  ;;  %v488_v58 = vmul.f32 %v671_v48, %v925_v42  ;;  %v504_v63 = vmul.f32 %v676_v3, %v675_v56 }
  0x40   : > { %v489_v36 = vadd.f32 %v485_v17, %v472_v12  ;;  %v490_v50 = vadd.f32 %v486_v33, %v473_v40  ;;  %v442_v51 = vadd.f32 %v438_v31, %v426_v44 }
  0x41   : > { %v474_v54 = vadd.f32 %v470_v15, %v457_v46 }
  0x42   : > { %v505_v21 = vadd.f32 %v501_v14, %v489_v36  ;;  %v506_v23 = vadd.f32 %v502_v41, %v490_v50  ;;  %v458_v57 = vadd.f32 %v454_v45, %v442_v51 }
  0x43   : > { %v491_v60 = vadd.f32 %v487_v47, %v474_v54 }
  0x44   : > { %v516_v53 = vmul.f32 %v677_v39, %v505_v21  ;;  %v517_v61 = vmul.f32 %v677_v39, %v506_v23  ;;  %v475_v62 = vadd.f32 %v471_v52, %v458_v57 }
  0x45   : > { %v507_v30 = vadd.f32 %v503_v55, %v491_v60 }
  0x46   : > { %v527_v59 = vadd.f32 %v678_v49, %v516_v53  ;;  %v528_v0 = vadd.f32 %v678_v49, %v517_v61  ;;  %v492_v1 = vadd.f32 %v488_v58, %v475_v62 }
  0x47   : > { %v518_v2 = vmul.f32 %v677_v39, %v507_v30 }
  0x48   : > { %532 = vst.msk [vmem:[%s364_s16] sm:$0xf] %vm531_vm0, %v527_v59  ;;  %533 = vst.msk [vmem:[%s364_s16 + $0x4] sm:$0xf] %vm531_vm0, %v528_v0  ;;  %v508_v4 = vadd.f32 %v504_v63, %v492_v1 }
  0x49   : > { %v529_v5 = vadd.f32 %v678_v49, %v518_v2 }
  0x4a   : > { %v519_v6 = vmul.f32 %v677_v39, %v508_v4 }
  0x4b   : > { %534 = vst.msk [vmem:[%s364_s16 + $0x8] sm:$0xf] %vm531_vm0, %v529_v5 }
  0x4c   : > { %v530_v7 = vadd.f32 %v678_v49, %v519_v6 }
  0x4e   : > { %535 = vst.msk [vmem:[%s364_s16 + $0xc] sm:$0xf] %vm531_vm0, %v530_v7 }
  0x4f PF: > { %s19_s24 = sadd.s32 1, %s778_s24  }
  0x50   : > { %p16_p3 = scmp.ge.s32.totalorder %s19_s24, 4  }
  0x52   :  { %18 = sbr.rel (!%p16_p3) target bundleno = 2 (0x2), region = 98 }
  0x57   :  { %557 = vsyncpa [#allocation3], 1 }
  0x58   :  { %559 = vsyncpa [#allocation3 + $0x1], 1 }
  0x59   :  { %560 = vsyncpa [#allocation5], 1 }

// kernel: shufflenet2_forward.81
= control target key start
LH: loop header
LB: loop body
LE: loop exit
PB: predicated region body
PF: predicated region fallthrough
CT: control target
= control target key end

     0   :  { %vm90_vm0 = vcmask 261120   ;;  %s511_s1 = inlined_call_operand.vmem [shape: bf16[32,128], index: 1, kind: input, shape index: {}]   ;;  %s512_s0 = inlined_call_operand.vmem [shape: bf16[128,32], index: 0, kind: input, shape index: {}]   ;;  %s513_s2 = inlined_call_operand.vmem [shape: f32[1,128], index: 2, kind: input, shape index: {}]   ;;  %s514_s3 = inlined_call_operand.vmem [shape: f32[1,128], index: 3, kind: input, shape index: {}]   ;;  %s515_s4 = inlined_call_operand.vmem [shape: f32[128,128], index: 4, kind: output, shape index: {}]  }
   0x1   :  { %v348_v0 = vld [vmem:[%s511_s1 + $0x8] sm:$0xff]   ;;  %v349_v1 = vld [vmem:[%s511_s1] sm:$0xff]   ;;  %v354_v6 = vld [vmem:[%s512_s0 + $0x10] sm:$0xff]  }
   0x2   :  { %324 = vmatprep.subr.bf16.mxu0 %v348_v0  ;;  %344 = vmatprep.subr.bf16.mxu1 %v348_v0  ;;  %v350_v2 = vld [vmem:[%s512_s0] sm:$0xff]   ;;  %v352_v4 = vld [vmem:[%s512_s0 + $0x8] sm:$0xff]   ;;  %v355_v7 = vld [vmem:[%s512_s0 + $0x30] sm:$0xff]  }
   0x3   :  { %325 = vmatpush3.bf16.msra.mxu0 %v348_v0  ;;  %346 = vmatpush3.bf16.msra.mxu1 %v348_v0  ;;  %v351_v3 = vld [vmem:[%s512_s0 + $0x20] sm:$0xff]   ;;  %v353_v5 = vld [vmem:[%s512_s0 + $0x28] sm:$0xff]   ;;  %v356_v8 = vld [vmem:[%s512_s0 + $0x18] sm:$0xff]  }
   0x4   :  { %326 = vmatprep.subr.bf16.mxu0 %v349_v1  ;;  %345 = vmatprep.subr.bf16.mxu1 %v349_v1  ;;  %v357_v9 = vld [vmem:[%s512_s0 + $0x38] sm:$0xff]   ;;  %v424_v10 = vld [vmem:[%s513_s2] ss:$0 sm:$0xff] }
   0x5   :  { %328 = vmatprep.mubr.msk.bf16.mxu0 %vm90_vm0, %v350_v2  ;;  %336 = vmatprep.mubr.msk.bf16.mxu1 %vm90_vm0, %v351_v3  ;;  %v429_v12 = vld [vmem:[%s514_s3] ss:$0 sm:$0xff] }
   0x7   :  { %327 = vmatpush3.bf16.msra.mxu0 %v349_v1  ;;  %347 = vmatpush3.bf16.msra.mxu1 %v349_v1 }
   0xa   :  { %329 = vmatmul.mubr.msk.bf16.vlgmr.msra.gmra.mxu0 %vm90_vm0, %v352_v4  ;;  %337 = vmatmul.mubr.msk.bf16.vlgmr.msra.gmra.mxu1 %vm90_vm0, %v353_v5 }
   0xb   :  { %332 = vmatprep.mubr.msk.bf16.mxu0 %vm90_vm0, %v354_v6  ;;  %340 = vmatprep.mubr.msk.bf16.mxu1 %vm90_vm0, %v355_v7 }
  0x12   :  { %333 = vmatmul.mubr.msk.bf16.gmra.mxu0 %vm90_vm0, %v356_v8  ;;  %341 = vmatmul.mubr.msk.bf16.gmra.mxu1 %vm90_vm0, %v357_v9 }
  0xca   :  { %v330_v11 = vpop.f32.mrf.mxu0  ;;  %v338_v13 = vpop.f32.mrf.mxu1 }
  0xcb   :  { %v221_v14 = vmul.f32 %v330_v11, %v424_v10  ;;  %v229_v15 = vmul.f32 %v338_v13, %v424_v10 }
  0xcc   :  { %v149_v16 = vpop.f32.mrf.mxu0  ;;  %v181_v17 = vpop.f32.mrf.mxu1 }
  0xcd   :  { %v244_v18 = vadd.f32 %v429_v12, %v221_v14  ;;  %v252_v19 = vadd.f32 %v429_v12, %v229_v15  ;;  %v219_v20 = vmul.f32 %v424_v10, %v149_v16  ;;  %v227_v21 = vmul.f32 %v424_v10, %v181_v17 }
  0xce   :  { %v331_v22 = vpop.f32.mrf.mxu0  ;;  %v339_v23 = vpop.f32.mrf.mxu1 }
  0xcf   :  { %v260_v24 = vmax.f32 %v244_v18, 0.0  ;;  %v268_v25 = vmax.f32 %v252_v19, 0.0  ;;  %v242_v26 = vadd.f32 %v429_v12, %v219_v20  ;;  %v250_v27 = vadd.f32 %v429_v12, %v227_v21 }
  0xd0   :  { %v222_v28 = vmul.f32 %v331_v22, %v424_v10  ;;  %v230_v29 = vmul.f32 %v339_v23, %v424_v10  ;;  %v152_v30 = vpop.f32.mrf.mxu0  ;;  %v184_v31 = vpop.f32.mrf.mxu1 }
  0xd1   :  { %276 = vst [vmem:[%s515_s4 + $0x10] sm:$0xff] %v260_v24  ;;  %284 = vst [vmem:[%s515_s4 + $0x50] sm:$0xff] %v268_v25  ;;  %v258_v32 = vmax.f32 %v242_v26, 0.0  ;;  %v266_v33 = vmax.f32 %v250_v27, 0.0  ;;  %v220_v34 = vmul.f32 %v424_v10, %v152_v30  ;;  %v228_v35 = vmul.f32 %v424_v10, %v184_v31 }
  0xd2   :  { %v245_v36 = vadd.f32 %v429_v12, %v222_v28  ;;  %v253_v37 = vadd.f32 %v429_v12, %v230_v29  ;;  %v334_v38 = vpop.f32.mrf.mxu0  ;;  %v342_v39 = vpop.f32.mrf.mxu1 }
  0xd3   :  { %274 = vst [vmem:[%s515_s4] sm:$0xff] %v258_v32  ;;  %282 = vst [vmem:[%s515_s4 + $0x40] sm:$0xff] %v266_v33  ;;  %v243_v40 = vadd.f32 %v429_v12, %v220_v34  ;;  %v251_v41 = vadd.f32 %v429_v12, %v228_v35  ;;  %v225_v42 = vmul.f32 %v334_v38, %v424_v10 }
  0xd4   :  { %v233_v43 = vmul.f32 %v342_v39, %v424_v10  ;;  %v261_v44 = vmax.f32 %v245_v36, 0.0  ;;  %v269_v45 = vmax.f32 %v253_v37, 0.0  ;;  %v165_v46 = vpop.f32.mrf.mxu0  ;;  %v197_v47 = vpop.f32.mrf.mxu1 }
  0xd5   :  { %v259_v48 = vmax.f32 %v243_v40, 0.0  ;;  %v267_v49 = vmax.f32 %v251_v41, 0.0  ;;  %v248_v50 = vadd.f32 %v429_v12, %v225_v42  ;;  %v223_v52 = vmul.f32 %v424_v10, %v165_v46 }
  0xd6   :  { %v256_v51 = vadd.f32 %v429_v12, %v233_v43  ;;  %277 = vst [vmem:[%s515_s4 + $0x18] sm:$0xff] %v261_v44  ;;  %285 = vst [vmem:[%s515_s4 + $0x58] sm:$0xff] %v269_v45  ;;  %v231_v53 = vmul.f32 %v424_v10, %v197_v47  ;;  %v335_v54 = vpop.f32.mrf.mxu0  ;;  %v343_v55 = vpop.f32.mrf.mxu1 }
  0xd7   :  { %275 = vst [vmem:[%s515_s4 + $0x8] sm:$0xff] %v259_v48  ;;  %283 = vst [vmem:[%s515_s4 + $0x48] sm:$0xff] %v267_v49  ;;  %v264_v56 = vmax.f32 %v248_v50, 0.0  ;;  %v226_v58 = vmul.f32 %v335_v54, %v424_v10  ;;  %v234_v59 = vmul.f32 %v343_v55, %v424_v10  ;;  %v246_v60 = vadd.f32 %v429_v12, %v223_v52 }
  0xd8   :  { %v272_v57 = vmax.f32 %v256_v51, 0.0  ;;  %v254_v61 = vadd.f32 %v429_v12, %v231_v53  ;;  %v168_v62 = vpop.f32.mrf.mxu0  ;;  %v200_v63 = vpop.f32.mrf.mxu1 }
  0xd9   :  { %280 = vst [vmem:[%s515_s4 + $0x30] sm:$0xff] %v264_v56  ;;  %v249_v0 = vadd.f32 %v429_v12, %v226_v58  ;;  %v257_v1 = vadd.f32 %v429_v12, %v234_v59  ;;  %v224_v2 = vmul.f32 %v424_v10, %v168_v62  ;;  %v232_v3 = vmul.f32 %v424_v10, %v200_v63 }
  0xda   :  { %288 = vst [vmem:[%s515_s4 + $0x70] sm:$0xff] %v272_v57  ;;  %v262_v4 = vmax.f32 %v246_v60, 0.0  ;;  %v270_v5 = vmax.f32 %v254_v61, 0.0 }
  0xdb   :  { %v265_v6 = vmax.f32 %v249_v0, 0.0  ;;  %v273_v7 = vmax.f32 %v257_v1, 0.0  ;;  %v247_v8 = vadd.f32 %v429_v12, %v224_v2  ;;  %v255_v9 = vadd.f32 %v429_v12, %v232_v3 }
  0xdc   :  { %278 = vst [vmem:[%s515_s4 + $0x20] sm:$0xff] %v262_v4  ;;  %286 = vst [vmem:[%s515_s4 + $0x60] sm:$0xff] %v270_v5 }
  0xdd   :  { %281 = vst [vmem:[%s515_s4 + $0x38] sm:$0xff] %v265_v6  ;;  %289 = vst [vmem:[%s515_s4 + $0x78] sm:$0xff] %v273_v7  ;;  %v263_v10 = vmax.f32 %v247_v8, 0.0  ;;  %v271_v11 = vmax.f32 %v255_v9, 0.0 }
  0xdf   :  { %279 = vst [vmem:[%s515_s4 + $0x28] sm:$0xff] %v263_v10  ;;  %287 = vst [vmem:[%s515_s4 + $0x68] sm:$0xff] %v271_v11 }

// kernel: shufflenet2_forward.82
= control target key start
LH: loop header
LB: loop body
LE: loop exit
PB: predicated region body
PF: predicated region fallthrough
CT: control target
= control target key end

     0   :  { %12 = vsyncpa [#allocation3], 0  ;;  %s981_s0 = inlined_call_operand.vmem [shape: f32[2,5,5,122], index: 0, kind: input, shape index: {}]   ;;  %s982_s1 = inlined_call_operand.vmem [shape: f32[2,5,5,122], index: 1, kind: input, shape index: {}]   ;;  %s983_s2 = inlined_call_operand.vmem [shape: f32[2,5,5,122], index: 2, kind: input, shape index: {}]   ;;  %s984_s3 = inlined_call_operand.vmem [shape: f32[2,5,5,122], index: 3, kind: input, shape index: {}]   ;;  %s985_s4 = inlined_call_operand.vmem [shape: f32[9,122], index: 4, kind: input, shape index: {}]   ;;  %s986_s5 = inlined_call_operand.hbm [shape: f32[1,122], index: 5, kind: input, shape index: {}]   ;;  %s987_s6 = inlined_call_operand.hbm [shape: f32[1,122], index: 6, kind: input, shape index: {}]   ;;  %s988_s7 = inlined_call_operand.vmem [shape: f32[2,4,4,122], index: 7, kind: output, shape index: {}]  }
   0x1   :  { %13 = vsyncpa [#allocation5], 0  ;;  %s822_s24 = smov 0  }
   0x2 LB: > { %s828_s25 = sadd.s32 4294967295, %s778_s24   ;;  %p651_p0 = scmp.ge.s32.totalorder %s778_s24, 1  ;;  %s778_s24 = sphi %s822_s24, %s19_s24  }
   0x3   : > { %p217_p1 = scmp.lt.s32.totalorder %s778_s24, 3  ;;  %p989_p2 = scmp.eq.s32.totalorder %s828_s25, 0 }
   0x4   : > { %s780_s27 = smov [#allocation2]   ;;  %s781_s29 = smov [#allocation4]  }
   0x5   : > { %p833_p3 = pnand %p651_p0, %p217_p1  ;;  %s233_s28 = sshll.u32 %s780_s27, 4  ;;  %s234_s28 = int_to_ptr.vmem [resolvable:$true] %s233_s28 }
   0x6   : > { %s244_s30 = sshll.u32 %s781_s29, 4  ;;  %s723_s9 = scalar_lea.vmem %s234_s28, 16  ;;  %s245_s30 = int_to_ptr.vmem [resolvable:$true] %s244_s30 }
   0x7   : > { %p691_p4 = pneg %p833_p3  ;;  %p724_p7 = scmp.ne.s32.totalorder %s234_s28, %s723_s9 }
   0x8   : > { %s730_s10 = scalar_lea.vmem %s234_s28, 32  ;;  %p731_p10 = scmp.lt.s32.totalorder %s234_s28, %s234_s28 }
   0x9   : > { %p841_p5 = pnand %p989_p2, %p691_p4  ;;  %p732_p11 = scmp.lt.s32.totalorder %s730_s10, %s723_s9 }
   0xb   : > { %p714_p6 = pneg %p841_p5  ;;  %p733_p12 = por %p732_p11, %p731_p10 }
   0xd   : > { %p726_p8 = pnand %p724_p7, %p714_p6 }
   0xf   : > { %p727_p9 = pneg %p726_p8 }
  0x11   : > { %p734_p13 = pnand %p733_p12, %p727_p9 }
  0x13   : > { %737 = shalt.err (!%p734_p13)
}
  0x14   : > { %694 = dma.hbm_to_vmem [thread:$0]  (!%p841_p5), %s986_s5, 16, %s234_s28, [#allocation3]  }
  0x15   : > { %s749_s13 = scalar_lea.vmem %s245_s30, 16  ;;  %s756_s14 = scalar_lea.vmem %s245_s30, 32 }
  0x16   : > { %p750_p0 = scmp.ne.s32.totalorder %s245_s30, %s749_s13  ;;  %p757_p7 = scmp.lt.s32.totalorder %s245_s30, %s245_s30 }
  0x17   : > { %p758_p8 = scmp.lt.s32.totalorder %s756_s14, %s749_s13 }
  0x18   : > { %p752_p1 = pnand %p750_p0, %p714_p6 }
  0x19   : > { %p759_p2 = por %p758_p8, %p757_p7 }
  0x1a   : > { %p753_p4 = pneg %p752_p1 }
  0x1c   : > { %p760_p10 = pnand %p759_p2, %p753_p4 }
  0x1e   : > { %763 = shalt.err (!%p760_p10)
}
  0x1f   : > { %697 = dma.hbm_to_vmem [thread:$0]  (!%p841_p5), %s987_s6, 16, %s245_s30, [#allocation5]  }
  0x20   : > { %289 = sbr.rel (%p833_p3) target bundleno = 79 (0x4f), region = 48  ;;  %p992_p9 = scmp.eq.s32.totalorder (!%p833_p3), %s828_s25, 0 }
  0x25   : > { %769 = dma.done.wait (%p992_p9), [#allocation3], 16   ;;  %p993_p6 = pmov %p992_p9 }
  0x27   : > { %771 = vsyncadd (%p993_p6), [#allocation3], 4294967280  ;;  %p994_p11 = pmov %p993_p6 }
  0x28   : > { %p995_p2 = pmov %p993_p6 }
  0x29   : > { %773 = dma.done.wait (%p994_p11), [#allocation5], 16  }
  0x2a   : > { %775 = vsyncadd (%p995_p2), [#allocation5], 4294967280  ;;  %p340_p12 = scmp.lt.s32.totalorder %s828_s25, 1  ;;  %v371_v0 = vlaneseq  ;;  %v365_v7 = vld [vmem:[%s985_s4] sm:$0xff]  ;;  %vm531_vm0 = vcmask 994304  }
  0x2c   : > { %s997_s25 = smov (!%p340_p12, %s828_s25), 1  ;;  %v372_v1 = vshrl.u32 %v371_v0, 7 }
  0x2d   : > { %s682_s17 = smul.u32 40, %s997_s25  ;;  %s681_s13 = sshll.u32 %s997_s25, 4 }
  0x2e   : > { %v373_v2 = vsub.s32 0, %v372_v1  ;;  %v385_v3 = vsub.s32 1, %v372_v1  ;;  %v401_v4 = vsub.s32 2, %v372_v1  ;;  %v417_v5 = vsub.s32 3, %v372_v1  ;;  %s364_s16 = scalar_lea.vmem %s988_s7, %s681_s13 }
  0x2f   : > { %s881_s20 = scalar_lea.vmem %s981_s0, %s682_s17  ;;  %s886_s23 = scalar_lea.vmem %s982_s1, %s682_s17  ;;  %v433_v6 = vsub.s32 4, %v372_v1  ;;  %v449_v9 = vsub.s32 5, %v372_v1  ;;  %v466_v17 = vsub.s32 6, %v372_v1  ;;  %v483_v24 = vsub.s32 7, %v372_v1 }
  0x30   : > { %s891_s28 = scalar_lea.vmem %s983_s2, %s682_s17  ;;  %v367_v8 = vld [vmem:[%s881_s20] sm:$0xf]  ;;  %s900_s10 = scalar_lea.vmem %s984_s3, %s682_s17  ;;  %v374_v10 = vrot.slane %v365_v7, %v373_v2  ;;  %v386_v12 = vrot.slane %v365_v7, %v385_v3  ;;  %v402_v14 = vrot.slane %v365_v7, %v401_v4  ;;  %v904_v15 = vrot.slane %v365_v7, %v417_v5  ;;  %v368_v28 = vld [vmem:[%s881_s20 + $0x8] sm:$0xf]  ;;  %v369_v45 = vld [vmem:[%s881_s20 + $0x10] sm:$0xf] }
  0x31   : > { %v379_v11 = vld [vmem:[%s886_s23] sm:$0xf]  ;;  %v907_v21 = vrot.slane %v365_v7, %v433_v6  ;;  %v910_v23 = vrot.slane %v365_v7, %v449_v9  ;;  %v380_v29 = vld [vmem:[%s886_s23 + $0x8] sm:$0xf]  ;;  %v916_v30 = vrot.slane %v365_v7, %v466_v17  ;;  %v925_v42 = vrot.slane %v365_v7, %v483_v24  ;;  %v381_v46 = vld [vmem:[%s886_s23 + $0x10] sm:$0xf] }
  0x32   : > { %v395_v13 = vld [vmem:[%s881_s20 + $0x1] sm:$0xf]  ;;  %v375_v18 = vmul.f32 %v374_v10, %v367_v8  ;;  %v387_v19 = vmul.f32 %v386_v12, %v379_v11  ;;  %v376_v31 = vmul.f32 %v374_v10, %v368_v28  ;;  %v388_v32 = vmul.f32 %v386_v12, %v380_v29  ;;  %v396_v33 = vld [vmem:[%s881_s20 + $0x9] sm:$0xf]  ;;  %v397_v47 = vld [vmem:[%s881_s20 + $0x11] sm:$0xf] }
  0x33   : > { %v411_v16 = vld [vmem:[%s891_s28] sm:$0xf]  ;;  %v403_v20 = vmul.f32 %v402_v14, %v395_v13  ;;  %v412_v34 = vld [vmem:[%s891_s28 + $0x8] sm:$0xf]  ;;  %v404_v39 = vmul.f32 %v402_v14, %v396_v33  ;;  %v429_v49 = vld [vmem:[%s900_s10 + $0x10] sm:$0xf]  ;;  %v377_v50 = vmul.f32 %v374_v10, %v369_v45  ;;  %v389_v51 = vmul.f32 %v386_v12, %v381_v46 }
  0x34   : > { %v427_v22 = vld [vmem:[%s900_s10] sm:$0xf]  ;;  %v391_v25 = vadd.f32 %v387_v19, %v375_v18  ;;  %v419_v26 = vmul.f32 %v904_v15, %v411_v16  ;;  %v428_v36 = vld [vmem:[%s900_s10 + $0x8] sm:$0xf]  ;;  %v392_v43 = vadd.f32 %v388_v32, %v376_v31  ;;  %v420_v44 = vmul.f32 %v904_v15, %v412_v34  ;;  %v413_v53 = vld [vmem:[%s891_s28 + $0x10] sm:$0xf] }
  0x35   : > { %v443_v27 = vld [vmem:[%s891_s28 + $0x1] sm:$0xf]  ;;  %v435_v37 = vmul.f32 %v907_v21, %v427_v22  ;;  %v664_v38 = vld [vmem:[%s881_s20 + $0x8] sm:$0xf]  ;;  %v405_v52 = vmul.f32 %v402_v14, %v397_v47  ;;  %v436_v54 = vmul.f32 %v907_v21, %v428_v36  ;;  %v665_v58 = vld [vmem:[%s881_s20 + $0x10] sm:$0xf]  ;;  %v393_v62 = vadd.f32 %v389_v51, %v377_v50 }
  0x36   : > { %v407_v35 = vadd.f32 %v403_v20, %v391_v25  ;;  %v444_v40 = vld [vmem:[%s891_s28 + $0x9] sm:$0xf]  ;;  %v451_v41 = vmul.f32 %v910_v23, %v443_v27  ;;  %v468_v55 = vmul.f32 %v664_v38, %v916_v30  ;;  %v408_v57 = vadd.f32 %v404_v39, %v392_v43  ;;  %v370_v59 = vld [vmem:[%s881_s20 + $0x18] sm:$0xf]  ;;  %v676_v3 = vld [vmem:[%s985_s4 + $0x8] ss:$0 sm:$0xff] }
  0x37   : > { %v668_v56 = vld [vmem:[%s886_s23 + $0x8] sm:$0xf]  ;;  %v452_v61 = vmul.f32 %v910_v23, %v444_v40  ;;  %v421_v63 = vmul.f32 %v904_v15, %v413_v53  ;;  %v382_v0 = vld [vmem:[%s886_s23 + $0x18] sm:$0xf]  ;;  %v445_v6 = vld [vmem:[%s891_s28 + $0x11] sm:$0xf]  ;;  %v378_v7 = vmul.f32 %v374_v10, %v370_v59  ;;  %v437_v13 = vmul.f32 %v907_v21, %v429_v49 }
  0x38   : > { %v423_v48 = vadd.f32 %v419_v26, %v407_v35  ;;  %v398_v1 = vld [vmem:[%s881_s20 + $0x19] sm:$0xf]  ;;  %v672_v4 = vld [vmem:[%s881_s20 + $0x9] sm:$0xf]  ;;  %v424_v5 = vadd.f32 %v420_v44, %v408_v57  ;;  %v390_v8 = vmul.f32 %v386_v12, %v382_v0  ;;  %v485_v17 = vmul.f32 %v668_v56, %v925_v42  ;;  %v669_v18 = vld [vmem:[%s886_s23 + $0x10] sm:$0xf] }
  0x39   : > { %v414_v2 = vld [vmem:[%s891_s28 + $0x18] sm:$0xf]  ;;  %v406_v9 = vmul.f32 %v402_v14, %v398_v1  ;;  %v409_v19 = vadd.f32 %v405_v52, %v393_v62  ;;  %v469_v22 = vmul.f32 %v665_v58, %v916_v30  ;;  %v501_v14 = vmul.f32 %v676_v3, %v672_v4  ;;  %v673_v26 = vld [vmem:[%s881_s20 + $0x11] sm:$0xf]  ;;  %v667_v38 = vld [vmem:[%s881_s20 + $0x20] sm:$0xf] }
  0x3a   : > { %v439_v60 = vadd.f32 %v435_v37, %v423_v48  ;;  %v430_v11 = vld [vmem:[%s900_s10 + $0x18] sm:$0xf]  ;;  %v440_v20 = vadd.f32 %v436_v54, %v424_v5  ;;  %v394_v25 = vadd.f32 %v390_v8, %v378_v7  ;;  %v422_v10 = vmul.f32 %v904_v15, %v414_v2  ;;  %v677_v39 = vld [vmem:[#allocation2] ss:$0 sm:$0xff]  ;;  %v678_v49 = vld [vmem:[#allocation4] ss:$0 sm:$0xff] }
  0x3b   : > { %v666_v24 = vld [vmem:[%s881_s20 + $0x18] sm:$0xf]  ;;  %v425_v27 = vadd.f32 %v421_v63, %v409_v19  ;;  %v453_v28 = vmul.f32 %v910_v23, %v445_v6  ;;  %v438_v31 = vmul.f32 %v907_v21, %v430_v11  ;;  %v486_v33 = vmul.f32 %v669_v18, %v925_v42  ;;  %v671_v48 = vld [vmem:[%s886_s23 + $0x20] sm:$0xf] }
  0x3c   : > { %v455_v16 = vadd.f32 %v451_v41, %v439_v60  ;;  %v446_v29 = vld [vmem:[%s891_s28 + $0x19] sm:$0xf]  ;;  %v456_v32 = vadd.f32 %v452_v61, %v440_v20  ;;  %v410_v35 = vadd.f32 %v406_v9, %v394_v25  ;;  %v470_v15 = vmul.f32 %v666_v24, %v916_v30  ;;  %v675_v56 = vld [vmem:[%s881_s20 + $0x21] sm:$0xf] }
  0x3d   : > { %v670_v34 = vld [vmem:[%s886_s23 + $0x18] sm:$0xf]  ;;  %v441_v37 = vadd.f32 %v437_v13, %v425_v27  ;;  %v502_v41 = vmul.f32 %v676_v3, %v673_v26  ;;  %v454_v45 = vmul.f32 %v910_v23, %v446_v29  ;;  %v471_v52 = vmul.f32 %v667_v38, %v916_v30 }
  0x3e   : > { %v472_v12 = vadd.f32 %v468_v55, %v455_v16  ;;  %v473_v40 = vadd.f32 %v469_v22, %v456_v32  ;;  %v674_v43 = vld [vmem:[%s881_s20 + $0x19] sm:$0xf]  ;;  %v426_v44 = vadd.f32 %v422_v10, %v410_v35  ;;  %v487_v47 = vmul.f32 %v670_v34, %v925_v42 }
  0x3f   : > { %v457_v46 = vadd.f32 %v453_v28, %v441_v37  ;;  %v503_v55 = vmul.f32 %v676_v3, %v674_v43  ;;  %v488_v58 = vmul.f32 %v671_v48, %v925_v42  ;;  %v504_v63 = vmul.f32 %v676_v3, %v675_v56 }
  0x40   : > { %v489_v36 = vadd.f32 %v485_v17, %v472_v12  ;;  %v490_v50 = vadd.f32 %v486_v33, %v473_v40  ;;  %v442_v51 = vadd.f32 %v438_v31, %v426_v44 }
  0x41   : > { %v474_v54 = vadd.f32 %v470_v15, %v457_v46 }
  0x42   : > { %v505_v21 = vadd.f32 %v501_v14, %v489_v36  ;;  %v506_v23 = vadd.f32 %v502_v41, %v490_v50  ;;  %v458_v57 = vadd.f32 %v454_v45, %v442_v51 }
  0x43   : > { %v491_v60 = vadd.f32 %v487_v47, %v474_v54 }
  0x44   : > { %v516_v53 = vmul.f32 %v677_v39, %v505_v21  ;;  %v517_v61 = vmul.f32 %v677_v39, %v506_v23  ;;  %v475_v62 = vadd.f32 %v471_v52, %v458_v57 }
  0x45   : > { %v507_v30 = vadd.f32 %v503_v55, %v491_v60 }
  0x46   : > { %v527_v59 = vadd.f32 %v678_v49, %v516_v53  ;;  %v528_v0 = vadd.f32 %v678_v49, %v517_v61  ;;  %v492_v1 = vadd.f32 %v488_v58, %v475_v62 }
  0x47   : > { %v518_v2 = vmul.f32 %v677_v39, %v507_v30 }
  0x48   : > { %532 = vst.msk [vmem:[%s364_s16] sm:$0xf] %vm531_vm0, %v527_v59  ;;  %533 = vst.msk [vmem:[%s364_s16 + $0x4] sm:$0xf] %vm531_vm0, %v528_v0  ;;  %v508_v4 = vadd.f32 %v504_v63, %v492_v1 }
  0x49   : > { %v529_v5 = vadd.f32 %v678_v49, %v518_v2 }
  0x4a   : > { %v519_v6 = vmul.f32 %v677_v39, %v508_v4 }
  0x4b   : > { %534 = vst.msk [vmem:[%s364_s16 + $0x8] sm:$0xf] %vm531_vm0, %v529_v5 }
  0x4c   : > { %v530_v7 = vadd.f32 %v678_v49, %v519_v6 }
  0x4e   : > { %535 = vst.msk [vmem:[%s364_s16 + $0xc] sm:$0xf] %vm531_vm0, %v530_v7 }
  0x4f PF: > { %s19_s24 = sadd.s32 1, %s778_s24  }
  0x50   : > { %p16_p3 = scmp.ge.s32.totalorder %s19_s24, 4  }
  0x52   :  { %18 = sbr.rel (!%p16_p3) target bundleno = 2 (0x2), region = 98 }
  0x57   :  { %557 = vsyncpa [#allocation3], 1 }
  0x58   :  { %559 = vsyncpa [#allocation3 + $0x1], 1 }
  0x59   :  { %560 = vsyncpa [#allocation5], 1 }

// kernel: shufflenet2_forward.83
= control target key start
LH: loop header
LB: loop body
LE: loop exit
PB: predicated region body
PF: predicated region fallthrough
CT: control target
= control target key end

     0   :  { %s306_s1 = inlined_call_operand.vmem [shape: bf16[128,128], index: 1, kind: input, shape index: {}]   ;;  %s307_s0 = inlined_call_operand.vmem [shape: bf16[32,128], index: 0, kind: input, shape index: {}]   ;;  %s308_s2 = inlined_call_operand.vmem [shape: f32[1,128], index: 2, kind: input, shape index: {}]   ;;  %s309_s3 = inlined_call_operand.vmem [shape: f32[1,128], index: 3, kind: input, shape index: {}]   ;;  %s310_s4 = inlined_call_operand.vmem [shape: f32[32,128], index: 4, kind: output, shape index: {}]  }
   0x1   :  { %v223_v0 = vld [vmem:[%s306_s1 + $0x38] sm:$0xff]   ;;  %v224_v1 = vld [vmem:[%s306_s1 + $0x30] sm:$0xff]   ;;  %v225_v2 = vld [vmem:[%s306_s1 + $0x28] sm:$0xff]  }
   0x2   :  { %203 = vmatprep.subr.bf16.mxu0 %v223_v0  ;;  %v226_v3 = vld [vmem:[%s306_s1 + $0x20] sm:$0xff]   ;;  %v227_v5 = vld [vmem:[%s306_s1 + $0x18] sm:$0xff]   ;;  %v228_v6 = vld [vmem:[%s306_s1 + $0x10] sm:$0xff]  }
   0x3   :  { %204 = vmatpush3.bf16.msra.mxu0 %v223_v0  ;;  %v231_v4 = vld [vmem:[%s307_s0] sm:$0xff]   ;;  %v229_v7 = vld [vmem:[%s306_s1 + $0x8] sm:$0xff]  }
   0x4   :  { %205 = vmatprep.subr.bf16.mxu0 %v224_v1  ;;  %219 = vmatprep.mubr.bf16.mxu0 %v231_v4  ;;  %v230_v8 = vld [vmem:[%s306_s1] sm:$0xff]   ;;  %v232_v9 = vld [vmem:[%s307_s0 + $0x8] sm:$0xff]  }
   0x5   :  { %v191_v10 = vld [vmem:[%s308_s2] ss:$0 sm:$0xff] }
   0x6   :  { %v192_v12 = vld [vmem:[%s309_s3] ss:$0 sm:$0xff] }
   0x7   :  { %206 = vmatpush3.bf16.msra.mxu0 %v224_v1 }
   0x8   :  { %207 = vmatprep.subr.bf16.mxu0 %v225_v2 }
   0xb   :  { %208 = vmatpush3.bf16.msra.mxu0 %v225_v2 }
   0xc   :  { %209 = vmatprep.subr.bf16.mxu0 %v226_v3 }
   0xf   :  { %210 = vmatpush3.bf16.msra.mxu0 %v226_v3 }
  0x10   :  { %211 = vmatprep.subr.bf16.mxu0 %v227_v5 }
  0x13   :  { %212 = vmatpush3.bf16.msra.mxu0 %v227_v5 }
  0x14   :  { %213 = vmatprep.subr.bf16.mxu0 %v228_v6 }
  0x17   :  { %214 = vmatpush3.bf16.msra.mxu0 %v228_v6 }
  0x18   :  { %215 = vmatprep.subr.bf16.mxu0 %v229_v7 }
  0x1b   :  { %216 = vmatpush3.bf16.msra.mxu0 %v229_v7 }
  0x1c   :  { %217 = vmatprep.subr.bf16.mxu0 %v230_v8 }
  0x1f   :  { %218 = vmatpush3.bf16.msra.mxu0 %v230_v8 }
  0x22   :  { %220 = vmatmul.mubr.bf16.vlgmr.msra.gmra.mxu0 %v232_v9 }
  0xe2   :  { %v221_v11 = vpop.f32.mrf.mxu0 }
  0xe3   :  { %v156_v13 = vmul.f32 %v221_v11, %v191_v10 }
  0xe4   :  { %v132_v14 = vpop.f32.mrf.mxu0 }
  0xe5   :  { %v167_v15 = vadd.f32 %v192_v12, %v156_v13  ;;  %v154_v16 = vmul.f32 %v191_v10, %v132_v14 }
  0xe6   :  { %v222_v17 = vpop.f32.mrf.mxu0 }
  0xe7   :  { %v171_v18 = vmax.f32 %v167_v15, 0.0  ;;  %v165_v19 = vadd.f32 %v192_v12, %v154_v16  ;;  %v157_v20 = vmul.f32 %v222_v17, %v191_v10 }
  0xe8   :  { %v135_v21 = vpop.f32.mrf.mxu0 }
  0xe9   :  { %175 = vst [vmem:[%s310_s4 + $0x10] sm:$0xff] %v171_v18  ;;  %v169_v22 = vmax.f32 %v165_v19, 0.0  ;;  %v168_v23 = vadd.f32 %v192_v12, %v157_v20  ;;  %v155_v24 = vmul.f32 %v191_v10, %v135_v21 }
  0xeb   :  { %173 = vst [vmem:[%s310_s4] sm:$0xff] %v169_v22  ;;  %v172_v25 = vmax.f32 %v168_v23, 0.0  ;;  %v166_v26 = vadd.f32 %v192_v12, %v155_v24 }
  0xed   :  { %176 = vst [vmem:[%s310_s4 + $0x18] sm:$0xff] %v172_v25  ;;  %v170_v27 = vmax.f32 %v166_v26, 0.0 }
  0xef   :  { %174 = vst [vmem:[%s310_s4 + $0x8] sm:$0xff] %v170_v27 }

// kernel: shufflenet2_forward.85
= control target key start
LH: loop header
LB: loop body
LE: loop exit
PB: predicated region body
PF: predicated region fallthrough
CT: control target
= control target key end

     0   :  { %9 = vsyncpa [#allocation3], 0  ;;  %s795_s0 = inlined_call_operand.vmem [shape: f32[2,6,6,122], index: 0, kind: input, shape index: {}]   ;;  %s796_s1 = inlined_call_operand.vmem [shape: f32[9,122], index: 1, kind: input, shape index: {}]   ;;  %s797_s2 = inlined_call_operand.hbm [shape: f32[1,122], index: 2, kind: input, shape index: {}]   ;;  %s798_s3 = inlined_call_operand.hbm [shape: f32[1,122], index: 3, kind: input, shape index: {}]   ;;  %s799_s4 = inlined_call_operand.vmem [shape: f32[2,4,4,122], index: 4, kind: output, shape index: {}]  }
   0x1   :  { %10 = vsyncpa [#allocation5], 0  ;;  %s639_s15 = smov 0  }
   0x2 LB: > { %s645_s16 = sadd.s32 4294967295, %s610_s15   ;;  %p474_p0 = scmp.ge.s32.totalorder %s610_s15, 1  ;;  %s610_s15 = sphi %s639_s15, %s16_s15  }
   0x3   : > { %p136_p1 = scmp.lt.s32.totalorder %s610_s15, 3  ;;  %p800_p2 = scmp.eq.s32.totalorder %s645_s16, 0 }
   0x4   : > { %s612_s18 = smov [#allocation2]   ;;  %s613_s20 = smov [#allocation4]  }
   0x5   : > { %p650_p3 = pnand %p474_p0, %p136_p1  ;;  %s152_s19 = sshll.u32 %s612_s18, 4  ;;  %s153_s19 = int_to_ptr.vmem [resolvable:$true] %s152_s19 }
   0x6   : > { %s163_s21 = sshll.u32 %s613_s20, 4  ;;  %s555_s23 = scalar_lea.vmem %s153_s19, 16  ;;  %s164_s21 = int_to_ptr.vmem [resolvable:$true] %s163_s21 }
   0x7   : > { %p523_p4 = pneg %p650_p3  ;;  %p556_p7 = scmp.ne.s32.totalorder %s153_s19, %s555_s23 }
   0x8   : > { %s562_s24 = scalar_lea.vmem %s153_s19, 32  ;;  %p563_p10 = scmp.lt.s32.totalorder %s153_s19, %s153_s19 }
   0x9   : > { %p658_p5 = pnand %p800_p2, %p523_p4  ;;  %p564_p11 = scmp.lt.s32.totalorder %s562_s24, %s555_s23 }
   0xb   : > { %p546_p6 = pneg %p658_p5  ;;  %p565_p12 = por %p564_p11, %p563_p10 }
   0xd   : > { %p558_p8 = pnand %p556_p7, %p546_p6 }
   0xf   : > { %p559_p9 = pneg %p558_p8 }
  0x11   : > { %p566_p13 = pnand %p565_p12, %p559_p9 }
  0x13   : > { %569 = shalt.err (!%p566_p13)
}
  0x14   : > { %526 = dma.hbm_to_vmem [thread:$0]  (!%p658_p5), %s797_s2, 16, %s153_s19, [#allocation3]  }
  0x15   : > { %s581_s27 = scalar_lea.vmem %s164_s21, 16  ;;  %s588_s28 = scalar_lea.vmem %s164_s21, 32 }
  0x16   : > { %p582_p0 = scmp.ne.s32.totalorder %s164_s21, %s581_s27  ;;  %p589_p7 = scmp.lt.s32.totalorder %s164_s21, %s164_s21 }
  0x17   : > { %p590_p8 = scmp.lt.s32.totalorder %s588_s28, %s581_s27 }
  0x18   : > { %p584_p1 = pnand %p582_p0, %p546_p6 }
  0x19   : > { %p591_p2 = por %p590_p8, %p589_p7 }
  0x1a   : > { %p585_p4 = pneg %p584_p1 }
  0x1c   : > { %p592_p10 = pnand %p591_p2, %p585_p4 }
  0x1e   : > { %595 = shalt.err (!%p592_p10)
}
  0x1f   : > { %529 = dma.hbm_to_vmem [thread:$0]  (!%p658_p5), %s798_s3, 16, %s164_s21, [#allocation5]  }
  0x20   : > { %184 = sbr.rel (%p650_p3) target bundleno = 80 (0x50), region = 36  ;;  %p803_p9 = scmp.eq.s32.totalorder (!%p650_p3), %s645_s16, 0 }
  0x25   : > { %601 = dma.done.wait (%p803_p9), [#allocation3], 16   ;;  %p804_p6 = pmov %p803_p9 }
  0x27   : > { %603 = vsyncadd (%p804_p6), [#allocation3], 4294967280  ;;  %p805_p11 = pmov %p804_p6 }
  0x28   : > { %p806_p2 = pmov %p804_p6 }
  0x29   : > { %605 = dma.done.wait (%p805_p11), [#allocation5], 16  }
  0x2a   : > { %607 = vsyncadd (%p806_p2), [#allocation5], 4294967280  ;;  %p214_p12 = scmp.lt.s32.totalorder %s645_s16, 1  ;;  %v230_v0 = vlaneseq  ;;  %v224_v7 = vld [vmem:[%s796_s1] sm:$0xff]  ;;  %vm390_vm0 = vcmask 994304  }
  0x2c   : > { %s808_s16 = smov (!%p214_p12, %s645_s16), 1  ;;  %v231_v1 = vshrl.u32 %v230_v0, 7 }
  0x2d   : > { %s514_s5 = smul.u32 48, %s808_s16  ;;  %s513_s13 = sshll.u32 %s808_s16, 4 }
  0x2e   : > { %v232_v2 = vsub.s32 0, %v231_v1  ;;  %v244_v3 = vsub.s32 1, %v231_v1  ;;  %v260_v4 = vsub.s32 2, %v231_v1  ;;  %v277_v5 = vsub.s32 3, %v231_v1  ;;  %s223_s18 = scalar_lea.vmem %s799_s4, %s513_s13 }
  0x2f   : > { %s698_s8 = scalar_lea.vmem %s795_s0, %s514_s5  ;;  %v293_v6 = vsub.s32 4, %v231_v1  ;;  %v309_v9 = vsub.s32 5, %v231_v1  ;;  %v326_v17 = vsub.s32 6, %v231_v1  ;;  %v342_v18 = vsub.s32 7, %v231_v1 }
  0x30   : > { %v226_v8 = vld [vmem:[%s698_s8] sm:$0xf]  ;;  %v704_v10 = vrot.slane %v224_v7, %v232_v2  ;;  %v707_v12 = vrot.slane %v224_v7, %v244_v3  ;;  %v261_v14 = vrot.slane %v224_v7, %v260_v4  ;;  %v710_v15 = vrot.slane %v224_v7, %v277_v5  ;;  %v484_v16 = vld [vmem:[%s698_s8 + $0x8] sm:$0xf]  ;;  %v485_v33 = vld [vmem:[%s698_s8 + $0x10] sm:$0xf] }
  0x31   : > { %v238_v11 = vld [vmem:[%s698_s8 + $0x1] sm:$0xf]  ;;  %v715_v22 = vrot.slane %v224_v7, %v293_v6  ;;  %v488_v23 = vld [vmem:[%s698_s8 + $0x9] sm:$0xf]  ;;  %v718_v24 = vrot.slane %v224_v7, %v309_v9  ;;  %v496_v34 = vld [vmem:[%s698_s8 + $0x10] sm:$0xf]  ;;  %v729_v35 = vrot.slane %v224_v7, %v326_v17  ;;  %v738_v46 = vrot.slane %v224_v7, %v342_v18 }
  0x32   : > { %v254_v13 = vld [vmem:[%s698_s8 + $0x2] sm:$0xf]  ;;  %v234_v19 = vmul.f32 %v704_v10, %v226_v8  ;;  %v246_v20 = vmul.f32 %v707_v12, %v238_v11  ;;  %v227_v25 = vld [vmem:[%s698_s8 + $0x8] sm:$0xf]  ;;  %v279_v28 = vmul.f32 %v484_v16, %v710_v15  ;;  %v489_v37 = vld [vmem:[%s698_s8 + $0x11] sm:$0xf]  ;;  %v280_v41 = vmul.f32 %v485_v33, %v710_v15 }
  0x33   : > { %v262_v21 = vmul.f32 %v261_v14, %v254_v13  ;;  %v239_v26 = vld [vmem:[%s698_s8 + $0x9] sm:$0xf]  ;;  %v235_v30 = vmul.f32 %v704_v10, %v227_v25  ;;  %v295_v39 = vmul.f32 %v488_v23, %v715_v22  ;;  %v493_v42 = vld [vmem:[%s698_s8 + $0x12] sm:$0xf]  ;;  %v486_v50 = vld [vmem:[%s698_s8 + $0x18] sm:$0xf]  ;;  %v296_v55 = vmul.f32 %v489_v37, %v715_v22 }
  0x34   : > { %v250_v27 = vadd.f32 %v246_v20, %v234_v19  ;;  %v492_v29 = vld [vmem:[%s698_s8 + $0xa] sm:$0xf]  ;;  %v247_v31 = vmul.f32 %v707_v12, %v239_v26  ;;  %v228_v43 = vld [vmem:[%s698_s8 + $0x10] sm:$0xf]  ;;  %v490_v51 = vld [vmem:[%s698_s8 + $0x19] sm:$0xf]  ;;  %v328_v57 = vmul.f32 %v496_v34, %v729_v35  ;;  %v281_v60 = vmul.f32 %v486_v50, %v710_v15 }
  0x35   : > { %v255_v32 = vld [vmem:[%s698_s8 + $0xa] sm:$0xf]  ;;  %v240_v44 = vld [vmem:[%s698_s8 + $0x11] sm:$0xf]  ;;  %v311_v45 = vmul.f32 %v492_v29, %v718_v24  ;;  %v236_v47 = vmul.f32 %v704_v10, %v228_v43  ;;  %v497_v58 = vld [vmem:[%s698_s8 + $0x18] sm:$0xf]  ;;  %v312_v1 = vmul.f32 %v493_v42, %v718_v24  ;;  %v297_v2 = vmul.f32 %v490_v51, %v715_v22 }
  0x36   : > { %v263_v36 = vmul.f32 %v261_v14, %v255_v32  ;;  %v266_v38 = vadd.f32 %v262_v21, %v250_v27  ;;  %v251_v40 = vadd.f32 %v247_v31, %v235_v30  ;;  %v248_v48 = vmul.f32 %v707_v12, %v240_v44  ;;  %v256_v49 = vld [vmem:[%s698_s8 + $0x12] sm:$0xf]  ;;  %v229_v61 = vld [vmem:[%s698_s8 + $0x18] sm:$0xf]  ;;  %v487_v5 = vld [vmem:[%s698_s8 + $0x20] sm:$0xf] }
  0x37   : > { %v500_v53 = vld [vmem:[%s698_s8 + $0x11] sm:$0xf]  ;;  %v264_v56 = vmul.f32 %v261_v14, %v256_v49  ;;  %v241_v62 = vld [vmem:[%s698_s8 + $0x19] sm:$0xf]  ;;  %v508_v6 = vld [vmem:[%s796_s1 + $0x8] ss:$0 sm:$0xff]  ;;  %v237_v11 = vmul.f32 %v704_v10, %v229_v61  ;;  %v329_v20 = vmul.f32 %v497_v58, %v729_v35  ;;  %v282_v10 = vmul.f32 %v487_v5, %v710_v15 }
  0x38   : > { %v283_v52 = vadd.f32 %v279_v28, %v266_v38  ;;  %v267_v54 = vadd.f32 %v263_v36, %v251_v40  ;;  %v252_v59 = vadd.f32 %v248_v48, %v236_v47  ;;  %v494_v3 = vld [vmem:[%s698_s8 + $0x1a] sm:$0xf]  ;;  %v504_v7 = vld [vmem:[%s698_s8 + $0x12] sm:$0xf]  ;;  %v249_v13 = vmul.f32 %v707_v12, %v241_v62  ;;  %v498_v21 = vld [vmem:[%s698_s8 + $0x20] sm:$0xf] }
  0x39   : > { %v257_v4 = vld [vmem:[%s698_s8 + $0x1a] sm:$0xf]  ;;  %v344_v18 = vmul.f32 %v500_v53, %v738_v46  ;;  %v491_v23 = vld [vmem:[%s698_s8 + $0x21] sm:$0xf]  ;;  %v313_v27 = vmul.f32 %v494_v3, %v718_v24  ;;  %v330_v34 = vmul.f32 %v498_v21, %v729_v35  ;;  %v499_v15 = vld [vmem:[%s698_s8 + $0x28] sm:$0xf] }
  0x3a   : > { %v299_v63 = vadd.f32 %v295_v39, %v283_v52  ;;  %v284_v0 = vadd.f32 %v280_v41, %v267_v54  ;;  %v501_v8 = vld [vmem:[%s698_s8 + $0x19] sm:$0xf]  ;;  %v268_v9 = vadd.f32 %v264_v56, %v252_v59  ;;  %v265_v16 = vmul.f32 %v261_v14, %v257_v4  ;;  %v502_v31 = vld [vmem:[%s698_s8 + $0x21] sm:$0xf]  ;;  %v509_v42 = vld [vmem:[#allocation2] ss:$0 sm:$0xff] }
  0x3b   : > { %v505_v25 = vld [vmem:[%s698_s8 + $0x1a] sm:$0xf]  ;;  %v253_v28 = vadd.f32 %v249_v13, %v237_v11  ;;  %v360_v14 = vmul.f32 %v508_v6, %v504_v7  ;;  %v345_v30 = vmul.f32 %v501_v8, %v738_v46  ;;  %v495_v32 = vld [vmem:[%s698_s8 + $0x22] sm:$0xf]  ;;  %v298_v37 = vmul.f32 %v491_v23, %v715_v22  ;;  %v503_v50 = vld [vmem:[%s698_s8 + $0x29] sm:$0xf] }
  0x3c   : > { %v315_v17 = vadd.f32 %v311_v45, %v299_v63  ;;  %v300_v19 = vadd.f32 %v296_v55, %v284_v0  ;;  %v285_v26 = vadd.f32 %v281_v60, %v268_v9  ;;  %v361_v40 = vmul.f32 %v508_v6, %v505_v25  ;;  %v506_v41 = vld [vmem:[%s698_s8 + $0x22] sm:$0xf] }
  0x3d   : > { %v269_v36 = vadd.f32 %v265_v16, %v253_v28  ;;  %v346_v44 = vmul.f32 %v502_v31, %v738_v46  ;;  %v314_v47 = vmul.f32 %v495_v32, %v718_v24  ;;  %v510_v51 = vld [vmem:[#allocation4] ss:$0 sm:$0xff]  ;;  %v362_v22 = vmul.f32 %v508_v6, %v506_v41 }
  0x3e   : > { %v332_v12 = vadd.f32 %v328_v57, %v315_v17  ;;  %v316_v29 = vadd.f32 %v312_v1, %v300_v19  ;;  %v301_v33 = vadd.f32 %v297_v2, %v285_v26  ;;  %v331_v54 = vmul.f32 %v499_v15, %v729_v35  ;;  %v507_v57 = vld [vmem:[%s698_s8 + $0x2a] sm:$0xf] }
  0x3f   : > { %v286_v45 = vadd.f32 %v282_v10, %v269_v36  ;;  %v347_v59 = vmul.f32 %v503_v50, %v738_v46  ;;  %v363_v0 = vmul.f32 %v508_v6, %v507_v57 }
  0x40   : > { %v348_v38 = vadd.f32 %v344_v18, %v332_v12  ;;  %v333_v39 = vadd.f32 %v329_v20, %v316_v29  ;;  %v317_v43 = vadd.f32 %v313_v27, %v301_v33 }
  0x41   : > { %v302_v53 = vadd.f32 %v298_v37, %v286_v45 }
  0x42   : > { %v364_v48 = vadd.f32 %v360_v14, %v348_v38  ;;  %v349_v49 = vadd.f32 %v345_v30, %v333_v39  ;;  %v334_v52 = vadd.f32 %v330_v34, %v317_v43 }
  0x43   : > { %v318_v24 = vadd.f32 %v314_v47, %v302_v53 }
  0x44   : > { %v375_v55 = vmul.f32 %v509_v42, %v364_v48  ;;  %v365_v56 = vadd.f32 %v361_v40, %v349_v49  ;;  %v350_v58 = vadd.f32 %v346_v44, %v334_v52 }
  0x45   : > { %v335_v63 = vadd.f32 %v331_v54, %v318_v24 }
  0x46   : > { %v386_v60 = vadd.f32 %v510_v51, %v375_v55  ;;  %v376_v61 = vmul.f32 %v509_v42, %v365_v56  ;;  %v366_v62 = vadd.f32 %v362_v22, %v350_v58 }
  0x47   : > { %v351_v2 = vadd.f32 %v347_v59, %v335_v63 }
  0x48   : > { %391 = vst.msk [vmem:[%s223_s18] sm:$0xf] %vm390_vm0, %v386_v60  ;;  %v387_v35 = vadd.f32 %v510_v51, %v376_v61  ;;  %v377_v1 = vmul.f32 %v509_v42, %v366_v62 }
  0x49   : > { %v367_v4 = vadd.f32 %v363_v0, %v351_v2 }
  0x4a   : > { %392 = vst.msk [vmem:[%s223_s18 + $0x4] sm:$0xf] %vm390_vm0, %v387_v35  ;;  %v388_v3 = vadd.f32 %v510_v51, %v377_v1 }
  0x4b   : > { %v378_v5 = vmul.f32 %v509_v42, %v367_v4 }
  0x4c   : > { %393 = vst.msk [vmem:[%s223_s18 + $0x8] sm:$0xf] %vm390_vm0, %v388_v3 }
  0x4d   : > { %v389_v7 = vadd.f32 %v510_v51, %v378_v5 }
  0x4f   : > { %394 = vst.msk [vmem:[%s223_s18 + $0xc] sm:$0xf] %vm390_vm0, %v389_v7 }
  0x50 PF: > { %s16_s15 = sadd.s32 1, %s610_s15  }
  0x51   : > { %p13_p3 = scmp.ge.s32.totalorder %s16_s15, 4  }
  0x53   :  { %15 = sbr.rel (!%p13_p3) target bundleno = 2 (0x2), region = 77 }
  0x58   :  { %416 = vsyncpa [#allocation3], 1 }
  0x59   :  { %418 = vsyncpa [#allocation3 + $0x1], 1 }
  0x5a   :  { %419 = vsyncpa [#allocation5], 1 }

// kernel: shufflenet2_forward.99
= control target key start
LH: loop header
LB: loop body
LE: loop exit
PB: predicated region body
PF: predicated region fallthrough
CT: control target
= control target key end

     0   :  { %12 = vsyncpa [#allocation3], 0  ;;  %s1034_s0 = inlined_call_operand.vmem [shape: f32[2,3,3,244], index: 0, kind: input, shape index: {}]   ;;  %s1035_s1 = inlined_call_operand.vmem [shape: f32[2,3,3,244], index: 1, kind: input, shape index: {}]   ;;  %s1036_s2 = inlined_call_operand.vmem [shape: f32[2,3,3,244], index: 2, kind: input, shape index: {}]   ;;  %s1037_s3 = inlined_call_operand.vmem [shape: f32[2,3,3,244], index: 3, kind: input, shape index: {}]   ;;  %s1038_s4 = inlined_call_operand.vmem [shape: f32[9,244], index: 4, kind: input, shape index: {}]   ;;  %s1039_s5 = inlined_call_operand.hbm [shape: f32[1,244], index: 5, kind: input, shape index: {}]   ;;  %s1040_s6 = inlined_call_operand.hbm [shape: f32[1,244], index: 6, kind: input, shape index: {}]   ;;  %s1041_s7 = inlined_call_operand.vmem [shape: f32[2,2,2,244], index: 7, kind: output, shape index: {}]  }
   0x1   :  { %13 = vsyncpa [#allocation5], 0  ;;  %s896_s24 = smov 0  }
   0x2 LB: > { %s902_s25 = sadd.s32 4294967295, %s851_s24   ;;  %p724_p0 = scmp.ge.s32.totalorder %s851_s24, 1  ;;  %s851_s24 = sphi %s896_s24, %s19_s24  }
   0x3   : > { %p217_p1 = scmp.lt.s32.totalorder %s851_s24, 3  ;;  %p1042_p2 = scmp.eq.s32.totalorder %s902_s25, 0 }
   0x4   : > { %s853_s27 = smov [#allocation2]   ;;  %s854_s29 = smov [#allocation4]  }
   0x5   : > { %p907_p3 = pnand %p724_p0, %p217_p1  ;;  %s233_s28 = sshll.u32 %s853_s27, 4  ;;  %s234_s28 = int_to_ptr.vmem [resolvable:$true] %s233_s28 }
   0x6   : > { %s244_s30 = sshll.u32 %s854_s29, 4  ;;  %s796_s9 = scalar_lea.vmem %s234_s28, 32  ;;  %s245_s30 = int_to_ptr.vmem [resolvable:$true] %s244_s30 }
   0x7   : > { %s1044_s26 = scalar_select %p907_p3, 1, 0 }
   0x8   : > { %p763_p4 = pneg %p907_p3  ;;  %p797_p7 = scmp.ne.s32.totalorder %s234_s28, %s796_s9 }
   0x9   : > { %p804_p10 = scmp.lt.s32.totalorder %s234_s28, %s234_s28  ;;  %p805_p11 = scmp.lt.s32.totalorder %s796_s9, %s796_s9 }
   0xa   : > { %p915_p5 = pnand %p1042_p2, %p763_p4 }
   0xb   : > { %p806_p12 = por %p805_p11, %p804_p10 }
   0xc   : > { %p787_p6 = pneg %p915_p5 }
   0xe   : > { %p799_p8 = pnand %p797_p7, %p787_p6 }
  0x10   : > { %p800_p9 = pneg %p799_p8 }
  0x12   : > { %p807_p13 = pnand %p806_p12, %p800_p9 }
  0x14   : > { %810 = shalt.err (!%p807_p13)
}
  0x15   : > { %766 = dma.hbm_to_vmem [thread:$0]  (!%p915_p5), %s1039_s5, 32, %s234_s28, [#allocation3]  }
  0x16   : > { %s822_s12 = scalar_lea.vmem %s245_s30, 32  ;;  %p830_p7 = scmp.lt.s32.totalorder %s245_s30, %s245_s30 }
  0x17   : > { %p823_p0 = scmp.ne.s32.totalorder %s245_s30, %s822_s12  ;;  %p831_p8 = scmp.lt.s32.totalorder %s822_s12, %s822_s12 }
  0x19   : > { %p825_p1 = pnand %p823_p0, %p787_p6  ;;  %p832_p2 = por %p831_p8, %p830_p7 }
  0x1b   : > { %p826_p4 = pneg %p825_p1 }
  0x1d   : > { %p833_p3 = pnand %p832_p2, %p826_p4 }
  0x1f   : > { %836 = shalt.err (!%p833_p3)
}
  0x20   : > { %769 = dma.hbm_to_vmem [thread:$0]  (!%p915_p5), %s1040_s6, 32, %s245_s30, [#allocation5]  }
  0x21   : > { %p1046_p9 = scmp.ne.s32.totalorder %s1044_s26, 0 }
  0x22   : > { %p1047_p10 = scmp.eq.s32.totalorder (!%p1046_p9), %s902_s25, 0 }
  0x23   : > { %289 = sbr.rel (%p1046_p9) target bundleno = 83 (0x53), region = 48 }
  0x28   : > { %842 = dma.done.wait (%p1047_p10), [#allocation3], 32   ;;  %p1048_p6 = pmov %p1047_p10 }
  0x2a   : > { %844 = vsyncadd (%p1048_p6), [#allocation3], 4294967264  ;;  %p1049_p11 = pmov %p1048_p6 }
  0x2b   : > { %p1050_p2 = pmov %p1048_p6 }
  0x2c   : > { %846 = dma.done.wait (%p1049_p11), [#allocation5], 32  }
  0x2d   : > { %848 = vsyncadd (%p1050_p2), [#allocation5], 4294967264  ;;  %p340_p3 = scmp.lt.s32.totalorder %s902_s25, 1  ;;  %v371_v0 = vlaneseq  ;;  %v365_v7 = vld [vmem:[%s1038_s4] sm:$0xff]  ;;  %v366_v8 = vld [vmem:[%s1038_s4 + $0x8] sm:$0xff]  ;;  %vm604_vm0 = vcmask 1041408  }
  0x2e   : > { %v747_v40 = vld [vmem:[%s1038_s4 + $0x10] ss:$0 sm:$0xff]  ;;  %v748_v41 = vld [vmem:[%s1038_s4 + $0x18] ss:$0 sm:$0xff]  ;;  %vm605_vm1 = vcmask 945154  }
  0x2f   : > { %s1052_s25 = smov (!%p340_p3, %s902_s25), 1  ;;  %v951_v1 = vshrl.u32 %v371_v0, 7  ;;  %v543_v62 = vcombine.low %v747_v40, %v748_v41  ;;  %vm606_vm2 = vmor %vm605_vm1, %vm604_vm0 }
  0x30   : > { %s954_s15 = smul.u32 24, %s1052_s25 }
  0x31   : > { %v957_v2 = vsub.s32 0, %v951_v1  ;;  %v960_v3 = vsub.s32 1, %v951_v1  ;;  %v407_v4 = vsub.s32 2, %v951_v1  ;;  %v434_v5 = vsub.s32 3, %v951_v1 }
  0x32   : > { %s968_s18 = scalar_lea.vmem %s1034_s0, %s954_s15  ;;  %s974_s21 = scalar_lea.vmem %s1035_s1, %s954_s15  ;;  %v452_v6 = vsub.s32 4, %v951_v1  ;;  %v470_v9 = vsub.s32 5, %v951_v1  ;;  %v498_v10 = vsub.s32 6, %v951_v1  ;;  %v517_v11 = vsub.s32 7, %v951_v1 }
  0x33   : > { %s990_s30 = scalar_lea.vmem %s1036_s2, %s954_s15  ;;  %v369_v12 = vld [vmem:[%s968_s18] sm:$0x33]  ;;  %v374_v13 = vrot.slane %v365_v7, %v957_v2  ;;  %v378_v14 = vrot.slane %v366_v8, %v957_v2  ;;  %v390_v15 = vrot.slane %v365_v7, %v960_v3  ;;  %v394_v16 = vrot.slane %v366_v8, %v960_v3  ;;  %v370_v17 = vld [vmem:[%s968_s18 + $0x8] sm:$0x33]  ;;  %s359_s10 = scalar_lea.vmem %s1037_s3, %s954_s15 }
  0x34   : > { %v385_v18 = vld [vmem:[%s974_s21] sm:$0x33]  ;;  %v386_v19 = vld [vmem:[%s974_s21 + $0x8] sm:$0x33]  ;;  %v408_v20 = vrot.slane %v365_v7, %v407_v4  ;;  %v412_v21 = vrot.slane %v366_v8, %v407_v4  ;;  %v435_v22 = vrot.slane %v365_v7, %v434_v5  ;;  %v439_v23 = vrot.slane %v366_v8, %v434_v5  ;;  %s753_s15 = sshll.u32 %s1052_s25, 3 }
  0x35   : > { %v381_v24 = vcombine.low %v374_v13, %v378_v14  ;;  %v397_v25 = vcombine.low %v390_v15, %v394_v16  ;;  %v453_v26 = vrot.slane %v365_v7, %v452_v6  ;;  %v457_v27 = vrot.slane %v366_v8, %v452_v6  ;;  %v430_v29 = vld [vmem:[%s990_s30] sm:$0x33]  ;;  %v404_v38 = vld [vmem:[%s968_s18 + $0x8] sm:$0x66] }
  0x36   : > { %v415_v28 = vcombine.low %v408_v20, %v412_v21  ;;  %v442_v30 = vcombine.low %v435_v22, %v439_v23  ;;  %v471_v31 = vrot.slane %v365_v7, %v470_v9  ;;  %v475_v32 = vrot.slane %v366_v8, %v470_v9  ;;  %v403_v37 = vld [vmem:[%s968_s18] sm:$0x66]  ;;  %v431_v42 = vld [vmem:[%s990_s30 + $0x8] sm:$0x33]  ;;  %v744_v23 = vld [vmem:[%s974_s21 + $0x10] sm:$0x33] }
  0x37   : > { %v383_v33 = vmul.f32 %v381_v24, %v369_v12  ;;  %v384_v34 = vmul.f32 %v381_v24, %v370_v17  ;;  %v399_v35 = vmul.f32 %v397_v25, %v385_v18  ;;  %v400_v36 = vmul.f32 %v397_v25, %v386_v19  ;;  %v448_v51 = vld [vmem:[%s359_s10] sm:$0x33]  ;;  %v467_v53 = vld [vmem:[%s990_s30 + $0x8] sm:$0x66] }
  0x38   : > { %v416_v39 = vrot.slane %v415_v28, 7  ;;  %v444_v43 = vmul.f32 %v442_v30, %v430_v29  ;;  %v460_v44 = vcombine.low %v453_v26, %v457_v27  ;;  %v478_v45 = vcombine.low %v471_v31, %v475_v32  ;;  %v466_v52 = vld [vmem:[%s990_s30] sm:$0x66]  ;;  %v449_v54 = vld [vmem:[%s359_s10 + $0x8] sm:$0x33] }
  0x39   : > { %v499_v46 = vrot.slane %v365_v7, %v498_v10  ;;  %v401_v47 = vadd.f32 %v399_v35, %v383_v33  ;;  %v402_v48 = vadd.f32 %v400_v36, %v384_v34  ;;  %v503_v56 = vrot.slane %v366_v8, %v498_v10  ;;  %v741_v13 = vld [vmem:[%s968_s18 + $0x8] sm:$0x33]  ;;  %v558_v19 = vld [vmem:[#allocation2] sm:$0x3]  ;;  %v572_v26 = vld [vmem:[#allocation4] sm:$0x3] }
  0x3a   : > { %v418_v49 = vmul.f32 %v416_v39, %v403_v37  ;;  %v419_v50 = vmul.f32 %v416_v39, %v404_v38  ;;  %v479_v55 = vrot.slane %v478_v45, 7  ;;  %v518_v57 = vrot.slane %v365_v7, %v517_v11  ;;  %v745_v14 = vld [vmem:[%s968_s18 + $0x8] sm:$0x66] }
  0x3b   : > { %v522_v58 = vrot.slane %v366_v8, %v517_v11  ;;  %v445_v61 = vmul.f32 %v442_v30, %v431_v42  ;;  %v462_v63 = vmul.f32 %v460_v44, %v448_v51  ;;  %v506_v5 = vcombine.low %v499_v46, %v503_v56  ;;  %v742_v8 = vld [vmem:[%s968_s18 + $0x10] sm:$0x33]  ;;  %v743_v21 = vld [vmem:[%s974_s21 + $0x8] sm:$0x33] }
  0x3c   : > { %v737_v59 = vrot.slane %v418_v49, 9  ;;  %v738_v60 = vrot.slane %v419_v50, 9  ;;  %v481_v0 = vmul.f32 %v479_v55, %v466_v52  ;;  %v482_v4 = vmul.f32 %v479_v55, %v467_v53  ;;  %v746_v11 = vld [vmem:[%s968_s18 + $0x10] sm:$0x66]  ;;  %s364_s18 = scalar_lea.vmem %s1041_s7, %s753_s15 }
  0x3d   : > { %v463_v12 = vmul.f32 %v460_v44, %v449_v54  ;;  %v544_v10 = vrot.slane %v543_v62, 7  ;;  %v525_v7 = vcombine.low %v518_v57, %v522_v58  ;;  %v508_v20 = vmul.f32 %v741_v13, %v506_v5 }
  0x3e   : > { %v428_v6 = vadd.f32 %v737_v59, %v401_v47  ;;  %v429_v9 = vadd.f32 %v738_v60, %v402_v48  ;;  %v739_v17 = vrot.slane %v481_v0, 9  ;;  %v740_v18 = vrot.slane %v482_v4, 9 }
  0x3f   : > { %v546_v22 = vmul.f32 %v745_v14, %v544_v10  ;;  %v509_v27 = vmul.f32 %v742_v8, %v506_v5  ;;  %v547_v28 = vmul.f32 %v746_v11, %v544_v10  ;;  %v563_v29 = vrot.slane %v558_v19, %v957_v2 }
  0x40   : > { %v446_v15 = vadd.f32 %v444_v43, %v428_v6  ;;  %v447_v16 = vadd.f32 %v445_v61, %v429_v9  ;;  %v567_v30 = vrot.slane %v558_v19, %v960_v3  ;;  %v855_v31 = vmov 1983009808  }
  0x41   : > { %v589_v32 = vunpack.c.l.s4 %v855_v31  ;;  %v527_v34 = vmul.f32 %v743_v21, %v525_v7  ;;  %v528_v36 = vmul.f32 %v744_v23, %v525_v7  ;;  %v577_v37 = vrot.slane %v572_v26, %v957_v2 }
  0x42   : > { %v464_v24 = vadd.f32 %v462_v63, %v446_v15  ;;  %v465_v25 = vadd.f32 %v463_v12, %v447_v16  ;;  %v581_v38 = vrot.slane %v572_v26, %v960_v3  ;;  %v749_v40 = vrot.slane %v546_v22, 9 }
  0x43   : > { %v750_v42 = vrot.slane %v547_v28, 9  ;;  %v568_v44 = vcombine.low %v563_v29, %v567_v30  ;;  %v590_v45 = vunpack.c.0.s8 %v589_v32 }
  0x44   : > { %v491_v33 = vadd.f32 %v739_v17, %v464_v24  ;;  %v492_v35 = vadd.f32 %v740_v18, %v465_v25  ;;  %v582_v48 = vcombine.low %v577_v37, %v581_v38 }
  0x45   : > { %v593_v51 = vsub.s32 %v590_v45, %v951_v1 }
  0x46   : > { %v510_v39 = vadd.f32 %v508_v20, %v491_v33  ;;  %v511_v41 = vadd.f32 %v509_v27, %v492_v35 }
  0x48   : > { %v529_v43 = vadd.f32 %v527_v34, %v510_v39  ;;  %v530_v46 = vadd.f32 %v528_v36, %v511_v41 }
  0x4a   : > { %v556_v47 = vadd.f32 %v749_v40, %v529_v43  ;;  %v557_v49 = vadd.f32 %v750_v42, %v530_v46 }
  0x4c   : > { %v570_v50 = vmul.f32 %v568_v44, %v556_v47  ;;  %v571_v2 = vmul.f32 %v568_v44, %v557_v49 }
  0x4e   : > { %v584_v52 = vadd.f32 %v582_v48, %v570_v50  ;;  %v585_v3 = vadd.f32 %v582_v48, %v571_v2 }
  0x50   : > { %v594_v53 = vrot.slane %v584_v52, %v593_v51  ;;  %v601_v54 = vrot.slane %v585_v3, %v593_v51 }
  0x52   : > { %607 = vst.msk [vmem:[%s364_s18] sm:$0xf] %vm606_vm2, %v594_v53  ;;  %608 = vst.msk [vmem:[%s364_s18 + $0x4] sm:$0xf] %vm606_vm2, %v601_v54 }
  0x53 PF: > { %s19_s24 = sadd.s32 1, %s851_s24  }
  0x54   : > { %p16_p5 = scmp.ge.s32.totalorder %s19_s24, 4  }
  0x56   :  { %18 = sbr.rel (!%p16_p5) target bundleno = 2 (0x2), region = 98 }
  0x5b   :  { %630 = vsyncpa [#allocation3], 1 }
  0x5c   :  { %632 = vsyncpa [#allocation3 + $0x1], 1 }
  0x5d   :  { %633 = vsyncpa [#allocation5], 1 }

// kernel: shufflenet2_forward.100
= control target key start
LH: loop header
LB: loop body
LE: loop exit
PB: predicated region body
PF: predicated region fallthrough
CT: control target
= control target key end

     0   :  { %v266_v34 = vlaneseq  ;;  %s538_s1 = inlined_call_operand.vmem [shape: bf16[256,256], index: 1, kind: input, shape index: {}]   ;;  %s539_s0 = inlined_call_operand.vmem [shape: bf16[16,256], index: 0, kind: input, shape index: {}]   ;;  %s540_s2 = inlined_call_operand.vmem [shape: f32[1,256], index: 2, kind: input, shape index: {}]   ;;  %s541_s3 = inlined_call_operand.vmem [shape: f32[1,256], index: 3, kind: input, shape index: {}]   ;;  %s542_s4 = inlined_call_operand.vmem [shape: f32[16,256], index: 4, kind: output, shape index: {}]  }
   0x1   :  { %v342_v0 = vld [vmem:[%s538_s1 + $0x74] ss:$8 sps:$4 sm:$0xff]   ;;  %v344_v1 = vld [vmem:[%s538_s1 + $0x70] ss:$8 sps:$4 sm:$0xff]   ;;  %v345_v2 = vld [vmem:[%s538_s1 + $0x64] ss:$8 sps:$4 sm:$0xff]  }
   0x2   :  { %221 = vmatprep.subr.bf16.mxu0 %v342_v0  ;;  %v347_v3 = vld [vmem:[%s538_s1 + $0x60] ss:$8 sps:$4 sm:$0xff]   ;;  %v348_v4 = vld [vmem:[%s538_s1 + $0x54] ss:$8 sps:$4 sm:$0xff]   ;;  %v350_v5 = vld [vmem:[%s538_s1 + $0x50] ss:$8 sps:$4 sm:$0xff]  }
   0x3   :  { %222 = vmatpush1.bf16.msra.mxu0 %v344_v1  ;;  %v351_v6 = vld [vmem:[%s538_s1 + $0x44] ss:$8 sps:$4 sm:$0xff]   ;;  %v353_v7 = vld [vmem:[%s538_s1 + $0x40] ss:$8 sps:$4 sm:$0xff]   ;;  %v354_v8 = vld [vmem:[%s538_s1 + $0x34] ss:$8 sps:$4 sm:$0xff]  }
   0x4   :  { %223 = vmatprep.subr.bf16.mxu0 %v345_v2  ;;  %v356_v9 = vld [vmem:[%s538_s1 + $0x30] ss:$8 sps:$4 sm:$0xff]   ;;  %v357_v10 = vld [vmem:[%s538_s1 + $0x24] ss:$8 sps:$4 sm:$0xff]   ;;  %v359_v11 = vld [vmem:[%s538_s1 + $0x20] ss:$8 sps:$4 sm:$0xff]  }
   0x5   :  { %v360_v12 = vld [vmem:[%s538_s1 + $0x14] ss:$8 sps:$4 sm:$0xff]   ;;  %v392_v13 = vld [vmem:[%s539_s0 + $0x4] ss:$8 sps:$4 sm:$0xff]   ;;  %v362_v14 = vld [vmem:[%s538_s1 + $0x10] ss:$8 sps:$4 sm:$0xff]  }
   0x6   :  { %v363_v15 = vld [vmem:[%s538_s1 + $0x4] ss:$8 sps:$4 sm:$0xff]   ;;  %253 = vmatprep.mubr.bf16.mxu0 %v392_v13  ;;  %v365_v16 = vld [vmem:[%s538_s1] ss:$8 sps:$4 sm:$0xff]   ;;  %v366_v17 = vld [vmem:[%s538_s1 + $0xf4] ss:$8 sps:$4 sm:$0xff]  }
   0x7   :  { %224 = vmatpush1.bf16.msra.mxu0 %v347_v3  ;;  %v368_v18 = vld [vmem:[%s538_s1 + $0xf0] ss:$8 sps:$4 sm:$0xff]   ;;  %v369_v19 = vld [vmem:[%s538_s1 + $0xe4] ss:$8 sps:$4 sm:$0xff]   ;;  %v371_v20 = vld [vmem:[%s538_s1 + $0xe0] ss:$8 sps:$4 sm:$0xff]  }
   0x8   :  { %225 = vmatprep.subr.bf16.mxu0 %v348_v4  ;;  %v372_v21 = vld [vmem:[%s538_s1 + $0xd4] ss:$8 sps:$4 sm:$0xff]   ;;  %v374_v22 = vld [vmem:[%s538_s1 + $0xd0] ss:$8 sps:$4 sm:$0xff]   ;;  %v375_v23 = vld [vmem:[%s538_s1 + $0xc4] ss:$8 sps:$4 sm:$0xff]  }
   0x9   :  { %v377_v24 = vld [vmem:[%s538_s1 + $0xc0] ss:$8 sps:$4 sm:$0xff]   ;;  %v378_v25 = vld [vmem:[%s538_s1 + $0xb4] ss:$8 sps:$4 sm:$0xff]   ;;  %v380_v26 = vld [vmem:[%s538_s1 + $0xb0] ss:$8 sps:$4 sm:$0xff]  }
   0xa   :  { %v381_v27 = vld [vmem:[%s538_s1 + $0xa4] ss:$8 sps:$4 sm:$0xff]   ;;  %v383_v28 = vld [vmem:[%s538_s1 + $0xa0] ss:$8 sps:$4 sm:$0xff]   ;;  %v384_v29 = vld [vmem:[%s538_s1 + $0x94] ss:$8 sps:$4 sm:$0xff]  }
   0xb   :  { %226 = vmatpush1.bf16.msra.mxu0 %v350_v5  ;;  %v386_v30 = vld [vmem:[%s538_s1 + $0x90] ss:$8 sps:$4 sm:$0xff]   ;;  %v387_v31 = vld [vmem:[%s538_s1 + $0x84] ss:$8 sps:$4 sm:$0xff]   ;;  %v389_v32 = vld [vmem:[%s538_s1 + $0x80] ss:$8 sps:$4 sm:$0xff]  }
   0xc   :  { %227 = vmatprep.subr.bf16.mxu0 %v351_v6  ;;  %v390_v33 = vld [vmem:[%s539_s0] ss:$8 sps:$4 sm:$0xff]   ;;  %v267_v35 = vshrl.u32 %v266_v34, 7 }
   0xd   :  { %v264_v37 = vld [vmem:[%s540_s2] sm:$0x3] }
   0xe   :  { %v268_v36 = vsub.s32 0, %v267_v35  ;;  %v272_v38 = vsub.s32 1, %v267_v35  ;;  %v280_v39 = vld [vmem:[%s541_s3] sm:$0x3] }
   0xf   :  { %228 = vmatpush1.bf16.msra.mxu0 %v353_v7 }
  0x10   :  { %229 = vmatprep.subr.bf16.mxu0 %v354_v8  ;;  %v269_v40 = vrot.slane %v264_v37, %v268_v36  ;;  %v285_v41 = vrot.slane %v280_v39, %v268_v36  ;;  %v273_v42 = vrot.slane %v264_v37, %v272_v38  ;;  %v289_v45 = vrot.slane %v280_v39, %v272_v38 }
  0x13   :  { %230 = vmatpush1.bf16.msra.mxu0 %v356_v9 }
  0x14   :  { %231 = vmatprep.subr.bf16.mxu0 %v357_v10 }
  0x17   :  { %232 = vmatpush1.bf16.msra.mxu0 %v359_v11 }
  0x18   :  { %233 = vmatprep.subr.bf16.mxu0 %v360_v12 }
  0x1b   :  { %234 = vmatpush1.bf16.msra.mxu0 %v362_v14 }
  0x1c   :  { %235 = vmatprep.subr.bf16.mxu0 %v363_v15 }
  0x1f   :  { %236 = vmatpush1.bf16.msra.mxu0 %v365_v16 }
  0x20   :  { %237 = vmatprep.subr.bf16.mxu0 %v366_v17 }
  0x23   :  { %238 = vmatpush2.bf16.msra.mxu0 %v368_v18 }
  0x24   :  { %239 = vmatprep.subr.bf16.mxu0 %v369_v19 }
  0x27   :  { %240 = vmatpush2.bf16.msra.mxu0 %v371_v20 }
  0x28   :  { %241 = vmatprep.subr.bf16.mxu0 %v372_v21 }
  0x2b   :  { %242 = vmatpush2.bf16.msra.mxu0 %v374_v22 }
  0x2c   :  { %243 = vmatprep.subr.bf16.mxu0 %v375_v23 }
  0x2f   :  { %244 = vmatpush2.bf16.msra.mxu0 %v377_v24 }
  0x30   :  { %245 = vmatprep.subr.bf16.mxu0 %v378_v25 }
  0x33   :  { %246 = vmatpush2.bf16.msra.mxu0 %v380_v26 }
  0x34   :  { %247 = vmatprep.subr.bf16.mxu0 %v381_v27 }
  0x37   :  { %248 = vmatpush2.bf16.msra.mxu0 %v383_v28 }
  0x38   :  { %249 = vmatprep.subr.bf16.mxu0 %v384_v29 }
  0x3b   :  { %250 = vmatpush2.bf16.msra.mxu0 %v386_v30 }
  0x3c   :  { %251 = vmatprep.subr.bf16.mxu0 %v387_v31 }
  0x3f   :  { %252 = vmatpush2.bf16.msra.mxu0 %v389_v32 }
  0x42   :  { %254 = vmatmul.mubr.bf16.vlgmr.msra.gmra.mxu0 %v390_v33 }
 0x102   :  { %v255_v43 = vpop.f32.mrf.mxu0 }
 0x103   :  { %v276_v44 = vmul.f32 %v269_v40, %v255_v43 }
 0x104   :  { %v257_v46 = vpop.f32.mrf.mxu0 }
 0x105   :  { %v292_v47 = vadd.f32 %v285_v41, %v276_v44  ;;  %v277_v48 = vmul.f32 %v273_v42, %v257_v46 }
 0x106   :  { %v259_v49 = vpop.f32.mrf.mxu0 }
 0x107   :  { %v296_v50 = vmax.f32 %v292_v47, 0.0  ;;  %v293_v51 = vadd.f32 %v289_v45, %v277_v48  ;;  %v278_v52 = vmul.f32 %v269_v40, %v259_v49 }
 0x108   :  { %v261_v53 = vpop.f32.mrf.mxu0 }
 0x109   :  { %300 = vst [vmem:[%s542_s4] sm:$0xff] %v296_v50  ;;  %v297_v54 = vmax.f32 %v293_v51, 0.0  ;;  %v294_v55 = vadd.f32 %v285_v41, %v278_v52  ;;  %v279_v56 = vmul.f32 %v273_v42, %v261_v53 }
 0x10b   :  { %301 = vst [vmem:[%s542_s4 + $0x8] sm:$0xff] %v297_v54  ;;  %v298_v57 = vmax.f32 %v294_v55, 0.0  ;;  %v295_v58 = vadd.f32 %v289_v45, %v279_v56 }
 0x10d   :  { %302 = vst [vmem:[%s542_s4 + $0x10] sm:$0xff] %v298_v57  ;;  %v299_v59 = vmax.f32 %v295_v58, 0.0 }
 0x10f   :  { %303 = vst [vmem:[%s542_s4 + $0x18] sm:$0xff] %v299_v59 }

// kernel: shufflenet2_forward.101
= control target key start
LH: loop header
LB: loop body
LE: loop exit
PB: predicated region body
PF: predicated region fallthrough
CT: control target
= control target key end

     0   :  { %v288_v36 = vlaneseq  ;;  %s631_s1 = inlined_call_operand.vmem [shape: bf16[256,256], index: 1, kind: input, shape index: {}]   ;;  %s632_s0 = inlined_call_operand.vmem [shape: bf16[32,256], index: 0, kind: input, shape index: {}]   ;;  %s633_s2 = inlined_call_operand.vmem [shape: f32[1,256], index: 2, kind: input, shape index: {}]   ;;  %s634_s3 = inlined_call_operand.vmem [shape: f32[1,256], index: 3, kind: input, shape index: {}]   ;;  %s635_s4 = inlined_call_operand.vmem [shape: f32[32,256], index: 4, kind: output, shape index: {}]  }
   0x1   :  { %v414_v0 = vld [vmem:[%s631_s1 + $0x74] ss:$8 sps:$4 sm:$0xff]   ;;  %v416_v1 = vld [vmem:[%s631_s1 + $0x70] ss:$8 sps:$4 sm:$0xff]   ;;  %v417_v2 = vld [vmem:[%s631_s1 + $0x64] ss:$8 sps:$4 sm:$0xff]  }
   0x2   :  { %233 = vmatprep.subr.bf16.mxu0 %v414_v0  ;;  %382 = vmatprep.subr.bf16.mxu1 %v414_v0  ;;  %v419_v3 = vld [vmem:[%s631_s1 + $0x60] ss:$8 sps:$4 sm:$0xff]   ;;  %v420_v4 = vld [vmem:[%s631_s1 + $0x54] ss:$8 sps:$4 sm:$0xff]   ;;  %v422_v5 = vld [vmem:[%s631_s1 + $0x50] ss:$8 sps:$4 sm:$0xff]  }
   0x3   :  { %234 = vmatpush1.bf16.msra.mxu0 %v416_v1  ;;  %398 = vmatpush1.bf16.msra.mxu1 %v416_v1  ;;  %v423_v6 = vld [vmem:[%s631_s1 + $0x44] ss:$8 sps:$4 sm:$0xff]   ;;  %v425_v7 = vld [vmem:[%s631_s1 + $0x40] ss:$8 sps:$4 sm:$0xff]   ;;  %v426_v8 = vld [vmem:[%s631_s1 + $0x34] ss:$8 sps:$4 sm:$0xff]  }
   0x4   :  { %235 = vmatprep.subr.bf16.mxu0 %v417_v2  ;;  %383 = vmatprep.subr.bf16.mxu1 %v417_v2  ;;  %v428_v9 = vld [vmem:[%s631_s1 + $0x30] ss:$8 sps:$4 sm:$0xff]   ;;  %v429_v10 = vld [vmem:[%s631_s1 + $0x24] ss:$8 sps:$4 sm:$0xff]   ;;  %v431_v11 = vld [vmem:[%s631_s1 + $0x20] ss:$8 sps:$4 sm:$0xff]  }
   0x5   :  { %v432_v12 = vld [vmem:[%s631_s1 + $0x14] ss:$8 sps:$4 sm:$0xff]   ;;  %v464_v13 = vld [vmem:[%s632_s0 + $0x4] ss:$8 sps:$4 sm:$0xff]   ;;  %v434_v14 = vld [vmem:[%s631_s1 + $0x10] ss:$8 sps:$4 sm:$0xff]  }
   0x6   :  { %v467_v15 = vld [vmem:[%s632_s0 + $0x14] ss:$8 sps:$4 sm:$0xff]   ;;  %v435_v16 = vld [vmem:[%s631_s1 + $0x4] ss:$8 sps:$4 sm:$0xff]   ;;  %265 = vmatprep.mubr.bf16.mxu0 %v464_v13  ;;  %v437_v17 = vld [vmem:[%s631_s1] ss:$8 sps:$4 sm:$0xff]  }
   0x7   :  { %236 = vmatpush1.bf16.msra.mxu0 %v419_v3  ;;  %399 = vmatpush1.bf16.msra.mxu1 %v419_v3  ;;  %v438_v18 = vld [vmem:[%s631_s1 + $0xf4] ss:$8 sps:$4 sm:$0xff]   ;;  %v440_v19 = vld [vmem:[%s631_s1 + $0xf0] ss:$8 sps:$4 sm:$0xff]   ;;  %v441_v20 = vld [vmem:[%s631_s1 + $0xe4] ss:$8 sps:$4 sm:$0xff]  }
   0x8   :  { %237 = vmatprep.subr.bf16.mxu0 %v420_v4  ;;  %384 = vmatprep.subr.bf16.mxu1 %v420_v4  ;;  %v443_v21 = vld [vmem:[%s631_s1 + $0xe0] ss:$8 sps:$4 sm:$0xff]   ;;  %v444_v22 = vld [vmem:[%s631_s1 + $0xd4] ss:$8 sps:$4 sm:$0xff]   ;;  %v446_v23 = vld [vmem:[%s631_s1 + $0xd0] ss:$8 sps:$4 sm:$0xff]  }
   0x9   :  { %275 = vmatprep.mubr.bf16.mxu1 %v467_v15  ;;  %v447_v24 = vld [vmem:[%s631_s1 + $0xc4] ss:$8 sps:$4 sm:$0xff]   ;;  %v449_v25 = vld [vmem:[%s631_s1 + $0xc0] ss:$8 sps:$4 sm:$0xff]   ;;  %v450_v26 = vld [vmem:[%s631_s1 + $0xb4] ss:$8 sps:$4 sm:$0xff]  }
   0xa   :  { %v452_v27 = vld [vmem:[%s631_s1 + $0xb0] ss:$8 sps:$4 sm:$0xff]   ;;  %v453_v28 = vld [vmem:[%s631_s1 + $0xa4] ss:$8 sps:$4 sm:$0xff]   ;;  %v455_v29 = vld [vmem:[%s631_s1 + $0xa0] ss:$8 sps:$4 sm:$0xff]  }
   0xb   :  { %238 = vmatpush1.bf16.msra.mxu0 %v422_v5  ;;  %400 = vmatpush1.bf16.msra.mxu1 %v422_v5  ;;  %v456_v30 = vld [vmem:[%s631_s1 + $0x94] ss:$8 sps:$4 sm:$0xff]   ;;  %v458_v31 = vld [vmem:[%s631_s1 + $0x90] ss:$8 sps:$4 sm:$0xff]   ;;  %v459_v32 = vld [vmem:[%s631_s1 + $0x84] ss:$8 sps:$4 sm:$0xff]  }
   0xc   :  { %239 = vmatprep.subr.bf16.mxu0 %v423_v6  ;;  %385 = vmatprep.subr.bf16.mxu1 %v423_v6  ;;  %v461_v33 = vld [vmem:[%s631_s1 + $0x80] ss:$8 sps:$4 sm:$0xff]   ;;  %v465_v35 = vld [vmem:[%s632_s0 + $0x10] ss:$8 sps:$4 sm:$0xff]   ;;  %v289_v37 = vshrl.u32 %v288_v36, 7 }
   0xd   :  { %v462_v34 = vld [vmem:[%s632_s0] ss:$8 sps:$4 sm:$0xff]  }
   0xe   :  { %v290_v38 = vsub.s32 0, %v289_v37  ;;  %v286_v39 = vld [vmem:[%s633_s2] sm:$0x3]  ;;  %v294_v40 = vsub.s32 1, %v289_v37 }
   0xf   :  { %240 = vmatpush1.bf16.msra.mxu0 %v425_v7  ;;  %401 = vmatpush1.bf16.msra.mxu1 %v425_v7  ;;  %v306_v41 = vld [vmem:[%s634_s3] sm:$0x3] }
  0x10   :  { %241 = vmatprep.subr.bf16.mxu0 %v426_v8  ;;  %386 = vmatprep.subr.bf16.mxu1 %v426_v8  ;;  %v291_v42 = vrot.slane %v286_v39, %v290_v38  ;;  %v311_v43 = vrot.slane %v306_v41, %v290_v38  ;;  %v295_v44 = vrot.slane %v286_v39, %v294_v40 }
  0x11   :  { %v315_v49 = vrot.slane %v306_v41, %v294_v40 }
  0x13   :  { %242 = vmatpush1.bf16.msra.mxu0 %v428_v9  ;;  %402 = vmatpush1.bf16.msra.mxu1 %v428_v9 }
  0x14   :  { %243 = vmatprep.subr.bf16.mxu0 %v429_v10  ;;  %387 = vmatprep.subr.bf16.mxu1 %v429_v10 }
  0x17   :  { %244 = vmatpush1.bf16.msra.mxu0 %v431_v11  ;;  %403 = vmatpush1.bf16.msra.mxu1 %v431_v11 }
  0x18   :  { %245 = vmatprep.subr.bf16.mxu0 %v432_v12  ;;  %388 = vmatprep.subr.bf16.mxu1 %v432_v12 }
  0x1b   :  { %246 = vmatpush1.bf16.msra.mxu0 %v434_v14  ;;  %404 = vmatpush1.bf16.msra.mxu1 %v434_v14 }
  0x1c   :  { %247 = vmatprep.subr.bf16.mxu0 %v435_v16  ;;  %389 = vmatprep.subr.bf16.mxu1 %v435_v16 }
  0x1f   :  { %248 = vmatpush1.bf16.msra.mxu0 %v437_v17  ;;  %405 = vmatpush1.bf16.msra.mxu1 %v437_v17 }
  0x20   :  { %249 = vmatprep.subr.bf16.mxu0 %v438_v18  ;;  %390 = vmatprep.subr.bf16.mxu1 %v438_v18 }
  0x23   :  { %250 = vmatpush2.bf16.msra.mxu0 %v440_v19  ;;  %406 = vmatpush2.bf16.msra.mxu1 %v440_v19 }
  0x24   :  { %251 = vmatprep.subr.bf16.mxu0 %v441_v20  ;;  %391 = vmatprep.subr.bf16.mxu1 %v441_v20 }
  0x27   :  { %252 = vmatpush2.bf16.msra.mxu0 %v443_v21  ;;  %407 = vmatpush2.bf16.msra.mxu1 %v443_v21 }
  0x28   :  { %253 = vmatprep.subr.bf16.mxu0 %v444_v22  ;;  %392 = vmatprep.subr.bf16.mxu1 %v444_v22 }
  0x2b   :  { %254 = vmatpush2.bf16.msra.mxu0 %v446_v23  ;;  %408 = vmatpush2.bf16.msra.mxu1 %v446_v23 }
  0x2c   :  { %255 = vmatprep.subr.bf16.mxu0 %v447_v24  ;;  %393 = vmatprep.subr.bf16.mxu1 %v447_v24 }
  0x2f   :  { %256 = vmatpush2.bf16.msra.mxu0 %v449_v25  ;;  %409 = vmatpush2.bf16.msra.mxu1 %v449_v25 }
  0x30   :  { %257 = vmatprep.subr.bf16.mxu0 %v450_v26  ;;  %394 = vmatprep.subr.bf16.mxu1 %v450_v26 }
  0x33   :  { %258 = vmatpush2.bf16.msra.mxu0 %v452_v27  ;;  %410 = vmatpush2.bf16.msra.mxu1 %v452_v27 }
  0x34   :  { %259 = vmatprep.subr.bf16.mxu0 %v453_v28  ;;  %395 = vmatprep.subr.bf16.mxu1 %v453_v28 }
  0x37   :  { %260 = vmatpush2.bf16.msra.mxu0 %v455_v29  ;;  %411 = vmatpush2.bf16.msra.mxu1 %v455_v29 }
  0x38   :  { %261 = vmatprep.subr.bf16.mxu0 %v456_v30  ;;  %396 = vmatprep.subr.bf16.mxu1 %v456_v30 }
  0x3b   :  { %262 = vmatpush2.bf16.msra.mxu0 %v458_v31  ;;  %412 = vmatpush2.bf16.msra.mxu1 %v458_v31 }
  0x3c   :  { %263 = vmatprep.subr.bf16.mxu0 %v459_v32  ;;  %397 = vmatprep.subr.bf16.mxu1 %v459_v32 }
  0x3f   :  { %264 = vmatpush2.bf16.msra.mxu0 %v461_v33  ;;  %413 = vmatpush2.bf16.msra.mxu1 %v461_v33 }
  0x42   :  { %266 = vmatmul.mubr.bf16.vlgmr.msra.gmra.mxu0 %v462_v34  ;;  %276 = vmatmul.mubr.bf16.vlgmr.msra.gmra.mxu1 %v465_v35 }
 0x102   :  { %v267_v45 = vpop.f32.mrf.mxu0  ;;  %v277_v46 = vpop.f32.mrf.mxu1 }
 0x103   :  { %v298_v47 = vmul.f32 %v291_v42, %v267_v45  ;;  %v302_v48 = vmul.f32 %v291_v42, %v277_v46 }
 0x104   :  { %v269_v50 = vpop.f32.mrf.mxu0  ;;  %v279_v51 = vpop.f32.mrf.mxu1 }
 0x105   :  { %v318_v52 = vadd.f32 %v311_v43, %v298_v47  ;;  %v322_v53 = vadd.f32 %v311_v43, %v302_v48  ;;  %v299_v54 = vmul.f32 %v295_v44, %v269_v50  ;;  %v303_v55 = vmul.f32 %v295_v44, %v279_v51 }
 0x106   :  { %v271_v56 = vpop.f32.mrf.mxu0  ;;  %v281_v57 = vpop.f32.mrf.mxu1 }
 0x107   :  { %v326_v58 = vmax.f32 %v318_v52, 0.0  ;;  %v330_v59 = vmax.f32 %v322_v53, 0.0  ;;  %v319_v60 = vadd.f32 %v315_v49, %v299_v54  ;;  %v323_v61 = vadd.f32 %v315_v49, %v303_v55 }
 0x108   :  { %v300_v62 = vmul.f32 %v291_v42, %v271_v56  ;;  %v304_v63 = vmul.f32 %v291_v42, %v281_v57  ;;  %v273_v0 = vpop.f32.mrf.mxu0  ;;  %v283_v1 = vpop.f32.mrf.mxu1 }
 0x109   :  { %334 = vst [vmem:[%s635_s4] sm:$0xff] %v326_v58  ;;  %338 = vst [vmem:[%s635_s4 + $0x20] sm:$0xff] %v330_v59  ;;  %v327_v2 = vmax.f32 %v319_v60, 0.0  ;;  %v331_v3 = vmax.f32 %v323_v61, 0.0  ;;  %v301_v4 = vmul.f32 %v295_v44, %v273_v0  ;;  %v305_v5 = vmul.f32 %v295_v44, %v283_v1 }
 0x10a   :  { %v320_v6 = vadd.f32 %v311_v43, %v300_v62  ;;  %v324_v7 = vadd.f32 %v311_v43, %v304_v63 }
 0x10b   :  { %335 = vst [vmem:[%s635_s4 + $0x8] sm:$0xff] %v327_v2  ;;  %339 = vst [vmem:[%s635_s4 + $0x28] sm:$0xff] %v331_v3  ;;  %v321_v8 = vadd.f32 %v315_v49, %v301_v4  ;;  %v325_v9 = vadd.f32 %v315_v49, %v305_v5 }
 0x10c   :  { %v328_v10 = vmax.f32 %v320_v6, 0.0  ;;  %v332_v11 = vmax.f32 %v324_v7, 0.0 }
 0x10d   :  { %v329_v12 = vmax.f32 %v321_v8, 0.0  ;;  %v333_v13 = vmax.f32 %v325_v9, 0.0 }
 0x10e   :  { %336 = vst [vmem:[%s635_s4 + $0x10] sm:$0xff] %v328_v10  ;;  %340 = vst [vmem:[%s635_s4 + $0x30] sm:$0xff] %v332_v11 }
 0x10f   :  { %337 = vst [vmem:[%s635_s4 + $0x18] sm:$0xff] %v329_v12  ;;  %341 = vst [vmem:[%s635_s4 + $0x38] sm:$0xff] %v333_v13 }

// kernel: shufflenet2_forward.105
= control target key start
LH: loop header
LB: loop body
LE: loop exit
PB: predicated region body
PF: predicated region fallthrough
CT: control target
= control target key end

     0   :  { %9 = vsyncpa [#allocation3], 0  ;;  %s862_s0 = inlined_call_operand.vmem [shape: f32[2,4,4,244], index: 0, kind: input, shape index: {}]   ;;  %s863_s1 = inlined_call_operand.vmem [shape: f32[9,244], index: 1, kind: input, shape index: {}]   ;;  %s864_s2 = inlined_call_operand.hbm [shape: f32[1,244], index: 2, kind: input, shape index: {}]   ;;  %s865_s3 = inlined_call_operand.hbm [shape: f32[1,244], index: 3, kind: input, shape index: {}]   ;;  %s866_s4 = inlined_call_operand.vmem [shape: f32[2,2,2,244], index: 4, kind: output, shape index: {}]  }
   0x1   :  { %10 = vsyncpa [#allocation5], 0  ;;  %s741_s15 = smov 0  }
   0x2 LB: > { %s747_s16 = sadd.s32 4294967295, %s711_s15   ;;  %p574_p0 = scmp.ge.s32.totalorder %s711_s15, 1  ;;  %s711_s15 = sphi %s741_s15, %s16_s15  }
   0x3   : > { %p136_p1 = scmp.lt.s32.totalorder %s711_s15, 3  ;;  %p867_p2 = scmp.eq.s32.totalorder %s747_s16, 0 }
   0x4   : > { %s713_s18 = smov [#allocation2]   ;;  %s714_s20 = smov [#allocation4]  }
   0x5   : > { %p752_p3 = pnand %p574_p0, %p136_p1  ;;  %s152_s19 = sshll.u32 %s713_s18, 4  ;;  %s153_s19 = int_to_ptr.vmem [resolvable:$true] %s152_s19 }
   0x6   : > { %s163_s21 = sshll.u32 %s714_s20, 4  ;;  %s656_s23 = scalar_lea.vmem %s153_s19, 32  ;;  %s164_s21 = int_to_ptr.vmem [resolvable:$true] %s163_s21 }
   0x7   : > { %s869_s17 = scalar_select %p752_p3, 1, 0 }
   0x8   : > { %p623_p4 = pneg %p752_p3  ;;  %p657_p7 = scmp.ne.s32.totalorder %s153_s19, %s656_s23 }
   0x9   : > { %p664_p10 = scmp.lt.s32.totalorder %s153_s19, %s153_s19  ;;  %p665_p11 = scmp.lt.s32.totalorder %s656_s23, %s656_s23 }
   0xa   : > { %p760_p5 = pnand %p867_p2, %p623_p4 }
   0xb   : > { %p666_p12 = por %p665_p11, %p664_p10 }
   0xc   : > { %p647_p6 = pneg %p760_p5 }
   0xe   : > { %p659_p8 = pnand %p657_p7, %p647_p6 }
  0x10   : > { %p660_p9 = pneg %p659_p8 }
  0x12   : > { %p667_p13 = pnand %p666_p12, %p660_p9 }
  0x14   : > { %670 = shalt.err (!%p667_p13)
}
  0x15   : > { %626 = dma.hbm_to_vmem [thread:$0]  (!%p760_p5), %s864_s2, 32, %s153_s19, [#allocation3]  }
  0x16   : > { %s682_s26 = scalar_lea.vmem %s164_s21, 32  ;;  %p690_p7 = scmp.lt.s32.totalorder %s164_s21, %s164_s21 }
  0x17   : > { %p683_p0 = scmp.ne.s32.totalorder %s164_s21, %s682_s26  ;;  %p691_p8 = scmp.lt.s32.totalorder %s682_s26, %s682_s26 }
  0x19   : > { %p685_p1 = pnand %p683_p0, %p647_p6  ;;  %p692_p2 = por %p691_p8, %p690_p7 }
  0x1b   : > { %p686_p4 = pneg %p685_p1 }
  0x1d   : > { %p693_p3 = pnand %p692_p2, %p686_p4 }
  0x1f   : > { %696 = shalt.err (!%p693_p3)
}
  0x20   : > { %629 = dma.hbm_to_vmem [thread:$0]  (!%p760_p5), %s865_s3, 32, %s164_s21, [#allocation5]  }
  0x21   : > { %p871_p9 = scmp.ne.s32.totalorder %s869_s17, 0 }
  0x22   : > { %p872_p10 = scmp.eq.s32.totalorder (!%p871_p9), %s747_s16, 0 }
  0x23   : > { %184 = sbr.rel (%p871_p9) target bundleno = 87 (0x57), region = 36 }
  0x28   : > { %702 = dma.done.wait (%p872_p10), [#allocation3], 32   ;;  %p873_p6 = pmov %p872_p10 }
  0x2a   : > { %704 = vsyncadd (%p873_p6), [#allocation3], 4294967264  ;;  %p874_p11 = pmov %p873_p6 }
  0x2b   : > { %p875_p2 = pmov %p873_p6 }
  0x2c   : > { %706 = dma.done.wait (%p874_p11), [#allocation5], 32  }
  0x2d   : > { %708 = vsyncadd (%p875_p2), [#allocation5], 4294967264  ;;  %p214_p3 = scmp.lt.s32.totalorder %s747_s16, 1  ;;  %v230_v0 = vlaneseq  ;;  %v224_v7 = vld [vmem:[%s863_s1] sm:$0xff]  ;;  %v225_v8 = vld [vmem:[%s863_s1 + $0x8] sm:$0xff]  ;;  %vm490_vm0 = vcmask 1041408  }
  0x2e   : > { %v607_v29 = vld [vmem:[%s863_s1 + $0x10] ss:$0 sm:$0xff]  ;;  %v608_v33 = vld [vmem:[%s863_s1 + $0x18] ss:$0 sm:$0xff]  ;;  %vm491_vm1 = vcmask 945154  }
  0x2f   : > { %s877_s16 = smov (!%p214_p3, %s747_s16), 1  ;;  %v796_v1 = vshrl.u32 %v230_v0, 7  ;;  %v429_v52 = vcombine.low %v607_v29, %v608_v33  ;;  %vm492_vm2 = vmor %vm491_vm1, %vm490_vm0 }
  0x30   : > { %s613_s29 = sshll.u32 %s877_s16, 5  ;;  %s614_s17 = sshll.u32 %s877_s16, 3 }
  0x31   : > { %v799_v2 = vsub.s32 0, %v796_v1  ;;  %v802_v3 = vsub.s32 1, %v796_v1  ;;  %v275_v4 = vsub.s32 2, %v796_v1  ;;  %v303_v5 = vsub.s32 3, %v796_v1  ;;  %s819_s10 = scalar_lea.vmem %s862_s0, %s613_s29  ;;  %s223_s20 = scalar_lea.vmem %s866_s4, %s614_s17 }
  0x32   : > { %v321_v6 = vsub.s32 4, %v796_v1  ;;  %v348_v9 = vsub.s32 5, %v796_v1  ;;  %v394_v10 = vsub.s32 7, %v796_v1  ;;  %v228_v19 = vld [vmem:[%s819_s10] sm:$0x33]  ;;  %v376_v28 = vsub.s32 6, %v796_v1 }
  0x33   : > { %v233_v11 = vrot.slane %v224_v7, %v799_v2  ;;  %v237_v12 = vrot.slane %v225_v8, %v799_v2  ;;  %v249_v13 = vrot.slane %v224_v7, %v802_v3  ;;  %v253_v14 = vrot.slane %v225_v8, %v802_v3  ;;  %v244_v24 = vld [vmem:[%s819_s10] sm:$0x66]  ;;  %v591_v37 = vld [vmem:[%s819_s10 + $0x8] sm:$0x66]  ;;  %v601_v61 = vld [vmem:[%s819_s10 + $0x10] sm:$0x66] }
  0x34   : > { %v276_v15 = vrot.slane %v224_v7, %v275_v4  ;;  %v280_v16 = vrot.slane %v225_v8, %v275_v4  ;;  %v304_v17 = vrot.slane %v224_v7, %v303_v5  ;;  %v308_v18 = vrot.slane %v225_v8, %v303_v5  ;;  %v271_v31 = vld [vmem:[%s819_s10] sm:$0xcc]  ;;  %v589_v44 = vld [vmem:[%s819_s10 + $0x8] sm:$0x33]  ;;  %v595_v45 = vld [vmem:[%s819_s10 + $0x8] sm:$0xcc] }
  0x35   : > { %v240_v20 = vcombine.low %v233_v11, %v237_v12  ;;  %v256_v21 = vcombine.low %v249_v13, %v253_v14  ;;  %v322_v22 = vrot.slane %v224_v7, %v321_v6  ;;  %v326_v23 = vrot.slane %v225_v8, %v321_v6  ;;  %v229_v54 = vld [vmem:[%s819_s10 + $0x8] sm:$0x33]  ;;  %v272_v60 = vld [vmem:[%s819_s10 + $0x8] sm:$0xcc]  ;;  %v592_v5 = vld [vmem:[%s819_s10 + $0x10] sm:$0x66] }
  0x36   : > { %v283_v25 = vcombine.low %v276_v15, %v280_v16  ;;  %v349_v26 = vrot.slane %v224_v7, %v348_v9  ;;  %v353_v27 = vrot.slane %v225_v8, %v348_v9  ;;  %v311_v36 = vcombine.low %v304_v17, %v308_v18  ;;  %v245_v59 = vld [vmem:[%s819_s10 + $0x8] sm:$0x66]  ;;  %v599_v6 = vld [vmem:[%s819_s10 + $0x10] sm:$0x33]  ;;  %v596_v15 = vld [vmem:[%s819_s10 + $0x10] sm:$0xcc] }
  0x37   : > { %v257_v30 = vrot.slane %v256_v21, 7  ;;  %v329_v32 = vcombine.low %v322_v22, %v326_v23  ;;  %v242_v34 = vmul.f32 %v240_v20, %v228_v19  ;;  %v395_v41 = vrot.slane %v224_v7, %v394_v10  ;;  %v590_v14 = vld [vmem:[%s819_s10 + $0x10] sm:$0x33]  ;;  %v444_v16 = vld [vmem:[#allocation2] sm:$0x3] }
  0x38   : > { %v284_v35 = vrot.slane %v283_v25, 6  ;;  %v356_v38 = vcombine.low %v349_v26, %v353_v27  ;;  %v399_v42 = vrot.slane %v225_v8, %v394_v10  ;;  %v377_v47 = vrot.slane %v224_v7, %v376_v28  ;;  %v605_v7 = vld [vmem:[%s819_s10 + $0x10] sm:$0xcc]  ;;  %v602_v33 = vld [vmem:[%s819_s10 + $0x18] sm:$0x66] }
  0x39   : > { %v259_v39 = vmul.f32 %v257_v30, %v244_v24  ;;  %v330_v40 = vrot.slane %v329_v32, 7  ;;  %v381_v48 = vrot.slane %v225_v8, %v376_v28  ;;  %v313_v56 = vmul.f32 %v589_v44, %v311_v36  ;;  %v458_v24 = vld [vmem:[#allocation4] sm:$0x3] }
  0x3a   : > { %v286_v43 = vmul.f32 %v284_v35, %v271_v31  ;;  %v357_v46 = vrot.slane %v356_v38, 6  ;;  %v402_v51 = vcombine.low %v395_v41, %v399_v42  ;;  %v430_v4 = vrot.slane %v429_v52, 6  ;;  %v600_v41 = vld [vmem:[%s819_s10 + $0x18] sm:$0x33]  ;;  %v606_v42 = vld [vmem:[%s819_s10 + $0x18] sm:$0xcc] }
  0x3b   : > { %v585_v49 = vrot.slane %v259_v39, 9  ;;  %v332_v50 = vmul.f32 %v591_v37, %v330_v40  ;;  %v384_v0 = vcombine.low %v377_v47, %v381_v48  ;;  %v243_v8 = vmul.f32 %v240_v20, %v229_v54 }
  0x3c   : > { %v587_v53 = vrot.slane %v286_v43, 10  ;;  %v359_v57 = vmul.f32 %v595_v45, %v357_v46  ;;  %v403_v58 = vrot.slane %v402_v51, 7  ;;  %v260_v9 = vmul.f32 %v257_v30, %v245_v59 }
  0x3d   : > { %v269_v55 = vadd.f32 %v585_v49, %v242_v34  ;;  %v593_v63 = vrot.slane %v332_v50, 9  ;;  %v287_v10 = vmul.f32 %v284_v35, %v272_v60  ;;  %v333_v19 = vmul.f32 %v592_v5, %v330_v40 }
  0x3e   : > { %v597_v12 = vrot.slane %v359_v57, 10  ;;  %v405_v13 = vmul.f32 %v601_v61, %v403_v58  ;;  %v586_v17 = vrot.slane %v260_v9, 9  ;;  %v386_v22 = vmul.f32 %v599_v6, %v384_v0 }
  0x3f   : > { %v296_v62 = vadd.f32 %v587_v53, %v269_v55  ;;  %v588_v18 = vrot.slane %v287_v10, 10  ;;  %v432_v23 = vmul.f32 %v605_v7, %v430_v4  ;;  %v715_v25 = vmov 1983009808  }
  0x40   : > { %v475_v26 = vunpack.c.l.s4 %v715_v25  ;;  %v270_v20 = vadd.f32 %v586_v17, %v243_v8  ;;  %v314_v27 = vmul.f32 %v590_v14, %v311_v36  ;;  %v360_v28 = vmul.f32 %v596_v15, %v357_v46 }
  0x41   : > { %v315_v11 = vadd.f32 %v313_v56, %v296_v62  ;;  %v603_v30 = vrot.slane %v405_v13, 9  ;;  %v449_v31 = vrot.slane %v444_v16, %v799_v2  ;;  %v453_v32 = vrot.slane %v444_v16, %v802_v3 }
  0x42   : > { %v297_v34 = vadd.f32 %v588_v18, %v270_v20  ;;  %v594_v35 = vrot.slane %v333_v19, 9  ;;  %v609_v38 = vrot.slane %v432_v23, 10  ;;  %v463_v39 = vrot.slane %v458_v24, %v799_v2 }
  0x43   : > { %v342_v21 = vadd.f32 %v593_v63, %v315_v11  ;;  %v467_v40 = vrot.slane %v458_v24, %v802_v3  ;;  %v598_v43 = vrot.slane %v360_v28, 10  ;;  %v406_v44 = vmul.f32 %v602_v33, %v403_v58 }
  0x44   : > { %v316_v36 = vadd.f32 %v314_v27, %v297_v34  ;;  %v454_v46 = vcombine.low %v449_v31, %v453_v32  ;;  %v476_v47 = vunpack.c.0.s8 %v475_v26  ;;  %v387_v49 = vmul.f32 %v600_v41, %v384_v0 }
  0x45   : > { %v369_v29 = vadd.f32 %v597_v12, %v342_v21  ;;  %v433_v50 = vmul.f32 %v606_v42, %v430_v4  ;;  %v468_v52 = vcombine.low %v463_v39, %v467_v40  ;;  %v604_v54 = vrot.slane %v406_v44, 9 }
  0x46   : > { %v343_v48 = vadd.f32 %v594_v35, %v316_v36  ;;  %v479_v3 = vsub.s32 %v476_v47, %v796_v1 }
  0x47   : > { %v388_v37 = vadd.f32 %v386_v22, %v369_v29  ;;  %v610_v56 = vrot.slane %v433_v50, 10 }
  0x48   : > { %v370_v53 = vadd.f32 %v598_v43, %v343_v48 }
  0x49   : > { %v415_v45 = vadd.f32 %v603_v30, %v388_v37 }
  0x4a   : > { %v389_v55 = vadd.f32 %v387_v49, %v370_v53 }
  0x4b   : > { %v442_v51 = vadd.f32 %v609_v38, %v415_v45 }
  0x4c   : > { %v416_v58 = vadd.f32 %v604_v54, %v389_v55 }
  0x4d   : > { %v456_v2 = vmul.f32 %v454_v46, %v442_v51 }
  0x4e   : > { %v443_v60 = vadd.f32 %v610_v56, %v416_v58 }
  0x4f   : > { %v470_v57 = vadd.f32 %v468_v52, %v456_v2 }
  0x50   : > { %v457_v61 = vmul.f32 %v454_v46, %v443_v60 }
  0x51   : > { %v480_v59 = vrot.slane %v470_v57, %v479_v3 }
  0x52   : > { %v471_v62 = vadd.f32 %v468_v52, %v457_v61 }
  0x53   : > { %493 = vst.msk [vmem:[%s223_s20] sm:$0xf] %vm492_vm2, %v480_v59 }
  0x54   : > { %v487_v63 = vrot.slane %v471_v62, %v479_v3 }
  0x56   : > { %494 = vst.msk [vmem:[%s223_s20 + $0x4] sm:$0xf] %vm492_vm2, %v487_v63 }
  0x57 PF: > { %s16_s15 = sadd.s32 1, %s711_s15  }
  0x58   : > { %p13_p5 = scmp.ge.s32.totalorder %s16_s15, 4  }
  0x5a   :  { %15 = sbr.rel (!%p13_p5) target bundleno = 2 (0x2), region = 77 }
  0x5f   :  { %516 = vsyncpa [#allocation3], 1 }
  0x60   :  { %518 = vsyncpa [#allocation3 + $0x1], 1 }
  0x61   :  { %519 = vsyncpa [#allocation5], 1 }

// kernel: shufflenet2_forward.131
= control target key start
LH: loop header
LB: loop body
LE: loop exit
PB: predicated region body
PF: predicated region fallthrough
CT: control target
= control target key end

     0   :  { %12 = vsyncpa [#allocation3], 0  ;;  %s921_s0 = inlined_call_operand.vmem [shape: f32[2,2,2,488], index: 0, kind: input, shape index: {}]   ;;  %s922_s1 = inlined_call_operand.vmem [shape: f32[2,2,2,488], index: 1, kind: input, shape index: {}]   ;;  %s923_s2 = inlined_call_operand.vmem [shape: f32[2,2,2,488], index: 2, kind: input, shape index: {}]   ;;  %s924_s3 = inlined_call_operand.vmem [shape: f32[2,2,2,488], index: 3, kind: input, shape index: {}]   ;;  %s925_s4 = inlined_call_operand.vmem [shape: f32[9,488], index: 4, kind: input, shape index: {}]   ;;  %s926_s5 = inlined_call_operand.hbm [shape: f32[1,488], index: 5, kind: input, shape index: {}]   ;;  %s927_s6 = inlined_call_operand.hbm [shape: f32[1,488], index: 6, kind: input, shape index: {}]   ;;  %s928_s7 = inlined_call_operand.vmem [shape: f32[2,1,1,488], index: 7, kind: output, shape index: {}]  }
   0x1   :  { %13 = vsyncpa [#allocation5], 0  ;;  %s810_s24 = smov 0  }
   0x2 LB: > { %s816_s25 = sadd.s32 4294967295, %s765_s24   ;;  %p634_p0 = scmp.ge.s32.totalorder %s765_s24, 1  ;;  %s765_s24 = sphi %s810_s24, %s19_s24  }
   0x3   : > { %p217_p1 = scmp.lt.s32.totalorder %s765_s24, 3  ;;  %p929_p2 = scmp.eq.s32.totalorder %s816_s25, 0 }
   0x4   : > { %s767_s27 = smov [#allocation2]   ;;  %s768_s29 = smov [#allocation4]  }
   0x5   : > { %p821_p3 = pnand %p634_p0, %p217_p1  ;;  %s233_s28 = sshll.u32 %s767_s27, 4  ;;  %s234_s28 = int_to_ptr.vmem [resolvable:$true] %s233_s28 }
   0x6   : > { %s244_s30 = sshll.u32 %s768_s29, 4  ;;  %s710_s9 = scalar_lea.vmem %s234_s28, 64  ;;  %s245_s30 = int_to_ptr.vmem [resolvable:$true] %s244_s30 }
   0x7   : > { %s931_s26 = scalar_select %p821_p3, 1, 0 }
   0x8   : > { %p669_p4 = pneg %p821_p3  ;;  %p711_p7 = scmp.ne.s32.totalorder %s234_s28, %s710_s9 }
   0x9   : > { %p718_p10 = scmp.lt.s32.totalorder %s234_s28, %s234_s28  ;;  %p719_p11 = scmp.lt.s32.totalorder %s710_s9, %s710_s9 }
   0xa   : > { %p829_p5 = pnand %p929_p2, %p669_p4 }
   0xb   : > { %p720_p12 = por %p719_p11, %p718_p10 }
   0xc   : > { %p701_p6 = pneg %p829_p5 }
   0xe   : > { %p713_p8 = pnand %p711_p7, %p701_p6 }
  0x10   : > { %p714_p9 = pneg %p713_p8 }
  0x12   : > { %p721_p13 = pnand %p720_p12, %p714_p9 }
  0x14   : > { %724 = shalt.err (!%p721_p13)
}
  0x15   : > { %672 = dma.hbm_to_vmem [thread:$0]  (!%p829_p5), %s926_s5, 64, %s234_s28, [#allocation3]  }
  0x16   : > { %s736_s12 = scalar_lea.vmem %s245_s30, 64  ;;  %p744_p7 = scmp.lt.s32.totalorder %s245_s30, %s245_s30 }
  0x17   : > { %p737_p0 = scmp.ne.s32.totalorder %s245_s30, %s736_s12  ;;  %p745_p8 = scmp.lt.s32.totalorder %s736_s12, %s736_s12 }
  0x19   : > { %p739_p1 = pnand %p737_p0, %p701_p6  ;;  %p746_p2 = por %p745_p8, %p744_p7 }
  0x1b   : > { %p740_p4 = pneg %p739_p1 }
  0x1d   : > { %p747_p3 = pnand %p746_p2, %p740_p4 }
  0x1f   : > { %750 = shalt.err (!%p747_p3)
}
  0x20   : > { %675 = dma.hbm_to_vmem [thread:$0]  (!%p829_p5), %s927_s6, 64, %s245_s30, [#allocation5]  }
  0x21   : > { %p933_p9 = scmp.ne.s32.totalorder %s931_s26, 0 }
  0x22   : > { %p934_p10 = scmp.eq.s32.totalorder (!%p933_p9), %s816_s25, 0 }
  0x23   : > { %289 = sbr.rel (%p933_p9) target bundleno = 81 (0x51), region = 48 }
  0x28   : > { %756 = dma.done.wait (%p934_p10), [#allocation3], 64   ;;  %p935_p6 = pmov %p934_p10 }
  0x2a   : > { %758 = vsyncadd (%p935_p6), [#allocation3], 4294967232  ;;  %p936_p11 = pmov %p935_p6 }
  0x2b   : > { %p937_p2 = pmov %p935_p6 }
  0x2c   : > { %760 = dma.done.wait (%p936_p11), [#allocation5], 64  }
  0x2d   : > { %762 = vsyncadd (%p937_p2), [#allocation5], 4294967232  ;;  %p339_p3 = scmp.lt.s32.totalorder %s816_s25, 1  ;;  %v381_v0 = vlaneseq  ;;  %v769_v1 = vmov 1966171168  }
  0x2e   : > { %v379_v2 = vunpack.c.l.s4 %v769_v1  ;;  %v691_v6 = vld [vmem:[%s925_s4] ss:$8 sps:$4 sm:$0xff]   ;;  %v693_v7 = vld [vmem:[%s925_s4 + $0x10] ss:$8 sps:$4 sm:$0xff]   ;;  %v695_v10 = vld [vmem:[%s925_s4 + $0x4] ss:$8 sps:$4 sm:$0xff]  }
  0x2f   : > { %v382_v4 = vshrl.u32 %v381_v0, 7  ;;  %s939_s25 = smov (!%p339_p3, %s816_s25), 1  ;;  %v696_v11 = vld [vmem:[%s925_s4 + $0x14] ss:$8 sps:$4 sm:$0xff]   ;;  %v511_v57 = vld [vmem:[#allocation2] sm:$0xf] }
  0x30   : > { %v380_v3 = vunpack.c.0.s8 %v379_v2  ;;  %s867_s15 = sshll.u32 %s939_s25, 4  ;;  %v697_v20 = vld [vmem:[%s925_s4 + $0x20] ss:$8 sps:$4 sm:$0x11]   ;;  %v513_v59 = vld [vmem:[#allocation4] sm:$0xf] }
  0x31   : > { %s879_s22 = scalar_lea.vmem %s921_s0, %s867_s15  ;;  %s885_s27 = scalar_lea.vmem %s922_s1, %s867_s15  ;;  %v698_v21 = vld [vmem:[%s925_s4 + $0x30] ss:$8 sps:$4 sm:$0x11]   ;;  %vm517_vm0 = vcmp.lt.s32.totalorder %v381_v0, 488 }
  0x32   : > { %v383_v5 = vsub.s32 %v380_v3, %v382_v4  ;;  %s353_s11 = scalar_lea.vmem %s923_s2, %s867_s15  ;;  %v371_v14 = vld [vmem:[%s879_s22] ss:$2 sm:$0xf]  ;;  %s358_s14 = scalar_lea.vmem %s924_s3, %s867_s15  ;;  %v650_v22 = vld [vmem:[%s879_s22 + $0x1] ss:$2 sm:$0xf] }
  0x33   : > { %v402_v15 = vld [vmem:[%s885_s27] ss:$2 sm:$0xf]  ;;  %v651_v38 = vld [vmem:[%s353_s11 + $0x1] ss:$2 sm:$0xf] }
  0x34   : > { %v384_v8 = vrot.slane %v691_v6, %v383_v5  ;;  %v391_v9 = vrot.slane %v693_v7, %v383_v5  ;;  %v434_v16 = vrot.slane %v695_v10, %v383_v5  ;;  %v441_v17 = vrot.slane %v696_v11, %v383_v5  ;;  %v420_v23 = vld [vmem:[%s353_s11] ss:$2 sm:$0xf]  ;;  %v652_v43 = vld [vmem:[%s879_s22 + $0x8] ss:$2 sm:$0xf] }
  0x35   : > { %v425_v30 = vld [vmem:[%s358_s14] ss:$2 sm:$0xf]  ;;  %v492_v32 = vrot.slane %v697_v20, %v383_v5  ;;  %v499_v33 = vrot.slane %v698_v21, %v383_v5  ;;  %v653_v47 = vld [vmem:[%s885_s27 + $0x8] ss:$2 sm:$0xf] }
  0x36   : > { %v392_v12 = vcombine.low %v384_v8, %v391_v9  ;;  %v403_v13 = vcombine.high %v384_v8, %v391_v9  ;;  %v442_v24 = vcombine.low %v434_v16, %v441_v17  ;;  %v455_v25 = vcombine.high %v434_v16, %v441_v17  ;;  %v654_v51 = vld [vmem:[%s879_s22 + $0x9] ss:$2 sm:$0xf]  ;;  %s649_s15 = sshll.u32 %s939_s25, 2 }
  0x37   : > { %v500_v42 = vcombine.low %v492_v32, %v499_v33  ;;  %s362_s23 = scalar_lea.vmem %s928_s7, %s649_s15 }
  0x38   : > { %v399_v18 = vrot.slane %v392_v12, %v383_v5  ;;  %v410_v19 = vrot.slane %v403_v13, %v383_v5  ;;  %v449_v31 = vrot.slane %v442_v24, %v383_v5  ;;  %v462_v37 = vrot.slane %v455_v25, %v383_v5 }
  0x39   : > { %v507_v50 = vrot.slane %v500_v42, %v383_v5 }
  0x3a   : > { %v401_v26 = vmul.f32 %v399_v18, %v371_v14  ;;  %v412_v27 = vmul.f32 %v410_v19, %v402_v15  ;;  %v416_v28 = vcombine.high %v399_v18, %v399_v18  ;;  %v421_v29 = vcombine.high %v410_v19, %v410_v19 }
  0x3b   : > { %v451_v40 = vmul.f32 %v449_v31, %v425_v30  ;;  %v468_v41 = vcombine.high %v449_v31, %v449_v31  ;;  %v464_v45 = vmul.f32 %v651_v38, %v462_v37  ;;  %v474_v46 = vcombine.high %v462_v37, %v462_v37 }
  0x3c   : > { %v413_v34 = vadd.f32 %v412_v27, %v401_v26  ;;  %v418_v35 = vmul.f32 %v650_v22, %v416_v28  ;;  %v423_v36 = vmul.f32 %v421_v29, %v420_v23  ;;  %v509_v55 = vmul.f32 %v654_v51, %v507_v50 }
  0x3d   : > { %v470_v49 = vmul.f32 %v652_v43, %v468_v41  ;;  %v476_v53 = vmul.f32 %v653_v47, %v474_v46 }
  0x3e   : > { %v419_v39 = vadd.f32 %v418_v35, %v413_v34 }
  0x40   : > { %v424_v44 = vadd.f32 %v423_v36, %v419_v39 }
  0x42   : > { %v452_v48 = vadd.f32 %v451_v40, %v424_v44 }
  0x44   : > { %v465_v52 = vadd.f32 %v464_v45, %v452_v48 }
  0x46   : > { %v471_v54 = vadd.f32 %v470_v49, %v465_v52 }
  0x48   : > { %v477_v56 = vadd.f32 %v476_v53, %v471_v54 }
  0x4a   : > { %v510_v58 = vadd.f32 %v509_v55, %v477_v56 }
  0x4c   : > { %v512_v60 = vmul.f32 %v511_v57, %v510_v58 }
  0x4e   : > { %v514_v61 = vadd.f32 %v513_v59, %v512_v60 }
  0x50   : > { %519 = vst.msk [vmem:[%s362_s23] sm:$0xf] %vm517_vm0, %v514_v61 }
  0x51 PF: > { %s19_s24 = sadd.s32 1, %s765_s24  }
  0x52   : > { %p16_p5 = scmp.ge.s32.totalorder %s19_s24, 4  }
  0x54   :  { %18 = sbr.rel (!%p16_p5) target bundleno = 2 (0x2), region = 101 }
  0x59   :  { %539 = vsyncpa [#allocation3], 1 }
  0x5a   :  { %541 = vsyncpa [#allocation3 + $0x1], 1 }
  0x5b   :  { %542 = vsyncpa [#allocation5], 1 }

// kernel: shufflenet2_forward.132
= control target key start
LH: loop header
LB: loop body
LE: loop exit
PB: predicated region body
PF: predicated region fallthrough
CT: control target
= control target key end

     0   :  { %s1526_s15 = smov 0   ;;  %s1528_s16 = smov 0   ;;  %s1819_s0 = inlined_call_operand.vmem [shape: bf16[16,512], index: 0, kind: input, shape index: {}]   ;;  %s1820_s1 = inlined_call_operand.vmem [shape: bf16[512,512], index: 1, kind: input, shape index: {}]   ;;  %s1821_s2 = inlined_call_operand.vmem [shape: f32[1,512], index: 2, kind: input, shape index: {}]   ;;  %s1822_s3 = inlined_call_operand.vmem [shape: f32[1,512], index: 3, kind: input, shape index: {}]   ;;  %s1823_s4 = inlined_call_operand.vmem [shape: f32[16,512], index: 4, kind: output, shape index: {}]  }
   0x1   :  { %s1530_s17 = smov 0   ;;  %s1532_s18 = smov 0  }
   0x2   :  { %s1534_s19 = smov 0  }
   0x3 LB: > { %s23_s20 = sadd.s32 1, %s1495_s18  ;;  %s1231_s21 = sadd.s32 4294967295, %s1499_s19   ;;  %s1499_s19 = sphi %s1534_s19, %s14_s19   ;;  %s1495_s18 = sphi %s1532_s18, %s1828_s18   ;;  %s1491_s17 = sphi %s1530_s17, %s1827_s17   ;;  %s1487_s16 = sphi %s1528_s16, %s1826_s16   ;;  %s1483_s15 = sphi %s1526_s15, %s1825_s15  }
   0x4   : > { %p24_p0 = scmp.ge.s32.totalorder %s23_s20, 2  ;;  %p66_p1 = scmp.ne.s32.totalorder %s1487_s16, %s1483_s15 }
   0x5   : > { %p67_p2 = scmp.eq.s32.totalorder %s1499_s19, 0  ;;  %p150_p4 = scmp.eq.s32.totalorder %s1231_s21, 1 }
   0x6   : > { %s1830_s20 = smov (%p24_p0, %s23_s20), 0  ;;  %s59_s23 = sadd.s32 1, %s1487_s16 }
   0x7   : > { %p68_p3 = por %p67_p2, %p66_p1  ;;  %s56_s22 = ssub.s32 %s1495_s18, %s1830_s20 }
   0x8   : > { %p57_p5 = scmp.eq.s32.totalorder %s56_s22, 0  ;;  %p1561_p6 = por %p150_p4, %p66_p1 }
   0x9   : > { %p1235_p7 = scmp.ge.s32.totalorder %s1499_s19, 2 }
   0xa   : > { %s1566_s25 = scalar_select %p57_p5, %s1487_s16, %s59_s23  }
   0xb   : > { %182 = sbr.rel (%p1235_p7) target bundleno = 52 (0x34), region = 20 }
  0x10   : > { %185 = sbr.rel (!%p68_p3) target bundleno = 52 (0x34), region = 24  ;;  %s187_s26 = sand.u32 (%p68_p3), 1, %s1487_s16  }
  0x11   : > { %s1317_s27 = sshll.u32 (%p68_p3), %s1495_s18, 3  ;;  %s1236_s28 = sshll.u32 (%p68_p3), %s187_s26, 9 }
  0x12   : > { %s1574_s5 = scalar_lea.vmem (%p68_p3), %s1820_s1, %s1317_s27  ;;  %s1579_s6 = scalar_lea.vmem (%p68_p3), [#allocation2], %s1236_s28 }
  0x13   : > { %v347_v0 = vld [vmem:[%s1574_s5] sm:$0xff] (%p68_p3)  ;;  %v349_v1 = vld [vmem:[%s1574_s5 + $0x10] sm:$0xff] (%p68_p3) }
  0x14   : > { %v351_v2 = vld [vmem:[%s1574_s5 + $0x20] sm:$0xff] (%p68_p3)  ;;  %348 = vst [vmem:[%s1579_s6] sm:$0xff] (%p68_p3), %v347_v0  ;;  %350 = vst [vmem:[%s1579_s6 + $0x8] sm:$0xff] (%p68_p3), %v349_v1  ;;  %v353_v3 = vld [vmem:[%s1574_s5 + $0x30] sm:$0xff] (%p68_p3) }
  0x15   : > { %352 = vst [vmem:[%s1579_s6 + $0x10] sm:$0xff] %v351_v2  ;;  %v355_v4 = vld [vmem:[%s1574_s5 + $0x40] sm:$0xff]  ;;  %v357_v5 = vld [vmem:[%s1574_s5 + $0x50] sm:$0xff]  ;;  %354 = vst [vmem:[%s1579_s6 + $0x18] sm:$0xff] %v353_v3 }
  0x16   : > { %356 = vst [vmem:[%s1579_s6 + $0x20] sm:$0xff] %v355_v4  ;;  %358 = vst [vmem:[%s1579_s6 + $0x28] sm:$0xff] %v357_v5  ;;  %v359_v6 = vld [vmem:[%s1574_s5 + $0x60] sm:$0xff]  ;;  %v361_v7 = vld [vmem:[%s1574_s5 + $0x70] sm:$0xff] }
  0x17   : > { %v363_v8 = vld [vmem:[%s1574_s5 + $0x80] sm:$0xff]  ;;  %360 = vst [vmem:[%s1579_s6 + $0x30] sm:$0xff] %v359_v6  ;;  %362 = vst [vmem:[%s1579_s6 + $0x38] sm:$0xff] %v361_v7  ;;  %v365_v9 = vld [vmem:[%s1574_s5 + $0x90] sm:$0xff] }
  0x18   : > { %364 = vst [vmem:[%s1579_s6 + $0x40] sm:$0xff] %v363_v8  ;;  %v367_v10 = vld [vmem:[%s1574_s5 + $0xa0] sm:$0xff]  ;;  %v369_v11 = vld [vmem:[%s1574_s5 + $0xb0] sm:$0xff]  ;;  %366 = vst [vmem:[%s1579_s6 + $0x48] sm:$0xff] %v365_v9 }
  0x19   : > { %368 = vst [vmem:[%s1579_s6 + $0x50] sm:$0xff] %v367_v10  ;;  %370 = vst [vmem:[%s1579_s6 + $0x58] sm:$0xff] %v369_v11  ;;  %v371_v12 = vld [vmem:[%s1574_s5 + $0xc0] sm:$0xff]  ;;  %v373_v13 = vld [vmem:[%s1574_s5 + $0xd0] sm:$0xff] }
  0x1a   : > { %v375_v14 = vld [vmem:[%s1574_s5 + $0xe0] sm:$0xff]  ;;  %372 = vst [vmem:[%s1579_s6 + $0x60] sm:$0xff] %v371_v12  ;;  %374 = vst [vmem:[%s1579_s6 + $0x68] sm:$0xff] %v373_v13  ;;  %v377_v15 = vld [vmem:[%s1574_s5 + $0xf0] sm:$0xff] }
  0x1b   : > { %376 = vst [vmem:[%s1579_s6 + $0x70] sm:$0xff] %v375_v14  ;;  %v379_v16 = vld [vmem:[%s1574_s5 + $0x100] sm:$0xff]  ;;  %v381_v17 = vld [vmem:[%s1574_s5 + $0x110] sm:$0xff]  ;;  %378 = vst [vmem:[%s1579_s6 + $0x78] sm:$0xff] %v377_v15 }
  0x1c   : > { %380 = vst [vmem:[%s1579_s6 + $0x80] sm:$0xff] %v379_v16  ;;  %382 = vst [vmem:[%s1579_s6 + $0x88] sm:$0xff] %v381_v17  ;;  %v383_v18 = vld [vmem:[%s1574_s5 + $0x120] sm:$0xff]  ;;  %v385_v19 = vld [vmem:[%s1574_s5 + $0x130] sm:$0xff] }
  0x1d   : > { %v387_v20 = vld [vmem:[%s1574_s5 + $0x140] sm:$0xff]  ;;  %384 = vst [vmem:[%s1579_s6 + $0x90] sm:$0xff] %v383_v18  ;;  %386 = vst [vmem:[%s1579_s6 + $0x98] sm:$0xff] %v385_v19  ;;  %v389_v21 = vld [vmem:[%s1574_s5 + $0x150] sm:$0xff] }
  0x1e   : > { %388 = vst [vmem:[%s1579_s6 + $0xa0] sm:$0xff] %v387_v20  ;;  %v391_v22 = vld [vmem:[%s1574_s5 + $0x160] sm:$0xff]  ;;  %v393_v23 = vld [vmem:[%s1574_s5 + $0x170] sm:$0xff]  ;;  %390 = vst [vmem:[%s1579_s6 + $0xa8] sm:$0xff] %v389_v21 }
  0x1f   : > { %392 = vst [vmem:[%s1579_s6 + $0xb0] sm:$0xff] %v391_v22  ;;  %394 = vst [vmem:[%s1579_s6 + $0xb8] sm:$0xff] %v393_v23  ;;  %v395_v24 = vld [vmem:[%s1574_s5 + $0x180] sm:$0xff]  ;;  %v397_v25 = vld [vmem:[%s1574_s5 + $0x190] sm:$0xff] }
  0x20   : > { %v399_v26 = vld [vmem:[%s1574_s5 + $0x1a0] sm:$0xff]  ;;  %396 = vst [vmem:[%s1579_s6 + $0xc0] sm:$0xff] %v395_v24  ;;  %398 = vst [vmem:[%s1579_s6 + $0xc8] sm:$0xff] %v397_v25  ;;  %v401_v27 = vld [vmem:[%s1574_s5 + $0x1b0] sm:$0xff] }
  0x21   : > { %400 = vst [vmem:[%s1579_s6 + $0xd0] sm:$0xff] %v399_v26  ;;  %v403_v28 = vld [vmem:[%s1574_s5 + $0x1c0] sm:$0xff]  ;;  %v405_v29 = vld [vmem:[%s1574_s5 + $0x1d0] sm:$0xff]  ;;  %402 = vst [vmem:[%s1579_s6 + $0xd8] sm:$0xff] %v401_v27 }
  0x22   : > { %404 = vst [vmem:[%s1579_s6 + $0xe0] sm:$0xff] %v403_v28  ;;  %406 = vst [vmem:[%s1579_s6 + $0xe8] sm:$0xff] %v405_v29  ;;  %v407_v30 = vld [vmem:[%s1574_s5 + $0x1e0] sm:$0xff]  ;;  %v409_v31 = vld [vmem:[%s1574_s5 + $0x1f0] sm:$0xff] }
  0x23   : > { %v411_v32 = vld [vmem:[%s1574_s5 + $0x200] sm:$0xff]  ;;  %408 = vst [vmem:[%s1579_s6 + $0xf0] sm:$0xff] %v407_v30  ;;  %410 = vst [vmem:[%s1579_s6 + $0xf8] sm:$0xff] %v409_v31  ;;  %v413_v33 = vld [vmem:[%s1574_s5 + $0x210] sm:$0xff] }
  0x24   : > { %412 = vst [vmem:[%s1579_s6 + $0x100] sm:$0xff] %v411_v32  ;;  %v415_v34 = vld [vmem:[%s1574_s5 + $0x220] sm:$0xff]  ;;  %v417_v35 = vld [vmem:[%s1574_s5 + $0x230] sm:$0xff]  ;;  %414 = vst [vmem:[%s1579_s6 + $0x108] sm:$0xff] %v413_v33 }
  0x25   : > { %416 = vst [vmem:[%s1579_s6 + $0x110] sm:$0xff] %v415_v34  ;;  %418 = vst [vmem:[%s1579_s6 + $0x118] sm:$0xff] %v417_v35  ;;  %v419_v36 = vld [vmem:[%s1574_s5 + $0x240] sm:$0xff]  ;;  %v421_v37 = vld [vmem:[%s1574_s5 + $0x250] sm:$0xff] }
  0x26   : > { %v423_v38 = vld [vmem:[%s1574_s5 + $0x260] sm:$0xff]  ;;  %420 = vst [vmem:[%s1579_s6 + $0x120] sm:$0xff] %v419_v36  ;;  %422 = vst [vmem:[%s1579_s6 + $0x128] sm:$0xff] %v421_v37  ;;  %v425_v39 = vld [vmem:[%s1574_s5 + $0x270] sm:$0xff] }
  0x27   : > { %424 = vst [vmem:[%s1579_s6 + $0x130] sm:$0xff] %v423_v38  ;;  %v427_v40 = vld [vmem:[%s1574_s5 + $0x280] sm:$0xff]  ;;  %v429_v41 = vld [vmem:[%s1574_s5 + $0x290] sm:$0xff]  ;;  %426 = vst [vmem:[%s1579_s6 + $0x138] sm:$0xff] %v425_v39 }
  0x28   : > { %428 = vst [vmem:[%s1579_s6 + $0x140] sm:$0xff] %v427_v40  ;;  %430 = vst [vmem:[%s1579_s6 + $0x148] sm:$0xff] %v429_v41  ;;  %v431_v42 = vld [vmem:[%s1574_s5 + $0x2a0] sm:$0xff]  ;;  %v433_v43 = vld [vmem:[%s1574_s5 + $0x2b0] sm:$0xff] }
  0x29   : > { %v435_v44 = vld [vmem:[%s1574_s5 + $0x2c0] sm:$0xff]  ;;  %432 = vst [vmem:[%s1579_s6 + $0x150] sm:$0xff] %v431_v42  ;;  %434 = vst [vmem:[%s1579_s6 + $0x158] sm:$0xff] %v433_v43  ;;  %v437_v45 = vld [vmem:[%s1574_s5 + $0x2d0] sm:$0xff] }
  0x2a   : > { %436 = vst [vmem:[%s1579_s6 + $0x160] sm:$0xff] %v435_v44  ;;  %v439_v46 = vld [vmem:[%s1574_s5 + $0x2e0] sm:$0xff]  ;;  %v441_v47 = vld [vmem:[%s1574_s5 + $0x2f0] sm:$0xff]  ;;  %438 = vst [vmem:[%s1579_s6 + $0x168] sm:$0xff] %v437_v45 }
  0x2b   : > { %440 = vst [vmem:[%s1579_s6 + $0x170] sm:$0xff] %v439_v46  ;;  %442 = vst [vmem:[%s1579_s6 + $0x178] sm:$0xff] %v441_v47  ;;  %v443_v48 = vld [vmem:[%s1574_s5 + $0x300] sm:$0xff]  ;;  %v445_v49 = vld [vmem:[%s1574_s5 + $0x310] sm:$0xff] }
  0x2c   : > { %v447_v50 = vld [vmem:[%s1574_s5 + $0x320] sm:$0xff]  ;;  %444 = vst [vmem:[%s1579_s6 + $0x180] sm:$0xff] %v443_v48  ;;  %446 = vst [vmem:[%s1579_s6 + $0x188] sm:$0xff] %v445_v49  ;;  %v449_v51 = vld [vmem:[%s1574_s5 + $0x330] sm:$0xff] }
  0x2d   : > { %448 = vst [vmem:[%s1579_s6 + $0x190] sm:$0xff] %v447_v50  ;;  %v451_v52 = vld [vmem:[%s1574_s5 + $0x340] sm:$0xff]  ;;  %v453_v53 = vld [vmem:[%s1574_s5 + $0x350] sm:$0xff]  ;;  %450 = vst [vmem:[%s1579_s6 + $0x198] sm:$0xff] %v449_v51 }
  0x2e   : > { %452 = vst [vmem:[%s1579_s6 + $0x1a0] sm:$0xff] %v451_v52  ;;  %454 = vst [vmem:[%s1579_s6 + $0x1a8] sm:$0xff] %v453_v53  ;;  %v455_v54 = vld [vmem:[%s1574_s5 + $0x360] sm:$0xff]  ;;  %v457_v55 = vld [vmem:[%s1574_s5 + $0x370] sm:$0xff] }
  0x2f   : > { %v459_v56 = vld [vmem:[%s1574_s5 + $0x380] sm:$0xff]  ;;  %456 = vst [vmem:[%s1579_s6 + $0x1b0] sm:$0xff] %v455_v54  ;;  %458 = vst [vmem:[%s1579_s6 + $0x1b8] sm:$0xff] %v457_v55  ;;  %v461_v57 = vld [vmem:[%s1574_s5 + $0x390] sm:$0xff] }
  0x30   : > { %460 = vst [vmem:[%s1579_s6 + $0x1c0] sm:$0xff] %v459_v56  ;;  %v463_v58 = vld [vmem:[%s1574_s5 + $0x3a0] sm:$0xff]  ;;  %v465_v59 = vld [vmem:[%s1574_s5 + $0x3b0] sm:$0xff]  ;;  %462 = vst [vmem:[%s1579_s6 + $0x1c8] sm:$0xff] %v461_v57 }
  0x31   : > { %464 = vst [vmem:[%s1579_s6 + $0x1d0] sm:$0xff] %v463_v58  ;;  %466 = vst [vmem:[%s1579_s6 + $0x1d8] sm:$0xff] %v465_v59  ;;  %v467_v60 = vld [vmem:[%s1574_s5 + $0x3c0] sm:$0xff]  ;;  %v469_v61 = vld [vmem:[%s1574_s5 + $0x3d0] sm:$0xff] }
  0x32   : > { %v471_v62 = vld [vmem:[%s1574_s5 + $0x3e0] sm:$0xff]  ;;  %468 = vst [vmem:[%s1579_s6 + $0x1e0] sm:$0xff] %v467_v60  ;;  %470 = vst [vmem:[%s1579_s6 + $0x1e8] sm:$0xff] %v469_v61  ;;  %v473_v63 = vld [vmem:[%s1574_s5 + $0x3f0] sm:$0xff] }
  0x33   : > { %472 = vst [vmem:[%s1579_s6 + $0x1f0] sm:$0xff] %v471_v62  ;;  %474 = vst [vmem:[%s1579_s6 + $0x1f8] sm:$0xff] %v473_v63 }
  0x34 PF: > { %p1239_p8 = scmp.ge.s32.totalorder %s1499_s19, 1  ;;  %p495_p9 = scmp.lt.s32.totalorder %s1499_s19, 3 }
  0x36   : > { %p496_p10 = pnand %p1239_p8, %p495_p9 }
  0x37   : > { %s502_s7 = sand.u32 (!%p496_p10), 1, %s1483_s15   ;;  %s1242_s26 = sshll.u32 (!%p496_p10), %s1491_s17, 1 }
  0x38   : > { %499 = sbr.rel (%p496_p10) target bundleno = 344 (0x158), region = 70  ;;  %s1240_s8 = sshll.u32 (!%p496_p10), %s502_s7, 9 }
  0x39   : > { %s1717_s13 = scalar_lea.vmem (!%p496_p10), [#allocation2], %s1240_s8  ;;  %p549_p11 = scmp.lt.s32.totalorder (!%p496_p10), %s1242_s26, 3 }
  0x3a   : > { %s1241_s8 = sshll.u32 (!%p496_p10), %s502_s7, 5 }
  0x3b   : > { %s539_s9 = scalar_lea.vmem (!%p496_p10), [#allocation3], %s1241_s8 }
  0x3d   : > { %v1457_v0 = vld [vmem:[%s1819_s0 + $0x4] ss:$16 sps:$4 sm:$0xff]   ;;  %v1460_v1 = vld [vmem:[%s1819_s0 + $0xc] ss:$16 sps:$4 sm:$0xff]   ;;  %v1363_v4 = vld [vmem:[%s1717_s13 + $0x70] ss:$8 sps:$4 sm:$0xff]  }
  0x3e   : > { %v1359_v2 = vld [vmem:[%s1717_s13 + $0x74] ss:$8 sps:$4 sm:$0xff]   ;;  %1000 = vmatprep.mubr.bf16.mxu0 %v1457_v0  ;;  %1043 = vmatprep.mubr.bf16.mxu1 %v1460_v1  ;;  %v1364_v5 = vld [vmem:[%s1717_s13 + $0x170] ss:$8 sps:$4 sm:$0xff]   ;;  %v1365_v6 = vld [vmem:[%s1717_s13 + $0x64] ss:$8 sps:$4 sm:$0xff]  }
  0x3f   : > { %v1361_v3 = vld [vmem:[%s1717_s13 + $0x174] ss:$8 sps:$4 sm:$0xff]   ;;  %968 = vmatprep.subr.bf16.mxu0 %v1359_v2  ;;  %v1367_v7 = vld [vmem:[%s1717_s13 + $0x164] ss:$8 sps:$4 sm:$0xff]   ;;  %v1369_v8 = vld [vmem:[%s1717_s13 + $0x60] ss:$8 sps:$4 sm:$0xff]  }
  0x40   : > { %1011 = vmatprep.subr.bf16.mxu1 %v1361_v3  ;;  %969 = vmatpush1.bf16.msra.mxu0 %v1363_v4  ;;  %v1370_v9 = vld [vmem:[%s1717_s13 + $0x160] ss:$8 sps:$4 sm:$0xff]   ;;  %v1371_v10 = vld [vmem:[%s1717_s13 + $0x54] ss:$8 sps:$4 sm:$0xff]   ;;  %v1375_v12 = vld [vmem:[%s1717_s13 + $0x50] ss:$8 sps:$4 sm:$0xff]   ;;  %v1056_v4 = vlaneseq }
  0x41   : > { %1012 = vmatpush1.bf16.msra.mxu1 %v1364_v5  ;;  %970 = vmatprep.subr.bf16.mxu0 %v1365_v6  ;;  %v1373_v11 = vld [vmem:[%s1717_s13 + $0x154] ss:$8 sps:$4 sm:$0xff]   ;;  %v1376_v13 = vld [vmem:[%s1717_s13 + $0x150] ss:$8 sps:$4 sm:$0xff]   ;;  %v1377_v14 = vld [vmem:[%s1717_s13 + $0x44] ss:$8 sps:$4 sm:$0xff]  }
  0x42   : > { %1013 = vmatprep.subr.bf16.mxu1 %v1367_v7  ;;  %v1379_v15 = vld [vmem:[%s1717_s13 + $0x144] ss:$8 sps:$4 sm:$0xff]   ;;  %v1381_v16 = vld [vmem:[%s1717_s13 + $0x40] ss:$8 sps:$4 sm:$0xff]   ;;  %v1383_v18 = vld [vmem:[%s1717_s13 + $0x34] ss:$8 sps:$4 sm:$0xff]  }
  0x43   : > { %v1382_v17 = vld [vmem:[%s1717_s13 + $0x140] ss:$8 sps:$4 sm:$0xff]   ;;  %v1385_v19 = vld [vmem:[%s1717_s13 + $0x134] ss:$8 sps:$4 sm:$0xff]   ;;  %v1387_v20 = vld [vmem:[%s1717_s13 + $0x30] ss:$8 sps:$4 sm:$0xff]  }
  0x44   : > { %971 = vmatpush1.bf16.msra.mxu0 %v1369_v8  ;;  %v1388_v21 = vld [vmem:[%s1717_s13 + $0x130] ss:$8 sps:$4 sm:$0xff]   ;;  %v1389_v22 = vld [vmem:[%s1717_s13 + $0x24] ss:$8 sps:$4 sm:$0xff]   ;;  %v1393_v24 = vld [vmem:[%s1717_s13 + $0x20] ss:$8 sps:$4 sm:$0xff]  }
  0x45   : > { %1014 = vmatpush1.bf16.msra.mxu1 %v1370_v9  ;;  %972 = vmatprep.subr.bf16.mxu0 %v1371_v10  ;;  %v1391_v23 = vld [vmem:[%s1717_s13 + $0x124] ss:$8 sps:$4 sm:$0xff]   ;;  %v1394_v25 = vld [vmem:[%s1717_s13 + $0x120] ss:$8 sps:$4 sm:$0xff]   ;;  %v1395_v26 = vld [vmem:[%s1717_s13 + $0x14] ss:$8 sps:$4 sm:$0xff]  }
  0x46   : > { %1015 = vmatprep.subr.bf16.mxu1 %v1373_v11  ;;  %v1397_v27 = vld [vmem:[%s1717_s13 + $0x114] ss:$8 sps:$4 sm:$0xff]   ;;  %v1399_v28 = vld [vmem:[%s1717_s13 + $0x10] ss:$8 sps:$4 sm:$0xff]   ;;  %v1401_v30 = vld [vmem:[%s1717_s13 + $0x4] ss:$8 sps:$4 sm:$0xff]  }
  0x47   : > { %v1400_v29 = vld [vmem:[%s1717_s13 + $0x110] ss:$8 sps:$4 sm:$0xff]   ;;  %v1403_v31 = vld [vmem:[%s1717_s13 + $0x104] ss:$8 sps:$4 sm:$0xff]   ;;  %v1405_v32 = vld [vmem:[%s1717_s13] ss:$8 sps:$4 sm:$0xff]  }
  0x48   : > { %973 = vmatpush1.bf16.msra.mxu0 %v1375_v12  ;;  %v1406_v33 = vld [vmem:[%s1717_s13 + $0x100] ss:$8 sps:$4 sm:$0xff]   ;;  %v1407_v34 = vld [vmem:[%s1717_s13 + $0xf4] ss:$8 sps:$4 sm:$0xff]   ;;  %v1411_v36 = vld [vmem:[%s1717_s13 + $0xf0] ss:$8 sps:$4 sm:$0xff]  }
  0x49   : > { %1016 = vmatpush1.bf16.msra.mxu1 %v1376_v13  ;;  %974 = vmatprep.subr.bf16.mxu0 %v1377_v14  ;;  %v1409_v35 = vld [vmem:[%s1717_s13 + $0x1f4] ss:$8 sps:$4 sm:$0xff]   ;;  %v1412_v37 = vld [vmem:[%s1717_s13 + $0x1f0] ss:$8 sps:$4 sm:$0xff]   ;;  %v1413_v38 = vld [vmem:[%s1717_s13 + $0xe4] ss:$8 sps:$4 sm:$0xff]  }
  0x4a   : > { %1017 = vmatprep.subr.bf16.mxu1 %v1379_v15  ;;  %v1415_v39 = vld [vmem:[%s1717_s13 + $0x1e4] ss:$8 sps:$4 sm:$0xff]   ;;  %v1417_v40 = vld [vmem:[%s1717_s13 + $0xe0] ss:$8 sps:$4 sm:$0xff]   ;;  %v1419_v42 = vld [vmem:[%s1717_s13 + $0xd4] ss:$8 sps:$4 sm:$0xff]  }
  0x4b   : > { %v1418_v41 = vld [vmem:[%s1717_s13 + $0x1e0] ss:$8 sps:$4 sm:$0xff]   ;;  %v1421_v43 = vld [vmem:[%s1717_s13 + $0x1d4] ss:$8 sps:$4 sm:$0xff]   ;;  %v1423_v44 = vld [vmem:[%s1717_s13 + $0xd0] ss:$8 sps:$4 sm:$0xff]  }
  0x4c   : > { %975 = vmatpush1.bf16.msra.mxu0 %v1381_v16  ;;  %v1424_v45 = vld [vmem:[%s1717_s13 + $0x1d0] ss:$8 sps:$4 sm:$0xff]   ;;  %v1425_v46 = vld [vmem:[%s1717_s13 + $0xc4] ss:$8 sps:$4 sm:$0xff]   ;;  %v1429_v48 = vld [vmem:[%s1717_s13 + $0xc0] ss:$8 sps:$4 sm:$0xff]  }
  0x4d   : > { %1018 = vmatpush1.bf16.msra.mxu1 %v1382_v17  ;;  %976 = vmatprep.subr.bf16.mxu0 %v1383_v18  ;;  %v1427_v47 = vld [vmem:[%s1717_s13 + $0x1c4] ss:$8 sps:$4 sm:$0xff]   ;;  %v1430_v49 = vld [vmem:[%s1717_s13 + $0x1c0] ss:$8 sps:$4 sm:$0xff]   ;;  %v1431_v50 = vld [vmem:[%s1717_s13 + $0xb4] ss:$8 sps:$4 sm:$0xff]  }
  0x4e   : > { %1019 = vmatprep.subr.bf16.mxu1 %v1385_v19  ;;  %v1433_v51 = vld [vmem:[%s1717_s13 + $0x1b4] ss:$8 sps:$4 sm:$0xff]   ;;  %v1435_v52 = vld [vmem:[%s1717_s13 + $0xb0] ss:$8 sps:$4 sm:$0xff]   ;;  %v1437_v54 = vld [vmem:[%s1717_s13 + $0xa4] ss:$8 sps:$4 sm:$0xff]  }
  0x4f   : > { %v1436_v53 = vld [vmem:[%s1717_s13 + $0x1b0] ss:$8 sps:$4 sm:$0xff]   ;;  %v1439_v55 = vld [vmem:[%s1717_s13 + $0x1a4] ss:$8 sps:$4 sm:$0xff]   ;;  %v1441_v56 = vld [vmem:[%s1717_s13 + $0xa0] ss:$8 sps:$4 sm:$0xff]  }
  0x50   : > { %977 = vmatpush1.bf16.msra.mxu0 %v1387_v20  ;;  %v1442_v57 = vld [vmem:[%s1717_s13 + $0x1a0] ss:$8 sps:$4 sm:$0xff]   ;;  %v1443_v58 = vld [vmem:[%s1717_s13 + $0x94] ss:$8 sps:$4 sm:$0xff]   ;;  %v1447_v60 = vld [vmem:[%s1717_s13 + $0x90] ss:$8 sps:$4 sm:$0xff]  }
  0x51   : > { %1020 = vmatpush1.bf16.msra.mxu1 %v1388_v21  ;;  %978 = vmatprep.subr.bf16.mxu0 %v1389_v22  ;;  %v1445_v59 = vld [vmem:[%s1717_s13 + $0x194] ss:$8 sps:$4 sm:$0xff]   ;;  %v1448_v61 = vld [vmem:[%s1717_s13 + $0x190] ss:$8 sps:$4 sm:$0xff]   ;;  %v1449_v62 = vld [vmem:[%s1717_s13 + $0x84] ss:$8 sps:$4 sm:$0xff]  }
  0x52   : > { %1021 = vmatprep.subr.bf16.mxu1 %v1391_v23  ;;  %v1451_v63 = vld [vmem:[%s1717_s13 + $0x184] ss:$8 sps:$4 sm:$0xff]   ;;  %v1453_v0 = vld [vmem:[%s1717_s13 + $0x80] ss:$8 sps:$4 sm:$0xff]   ;;  %s1832_s26 = smov (!%p549_p11, %s1242_s26), 3  ;;  %v1057_v5 = vshrl.u32 %v1056_v4, 7 }
  0x53   : > { %v1454_v1 = vld [vmem:[%s1717_s13 + $0x180] ss:$8 sps:$4 sm:$0xff]   ;;  %s551_s29 = scalar_lea.vmem %s1821_s2, %s1832_s26  ;;  %s556_s6 = scalar_lea.vmem %s1822_s3, %s1832_s26 }
  0x54   : > { %979 = vmatpush1.bf16.msra.mxu0 %v1393_v24  ;;  %v1455_v2 = vld [vmem:[%s1819_s0] ss:$16 sps:$4 sm:$0xff]   ;;  %v1458_v3 = vld [vmem:[%s1819_s0 + $0x8] ss:$16 sps:$4 sm:$0xff]   ;;  %v1058_v6 = vsub.s32 0, %v1057_v5  ;;  %v1062_v8 = vsub.s32 1, %v1057_v5 }
  0x55   : > { %1022 = vmatpush1.bf16.msra.mxu1 %v1394_v25  ;;  %980 = vmatprep.subr.bf16.mxu0 %v1395_v26  ;;  %v1054_v7 = vld [vmem:[%s551_s29] sm:$0x3]  ;;  %s1318_s15 = sshll.u32 (%p1561_p6), %s1491_s17, 4 }
  0x56   : > { %1023 = vmatprep.subr.bf16.mxu1 %v1397_v27  ;;  %v1070_v9 = vld [vmem:[%s556_s6] sm:$0x3]  ;;  %v1059_v10 = vrot.slane %v1054_v7, %v1058_v6  ;;  %v1063_v15 = vrot.slane %v1054_v7, %v1062_v8  ;;  %s1106_s11 = scalar_lea.vmem (%p1561_p6), %s1823_s4, %s1318_s15 }
  0x57   : > { %v1075_v14 = vrot.slane %v1070_v9, %v1058_v6  ;;  %v1079_v20 = vrot.slane %v1070_v9, %v1062_v8 }
  0x58   : > { %981 = vmatpush1.bf16.msra.mxu0 %v1399_v28 }
  0x59   : > { %1024 = vmatpush1.bf16.msra.mxu1 %v1400_v29  ;;  %982 = vmatprep.subr.bf16.mxu0 %v1401_v30 }
  0x5a   : > { %1025 = vmatprep.subr.bf16.mxu1 %v1403_v31 }
  0x5c   : > { %983 = vmatpush1.bf16.msra.mxu0 %v1405_v32 }
  0x5d   : > { %1026 = vmatpush1.bf16.msra.mxu1 %v1406_v33  ;;  %984 = vmatprep.subr.bf16.mxu0 %v1407_v34 }
  0x5e   : > { %1027 = vmatprep.subr.bf16.mxu1 %v1409_v35 }
  0x60   : > { %985 = vmatpush2.bf16.msra.mxu0 %v1411_v36 }
  0x61   : > { %1028 = vmatpush2.bf16.msra.mxu1 %v1412_v37  ;;  %986 = vmatprep.subr.bf16.mxu0 %v1413_v38 }
  0x62   : > { %1029 = vmatprep.subr.bf16.mxu1 %v1415_v39 }
  0x64   : > { %987 = vmatpush2.bf16.msra.mxu0 %v1417_v40 }
  0x65   : > { %1030 = vmatpush2.bf16.msra.mxu1 %v1418_v41  ;;  %988 = vmatprep.subr.bf16.mxu0 %v1419_v42 }
  0x66   : > { %1031 = vmatprep.subr.bf16.mxu1 %v1421_v43 }
  0x68   : > { %989 = vmatpush2.bf16.msra.mxu0 %v1423_v44 }
  0x69   : > { %1032 = vmatpush2.bf16.msra.mxu1 %v1424_v45  ;;  %990 = vmatprep.subr.bf16.mxu0 %v1425_v46 }
  0x6a   : > { %1033 = vmatprep.subr.bf16.mxu1 %v1427_v47 }
  0x6c   : > { %991 = vmatpush2.bf16.msra.mxu0 %v1429_v48 }
  0x6d   : > { %1034 = vmatpush2.bf16.msra.mxu1 %v1430_v49  ;;  %992 = vmatprep.subr.bf16.mxu0 %v1431_v50 }
  0x6e   : > { %1035 = vmatprep.subr.bf16.mxu1 %v1433_v51 }
  0x70   : > { %993 = vmatpush2.bf16.msra.mxu0 %v1435_v52 }
  0x71   : > { %1036 = vmatpush2.bf16.msra.mxu1 %v1436_v53  ;;  %994 = vmatprep.subr.bf16.mxu0 %v1437_v54 }
  0x72   : > { %1037 = vmatprep.subr.bf16.mxu1 %v1439_v55 }
  0x74   : > { %995 = vmatpush2.bf16.msra.mxu0 %v1441_v56 }
  0x75   : > { %1038 = vmatpush2.bf16.msra.mxu1 %v1442_v57  ;;  %996 = vmatprep.subr.bf16.mxu0 %v1443_v58 }
  0x76   : > { %1039 = vmatprep.subr.bf16.mxu1 %v1445_v59 }
  0x78   : > { %997 = vmatpush2.bf16.msra.mxu0 %v1447_v60 }
  0x79   : > { %1040 = vmatpush2.bf16.msra.mxu1 %v1448_v61  ;;  %998 = vmatprep.subr.bf16.mxu0 %v1449_v62 }
  0x7a   : > { %1041 = vmatprep.subr.bf16.mxu1 %v1451_v63 }
  0x7c   : > { %999 = vmatpush2.bf16.msra.mxu0 %v1453_v0 }
  0x7d   : > { %1042 = vmatpush2.bf16.msra.mxu1 %v1454_v1 }
  0x7f   : > { %1001 = vmatmul.mubr.bf16.vlgmr.msra.gmra.mxu0 %v1455_v2 }
  0x80   : > { %1044 = vmatmul.mubr.bf16.vlgmr.msra.gmra.mxu1 %v1458_v3 }
 0x13f   : > { %v1002_v11 = vpop.f32.mrf.mxu0 }
 0x140   : > { %v1045_v12 = vpop.f32.mrf.mxu1 }
 0x141   : > { %v1046_v13 = vadd.f32 %v1045_v12, %v1002_v11  ;;  %v1004_v16 = vpop.f32.mrf.mxu0 }
 0x142   : > { %v1047_v17 = vpop.f32.mrf.mxu1 }
 0x143   : > { %v1066_v18 = vmul.f32 %v1059_v10, %v1046_v13  ;;  %v1048_v19 = vadd.f32 %v1047_v17, %v1004_v16  ;;  %v1006_v21 = vpop.f32.mrf.mxu0 }
 0x144   : > { %v1049_v22 = vpop.f32.mrf.mxu1 }
 0x145   : > { %v1082_v23 = vadd.f32 %v1075_v14, %v1066_v18  ;;  %v1067_v24 = vmul.f32 %v1063_v15, %v1048_v19  ;;  %v1050_v25 = vadd.f32 %v1049_v22, %v1006_v21  ;;  %v1008_v26 = vpop.f32.mrf.mxu0 }
 0x146   : > { %v1051_v27 = vpop.f32.mrf.mxu1 }
 0x147   : > { %v1086_v28 = vmax.f32 %v1082_v23, 0.0  ;;  %v1083_v29 = vadd.f32 %v1079_v20, %v1067_v24  ;;  %v1068_v30 = vmul.f32 %v1059_v10, %v1050_v25  ;;  %v1052_v31 = vadd.f32 %v1051_v27, %v1008_v26 }
 0x149   : > { %1090 = vst [vmem:[%s539_s9] sm:$0xff] %v1086_v28  ;;  %v1087_v32 = vmax.f32 %v1083_v29, 0.0  ;;  %v1084_v33 = vadd.f32 %v1075_v14, %v1068_v30  ;;  %v1069_v34 = vmul.f32 %v1063_v15, %v1052_v31 }
 0x14b   : > { %1091 = vst [vmem:[%s539_s9 + $0x8] sm:$0xff] %v1087_v32  ;;  %v1088_v35 = vmax.f32 %v1084_v33, 0.0  ;;  %v1085_v36 = vadd.f32 %v1079_v20, %v1069_v34  ;;  %1100 = sbr.rel (!%p1561_p6) target bundleno = 344 (0x158), region = 78 }
 0x14d   : > { %1092 = vst [vmem:[%s539_s9 + $0x10] sm:$0xff] %v1088_v35  ;;  %v1089_v37 = vmax.f32 %v1085_v36, 0.0 }
 0x14f   : > { %1093 = vst [vmem:[%s539_s9 + $0x18] sm:$0xff] %v1089_v37 }
 0x150   : > { %v1119_v38 = vld [vmem:[%s539_s9] sm:$0xff] }
 0x151   : > { %1120 = vst [vmem:[%s1106_s11] sm:$0xff] %v1119_v38 }
 0x152   : > { %v1121_v39 = vld [vmem:[%s539_s9 + $0x8] sm:$0xff] }
 0x153   : > { %1122 = vst [vmem:[%s1106_s11 + $0x8] sm:$0xff] %v1121_v39 }
 0x154   : > { %v1123_v40 = vld [vmem:[%s539_s9 + $0x10] sm:$0xff] }
 0x155   : > { %1124 = vst [vmem:[%s1106_s11 + $0x20] sm:$0xff] %v1123_v40 }
 0x156   : > { %v1125_v41 = vld [vmem:[%s539_s9 + $0x18] sm:$0xff] }
 0x157   : > { %1126 = vst [vmem:[%s1106_s11 + $0x28] sm:$0xff] %v1125_v41 }
 0x158 PF: > { %s14_s19 = sadd.s32 1, %s1499_s19   ;;  %s1825_s15 = smov %s1487_s16 }
 0x159   : > { %p11_p12 = scmp.ge.s32.totalorder %s14_s19, 4   ;;  %s1826_s16 = smov %s1566_s25 }
 0x15a   : > { %s1827_s17 = smov %s1495_s18  ;;  %s1828_s18 = smov %s1830_s20 }
 0x15b   :  { %13 = sbr.rel (!%p11_p12) target bundleno = 3 (0x3), region = 141 }

// kernel: shufflenet2_forward.137
= control target key start
LH: loop header
LB: loop body
LE: loop exit
PB: predicated region body
PF: predicated region fallthrough
CT: control target
= control target key end

     0   :  { %9 = vsyncpa [#allocation3], 0  ;;  %s714_s0 = inlined_call_operand.vmem [shape: f32[2,3,3,488], index: 0, kind: input, shape index: {}]   ;;  %s715_s1 = inlined_call_operand.vmem [shape: f32[9,488], index: 1, kind: input, shape index: {}]   ;;  %s716_s2 = inlined_call_operand.hbm [shape: f32[1,488], index: 2, kind: input, shape index: {}]   ;;  %s717_s3 = inlined_call_operand.hbm [shape: f32[1,488], index: 3, kind: input, shape index: {}]   ;;  %s718_s4 = inlined_call_operand.vmem [shape: f32[2,1,1,488], index: 4, kind: output, shape index: {}]  }
   0x1   :  { %10 = vsyncpa [#allocation5], 0  ;;  %s617_s15 = smov 0  }
   0x2 LB: > { %s623_s16 = sadd.s32 4294967295, %s587_s15   ;;  %p463_p0 = scmp.ge.s32.totalorder %s587_s15, 1  ;;  %s587_s15 = sphi %s617_s15, %s16_s15  }
   0x3   : > { %p136_p1 = scmp.lt.s32.totalorder %s587_s15, 3  ;;  %p719_p2 = scmp.eq.s32.totalorder %s623_s16, 0 }
   0x4   : > { %s589_s18 = smov [#allocation2]   ;;  %s590_s20 = smov [#allocation4]  }
   0x5   : > { %p628_p3 = pnand %p463_p0, %p136_p1  ;;  %s152_s19 = sshll.u32 %s589_s18, 4  ;;  %s153_s19 = int_to_ptr.vmem [resolvable:$true] %s152_s19 }
   0x6   : > { %s163_s21 = sshll.u32 %s590_s20, 4  ;;  %s532_s23 = scalar_lea.vmem %s153_s19, 64  ;;  %s164_s21 = int_to_ptr.vmem [resolvable:$true] %s163_s21 }
   0x7   : > { %s721_s17 = scalar_select %p628_p3, 1, 0 }
   0x8   : > { %p491_p4 = pneg %p628_p3  ;;  %p533_p7 = scmp.ne.s32.totalorder %s153_s19, %s532_s23 }
   0x9   : > { %p540_p10 = scmp.lt.s32.totalorder %s153_s19, %s153_s19  ;;  %p541_p11 = scmp.lt.s32.totalorder %s532_s23, %s532_s23 }
   0xa   : > { %p636_p5 = pnand %p719_p2, %p491_p4 }
   0xb   : > { %p542_p12 = por %p541_p11, %p540_p10 }
   0xc   : > { %p523_p6 = pneg %p636_p5 }
   0xe   : > { %p535_p8 = pnand %p533_p7, %p523_p6 }
  0x10   : > { %p536_p9 = pneg %p535_p8 }
  0x12   : > { %p543_p13 = pnand %p542_p12, %p536_p9 }
  0x14   : > { %546 = shalt.err (!%p543_p13)
}
  0x15   : > { %494 = dma.hbm_to_vmem [thread:$0]  (!%p636_p5), %s716_s2, 64, %s153_s19, [#allocation3]  }
  0x16   : > { %s558_s26 = scalar_lea.vmem %s164_s21, 64  ;;  %p566_p7 = scmp.lt.s32.totalorder %s164_s21, %s164_s21 }
  0x17   : > { %p559_p0 = scmp.ne.s32.totalorder %s164_s21, %s558_s26  ;;  %p567_p8 = scmp.lt.s32.totalorder %s558_s26, %s558_s26 }
  0x19   : > { %p561_p1 = pnand %p559_p0, %p523_p6  ;;  %p568_p2 = por %p567_p8, %p566_p7 }
  0x1b   : > { %p562_p4 = pneg %p561_p1 }
  0x1d   : > { %p569_p3 = pnand %p568_p2, %p562_p4 }
  0x1f   : > { %572 = shalt.err (!%p569_p3)
}
  0x20   : > { %497 = dma.hbm_to_vmem [thread:$0]  (!%p636_p5), %s717_s3, 64, %s164_s21, [#allocation5]  }
  0x21   : > { %p723_p9 = scmp.ne.s32.totalorder %s721_s17, 0 }
  0x22   : > { %p724_p10 = scmp.eq.s32.totalorder (!%p723_p9), %s623_s16, 0 }
  0x23   : > { %184 = sbr.rel (%p723_p9) target bundleno = 81 (0x51), region = 36 }
  0x28   : > { %578 = dma.done.wait (%p724_p10), [#allocation3], 64   ;;  %p725_p6 = pmov %p724_p10 }
  0x2a   : > { %580 = vsyncadd (%p725_p6), [#allocation3], 4294967232  ;;  %p726_p11 = pmov %p725_p6 }
  0x2b   : > { %p727_p2 = pmov %p725_p6 }
  0x2c   : > { %582 = dma.done.wait (%p726_p11), [#allocation5], 64  }
  0x2d   : > { %584 = vsyncadd (%p727_p2), [#allocation5], 4294967232  ;;  %p213_p3 = scmp.lt.s32.totalorder %s623_s16, 1  ;;  %v240_v0 = vlaneseq  ;;  %v591_v1 = vmov 1966171168  }
  0x2e   : > { %v238_v2 = vunpack.c.l.s4 %v591_v1  ;;  %v513_v6 = vld [vmem:[%s715_s1] ss:$8 sps:$4 sm:$0xff]   ;;  %v515_v7 = vld [vmem:[%s715_s1 + $0x10] ss:$8 sps:$4 sm:$0xff]   ;;  %v517_v10 = vld [vmem:[%s715_s1 + $0x4] ss:$8 sps:$4 sm:$0xff]  }
  0x2f   : > { %v241_v4 = vshrl.u32 %v240_v0, 7  ;;  %s729_s16 = smov (!%p213_p3, %s623_s16), 1  ;;  %v518_v11 = vld [vmem:[%s715_s1 + $0x14] ss:$8 sps:$4 sm:$0xff]   ;;  %v373_v57 = vld [vmem:[#allocation2] sm:$0xf] }
  0x30   : > { %v239_v3 = vunpack.c.0.s8 %v238_v2  ;;  %s482_s29 = smul.u32 48, %s729_s16  ;;  %v519_v20 = vld [vmem:[%s715_s1 + $0x20] ss:$8 sps:$4 sm:$0x11]   ;;  %s471_s21 = sshll.u32 %s729_s16, 2  ;;  %vm379_vm0 = vcmp.lt.s32.totalorder %v240_v0, 488 }
  0x31   : > { %v520_v21 = vld [vmem:[%s715_s1 + $0x30] ss:$8 sps:$4 sm:$0x11]   ;;  %v375_v59 = vld [vmem:[#allocation4] sm:$0xf]  ;;  %s221_s24 = scalar_lea.vmem %s718_s4, %s471_s21 }
  0x32   : > { %v242_v5 = vsub.s32 %v239_v3, %v241_v4  ;;  %s683_s10 = scalar_lea.vmem %s714_s0, %s482_s29 }
  0x33   : > { %v230_v14 = vld [vmem:[%s683_s10] ss:$4 sm:$0xf]  ;;  %v472_v15 = vld [vmem:[%s683_s10 + $0x1] ss:$4 sm:$0xf] }
  0x34   : > { %v243_v8 = vrot.slane %v513_v6, %v242_v5  ;;  %v250_v9 = vrot.slane %v515_v7, %v242_v5  ;;  %v296_v16 = vrot.slane %v517_v10, %v242_v5  ;;  %v303_v17 = vrot.slane %v518_v11, %v242_v5  ;;  %v473_v22 = vld [vmem:[%s683_s10 + $0x2] ss:$4 sm:$0xf]  ;;  %v474_v23 = vld [vmem:[%s683_s10 + $0x10] ss:$4 sm:$0xf] }
  0x35   : > { %v475_v30 = vld [vmem:[%s683_s10 + $0x11] ss:$4 sm:$0xf]  ;;  %v354_v32 = vrot.slane %v519_v20, %v242_v5  ;;  %v361_v33 = vrot.slane %v520_v21, %v242_v5  ;;  %v476_v38 = vld [vmem:[%s683_s10 + $0x12] ss:$4 sm:$0xf] }
  0x36   : > { %v251_v12 = vcombine.low %v243_v8, %v250_v9  ;;  %v263_v13 = vcombine.high %v243_v8, %v250_v9  ;;  %v304_v24 = vcombine.low %v296_v16, %v303_v17  ;;  %v317_v25 = vcombine.high %v296_v16, %v303_v17  ;;  %v477_v43 = vld [vmem:[%s683_s10 + $0x20] ss:$4 sm:$0xf]  ;;  %v478_v47 = vld [vmem:[%s683_s10 + $0x21] ss:$4 sm:$0xf] }
  0x37   : > { %v362_v42 = vcombine.low %v354_v32, %v361_v33  ;;  %v479_v51 = vld [vmem:[%s683_s10 + $0x22] ss:$4 sm:$0xf] }
  0x38   : > { %v258_v18 = vrot.slane %v251_v12, %v242_v5  ;;  %v270_v19 = vrot.slane %v263_v13, %v242_v5  ;;  %v311_v31 = vrot.slane %v304_v24, %v242_v5  ;;  %v324_v37 = vrot.slane %v317_v25, %v242_v5 }
  0x39   : > { %v369_v50 = vrot.slane %v362_v42, %v242_v5 }
  0x3a   : > { %v260_v26 = vmul.f32 %v258_v18, %v230_v14  ;;  %v272_v27 = vmul.f32 %v472_v15, %v270_v19  ;;  %v276_v28 = vcombine.high %v258_v18, %v258_v18  ;;  %v282_v29 = vcombine.high %v270_v19, %v270_v19 }
  0x3b   : > { %v313_v40 = vmul.f32 %v475_v30, %v311_v31  ;;  %v330_v41 = vcombine.high %v311_v31, %v311_v31  ;;  %v326_v45 = vmul.f32 %v476_v38, %v324_v37  ;;  %v336_v46 = vcombine.high %v324_v37, %v324_v37 }
  0x3c   : > { %v273_v34 = vadd.f32 %v272_v27, %v260_v26  ;;  %v278_v35 = vmul.f32 %v473_v22, %v276_v28  ;;  %v284_v36 = vmul.f32 %v474_v23, %v282_v29  ;;  %v371_v55 = vmul.f32 %v479_v51, %v369_v50 }
  0x3d   : > { %v332_v49 = vmul.f32 %v477_v43, %v330_v41  ;;  %v338_v53 = vmul.f32 %v478_v47, %v336_v46 }
  0x3e   : > { %v279_v39 = vadd.f32 %v278_v35, %v273_v34 }
  0x40   : > { %v285_v44 = vadd.f32 %v284_v36, %v279_v39 }
  0x42   : > { %v314_v48 = vadd.f32 %v313_v40, %v285_v44 }
  0x44   : > { %v327_v52 = vadd.f32 %v326_v45, %v314_v48 }
  0x46   : > { %v333_v54 = vadd.f32 %v332_v49, %v327_v52 }
  0x48   : > { %v339_v56 = vadd.f32 %v338_v53, %v333_v54 }
  0x4a   : > { %v372_v58 = vadd.f32 %v371_v55, %v339_v56 }
  0x4c   : > { %v374_v60 = vmul.f32 %v373_v57, %v372_v58 }
  0x4e   : > { %v376_v61 = vadd.f32 %v375_v59, %v374_v60 }
  0x50   : > { %381 = vst.msk [vmem:[%s221_s24] sm:$0xf] %vm379_vm0, %v376_v61 }
  0x51 PF: > { %s16_s15 = sadd.s32 1, %s587_s15  }
  0x52   : > { %p13_p5 = scmp.ge.s32.totalorder %s16_s15, 4  }
  0x54   :  { %15 = sbr.rel (!%p13_p5) target bundleno = 2 (0x2), region = 83 }
  0x59   :  { %401 = vsyncpa [#allocation3], 1 }
  0x5a   :  { %403 = vsyncpa [#allocation3 + $0x1], 1 }
  0x5b   :  { %404 = vsyncpa [#allocation5], 1 }

// kernel: shufflenet2_forward.151
= control target key start
LH: loop header
LB: loop body
LE: loop exit
PB: predicated region body
PF: predicated region fallthrough
CT: control target
= control target key end

     0   :  { %s2111_s0 = inlined_call_operand.vmem [shape: bf16[16,9216], index: 0, kind: input, shape index: {}]   ;;  %s2112_s1 = inlined_call_operand.vmem [shape: bf16[9216,2048], index: 1, kind: input, shape index: {}]   ;;  %s2113_s2 = inlined_call_operand.vmem [shape: f32[1,2048], index: 2, kind: input, shape index: {}]   ;;  %s2114_s3 = inlined_call_operand.vmem [shape: f32[1,2048], index: 3, kind: input, shape index: {}]   ;;  %s2115_s4 = inlined_call_operand.vmem [shape: f32[16,2048], index: 4, kind: output, shape index: {}]  }
   0x1   :  { %2118 = sst [smem:[#allocation8_spill]] %s2111_s0 }
   0x2   :  { %2119 = sst [smem:[#allocation9_spill]] %s2112_s1 }
   0x3   :  { %s1716_s15 = smov 0   ;;  %s1718_s16 = smov 0  }
   0x4   :  { %s1720_s17 = smov 0   ;;  %s1722_s18 = smov 0  }
   0x5   :  { %s1724_s19 = smov 0   ;;  %s1726_s20 = smov 0  }
   0x6   :  { %s1728_s21 = smov 0   ;;  %s1730_s22 = smov 0  }
   0x7   :  { %s1732_s23 = smov 0   ;;  %s1734_s24 = smov 0  }
   0x8   :  { %s1736_s25 = smov 0  }
   0x9 LB: > { %s1315_s26 = sadd.s32 4294967295, %s1688_s25   ;;  %s26_s27 = sadd.s32 1, %s1680_s23  ;;  %s1688_s25 = sphi %s1736_s25, %s14_s25   ;;  %s1684_s24 = sphi %s1734_s24, %s2138_s24   ;;  %s1680_s23 = sphi %s1732_s23, %s2137_s23   ;;  %s1676_s22 = sphi %s1730_s22, %s2136_s22   ;;  %s1672_s21 = sphi %s1728_s21, %s2135_s21   ;;  %s1668_s20 = sphi %s1726_s20, %s2134_s20   ;;  %s1664_s19 = sphi %s1724_s19, %s2133_s19   ;;  %s1660_s18 = sphi %s1722_s18, %s2132_s18   ;;  %s1656_s17 = sphi %s1720_s17, %s2131_s17   ;;  %s1652_s16 = sphi %s1718_s16, %s2130_s16   ;;  %s1648_s15 = sphi %s1716_s15, %s2129_s15  }
   0xa   : > { %p27_p0 = scmp.ge.s32.totalorder %s26_s27, 18  ;;  %s29_s28 = sadd.s32 1, %s1684_s24 }
   0xb   : > { %s42_s29 = sadd.s32 1, %s1668_s20  ;;  %p49_p1 = scmp.ne.s32.totalorder %s1668_s20, %s1664_s19 }
   0xc   : > { %s2140_s27 = smov (%p27_p0, %s26_s27), 0  ;;  %s2142_s28 = smov (!%p27_p0, %s29_s28), %s1684_s24 }
   0xd   : > { %2120 = sst [smem:[#allocation6_spill]] %s2140_s27  ;;  %s38_s30 = ssub.s32 %s1680_s23, %s2140_s27 }
   0xe   : > { %p50_p2 = scmp.eq.s32.totalorder %s1688_s25, 0  ;;  %p31_p3 = scmp.ge.s32.totalorder %s2142_s28, 8 }
   0xf   : > { %p40_p4 = scmp.eq.s32.totalorder %s38_s30, 0  ;;  %s70_s6 = sadd.s32 1, %s1660_s18 }
  0x10   : > { %p1783_p5 = por %p50_p2, %p49_p1  ;;  %s2144_s28 = smov (%p31_p3, %s2142_s28), 0 }
  0x11   : > { %2122 = sst [smem:[#allocation7_spill]] %s2144_s28  ;;  %s66_s8 = ssub.s32 %s1684_s24, %s2144_s28 }
  0x12   : > { %s1791_s7 = scalar_select %p40_p4, %s1668_s20, %s42_s29  }
  0x13   : > { %p77_p6 = scmp.ne.s32.totalorder %s1660_s18, %s1656_s17  ;;  %s67_s9 = sor.u32 %s66_s8, %s38_s30 }
  0x14   : > { %p148_p7 = scmp.eq.s32.totalorder %s66_s8, 0  ;;  %p68_p8 = scmp.eq.s32.totalorder %s67_s9, 0 }
  0x15   : > { %p1797_p9 = por %p77_p6, %p50_p2  ;;  %s150_s11 = sadd.s32 1, %s1652_s16 }
  0x16   : > { %p160_p10 = scmp.ne.s32.totalorder %s1652_s16, %s1648_s15  ;;  %p161_p11 = scmp.eq.s32.totalorder %s1315_s26, 143 }
  0x17   : > { %s1805_s12 = scalar_select %p68_p8, %s1660_s18, %s70_s6  }
  0x18   : > { %s1808_s13 = scalar_select %p148_p7, %s1652_s16, %s150_s11  }
  0x19   : > { %p1810_p12 = por %p161_p11, %p160_p10  ;;  %p1318_p13 = scmp.ge.s32.totalorder %s1688_s25, 144 }
  0x1b   : > { %183 = sbr.rel (%p1318_p13) target bundleno = 118 (0x76), region = 16 }
  0x20   : > { %186 = sbr.rel (!%p1783_p5) target bundleno = 44 (0x2c), region = 20  ;;  %s188_s29 = sand.u32 (%p1783_p5), 1, %s1668_s20  }
  0x21   : > { %s1408_s30 = sshll.u32 (%p1783_p5), %s1680_s23, 4  ;;  %s1319_s8 = sshll.u32 (%p1783_p5), %s188_s29, 5 }
  0x22   : > { %s2125_s0 = sld [smem:[#allocation8_spill]] (%p1783_p5)  ;;  %s190_s26 = scalar_lea.vmem (%p1783_p5), [#allocation3], %s1319_s8 }
  0x28   : > { %s196_s11 = scalar_lea.vmem %s2125_s0, %s1408_s30 }
  0x29   : > { %v209_v0 = vld [vmem:[%s196_s11] sm:$0xff]  ;;  %v211_v1 = vld [vmem:[%s196_s11 + $0x8] sm:$0xff] }
  0x2a   : > { %v213_v2 = vld [vmem:[%s196_s11 + $0x120] sm:$0xff]  ;;  %210 = vst [vmem:[%s190_s26] sm:$0xff] %v209_v0  ;;  %212 = vst [vmem:[%s190_s26 + $0x8] sm:$0xff] %v211_v1  ;;  %v215_v3 = vld [vmem:[%s196_s11 + $0x128] sm:$0xff] }
  0x2b   : > { %214 = vst [vmem:[%s190_s26 + $0x10] sm:$0xff] %v213_v2  ;;  %216 = vst [vmem:[%s190_s26 + $0x18] sm:$0xff] %v215_v3 }
  0x2c PF: > { %222 = sbr.rel (!%p1797_p9) target bundleno = 118 (0x76), region = 43  ;;  %s224_s5 = sand.u32 (%p1797_p9), 1, %s1660_s18  }
  0x2d   : > { %s1324_s29 = sshll.u32 (%p1797_p9), %s1684_s24, 1  ;;  %s1322_s6 = sshll.u32 (%p1797_p9), %s224_s5, 9 }
  0x2e   : > { %s1409_s30 = sshll.u32 (%p1797_p9), %s1680_s23, 10  ;;  %s2126_s1 = sld [smem:[#allocation9_spill]] (%p1797_p9) }
  0x2f   : > { %s230_s9 = sadd.s32 (%p1797_p9), %s1409_s30, %s1324_s29  ;;  %s1835_s10 = scalar_lea.vmem (%p1797_p9), [#allocation4], %s1322_s6 }
  0x30   : > { %s1326_s0 = sshll.u32 (%p1797_p9), %s230_s9, 2 }
  0x34   : > { %s1830_s27 = scalar_lea.vmem %s2126_s1, %s1326_s0 }
  0x35   : > { %v387_v4 = vld [vmem:[%s1830_s27] sm:$0xff] }
  0x36   : > { %v389_v5 = vld [vmem:[%s1830_s27 + $0x40] sm:$0xff]  ;;  %388 = vst [vmem:[%s1835_s10] sm:$0xff] %v387_v4 }
  0x37   : > { %v391_v6 = vld [vmem:[%s1830_s27 + $0x80] sm:$0xff]  ;;  %390 = vst [vmem:[%s1835_s10 + $0x8] sm:$0xff] %v389_v5 }
  0x38   : > { %392 = vst [vmem:[%s1835_s10 + $0x10] sm:$0xff] %v391_v6  ;;  %v393_v7 = vld [vmem:[%s1830_s27 + $0xc0] sm:$0xff] }
  0x39   : > { %v395_v8 = vld [vmem:[%s1830_s27 + $0x100] sm:$0xff]  ;;  %394 = vst [vmem:[%s1835_s10 + $0x18] sm:$0xff] %v393_v7 }
  0x3a   : > { %v397_v9 = vld [vmem:[%s1830_s27 + $0x140] sm:$0xff]  ;;  %396 = vst [vmem:[%s1835_s10 + $0x20] sm:$0xff] %v395_v8 }
  0x3b   : > { %398 = vst [vmem:[%s1835_s10 + $0x28] sm:$0xff] %v397_v9  ;;  %v399_v10 = vld [vmem:[%s1830_s27 + $0x180] sm:$0xff] }
  0x3c   : > { %v401_v11 = vld [vmem:[%s1830_s27 + $0x1c0] sm:$0xff]  ;;  %400 = vst [vmem:[%s1835_s10 + $0x30] sm:$0xff] %v399_v10 }
  0x3d   : > { %v403_v12 = vld [vmem:[%s1830_s27 + $0x200] sm:$0xff]  ;;  %402 = vst [vmem:[%s1835_s10 + $0x38] sm:$0xff] %v401_v11 }
  0x3e   : > { %404 = vst [vmem:[%s1835_s10 + $0x40] sm:$0xff] %v403_v12  ;;  %v405_v13 = vld [vmem:[%s1830_s27 + $0x240] sm:$0xff] }
  0x3f   : > { %v407_v14 = vld [vmem:[%s1830_s27 + $0x280] sm:$0xff]  ;;  %406 = vst [vmem:[%s1835_s10 + $0x48] sm:$0xff] %v405_v13 }
  0x40   : > { %v409_v15 = vld [vmem:[%s1830_s27 + $0x2c0] sm:$0xff]  ;;  %408 = vst [vmem:[%s1835_s10 + $0x50] sm:$0xff] %v407_v14 }
  0x41   : > { %410 = vst [vmem:[%s1835_s10 + $0x58] sm:$0xff] %v409_v15  ;;  %v411_v16 = vld [vmem:[%s1830_s27 + $0x300] sm:$0xff] }
  0x42   : > { %v413_v17 = vld [vmem:[%s1830_s27 + $0x340] sm:$0xff]  ;;  %412 = vst [vmem:[%s1835_s10 + $0x60] sm:$0xff] %v411_v16 }
  0x43   : > { %v415_v18 = vld [vmem:[%s1830_s27 + $0x380] sm:$0xff]  ;;  %414 = vst [vmem:[%s1835_s10 + $0x68] sm:$0xff] %v413_v17 }
  0x44   : > { %416 = vst [vmem:[%s1835_s10 + $0x70] sm:$0xff] %v415_v18  ;;  %v417_v19 = vld [vmem:[%s1830_s27 + $0x3c0] sm:$0xff] }
  0x45   : > { %v419_v20 = vld [vmem:[%s1830_s27 + $0x400] sm:$0xff]  ;;  %418 = vst [vmem:[%s1835_s10 + $0x78] sm:$0xff] %v417_v19 }
  0x46   : > { %v421_v21 = vld [vmem:[%s1830_s27 + $0x440] sm:$0xff]  ;;  %420 = vst [vmem:[%s1835_s10 + $0x80] sm:$0xff] %v419_v20 }
  0x47   : > { %422 = vst [vmem:[%s1835_s10 + $0x88] sm:$0xff] %v421_v21  ;;  %v423_v22 = vld [vmem:[%s1830_s27 + $0x480] sm:$0xff] }
  0x48   : > { %v425_v23 = vld [vmem:[%s1830_s27 + $0x4c0] sm:$0xff]  ;;  %424 = vst [vmem:[%s1835_s10 + $0x90] sm:$0xff] %v423_v22 }
  0x49   : > { %v427_v24 = vld [vmem:[%s1830_s27 + $0x500] sm:$0xff]  ;;  %426 = vst [vmem:[%s1835_s10 + $0x98] sm:$0xff] %v425_v23 }
  0x4a   : > { %428 = vst [vmem:[%s1835_s10 + $0xa0] sm:$0xff] %v427_v24  ;;  %v429_v25 = vld [vmem:[%s1830_s27 + $0x540] sm:$0xff] }
  0x4b   : > { %v431_v26 = vld [vmem:[%s1830_s27 + $0x580] sm:$0xff]  ;;  %430 = vst [vmem:[%s1835_s10 + $0xa8] sm:$0xff] %v429_v25 }
  0x4c   : > { %v433_v27 = vld [vmem:[%s1830_s27 + $0x5c0] sm:$0xff]  ;;  %432 = vst [vmem:[%s1835_s10 + $0xb0] sm:$0xff] %v431_v26 }
  0x4d   : > { %434 = vst [vmem:[%s1835_s10 + $0xb8] sm:$0xff] %v433_v27  ;;  %v435_v28 = vld [vmem:[%s1830_s27 + $0x600] sm:$0xff] }
  0x4e   : > { %v437_v29 = vld [vmem:[%s1830_s27 + $0x640] sm:$0xff]  ;;  %436 = vst [vmem:[%s1835_s10 + $0xc0] sm:$0xff] %v435_v28 }
  0x4f   : > { %v439_v30 = vld [vmem:[%s1830_s27 + $0x680] sm:$0xff]  ;;  %438 = vst [vmem:[%s1835_s10 + $0xc8] sm:$0xff] %v437_v29 }
  0x50   : > { %440 = vst [vmem:[%s1835_s10 + $0xd0] sm:$0xff] %v439_v30  ;;  %v441_v31 = vld [vmem:[%s1830_s27 + $0x6c0] sm:$0xff] }
  0x51   : > { %v443_v32 = vld [vmem:[%s1830_s27 + $0x700] sm:$0xff]  ;;  %442 = vst [vmem:[%s1835_s10 + $0xd8] sm:$0xff] %v441_v31 }
  0x52   : > { %v445_v33 = vld [vmem:[%s1830_s27 + $0x740] sm:$0xff]  ;;  %444 = vst [vmem:[%s1835_s10 + $0xe0] sm:$0xff] %v443_v32 }
  0x53   : > { %446 = vst [vmem:[%s1835_s10 + $0xe8] sm:$0xff] %v445_v33  ;;  %v447_v34 = vld [vmem:[%s1830_s27 + $0x780] sm:$0xff] }
  0x54   : > { %v449_v35 = vld [vmem:[%s1830_s27 + $0x7c0] sm:$0xff]  ;;  %448 = vst [vmem:[%s1835_s10 + $0xf0] sm:$0xff] %v447_v34 }
  0x55   : > { %v451_v36 = vld [vmem:[%s1830_s27 + $0x800] sm:$0xff]  ;;  %450 = vst [vmem:[%s1835_s10 + $0xf8] sm:$0xff] %v449_v35 }
  0x56   : > { %452 = vst [vmem:[%s1835_s10 + $0x100] sm:$0xff] %v451_v36  ;;  %v453_v37 = vld [vmem:[%s1830_s27 + $0x840] sm:$0xff] }
  0x57   : > { %v455_v38 = vld [vmem:[%s1830_s27 + $0x880] sm:$0xff]  ;;  %454 = vst [vmem:[%s1835_s10 + $0x108] sm:$0xff] %v453_v37 }
  0x58   : > { %v457_v39 = vld [vmem:[%s1830_s27 + $0x8c0] sm:$0xff]  ;;  %456 = vst [vmem:[%s1835_s10 + $0x110] sm:$0xff] %v455_v38 }
  0x59   : > { %458 = vst [vmem:[%s1835_s10 + $0x118] sm:$0xff] %v457_v39  ;;  %v459_v40 = vld [vmem:[%s1830_s27 + $0x900] sm:$0xff] }
  0x5a   : > { %v461_v41 = vld [vmem:[%s1830_s27 + $0x940] sm:$0xff]  ;;  %460 = vst [vmem:[%s1835_s10 + $0x120] sm:$0xff] %v459_v40 }
  0x5b   : > { %v463_v42 = vld [vmem:[%s1830_s27 + $0x980] sm:$0xff]  ;;  %462 = vst [vmem:[%s1835_s10 + $0x128] sm:$0xff] %v461_v41 }
  0x5c   : > { %464 = vst [vmem:[%s1835_s10 + $0x130] sm:$0xff] %v463_v42  ;;  %v465_v43 = vld [vmem:[%s1830_s27 + $0x9c0] sm:$0xff] }
  0x5d   : > { %v467_v44 = vld [vmem:[%s1830_s27 + $0xa00] sm:$0xff]  ;;  %466 = vst [vmem:[%s1835_s10 + $0x138] sm:$0xff] %v465_v43 }
  0x5e   : > { %v469_v45 = vld [vmem:[%s1830_s27 + $0xa40] sm:$0xff]  ;;  %468 = vst [vmem:[%s1835_s10 + $0x140] sm:$0xff] %v467_v44 }
  0x5f   : > { %470 = vst [vmem:[%s1835_s10 + $0x148] sm:$0xff] %v469_v45  ;;  %v471_v46 = vld [vmem:[%s1830_s27 + $0xa80] sm:$0xff] }
  0x60   : > { %v473_v47 = vld [vmem:[%s1830_s27 + $0xac0] sm:$0xff]  ;;  %472 = vst [vmem:[%s1835_s10 + $0x150] sm:$0xff] %v471_v46 }
  0x61   : > { %v475_v48 = vld [vmem:[%s1830_s27 + $0xb00] sm:$0xff]  ;;  %474 = vst [vmem:[%s1835_s10 + $0x158] sm:$0xff] %v473_v47 }
  0x62   : > { %476 = vst [vmem:[%s1835_s10 + $0x160] sm:$0xff] %v475_v48  ;;  %v477_v49 = vld [vmem:[%s1830_s27 + $0xb40] sm:$0xff] }
  0x63   : > { %v479_v50 = vld [vmem:[%s1830_s27 + $0xb80] sm:$0xff]  ;;  %478 = vst [vmem:[%s1835_s10 + $0x168] sm:$0xff] %v477_v49 }
  0x64   : > { %v481_v51 = vld [vmem:[%s1830_s27 + $0xbc0] sm:$0xff]  ;;  %480 = vst [vmem:[%s1835_s10 + $0x170] sm:$0xff] %v479_v50 }
  0x65   : > { %482 = vst [vmem:[%s1835_s10 + $0x178] sm:$0xff] %v481_v51  ;;  %v483_v52 = vld [vmem:[%s1830_s27 + $0xc00] sm:$0xff] }
  0x66   : > { %v485_v53 = vld [vmem:[%s1830_s27 + $0xc40] sm:$0xff]  ;;  %484 = vst [vmem:[%s1835_s10 + $0x180] sm:$0xff] %v483_v52 }
  0x67   : > { %v487_v54 = vld [vmem:[%s1830_s27 + $0xc80] sm:$0xff]  ;;  %486 = vst [vmem:[%s1835_s10 + $0x188] sm:$0xff] %v485_v53 }
  0x68   : > { %488 = vst [vmem:[%s1835_s10 + $0x190] sm:$0xff] %v487_v54  ;;  %v489_v55 = vld [vmem:[%s1830_s27 + $0xcc0] sm:$0xff] }
  0x69   : > { %v491_v56 = vld [vmem:[%s1830_s27 + $0xd00] sm:$0xff]  ;;  %490 = vst [vmem:[%s1835_s10 + $0x198] sm:$0xff] %v489_v55 }
  0x6a   : > { %v493_v57 = vld [vmem:[%s1830_s27 + $0xd40] sm:$0xff]  ;;  %492 = vst [vmem:[%s1835_s10 + $0x1a0] sm:$0xff] %v491_v56 }
  0x6b   : > { %494 = vst [vmem:[%s1835_s10 + $0x1a8] sm:$0xff] %v493_v57  ;;  %v495_v58 = vld [vmem:[%s1830_s27 + $0xd80] sm:$0xff] }
  0x6c   : > { %v497_v59 = vld [vmem:[%s1830_s27 + $0xdc0] sm:$0xff]  ;;  %496 = vst [vmem:[%s1835_s10 + $0x1b0] sm:$0xff] %v495_v58 }
  0x6d   : > { %v499_v60 = vld [vmem:[%s1830_s27 + $0xe00] sm:$0xff]  ;;  %498 = vst [vmem:[%s1835_s10 + $0x1b8] sm:$0xff] %v497_v59 }
  0x6e   : > { %500 = vst [vmem:[%s1835_s10 + $0x1c0] sm:$0xff] %v499_v60  ;;  %v501_v61 = vld [vmem:[%s1830_s27 + $0xe40] sm:$0xff] }
  0x6f   : > { %v503_v62 = vld [vmem:[%s1830_s27 + $0xe80] sm:$0xff]  ;;  %502 = vst [vmem:[%s1835_s10 + $0x1c8] sm:$0xff] %v501_v61 }
  0x70   : > { %v505_v63 = vld [vmem:[%s1830_s27 + $0xec0] sm:$0xff]  ;;  %504 = vst [vmem:[%s1835_s10 + $0x1d0] sm:$0xff] %v503_v62 }
  0x71   : > { %506 = vst [vmem:[%s1835_s10 + $0x1d8] sm:$0xff] %v505_v63  ;;  %v507_v0 = vld [vmem:[%s1830_s27 + $0xf00] sm:$0xff] }
  0x72   : > { %v509_v1 = vld [vmem:[%s1830_s27 + $0xf40] sm:$0xff]  ;;  %508 = vst [vmem:[%s1835_s10 + $0x1e0] sm:$0xff] %v507_v0 }
  0x73   : > { %v511_v2 = vld [vmem:[%s1830_s27 + $0xf80] sm:$0xff]  ;;  %510 = vst [vmem:[%s1835_s10 + $0x1e8] sm:$0xff] %v509_v1 }
  0x74   : > { %512 = vst [vmem:[%s1835_s10 + $0x1f0] sm:$0xff] %v511_v2  ;;  %v513_v3 = vld [vmem:[%s1830_s27 + $0xfc0] sm:$0xff] }
  0x75   : > { %514 = vst [vmem:[%s1835_s10 + $0x1f8] sm:$0xff] %v513_v3 }
  0x76 PF: > { %p1327_p0 = scmp.ge.s32.totalorder %s1688_s25, 1  ;;  %p535_p1 = scmp.lt.s32.totalorder %s1688_s25, 145 }
  0x78   : > { %p536_p2 = pnand %p1327_p0, %p535_p1 }
  0x79   : > { %s542_s0 = sand.u32 (!%p536_p2), 1, %s1664_s19   ;;  %s549_s28 = sand.u32 (!%p536_p2), 1, %s1656_s17  }
  0x7a   : > { %539 = sbr.rel (%p536_p2) target bundleno = 431 (0x1af), region = 89  ;;  %s1328_s11 = sshll.u32 (!%p536_p2), %s542_s0, 5 }
  0x7b   : > { %s1329_s26 = sshll.u32 (!%p536_p2), %s549_s28, 9  ;;  %s582_s5 = sand.u32 (!%p536_p2), 1, %s1648_s15  }
  0x7c   : > { %s1331_s29 = sshll.u32 (!%p536_p2), %s1676_s22, 1  ;;  %s1330_s27 = sshll.u32 (!%p536_p2), %s582_s5, 5 }
  0x7d   : > { %p590_p3 = scmp.lt.s32.totalorder (!%p536_p2), %s1331_s29, 15  ;;  %s1978_s19 = scalar_lea.vmem (!%p536_p2), [#allocation3], %s1328_s11 }
  0x7e   : > { %s1980_s17 = scalar_lea.vmem (!%p536_p2), [#allocation4], %s1329_s26  ;;  %s1982_s15 = scalar_lea.vmem (!%p536_p2), [#allocation5], %s1330_s27 }
  0x7f   : > { %s2146_s29 = smov (!%p590_p3, %s1331_s29), 15  ;;  %p1333_p4 = scmp.ne.s32.totalorder %s1672_s21, 0 }
  0x80   : > { %s592_s9 = scalar_lea.vmem %s2113_s2, %s2146_s29  ;;  %s597_s1 = scalar_lea.vmem %s2114_s3, %s2146_s29 }
  0x81   : > { %604 = sbr.rel (%p1333_p4) target bundleno = 137 (0x89), region = 101 }
  0x86   : > { %v1690_v4 = vmov 0.0  }
  0x87   : > { %605 = vst [vmem:[#allocation2 + $0x10] sm:$0xff] %v1690_v4  ;;  %606 = vst [vmem:[#allocation2] sm:$0xff] %v1690_v4 }
  0x88   : > { %607 = vst [vmem:[#allocation2 + $0x18] sm:$0xff] %v1690_v4  ;;  %608 = vst [vmem:[#allocation2 + $0x8] sm:$0xff] %v1690_v4 }
  0x89 PF: > { %v1500_v5 = vld [vmem:[%s1980_s17 + $0x74] ss:$8 sps:$4 sm:$0xff]   ;;  %v1504_v7 = vld [vmem:[%s1980_s17 + $0x70] ss:$8 sps:$4 sm:$0xff]   ;;  %v1506_v9 = vld [vmem:[%s1980_s17 + $0x64] ss:$8 sps:$4 sm:$0xff]  }
  0x8a   : > { %v1502_v6 = vld [vmem:[%s1980_s17 + $0x174] ss:$8 sps:$4 sm:$0xff]   ;;  %1021 = vmatprep.subr.bf16.mxu0 %v1500_v5  ;;  %v1505_v8 = vld [vmem:[%s1980_s17 + $0x170] ss:$8 sps:$4 sm:$0xff]   ;;  %v1508_v10 = vld [vmem:[%s1980_s17 + $0x164] ss:$8 sps:$4 sm:$0xff]  }
  0x8b   : > { %1064 = vmatprep.subr.bf16.mxu1 %v1502_v6  ;;  %1022 = vmatpush1.bf16.msra.mxu0 %v1504_v7  ;;  %v1510_v11 = vld [vmem:[%s1980_s17 + $0x60] ss:$8 sps:$4 sm:$0xff]   ;;  %v1512_v13 = vld [vmem:[%s1980_s17 + $0x54] ss:$8 sps:$4 sm:$0xff]   ;;  %v1516_v15 = vld [vmem:[%s1980_s17 + $0x50] ss:$8 sps:$4 sm:$0xff]  }
  0x8c   : > { %1065 = vmatpush1.bf16.msra.mxu1 %v1505_v8  ;;  %1023 = vmatprep.subr.bf16.mxu0 %v1506_v9  ;;  %v1511_v12 = vld [vmem:[%s1980_s17 + $0x160] ss:$8 sps:$4 sm:$0xff]   ;;  %v1514_v14 = vld [vmem:[%s1980_s17 + $0x154] ss:$8 sps:$4 sm:$0xff]   ;;  %v1517_v16 = vld [vmem:[%s1980_s17 + $0x150] ss:$8 sps:$4 sm:$0xff]  }
  0x8d   : > { %1066 = vmatprep.subr.bf16.mxu1 %v1508_v10  ;;  %v1518_v17 = vld [vmem:[%s1980_s17 + $0x44] ss:$8 sps:$4 sm:$0xff]   ;;  %v1522_v19 = vld [vmem:[%s1980_s17 + $0x40] ss:$8 sps:$4 sm:$0xff]   ;;  %v1524_v21 = vld [vmem:[%s1980_s17 + $0x34] ss:$8 sps:$4 sm:$0xff]  }
  0x8e   : > { %v1520_v18 = vld [vmem:[%s1980_s17 + $0x144] ss:$8 sps:$4 sm:$0xff]   ;;  %v1523_v20 = vld [vmem:[%s1980_s17 + $0x140] ss:$8 sps:$4 sm:$0xff]   ;;  %v1526_v22 = vld [vmem:[%s1980_s17 + $0x134] ss:$8 sps:$4 sm:$0xff]  }
  0x8f   : > { %1024 = vmatpush1.bf16.msra.mxu0 %v1510_v11  ;;  %v1528_v23 = vld [vmem:[%s1980_s17 + $0x30] ss:$8 sps:$4 sm:$0xff]   ;;  %v1530_v25 = vld [vmem:[%s1980_s17 + $0x24] ss:$8 sps:$4 sm:$0xff]   ;;  %v1534_v27 = vld [vmem:[%s1980_s17 + $0x20] ss:$8 sps:$4 sm:$0xff]  }
  0x90   : > { %1067 = vmatpush1.bf16.msra.mxu1 %v1511_v12  ;;  %1025 = vmatprep.subr.bf16.mxu0 %v1512_v13  ;;  %v1529_v24 = vld [vmem:[%s1980_s17 + $0x130] ss:$8 sps:$4 sm:$0xff]   ;;  %v1532_v26 = vld [vmem:[%s1980_s17 + $0x124] ss:$8 sps:$4 sm:$0xff]   ;;  %v1535_v28 = vld [vmem:[%s1980_s17 + $0x120] ss:$8 sps:$4 sm:$0xff]  }
  0x91   : > { %1068 = vmatprep.subr.bf16.mxu1 %v1514_v14  ;;  %v1536_v29 = vld [vmem:[%s1980_s17 + $0x14] ss:$8 sps:$4 sm:$0xff]   ;;  %v1540_v31 = vld [vmem:[%s1980_s17 + $0x10] ss:$8 sps:$4 sm:$0xff]   ;;  %v1542_v33 = vld [vmem:[%s1980_s17 + $0x4] ss:$8 sps:$4 sm:$0xff]  }
  0x92   : > { %v1538_v30 = vld [vmem:[%s1980_s17 + $0x114] ss:$8 sps:$4 sm:$0xff]   ;;  %v1541_v32 = vld [vmem:[%s1980_s17 + $0x110] ss:$8 sps:$4 sm:$0xff]   ;;  %v1544_v34 = vld [vmem:[%s1980_s17 + $0x104] ss:$8 sps:$4 sm:$0xff]  }
  0x93   : > { %1026 = vmatpush1.bf16.msra.mxu0 %v1516_v15  ;;  %v1546_v35 = vld [vmem:[%s1980_s17] ss:$8 sps:$4 sm:$0xff]   ;;  %v1548_v37 = vld [vmem:[%s1980_s17 + $0xf4] ss:$8 sps:$4 sm:$0xff]   ;;  %v1552_v39 = vld [vmem:[%s1980_s17 + $0xf0] ss:$8 sps:$4 sm:$0xff]  }
  0x94   : > { %1069 = vmatpush1.bf16.msra.mxu1 %v1517_v16  ;;  %1027 = vmatprep.subr.bf16.mxu0 %v1518_v17  ;;  %v1547_v36 = vld [vmem:[%s1980_s17 + $0x100] ss:$8 sps:$4 sm:$0xff]   ;;  %v1550_v38 = vld [vmem:[%s1980_s17 + $0x1f4] ss:$8 sps:$4 sm:$0xff]   ;;  %v1553_v40 = vld [vmem:[%s1980_s17 + $0x1f0] ss:$8 sps:$4 sm:$0xff]  }
  0x95   : > { %1070 = vmatprep.subr.bf16.mxu1 %v1520_v18  ;;  %v1554_v41 = vld [vmem:[%s1980_s17 + $0xe4] ss:$8 sps:$4 sm:$0xff]   ;;  %v1558_v43 = vld [vmem:[%s1980_s17 + $0xe0] ss:$8 sps:$4 sm:$0xff]   ;;  %v1560_v45 = vld [vmem:[%s1980_s17 + $0xd4] ss:$8 sps:$4 sm:$0xff]  }
  0x96   : > { %v1556_v42 = vld [vmem:[%s1980_s17 + $0x1e4] ss:$8 sps:$4 sm:$0xff]   ;;  %v1559_v44 = vld [vmem:[%s1980_s17 + $0x1e0] ss:$8 sps:$4 sm:$0xff]   ;;  %v1562_v46 = vld [vmem:[%s1980_s17 + $0x1d4] ss:$8 sps:$4 sm:$0xff]  }
  0x97   : > { %1028 = vmatpush1.bf16.msra.mxu0 %v1522_v19  ;;  %v1564_v47 = vld [vmem:[%s1980_s17 + $0xd0] ss:$8 sps:$4 sm:$0xff]   ;;  %v1566_v49 = vld [vmem:[%s1980_s17 + $0xc4] ss:$8 sps:$4 sm:$0xff]   ;;  %v1570_v51 = vld [vmem:[%s1980_s17 + $0xc0] ss:$8 sps:$4 sm:$0xff]  }
  0x98   : > { %1071 = vmatpush1.bf16.msra.mxu1 %v1523_v20  ;;  %1029 = vmatprep.subr.bf16.mxu0 %v1524_v21  ;;  %v1565_v48 = vld [vmem:[%s1980_s17 + $0x1d0] ss:$8 sps:$4 sm:$0xff]   ;;  %v1568_v50 = vld [vmem:[%s1980_s17 + $0x1c4] ss:$8 sps:$4 sm:$0xff]   ;;  %v1571_v53 = vld [vmem:[%s1980_s17 + $0x1c0] ss:$8 sps:$4 sm:$0xff]  }
  0x99   : > { %1072 = vmatprep.subr.bf16.mxu1 %v1526_v22  ;;  %v1598_v52 = vld [vmem:[%s1978_s19 + $0x4] ss:$16 sps:$4 sm:$0xff]   ;;  %v1601_v56 = vld [vmem:[%s1978_s19 + $0xc] ss:$16 sps:$4 sm:$0xff]   ;;  %v1576_v57 = vld [vmem:[%s1980_s17 + $0xb0] ss:$8 sps:$4 sm:$0xff]  }
  0x9a   : > { %v1572_v54 = vld [vmem:[%s1980_s17 + $0xb4] ss:$8 sps:$4 sm:$0xff]   ;;  %1053 = vmatprep.mubr.bf16.mxu0 %v1598_v52  ;;  %1096 = vmatprep.mubr.bf16.mxu1 %v1601_v56  ;;  %v1577_v58 = vld [vmem:[%s1980_s17 + $0x1b0] ss:$8 sps:$4 sm:$0xff]   ;;  %v1578_v59 = vld [vmem:[%s1980_s17 + $0xa4] ss:$8 sps:$4 sm:$0xff]  }
  0x9b   : > { %1030 = vmatpush1.bf16.msra.mxu0 %v1528_v23  ;;  %v1574_v55 = vld [vmem:[%s1980_s17 + $0x1b4] ss:$8 sps:$4 sm:$0xff]   ;;  %v1580_v60 = vld [vmem:[%s1980_s17 + $0x1a4] ss:$8 sps:$4 sm:$0xff]   ;;  %v1582_v61 = vld [vmem:[%s1980_s17 + $0xa0] ss:$8 sps:$4 sm:$0xff]  }
  0x9c   : > { %1073 = vmatpush1.bf16.msra.mxu1 %v1529_v24  ;;  %1031 = vmatprep.subr.bf16.mxu0 %v1530_v25  ;;  %v1583_v62 = vld [vmem:[%s1980_s17 + $0x1a0] ss:$8 sps:$4 sm:$0xff]   ;;  %v1584_v63 = vld [vmem:[%s1980_s17 + $0x94] ss:$8 sps:$4 sm:$0xff]   ;;  %v1588_v1 = vld [vmem:[%s1980_s17 + $0x90] ss:$8 sps:$4 sm:$0xff]  }
  0x9d   : > { %1074 = vmatprep.subr.bf16.mxu1 %v1532_v26  ;;  %v1586_v0 = vld [vmem:[%s1980_s17 + $0x194] ss:$8 sps:$4 sm:$0xff]   ;;  %v1589_v2 = vld [vmem:[%s1980_s17 + $0x190] ss:$8 sps:$4 sm:$0xff]   ;;  %v1590_v3 = vld [vmem:[%s1980_s17 + $0x84] ss:$8 sps:$4 sm:$0xff]  }
  0x9e   : > { %v1592_v4 = vld [vmem:[%s1980_s17 + $0x184] ss:$8 sps:$4 sm:$0xff]   ;;  %v1594_v5 = vld [vmem:[%s1980_s17 + $0x80] ss:$8 sps:$4 sm:$0xff]   ;;  %v609_v10 = vld [vmem:[#allocation2 + $0x10] sm:$0xff]  ;;  %p1402_p5 = scmp.ne.s32.totalorder %s1672_s21, 17 }
  0x9f   : > { %1032 = vmatpush1.bf16.msra.mxu0 %v1534_v27  ;;  %v1595_v6 = vld [vmem:[%s1980_s17 + $0x180] ss:$8 sps:$4 sm:$0xff]   ;;  %v611_v19 = vld [vmem:[#allocation2 + $0x18] sm:$0xff] }
  0xa0   : > { %1075 = vmatpush1.bf16.msra.mxu1 %v1535_v28  ;;  %1033 = vmatprep.subr.bf16.mxu0 %v1536_v29  ;;  %v1596_v7 = vld [vmem:[%s1978_s19] ss:$16 sps:$4 sm:$0xff]   ;;  %v1599_v8 = vld [vmem:[%s1978_s19 + $0x8] ss:$16 sps:$4 sm:$0xff]  }
  0xa1   : > { %1076 = vmatprep.subr.bf16.mxu1 %v1538_v30  ;;  %v610_v14 = vld [vmem:[#allocation2] sm:$0xff]  ;;  %v612_v24 = vld [vmem:[#allocation2 + $0x8] sm:$0xff] }
  0xa3   : > { %1034 = vmatpush1.bf16.msra.mxu0 %v1540_v31 }
  0xa4   : > { %1077 = vmatpush1.bf16.msra.mxu1 %v1541_v32  ;;  %1035 = vmatprep.subr.bf16.mxu0 %v1542_v33 }
  0xa5   : > { %1078 = vmatprep.subr.bf16.mxu1 %v1544_v34 }
  0xa7   : > { %1036 = vmatpush1.bf16.msra.mxu0 %v1546_v35 }
  0xa8   : > { %1079 = vmatpush1.bf16.msra.mxu1 %v1547_v36  ;;  %1037 = vmatprep.subr.bf16.mxu0 %v1548_v37 }
  0xa9   : > { %1080 = vmatprep.subr.bf16.mxu1 %v1550_v38 }
  0xab   : > { %1038 = vmatpush2.bf16.msra.mxu0 %v1552_v39 }
  0xac   : > { %1081 = vmatpush2.bf16.msra.mxu1 %v1553_v40  ;;  %1039 = vmatprep.subr.bf16.mxu0 %v1554_v41 }
  0xad   : > { %1082 = vmatprep.subr.bf16.mxu1 %v1556_v42 }
  0xaf   : > { %1040 = vmatpush2.bf16.msra.mxu0 %v1558_v43 }
  0xb0   : > { %1083 = vmatpush2.bf16.msra.mxu1 %v1559_v44  ;;  %1041 = vmatprep.subr.bf16.mxu0 %v1560_v45 }
  0xb1   : > { %1084 = vmatprep.subr.bf16.mxu1 %v1562_v46 }
  0xb3   : > { %1042 = vmatpush2.bf16.msra.mxu0 %v1564_v47 }
  0xb4   : > { %1085 = vmatpush2.bf16.msra.mxu1 %v1565_v48  ;;  %1043 = vmatprep.subr.bf16.mxu0 %v1566_v49 }
  0xb5   : > { %1086 = vmatprep.subr.bf16.mxu1 %v1568_v50 }
  0xb7   : > { %1044 = vmatpush2.bf16.msra.mxu0 %v1570_v51 }
  0xb8   : > { %1087 = vmatpush2.bf16.msra.mxu1 %v1571_v53  ;;  %1045 = vmatprep.subr.bf16.mxu0 %v1572_v54 }
  0xb9   : > { %1088 = vmatprep.subr.bf16.mxu1 %v1574_v55 }
  0xbb   : > { %1046 = vmatpush2.bf16.msra.mxu0 %v1576_v57 }
  0xbc   : > { %1089 = vmatpush2.bf16.msra.mxu1 %v1577_v58  ;;  %1047 = vmatprep.subr.bf16.mxu0 %v1578_v59 }
  0xbd   : > { %1090 = vmatprep.subr.bf16.mxu1 %v1580_v60 }
  0xbf   : > { %1048 = vmatpush2.bf16.msra.mxu0 %v1582_v61 }
  0xc0   : > { %1091 = vmatpush2.bf16.msra.mxu1 %v1583_v62  ;;  %1049 = vmatprep.subr.bf16.mxu0 %v1584_v63 }
  0xc1   : > { %1092 = vmatprep.subr.bf16.mxu1 %v1586_v0 }
  0xc3   : > { %1050 = vmatpush2.bf16.msra.mxu0 %v1588_v1 }
  0xc4   : > { %1093 = vmatpush2.bf16.msra.mxu1 %v1589_v2  ;;  %1051 = vmatprep.subr.bf16.mxu0 %v1590_v3 }
  0xc5   : > { %1094 = vmatprep.subr.bf16.mxu1 %v1592_v4 }
  0xc7   : > { %1052 = vmatpush2.bf16.msra.mxu0 %v1594_v5 }
  0xc8   : > { %1095 = vmatpush2.bf16.msra.mxu1 %v1595_v6 }
  0xca   : > { %1054 = vmatmul.mubr.bf16.vlgmr.msra.gmra.mxu0 %v1596_v7 }
  0xcb   : > { %1097 = vmatmul.mubr.bf16.vlgmr.msra.gmra.mxu1 %v1599_v8 }
 0x18a   : > { %v1055_v9 = vpop.f32.mrf.mxu0 }
 0x18b   : > { %v1098_v11 = vpop.f32.mrf.mxu1 }
 0x18c   : > { %v1099_v12 = vadd.f32 %v1098_v11, %v1055_v9  ;;  %v1057_v13 = vpop.f32.mrf.mxu0 }
 0x18d   : > { %v1100_v15 = vpop.f32.mrf.mxu1 }
 0x18e   : > { %v1107_v16 = vadd.f32 %v1099_v12, %v609_v10  ;;  %v1101_v17 = vadd.f32 %v1100_v15, %v1057_v13  ;;  %v1059_v18 = vpop.f32.mrf.mxu0 }
 0x18f   : > { %v1102_v20 = vpop.f32.mrf.mxu1 }
 0x190   : > { %1111 = vst [vmem:[#allocation2 + $0x10] sm:$0xff] %v1107_v16  ;;  %v1108_v21 = vadd.f32 %v1101_v17, %v610_v14  ;;  %v1103_v22 = vadd.f32 %v1102_v20, %v1059_v18  ;;  %v1061_v23 = vpop.f32.mrf.mxu0 }
 0x191   : > { %v1104_v25 = vpop.f32.mrf.mxu1 }
 0x192   : > { %1112 = vst [vmem:[#allocation2] sm:$0xff] %v1108_v21  ;;  %v1109_v26 = vadd.f32 %v1103_v22, %v611_v19  ;;  %v1105_v27 = vadd.f32 %v1104_v25, %v1061_v23  ;;  %1118 = sbr.rel (%p1402_p5) target bundleno = 423 (0x1a7), region = 105 }
 0x194   : > { %1113 = vst [vmem:[#allocation2 + $0x18] sm:$0xff] %v1109_v26  ;;  %v1110_v28 = vadd.f32 %v1105_v27, %v612_v24 }
 0x196   : > { %1114 = vst [vmem:[#allocation2 + $0x8] sm:$0xff] %v1110_v28 }
 0x197   : > { %v1125_v29 = vlaneseq  ;;  %v1123_v31 = vld [vmem:[%s592_s9] sm:$0x3]  ;;  %v1119_v33 = vld [vmem:[#allocation2 + $0x10] sm:$0xff] }
 0x198   : > { %v1139_v32 = vld [vmem:[%s597_s1] sm:$0x3] }
 0x199   : > { %v1126_v30 = vshrl.u32 %v1125_v29, 7  ;;  %v1120_v36 = vld [vmem:[#allocation2] sm:$0xff] }
 0x19b   : > { %v1127_v34 = vsub.s32 0, %v1126_v30  ;;  %v1131_v35 = vsub.s32 1, %v1126_v30  ;;  %v1121_v37 = vld [vmem:[#allocation2 + $0x18] sm:$0xff] }
 0x19d   : > { %v1122_v38 = vld [vmem:[#allocation2 + $0x8] sm:$0xff]  ;;  %v1128_v39 = vrot.slane %v1123_v31, %v1127_v34  ;;  %v1144_v40 = vrot.slane %v1139_v32, %v1127_v34  ;;  %v1132_v41 = vrot.slane %v1123_v31, %v1131_v35  ;;  %v1148_v42 = vrot.slane %v1139_v32, %v1131_v35 }
 0x19f   : > { %v1135_v43 = vmul.f32 %v1128_v39, %v1119_v33  ;;  %v1136_v44 = vmul.f32 %v1132_v41, %v1120_v36  ;;  %v1137_v45 = vmul.f32 %v1128_v39, %v1121_v37  ;;  %v1138_v46 = vmul.f32 %v1132_v41, %v1122_v38 }
 0x1a1   : > { %v1151_v47 = vadd.f32 %v1144_v40, %v1135_v43  ;;  %v1152_v48 = vadd.f32 %v1148_v42, %v1136_v44  ;;  %v1153_v49 = vadd.f32 %v1144_v40, %v1137_v45  ;;  %v1154_v50 = vadd.f32 %v1148_v42, %v1138_v46 }
 0x1a3   : > { %v1155_v51 = vmax.f32 %v1151_v47, 0.0  ;;  %v1156_v52 = vmax.f32 %v1152_v48, 0.0  ;;  %v1157_v53 = vmax.f32 %v1153_v49, 0.0  ;;  %v1158_v54 = vmax.f32 %v1154_v50, 0.0 }
 0x1a5   : > { %1159 = vst [vmem:[%s1982_s15] sm:$0xff] %v1155_v51  ;;  %1160 = vst [vmem:[%s1982_s15 + $0x8] sm:$0xff] %v1156_v52 }
 0x1a6   : > { %1161 = vst [vmem:[%s1982_s15 + $0x10] sm:$0xff] %v1157_v53  ;;  %1162 = vst [vmem:[%s1982_s15 + $0x18] sm:$0xff] %v1158_v54 }
 0x1a7 PF: > { %1169 = sbr.rel (!%p1810_p12) target bundleno = 431 (0x1af), region = 109  ;;  %s1410_s1 = sshll.u32 (%p1810_p12), %s1676_s22, 4 }
 0x1a8   : > { %s1175_s29 = scalar_lea.vmem (%p1810_p12), %s2115_s4, %s1410_s1 }
 0x1ac   : > { %v1188_v55 = vld [vmem:[%s1982_s15] sm:$0xff]  ;;  %v1190_v56 = vld [vmem:[%s1982_s15 + $0x8] sm:$0xff] }
 0x1ad   : > { %v1192_v57 = vld [vmem:[%s1982_s15 + $0x10] sm:$0xff]  ;;  %v1194_v58 = vld [vmem:[%s1982_s15 + $0x18] sm:$0xff]  ;;  %1189 = vst [vmem:[%s1175_s29] sm:$0xff] %v1188_v55  ;;  %1191 = vst [vmem:[%s1175_s29 + $0x8] sm:$0xff] %v1190_v56 }
 0x1ae   : > { %1193 = vst [vmem:[%s1175_s29 + $0x80] sm:$0xff] %v1192_v57  ;;  %1195 = vst [vmem:[%s1175_s29 + $0x88] sm:$0xff] %v1194_v58 }
 0x1af PF: > { %s14_s25 = sadd.s32 1, %s1688_s25   ;;  %s2127_s14 = sld [smem:[#allocation6_spill]] }
 0x1b0   : > { %p11_p6 = scmp.ge.s32.totalorder %s14_s25, 146   ;;  %s2128_s27 = sld [smem:[#allocation7_spill]] }
 0x1b1   : > { %s2129_s15 = smov %s1652_s16  ;;  %s2130_s16 = smov %s1808_s13 }
 0x1b2   : > { %s2131_s17 = smov %s1660_s18  ;;  %s2132_s18 = smov %s1805_s12 }
 0x1b3   : > { %s2133_s19 = smov %s1668_s20  ;;  %s2134_s20 = smov %s1791_s7 }
 0x1b4   : > { %s2135_s21 = smov %s1680_s23  ;;  %s2136_s22 = smov %s1684_s24 }
 0x1b5   : > { %s2137_s23 = smov %s2127_s14  ;;  %13 = sbr.rel (!%p11_p6) target bundleno = 9 (0x9), region = 177 }
 0x1b6   : > { %s2138_s24 = smov %s2128_s27 }

// kernel: shufflenet2_forward.152
= control target key start
LH: loop header
LB: loop body
LE: loop exit
PB: predicated region body
PF: predicated region fallthrough
CT: control target
= control target key end

     0   :  { %s4262_s15 = smov 0   ;;  %s4264_s16 = smov 0   ;;  %s5237_s0 = inlined_call_operand.vmem [shape: bf16[16,2048], index: 0, kind: input, shape index: {}]   ;;  %s5238_s1 = inlined_call_operand.vmem [shape: bf16[2048,2048], index: 1, kind: input, shape index: {}]   ;;  %s5239_s2 = inlined_call_operand.vmem [shape: f32[1,2048], index: 2, kind: input, shape index: {}]   ;;  %s5240_s3 = inlined_call_operand.vmem [shape: f32[1,2048], index: 3, kind: input, shape index: {}]   ;;  %s5241_s4 = inlined_call_operand.vmem [shape: f32[16,2048], index: 4, kind: output, shape index: {}]  }
   0x1   :  { %s4266_s17 = smov 0   ;;  %s4268_s18 = smov 0  }
   0x2   :  { %s4270_s19 = smov 0  }
   0x3 LB: > { %s23_s20 = sadd.s32 1, %s4231_s18  ;;  %s3481_s21 = sadd.s32 4294967295, %s4235_s19   ;;  %s4235_s19 = sphi %s4270_s19, %s14_s19   ;;  %s4231_s18 = sphi %s4268_s18, %s5246_s18   ;;  %s4227_s17 = sphi %s4266_s17, %s5245_s17   ;;  %s4223_s16 = sphi %s4264_s16, %s5244_s16   ;;  %s4219_s15 = sphi %s4262_s15, %s5243_s15  }
   0x4   : > { %p24_p0 = scmp.ge.s32.totalorder %s23_s20, 8  ;;  %p66_p1 = scmp.ne.s32.totalorder %s4223_s16, %s4219_s15 }
   0x5   : > { %p67_p2 = scmp.eq.s32.totalorder %s4235_s19, 0  ;;  %p150_p4 = scmp.eq.s32.totalorder %s3481_s21, 7 }
   0x6   : > { %s5248_s20 = smov (%p24_p0, %s23_s20), 0  ;;  %s59_s23 = sadd.s32 1, %s4223_s16 }
   0x7   : > { %p68_p3 = por %p67_p2, %p66_p1  ;;  %s56_s22 = ssub.s32 %s4231_s18, %s5248_s20 }
   0x8   : > { %p57_p5 = scmp.eq.s32.totalorder %s56_s22, 0  ;;  %p4297_p6 = por %p150_p4, %p66_p1 }
   0x9   : > { %p3485_p7 = scmp.ge.s32.totalorder %s4235_s19, 8 }
   0xa   : > { %s4302_s25 = scalar_select %p57_p5, %s4223_s16, %s59_s23  }
   0xb   : > { %182 = sbr.rel (%p3485_p7) target bundleno = 276 (0x114), region = 20 }
  0x10   : > { %185 = sbr.rel (!%p68_p3) target bundleno = 276 (0x114), region = 24  ;;  %s187_s26 = sand.u32 (%p68_p3), 1, %s4223_s16  }
  0x11   : > { %s3771_s27 = sshll.u32 (%p68_p3), %s4231_s18, 3  ;;  %s3486_s28 = sshll.u32 (%p68_p3), %s187_s26, 11 }
  0x12   : > { %s4310_s5 = scalar_lea.vmem (%p68_p3), %s5238_s1, %s3771_s27  ;;  %s4315_s6 = scalar_lea.vmem (%p68_p3), [#allocation2], %s3486_s28 }
  0x13   : > { %v731_v0 = vld [vmem:[%s4310_s5] sm:$0xff] (%p68_p3) }
  0x14   : > { %v733_v1 = vld [vmem:[%s4310_s5 + $0x40] sm:$0xff] (%p68_p3)  ;;  %732 = vst [vmem:[%s4315_s6] sm:$0xff] (%p68_p3), %v731_v0 }
  0x15   : > { %v735_v2 = vld [vmem:[%s4310_s5 + $0x80] sm:$0xff]  ;;  %734 = vst [vmem:[%s4315_s6 + $0x8] sm:$0xff] %v733_v1 }
  0x16   : > { %736 = vst [vmem:[%s4315_s6 + $0x10] sm:$0xff] %v735_v2  ;;  %v737_v3 = vld [vmem:[%s4310_s5 + $0xc0] sm:$0xff] }
  0x17   : > { %v739_v4 = vld [vmem:[%s4310_s5 + $0x100] sm:$0xff]  ;;  %738 = vst [vmem:[%s4315_s6 + $0x18] sm:$0xff] %v737_v3 }
  0x18   : > { %v741_v5 = vld [vmem:[%s4310_s5 + $0x140] sm:$0xff]  ;;  %740 = vst [vmem:[%s4315_s6 + $0x20] sm:$0xff] %v739_v4 }
  0x19   : > { %742 = vst [vmem:[%s4315_s6 + $0x28] sm:$0xff] %v741_v5  ;;  %v743_v6 = vld [vmem:[%s4310_s5 + $0x180] sm:$0xff] }
  0x1a   : > { %v745_v7 = vld [vmem:[%s4310_s5 + $0x1c0] sm:$0xff]  ;;  %744 = vst [vmem:[%s4315_s6 + $0x30] sm:$0xff] %v743_v6 }
  0x1b   : > { %v747_v8 = vld [vmem:[%s4310_s5 + $0x200] sm:$0xff]  ;;  %746 = vst [vmem:[%s4315_s6 + $0x38] sm:$0xff] %v745_v7 }
  0x1c   : > { %748 = vst [vmem:[%s4315_s6 + $0x40] sm:$0xff] %v747_v8  ;;  %v749_v9 = vld [vmem:[%s4310_s5 + $0x240] sm:$0xff] }
  0x1d   : > { %v751_v10 = vld [vmem:[%s4310_s5 + $0x280] sm:$0xff]  ;;  %750 = vst [vmem:[%s4315_s6 + $0x48] sm:$0xff] %v749_v9 }
  0x1e   : > { %v753_v11 = vld [vmem:[%s4310_s5 + $0x2c0] sm:$0xff]  ;;  %752 = vst [vmem:[%s4315_s6 + $0x50] sm:$0xff] %v751_v10 }
  0x1f   : > { %754 = vst [vmem:[%s4315_s6 + $0x58] sm:$0xff] %v753_v11  ;;  %v755_v12 = vld [vmem:[%s4310_s5 + $0x300] sm:$0xff] }
  0x20   : > { %v757_v13 = vld [vmem:[%s4310_s5 + $0x340] sm:$0xff]  ;;  %756 = vst [vmem:[%s4315_s6 + $0x60] sm:$0xff] %v755_v12 }
  0x21   : > { %v759_v14 = vld [vmem:[%s4310_s5 + $0x380] sm:$0xff]  ;;  %758 = vst [vmem:[%s4315_s6 + $0x68] sm:$0xff] %v757_v13 }
  0x22   : > { %760 = vst [vmem:[%s4315_s6 + $0x70] sm:$0xff] %v759_v14  ;;  %v761_v15 = vld [vmem:[%s4310_s5 + $0x3c0] sm:$0xff] }
  0x23   : > { %v763_v16 = vld [vmem:[%s4310_s5 + $0x400] sm:$0xff]  ;;  %762 = vst [vmem:[%s4315_s6 + $0x78] sm:$0xff] %v761_v15 }
  0x24   : > { %v765_v17 = vld [vmem:[%s4310_s5 + $0x440] sm:$0xff]  ;;  %764 = vst [vmem:[%s4315_s6 + $0x80] sm:$0xff] %v763_v16 }
  0x25   : > { %766 = vst [vmem:[%s4315_s6 + $0x88] sm:$0xff] %v765_v17  ;;  %v767_v18 = vld [vmem:[%s4310_s5 + $0x480] sm:$0xff] }
  0x26   : > { %v769_v19 = vld [vmem:[%s4310_s5 + $0x4c0] sm:$0xff]  ;;  %768 = vst [vmem:[%s4315_s6 + $0x90] sm:$0xff] %v767_v18 }
  0x27   : > { %v771_v20 = vld [vmem:[%s4310_s5 + $0x500] sm:$0xff]  ;;  %770 = vst [vmem:[%s4315_s6 + $0x98] sm:$0xff] %v769_v19 }
  0x28   : > { %772 = vst [vmem:[%s4315_s6 + $0xa0] sm:$0xff] %v771_v20  ;;  %v773_v21 = vld [vmem:[%s4310_s5 + $0x540] sm:$0xff] }
  0x29   : > { %v775_v22 = vld [vmem:[%s4310_s5 + $0x580] sm:$0xff]  ;;  %774 = vst [vmem:[%s4315_s6 + $0xa8] sm:$0xff] %v773_v21 }
  0x2a   : > { %v777_v23 = vld [vmem:[%s4310_s5 + $0x5c0] sm:$0xff]  ;;  %776 = vst [vmem:[%s4315_s6 + $0xb0] sm:$0xff] %v775_v22 }
  0x2b   : > { %778 = vst [vmem:[%s4315_s6 + $0xb8] sm:$0xff] %v777_v23  ;;  %v779_v24 = vld [vmem:[%s4310_s5 + $0x600] sm:$0xff] }
  0x2c   : > { %v781_v25 = vld [vmem:[%s4310_s5 + $0x640] sm:$0xff]  ;;  %780 = vst [vmem:[%s4315_s6 + $0xc0] sm:$0xff] %v779_v24 }
  0x2d   : > { %v783_v26 = vld [vmem:[%s4310_s5 + $0x680] sm:$0xff]  ;;  %782 = vst [vmem:[%s4315_s6 + $0xc8] sm:$0xff] %v781_v25 }
  0x2e   : > { %784 = vst [vmem:[%s4315_s6 + $0xd0] sm:$0xff] %v783_v26  ;;  %v785_v27 = vld [vmem:[%s4310_s5 + $0x6c0] sm:$0xff] }
  0x2f   : > { %v787_v28 = vld [vmem:[%s4310_s5 + $0x700] sm:$0xff]  ;;  %786 = vst [vmem:[%s4315_s6 + $0xd8] sm:$0xff] %v785_v27 }
  0x30   : > { %v789_v29 = vld [vmem:[%s4310_s5 + $0x740] sm:$0xff]  ;;  %788 = vst [vmem:[%s4315_s6 + $0xe0] sm:$0xff] %v787_v28 }
  0x31   : > { %790 = vst [vmem:[%s4315_s6 + $0xe8] sm:$0xff] %v789_v29  ;;  %v791_v30 = vld [vmem:[%s4310_s5 + $0x780] sm:$0xff] }
  0x32   : > { %v793_v31 = vld [vmem:[%s4310_s5 + $0x7c0] sm:$0xff]  ;;  %792 = vst [vmem:[%s4315_s6 + $0xf0] sm:$0xff] %v791_v30 }
  0x33   : > { %v795_v32 = vld [vmem:[%s4310_s5 + $0x800] sm:$0xff]  ;;  %794 = vst [vmem:[%s4315_s6 + $0xf8] sm:$0xff] %v793_v31 }
  0x34   : > { %796 = vst [vmem:[%s4315_s6 + $0x100] sm:$0xff] %v795_v32  ;;  %v797_v33 = vld [vmem:[%s4310_s5 + $0x840] sm:$0xff] }
  0x35   : > { %v799_v34 = vld [vmem:[%s4310_s5 + $0x880] sm:$0xff]  ;;  %798 = vst [vmem:[%s4315_s6 + $0x108] sm:$0xff] %v797_v33 }
  0x36   : > { %v801_v35 = vld [vmem:[%s4310_s5 + $0x8c0] sm:$0xff]  ;;  %800 = vst [vmem:[%s4315_s6 + $0x110] sm:$0xff] %v799_v34 }
  0x37   : > { %802 = vst [vmem:[%s4315_s6 + $0x118] sm:$0xff] %v801_v35  ;;  %v803_v36 = vld [vmem:[%s4310_s5 + $0x900] sm:$0xff] }
  0x38   : > { %v805_v37 = vld [vmem:[%s4310_s5 + $0x940] sm:$0xff]  ;;  %804 = vst [vmem:[%s4315_s6 + $0x120] sm:$0xff] %v803_v36 }
  0x39   : > { %v807_v38 = vld [vmem:[%s4310_s5 + $0x980] sm:$0xff]  ;;  %806 = vst [vmem:[%s4315_s6 + $0x128] sm:$0xff] %v805_v37 }
  0x3a   : > { %808 = vst [vmem:[%s4315_s6 + $0x130] sm:$0xff] %v807_v38  ;;  %v809_v39 = vld [vmem:[%s4310_s5 + $0x9c0] sm:$0xff] }
  0x3b   : > { %v811_v40 = vld [vmem:[%s4310_s5 + $0xa00] sm:$0xff]  ;;  %810 = vst [vmem:[%s4315_s6 + $0x138] sm:$0xff] %v809_v39 }
  0x3c   : > { %v813_v41 = vld [vmem:[%s4310_s5 + $0xa40] sm:$0xff]  ;;  %812 = vst [vmem:[%s4315_s6 + $0x140] sm:$0xff] %v811_v40 }
  0x3d   : > { %814 = vst [vmem:[%s4315_s6 + $0x148] sm:$0xff] %v813_v41  ;;  %v815_v42 = vld [vmem:[%s4310_s5 + $0xa80] sm:$0xff] }
  0x3e   : > { %v817_v43 = vld [vmem:[%s4310_s5 + $0xac0] sm:$0xff]  ;;  %816 = vst [vmem:[%s4315_s6 + $0x150] sm:$0xff] %v815_v42 }
  0x3f   : > { %v819_v44 = vld [vmem:[%s4310_s5 + $0xb00] sm:$0xff]  ;;  %818 = vst [vmem:[%s4315_s6 + $0x158] sm:$0xff] %v817_v43 }
  0x40   : > { %820 = vst [vmem:[%s4315_s6 + $0x160] sm:$0xff] %v819_v44  ;;  %v821_v45 = vld [vmem:[%s4310_s5 + $0xb40] sm:$0xff] }
  0x41   : > { %v823_v46 = vld [vmem:[%s4310_s5 + $0xb80] sm:$0xff]  ;;  %822 = vst [vmem:[%s4315_s6 + $0x168] sm:$0xff] %v821_v45 }
  0x42   : > { %v825_v47 = vld [vmem:[%s4310_s5 + $0xbc0] sm:$0xff]  ;;  %824 = vst [vmem:[%s4315_s6 + $0x170] sm:$0xff] %v823_v46 }
  0x43   : > { %826 = vst [vmem:[%s4315_s6 + $0x178] sm:$0xff] %v825_v47  ;;  %v827_v48 = vld [vmem:[%s4310_s5 + $0xc00] sm:$0xff] }
  0x44   : > { %v829_v49 = vld [vmem:[%s4310_s5 + $0xc40] sm:$0xff]  ;;  %828 = vst [vmem:[%s4315_s6 + $0x180] sm:$0xff] %v827_v48 }
  0x45   : > { %v831_v50 = vld [vmem:[%s4310_s5 + $0xc80] sm:$0xff]  ;;  %830 = vst [vmem:[%s4315_s6 + $0x188] sm:$0xff] %v829_v49 }
  0x46   : > { %832 = vst [vmem:[%s4315_s6 + $0x190] sm:$0xff] %v831_v50  ;;  %v833_v51 = vld [vmem:[%s4310_s5 + $0xcc0] sm:$0xff] }
  0x47   : > { %v835_v52 = vld [vmem:[%s4310_s5 + $0xd00] sm:$0xff]  ;;  %834 = vst [vmem:[%s4315_s6 + $0x198] sm:$0xff] %v833_v51 }
  0x48   : > { %v837_v53 = vld [vmem:[%s4310_s5 + $0xd40] sm:$0xff]  ;;  %836 = vst [vmem:[%s4315_s6 + $0x1a0] sm:$0xff] %v835_v52 }
  0x49   : > { %838 = vst [vmem:[%s4315_s6 + $0x1a8] sm:$0xff] %v837_v53  ;;  %v839_v54 = vld [vmem:[%s4310_s5 + $0xd80] sm:$0xff] }
  0x4a   : > { %v841_v55 = vld [vmem:[%s4310_s5 + $0xdc0] sm:$0xff]  ;;  %840 = vst [vmem:[%s4315_s6 + $0x1b0] sm:$0xff] %v839_v54 }
  0x4b   : > { %v843_v56 = vld [vmem:[%s4310_s5 + $0xe00] sm:$0xff]  ;;  %842 = vst [vmem:[%s4315_s6 + $0x1b8] sm:$0xff] %v841_v55 }
  0x4c   : > { %844 = vst [vmem:[%s4315_s6 + $0x1c0] sm:$0xff] %v843_v56  ;;  %v845_v57 = vld [vmem:[%s4310_s5 + $0xe40] sm:$0xff] }
  0x4d   : > { %v847_v58 = vld [vmem:[%s4310_s5 + $0xe80] sm:$0xff]  ;;  %846 = vst [vmem:[%s4315_s6 + $0x1c8] sm:$0xff] %v845_v57 }
  0x4e   : > { %v849_v59 = vld [vmem:[%s4310_s5 + $0xec0] sm:$0xff]  ;;  %848 = vst [vmem:[%s4315_s6 + $0x1d0] sm:$0xff] %v847_v58 }
  0x4f   : > { %850 = vst [vmem:[%s4315_s6 + $0x1d8] sm:$0xff] %v849_v59  ;;  %v851_v60 = vld [vmem:[%s4310_s5 + $0xf00] sm:$0xff] }
  0x50   : > { %v853_v61 = vld [vmem:[%s4310_s5 + $0xf40] sm:$0xff]  ;;  %852 = vst [vmem:[%s4315_s6 + $0x1e0] sm:$0xff] %v851_v60 }
  0x51   : > { %v855_v62 = vld [vmem:[%s4310_s5 + $0xf80] sm:$0xff]  ;;  %854 = vst [vmem:[%s4315_s6 + $0x1e8] sm:$0xff] %v853_v61 }
  0x52   : > { %856 = vst [vmem:[%s4315_s6 + $0x1f0] sm:$0xff] %v855_v62  ;;  %v857_v63 = vld [vmem:[%s4310_s5 + $0xfc0] sm:$0xff] }
  0x53   : > { %v859_v0 = vld [vmem:[%s4310_s5 + $0x1000] sm:$0xff]  ;;  %858 = vst [vmem:[%s4315_s6 + $0x1f8] sm:$0xff] %v857_v63 }
  0x54   : > { %v861_v1 = vld [vmem:[%s4310_s5 + $0x1040] sm:$0xff]  ;;  %860 = vst [vmem:[%s4315_s6 + $0x200] sm:$0xff] %v859_v0 }
  0x55   : > { %862 = vst [vmem:[%s4315_s6 + $0x208] sm:$0xff] %v861_v1  ;;  %v863_v2 = vld [vmem:[%s4310_s5 + $0x1080] sm:$0xff] }
  0x56   : > { %v865_v3 = vld [vmem:[%s4310_s5 + $0x10c0] sm:$0xff]  ;;  %864 = vst [vmem:[%s4315_s6 + $0x210] sm:$0xff] %v863_v2 }
  0x57   : > { %v867_v4 = vld [vmem:[%s4310_s5 + $0x1100] sm:$0xff]  ;;  %866 = vst [vmem:[%s4315_s6 + $0x218] sm:$0xff] %v865_v3 }
  0x58   : > { %868 = vst [vmem:[%s4315_s6 + $0x220] sm:$0xff] %v867_v4  ;;  %v869_v5 = vld [vmem:[%s4310_s5 + $0x1140] sm:$0xff] }
  0x59   : > { %v871_v6 = vld [vmem:[%s4310_s5 + $0x1180] sm:$0xff]  ;;  %870 = vst [vmem:[%s4315_s6 + $0x228] sm:$0xff] %v869_v5 }
  0x5a   : > { %v873_v7 = vld [vmem:[%s4310_s5 + $0x11c0] sm:$0xff]  ;;  %872 = vst [vmem:[%s4315_s6 + $0x230] sm:$0xff] %v871_v6 }
  0x5b   : > { %874 = vst [vmem:[%s4315_s6 + $0x238] sm:$0xff] %v873_v7  ;;  %v875_v8 = vld [vmem:[%s4310_s5 + $0x1200] sm:$0xff] }
  0x5c   : > { %v877_v9 = vld [vmem:[%s4310_s5 + $0x1240] sm:$0xff]  ;;  %876 = vst [vmem:[%s4315_s6 + $0x240] sm:$0xff] %v875_v8 }
  0x5d   : > { %v879_v10 = vld [vmem:[%s4310_s5 + $0x1280] sm:$0xff]  ;;  %878 = vst [vmem:[%s4315_s6 + $0x248] sm:$0xff] %v877_v9 }
  0x5e   : > { %880 = vst [vmem:[%s4315_s6 + $0x250] sm:$0xff] %v879_v10  ;;  %v881_v11 = vld [vmem:[%s4310_s5 + $0x12c0] sm:$0xff] }
  0x5f   : > { %v883_v12 = vld [vmem:[%s4310_s5 + $0x1300] sm:$0xff]  ;;  %882 = vst [vmem:[%s4315_s6 + $0x258] sm:$0xff] %v881_v11 }
  0x60   : > { %v885_v13 = vld [vmem:[%s4310_s5 + $0x1340] sm:$0xff]  ;;  %884 = vst [vmem:[%s4315_s6 + $0x260] sm:$0xff] %v883_v12 }
  0x61   : > { %886 = vst [vmem:[%s4315_s6 + $0x268] sm:$0xff] %v885_v13  ;;  %v887_v14 = vld [vmem:[%s4310_s5 + $0x1380] sm:$0xff] }
  0x62   : > { %v889_v15 = vld [vmem:[%s4310_s5 + $0x13c0] sm:$0xff]  ;;  %888 = vst [vmem:[%s4315_s6 + $0x270] sm:$0xff] %v887_v14 }
  0x63   : > { %v891_v16 = vld [vmem:[%s4310_s5 + $0x1400] sm:$0xff]  ;;  %890 = vst [vmem:[%s4315_s6 + $0x278] sm:$0xff] %v889_v15 }
  0x64   : > { %892 = vst [vmem:[%s4315_s6 + $0x280] sm:$0xff] %v891_v16  ;;  %v893_v17 = vld [vmem:[%s4310_s5 + $0x1440] sm:$0xff] }
  0x65   : > { %v895_v18 = vld [vmem:[%s4310_s5 + $0x1480] sm:$0xff]  ;;  %894 = vst [vmem:[%s4315_s6 + $0x288] sm:$0xff] %v893_v17 }
  0x66   : > { %v897_v19 = vld [vmem:[%s4310_s5 + $0x14c0] sm:$0xff]  ;;  %896 = vst [vmem:[%s4315_s6 + $0x290] sm:$0xff] %v895_v18 }
  0x67   : > { %898 = vst [vmem:[%s4315_s6 + $0x298] sm:$0xff] %v897_v19  ;;  %v899_v20 = vld [vmem:[%s4310_s5 + $0x1500] sm:$0xff] }
  0x68   : > { %v901_v21 = vld [vmem:[%s4310_s5 + $0x1540] sm:$0xff]  ;;  %900 = vst [vmem:[%s4315_s6 + $0x2a0] sm:$0xff] %v899_v20 }
  0x69   : > { %v903_v22 = vld [vmem:[%s4310_s5 + $0x1580] sm:$0xff]  ;;  %902 = vst [vmem:[%s4315_s6 + $0x2a8] sm:$0xff] %v901_v21 }
  0x6a   : > { %904 = vst [vmem:[%s4315_s6 + $0x2b0] sm:$0xff] %v903_v22  ;;  %v905_v23 = vld [vmem:[%s4310_s5 + $0x15c0] sm:$0xff] }
  0x6b   : > { %v907_v24 = vld [vmem:[%s4310_s5 + $0x1600] sm:$0xff]  ;;  %906 = vst [vmem:[%s4315_s6 + $0x2b8] sm:$0xff] %v905_v23 }
  0x6c   : > { %v909_v25 = vld [vmem:[%s4310_s5 + $0x1640] sm:$0xff]  ;;  %908 = vst [vmem:[%s4315_s6 + $0x2c0] sm:$0xff] %v907_v24 }
  0x6d   : > { %910 = vst [vmem:[%s4315_s6 + $0x2c8] sm:$0xff] %v909_v25  ;;  %v911_v26 = vld [vmem:[%s4310_s5 + $0x1680] sm:$0xff] }
  0x6e   : > { %v913_v27 = vld [vmem:[%s4310_s5 + $0x16c0] sm:$0xff]  ;;  %912 = vst [vmem:[%s4315_s6 + $0x2d0] sm:$0xff] %v911_v26 }
  0x6f   : > { %v915_v28 = vld [vmem:[%s4310_s5 + $0x1700] sm:$0xff]  ;;  %914 = vst [vmem:[%s4315_s6 + $0x2d8] sm:$0xff] %v913_v27 }
  0x70   : > { %916 = vst [vmem:[%s4315_s6 + $0x2e0] sm:$0xff] %v915_v28  ;;  %v917_v29 = vld [vmem:[%s4310_s5 + $0x1740] sm:$0xff] }
  0x71   : > { %v919_v30 = vld [vmem:[%s4310_s5 + $0x1780] sm:$0xff]  ;;  %918 = vst [vmem:[%s4315_s6 + $0x2e8] sm:$0xff] %v917_v29 }
  0x72   : > { %v921_v31 = vld [vmem:[%s4310_s5 + $0x17c0] sm:$0xff]  ;;  %920 = vst [vmem:[%s4315_s6 + $0x2f0] sm:$0xff] %v919_v30 }
  0x73   : > { %922 = vst [vmem:[%s4315_s6 + $0x2f8] sm:$0xff] %v921_v31  ;;  %v923_v32 = vld [vmem:[%s4310_s5 + $0x1800] sm:$0xff] }
  0x74   : > { %v925_v33 = vld [vmem:[%s4310_s5 + $0x1840] sm:$0xff]  ;;  %924 = vst [vmem:[%s4315_s6 + $0x300] sm:$0xff] %v923_v32 }
  0x75   : > { %v927_v34 = vld [vmem:[%s4310_s5 + $0x1880] sm:$0xff]  ;;  %926 = vst [vmem:[%s4315_s6 + $0x308] sm:$0xff] %v925_v33 }
  0x76   : > { %928 = vst [vmem:[%s4315_s6 + $0x310] sm:$0xff] %v927_v34  ;;  %v929_v35 = vld [vmem:[%s4310_s5 + $0x18c0] sm:$0xff] }
  0x77   : > { %v931_v36 = vld [vmem:[%s4310_s5 + $0x1900] sm:$0xff]  ;;  %930 = vst [vmem:[%s4315_s6 + $0x318] sm:$0xff] %v929_v35 }
  0x78   : > { %v933_v37 = vld [vmem:[%s4310_s5 + $0x1940] sm:$0xff]  ;;  %932 = vst [vmem:[%s4315_s6 + $0x320] sm:$0xff] %v931_v36 }
  0x79   : > { %934 = vst [vmem:[%s4315_s6 + $0x328] sm:$0xff] %v933_v37  ;;  %v935_v38 = vld [vmem:[%s4310_s5 + $0x1980] sm:$0xff] }
  0x7a   : > { %v937_v39 = vld [vmem:[%s4310_s5 + $0x19c0] sm:$0xff]  ;;  %936 = vst [vmem:[%s4315_s6 + $0x330] sm:$0xff] %v935_v38 }
  0x7b   : > { %v939_v40 = vld [vmem:[%s4310_s5 + $0x1a00] sm:$0xff]  ;;  %938 = vst [vmem:[%s4315_s6 + $0x338] sm:$0xff] %v937_v39 }
  0x7c   : > { %940 = vst [vmem:[%s4315_s6 + $0x340] sm:$0xff] %v939_v40  ;;  %v941_v41 = vld [vmem:[%s4310_s5 + $0x1a40] sm:$0xff] }
  0x7d   : > { %v943_v42 = vld [vmem:[%s4310_s5 + $0x1a80] sm:$0xff]  ;;  %942 = vst [vmem:[%s4315_s6 + $0x348] sm:$0xff] %v941_v41 }
  0x7e   : > { %v945_v43 = vld [vmem:[%s4310_s5 + $0x1ac0] sm:$0xff]  ;;  %944 = vst [vmem:[%s4315_s6 + $0x350] sm:$0xff] %v943_v42 }
  0x7f   : > { %946 = vst [vmem:[%s4315_s6 + $0x358] sm:$0xff] %v945_v43  ;;  %v947_v44 = vld [vmem:[%s4310_s5 + $0x1b00] sm:$0xff] }
  0x80   : > { %v949_v45 = vld [vmem:[%s4310_s5 + $0x1b40] sm:$0xff]  ;;  %948 = vst [vmem:[%s4315_s6 + $0x360] sm:$0xff] %v947_v44 }
  0x81   : > { %v951_v46 = vld [vmem:[%s4310_s5 + $0x1b80] sm:$0xff]  ;;  %950 = vst [vmem:[%s4315_s6 + $0x368] sm:$0xff] %v949_v45 }
  0x82   : > { %952 = vst [vmem:[%s4315_s6 + $0x370] sm:$0xff] %v951_v46  ;;  %v953_v47 = vld [vmem:[%s4310_s5 + $0x1bc0] sm:$0xff] }
  0x83   : > { %v955_v48 = vld [vmem:[%s4310_s5 + $0x1c00] sm:$0xff]  ;;  %954 = vst [vmem:[%s4315_s6 + $0x378] sm:$0xff] %v953_v47 }
  0x84   : > { %v957_v49 = vld [vmem:[%s4310_s5 + $0x1c40] sm:$0xff]  ;;  %956 = vst [vmem:[%s4315_s6 + $0x380] sm:$0xff] %v955_v48 }
  0x85   : > { %958 = vst [vmem:[%s4315_s6 + $0x388] sm:$0xff] %v957_v49  ;;  %v959_v50 = vld [vmem:[%s4310_s5 + $0x1c80] sm:$0xff] }
  0x86   : > { %v961_v51 = vld [vmem:[%s4310_s5 + $0x1cc0] sm:$0xff]  ;;  %960 = vst [vmem:[%s4315_s6 + $0x390] sm:$0xff] %v959_v50 }
  0x87   : > { %v963_v52 = vld [vmem:[%s4310_s5 + $0x1d00] sm:$0xff]  ;;  %962 = vst [vmem:[%s4315_s6 + $0x398] sm:$0xff] %v961_v51 }
  0x88   : > { %964 = vst [vmem:[%s4315_s6 + $0x3a0] sm:$0xff] %v963_v52  ;;  %v965_v53 = vld [vmem:[%s4310_s5 + $0x1d40] sm:$0xff] }
  0x89   : > { %v967_v54 = vld [vmem:[%s4310_s5 + $0x1d80] sm:$0xff]  ;;  %966 = vst [vmem:[%s4315_s6 + $0x3a8] sm:$0xff] %v965_v53 }
  0x8a   : > { %v969_v55 = vld [vmem:[%s4310_s5 + $0x1dc0] sm:$0xff]  ;;  %968 = vst [vmem:[%s4315_s6 + $0x3b0] sm:$0xff] %v967_v54 }
  0x8b   : > { %970 = vst [vmem:[%s4315_s6 + $0x3b8] sm:$0xff] %v969_v55  ;;  %v971_v56 = vld [vmem:[%s4310_s5 + $0x1e00] sm:$0xff] }
  0x8c   : > { %v973_v57 = vld [vmem:[%s4310_s5 + $0x1e40] sm:$0xff]  ;;  %972 = vst [vmem:[%s4315_s6 + $0x3c0] sm:$0xff] %v971_v56 }
  0x8d   : > { %v975_v58 = vld [vmem:[%s4310_s5 + $0x1e80] sm:$0xff]  ;;  %974 = vst [vmem:[%s4315_s6 + $0x3c8] sm:$0xff] %v973_v57 }
  0x8e   : > { %976 = vst [vmem:[%s4315_s6 + $0x3d0] sm:$0xff] %v975_v58  ;;  %v977_v59 = vld [vmem:[%s4310_s5 + $0x1ec0] sm:$0xff] }
  0x8f   : > { %v979_v60 = vld [vmem:[%s4310_s5 + $0x1f00] sm:$0xff]  ;;  %978 = vst [vmem:[%s4315_s6 + $0x3d8] sm:$0xff] %v977_v59 }
  0x90   : > { %v981_v61 = vld [vmem:[%s4310_s5 + $0x1f40] sm:$0xff]  ;;  %980 = vst [vmem:[%s4315_s6 + $0x3e0] sm:$0xff] %v979_v60 }
  0x91   : > { %982 = vst [vmem:[%s4315_s6 + $0x3e8] sm:$0xff] %v981_v61  ;;  %v983_v62 = vld [vmem:[%s4310_s5 + $0x1f80] sm:$0xff] }
  0x92   : > { %v985_v63 = vld [vmem:[%s4310_s5 + $0x1fc0] sm:$0xff]  ;;  %984 = vst [vmem:[%s4315_s6 + $0x3f0] sm:$0xff] %v983_v62 }
  0x93   : > { %v987_v0 = vld [vmem:[%s4310_s5 + $0x2000] sm:$0xff]  ;;  %986 = vst [vmem:[%s4315_s6 + $0x3f8] sm:$0xff] %v985_v63 }
  0x94   : > { %988 = vst [vmem:[%s4315_s6 + $0x400] sm:$0xff] %v987_v0  ;;  %v989_v1 = vld [vmem:[%s4310_s5 + $0x2040] sm:$0xff] }
  0x95   : > { %v991_v2 = vld [vmem:[%s4310_s5 + $0x2080] sm:$0xff]  ;;  %990 = vst [vmem:[%s4315_s6 + $0x408] sm:$0xff] %v989_v1 }
  0x96   : > { %v993_v3 = vld [vmem:[%s4310_s5 + $0x20c0] sm:$0xff]  ;;  %992 = vst [vmem:[%s4315_s6 + $0x410] sm:$0xff] %v991_v2 }
  0x97   : > { %994 = vst [vmem:[%s4315_s6 + $0x418] sm:$0xff] %v993_v3  ;;  %v995_v4 = vld [vmem:[%s4310_s5 + $0x2100] sm:$0xff] }
  0x98   : > { %v997_v5 = vld [vmem:[%s4310_s5 + $0x2140] sm:$0xff]  ;;  %996 = vst [vmem:[%s4315_s6 + $0x420] sm:$0xff] %v995_v4 }
  0x99   : > { %v999_v6 = vld [vmem:[%s4310_s5 + $0x2180] sm:$0xff]  ;;  %998 = vst [vmem:[%s4315_s6 + $0x428] sm:$0xff] %v997_v5 }
  0x9a   : > { %1000 = vst [vmem:[%s4315_s6 + $0x430] sm:$0xff] %v999_v6  ;;  %v1001_v7 = vld [vmem:[%s4310_s5 + $0x21c0] sm:$0xff] }
  0x9b   : > { %v1003_v8 = vld [vmem:[%s4310_s5 + $0x2200] sm:$0xff]  ;;  %1002 = vst [vmem:[%s4315_s6 + $0x438] sm:$0xff] %v1001_v7 }
  0x9c   : > { %v1005_v9 = vld [vmem:[%s4310_s5 + $0x2240] sm:$0xff]  ;;  %1004 = vst [vmem:[%s4315_s6 + $0x440] sm:$0xff] %v1003_v8 }
  0x9d   : > { %1006 = vst [vmem:[%s4315_s6 + $0x448] sm:$0xff] %v1005_v9  ;;  %v1007_v10 = vld [vmem:[%s4310_s5 + $0x2280] sm:$0xff] }
  0x9e   : > { %v1009_v11 = vld [vmem:[%s4310_s5 + $0x22c0] sm:$0xff]  ;;  %1008 = vst [vmem:[%s4315_s6 + $0x450] sm:$0xff] %v1007_v10 }
  0x9f   : > { %v1011_v12 = vld [vmem:[%s4310_s5 + $0x2300] sm:$0xff]  ;;  %1010 = vst [vmem:[%s4315_s6 + $0x458] sm:$0xff] %v1009_v11 }
  0xa0   : > { %1012 = vst [vmem:[%s4315_s6 + $0x460] sm:$0xff] %v1011_v12  ;;  %v1013_v13 = vld [vmem:[%s4310_s5 + $0x2340] sm:$0xff] }
  0xa1   : > { %v1015_v14 = vld [vmem:[%s4310_s5 + $0x2380] sm:$0xff]  ;;  %1014 = vst [vmem:[%s4315_s6 + $0x468] sm:$0xff] %v1013_v13 }
  0xa2   : > { %v1017_v15 = vld [vmem:[%s4310_s5 + $0x23c0] sm:$0xff]  ;;  %1016 = vst [vmem:[%s4315_s6 + $0x470] sm:$0xff] %v1015_v14 }
  0xa3   : > { %1018 = vst [vmem:[%s4315_s6 + $0x478] sm:$0xff] %v1017_v15  ;;  %v1019_v16 = vld [vmem:[%s4310_s5 + $0x2400] sm:$0xff] }
  0xa4   : > { %v1021_v17 = vld [vmem:[%s4310_s5 + $0x2440] sm:$0xff]  ;;  %1020 = vst [vmem:[%s4315_s6 + $0x480] sm:$0xff] %v1019_v16 }
  0xa5   : > { %v1023_v18 = vld [vmem:[%s4310_s5 + $0x2480] sm:$0xff]  ;;  %1022 = vst [vmem:[%s4315_s6 + $0x488] sm:$0xff] %v1021_v17 }
  0xa6   : > { %1024 = vst [vmem:[%s4315_s6 + $0x490] sm:$0xff] %v1023_v18  ;;  %v1025_v19 = vld [vmem:[%s4310_s5 + $0x24c0] sm:$0xff] }
  0xa7   : > { %v1027_v20 = vld [vmem:[%s4310_s5 + $0x2500] sm:$0xff]  ;;  %1026 = vst [vmem:[%s4315_s6 + $0x498] sm:$0xff] %v1025_v19 }
  0xa8   : > { %v1029_v21 = vld [vmem:[%s4310_s5 + $0x2540] sm:$0xff]  ;;  %1028 = vst [vmem:[%s4315_s6 + $0x4a0] sm:$0xff] %v1027_v20 }
  0xa9   : > { %1030 = vst [vmem:[%s4315_s6 + $0x4a8] sm:$0xff] %v1029_v21  ;;  %v1031_v22 = vld [vmem:[%s4310_s5 + $0x2580] sm:$0xff] }
  0xaa   : > { %v1033_v23 = vld [vmem:[%s4310_s5 + $0x25c0] sm:$0xff]  ;;  %1032 = vst [vmem:[%s4315_s6 + $0x4b0] sm:$0xff] %v1031_v22 }
  0xab   : > { %v1035_v24 = vld [vmem:[%s4310_s5 + $0x2600] sm:$0xff]  ;;  %1034 = vst [vmem:[%s4315_s6 + $0x4b8] sm:$0xff] %v1033_v23 }
  0xac   : > { %1036 = vst [vmem:[%s4315_s6 + $0x4c0] sm:$0xff] %v1035_v24  ;;  %v1037_v25 = vld [vmem:[%s4310_s5 + $0x2640] sm:$0xff] }
  0xad   : > { %v1039_v26 = vld [vmem:[%s4310_s5 + $0x2680] sm:$0xff]  ;;  %1038 = vst [vmem:[%s4315_s6 + $0x4c8] sm:$0xff] %v1037_v25 }
  0xae   : > { %v1041_v27 = vld [vmem:[%s4310_s5 + $0x26c0] sm:$0xff]  ;;  %1040 = vst [vmem:[%s4315_s6 + $0x4d0] sm:$0xff] %v1039_v26 }
  0xaf   : > { %1042 = vst [vmem:[%s4315_s6 + $0x4d8] sm:$0xff] %v1041_v27  ;;  %v1043_v28 = vld [vmem:[%s4310_s5 + $0x2700] sm:$0xff] }
  0xb0   : > { %v1045_v29 = vld [vmem:[%s4310_s5 + $0x2740] sm:$0xff]  ;;  %1044 = vst [vmem:[%s4315_s6 + $0x4e0] sm:$0xff] %v1043_v28 }
  0xb1   : > { %v1047_v30 = vld [vmem:[%s4310_s5 + $0x2780] sm:$0xff]  ;;  %1046 = vst [vmem:[%s4315_s6 + $0x4e8] sm:$0xff] %v1045_v29 }
  0xb2   : > { %1048 = vst [vmem:[%s4315_s6 + $0x4f0] sm:$0xff] %v1047_v30  ;;  %v1049_v31 = vld [vmem:[%s4310_s5 + $0x27c0] sm:$0xff] }
  0xb3   : > { %v1051_v32 = vld [vmem:[%s4310_s5 + $0x2800] sm:$0xff]  ;;  %1050 = vst [vmem:[%s4315_s6 + $0x4f8] sm:$0xff] %v1049_v31 }
  0xb4   : > { %v1053_v33 = vld [vmem:[%s4310_s5 + $0x2840] sm:$0xff]  ;;  %1052 = vst [vmem:[%s4315_s6 + $0x500] sm:$0xff] %v1051_v32 }
  0xb5   : > { %1054 = vst [vmem:[%s4315_s6 + $0x508] sm:$0xff] %v1053_v33  ;;  %v1055_v34 = vld [vmem:[%s4310_s5 + $0x2880] sm:$0xff] }
  0xb6   : > { %v1057_v35 = vld [vmem:[%s4310_s5 + $0x28c0] sm:$0xff]  ;;  %1056 = vst [vmem:[%s4315_s6 + $0x510] sm:$0xff] %v1055_v34 }
  0xb7   : > { %v1059_v36 = vld [vmem:[%s4310_s5 + $0x2900] sm:$0xff]  ;;  %1058 = vst [vmem:[%s4315_s6 + $0x518] sm:$0xff] %v1057_v35 }
  0xb8   : > { %1060 = vst [vmem:[%s4315_s6 + $0x520] sm:$0xff] %v1059_v36  ;;  %v1061_v37 = vld [vmem:[%s4310_s5 + $0x2940] sm:$0xff] }
  0xb9   : > { %v1063_v38 = vld [vmem:[%s4310_s5 + $0x2980] sm:$0xff]  ;;  %1062 = vst [vmem:[%s4315_s6 + $0x528] sm:$0xff] %v1061_v37 }
  0xba   : > { %v1065_v39 = vld [vmem:[%s4310_s5 + $0x29c0] sm:$0xff]  ;;  %1064 = vst [vmem:[%s4315_s6 + $0x530] sm:$0xff] %v1063_v38 }
  0xbb   : > { %1066 = vst [vmem:[%s4315_s6 + $0x538] sm:$0xff] %v1065_v39  ;;  %v1067_v40 = vld [vmem:[%s4310_s5 + $0x2a00] sm:$0xff] }
  0xbc   : > { %v1069_v41 = vld [vmem:[%s4310_s5 + $0x2a40] sm:$0xff]  ;;  %1068 = vst [vmem:[%s4315_s6 + $0x540] sm:$0xff] %v1067_v40 }
  0xbd   : > { %v1071_v42 = vld [vmem:[%s4310_s5 + $0x2a80] sm:$0xff]  ;;  %1070 = vst [vmem:[%s4315_s6 + $0x548] sm:$0xff] %v1069_v41 }
  0xbe   : > { %1072 = vst [vmem:[%s4315_s6 + $0x550] sm:$0xff] %v1071_v42  ;;  %v1073_v43 = vld [vmem:[%s4310_s5 + $0x2ac0] sm:$0xff] }
  0xbf   : > { %v1075_v44 = vld [vmem:[%s4310_s5 + $0x2b00] sm:$0xff]  ;;  %1074 = vst [vmem:[%s4315_s6 + $0x558] sm:$0xff] %v1073_v43 }
  0xc0   : > { %v1077_v45 = vld [vmem:[%s4310_s5 + $0x2b40] sm:$0xff]  ;;  %1076 = vst [vmem:[%s4315_s6 + $0x560] sm:$0xff] %v1075_v44 }
  0xc1   : > { %1078 = vst [vmem:[%s4315_s6 + $0x568] sm:$0xff] %v1077_v45  ;;  %v1079_v46 = vld [vmem:[%s4310_s5 + $0x2b80] sm:$0xff] }
  0xc2   : > { %v1081_v47 = vld [vmem:[%s4310_s5 + $0x2bc0] sm:$0xff]  ;;  %1080 = vst [vmem:[%s4315_s6 + $0x570] sm:$0xff] %v1079_v46 }
  0xc3   : > { %v1083_v48 = vld [vmem:[%s4310_s5 + $0x2c00] sm:$0xff]  ;;  %1082 = vst [vmem:[%s4315_s6 + $0x578] sm:$0xff] %v1081_v47 }
  0xc4   : > { %1084 = vst [vmem:[%s4315_s6 + $0x580] sm:$0xff] %v1083_v48  ;;  %v1085_v49 = vld [vmem:[%s4310_s5 + $0x2c40] sm:$0xff] }
  0xc5   : > { %v1087_v50 = vld [vmem:[%s4310_s5 + $0x2c80] sm:$0xff]  ;;  %1086 = vst [vmem:[%s4315_s6 + $0x588] sm:$0xff] %v1085_v49 }
  0xc6   : > { %v1089_v51 = vld [vmem:[%s4310_s5 + $0x2cc0] sm:$0xff]  ;;  %1088 = vst [vmem:[%s4315_s6 + $0x590] sm:$0xff] %v1087_v50 }
  0xc7   : > { %1090 = vst [vmem:[%s4315_s6 + $0x598] sm:$0xff] %v1089_v51  ;;  %v1091_v52 = vld [vmem:[%s4310_s5 + $0x2d00] sm:$0xff] }
  0xc8   : > { %v1093_v53 = vld [vmem:[%s4310_s5 + $0x2d40] sm:$0xff]  ;;  %1092 = vst [vmem:[%s4315_s6 + $0x5a0] sm:$0xff] %v1091_v52 }
  0xc9   : > { %v1095_v54 = vld [vmem:[%s4310_s5 + $0x2d80] sm:$0xff]  ;;  %1094 = vst [vmem:[%s4315_s6 + $0x5a8] sm:$0xff] %v1093_v53 }
  0xca   : > { %1096 = vst [vmem:[%s4315_s6 + $0x5b0] sm:$0xff] %v1095_v54  ;;  %v1097_v55 = vld [vmem:[%s4310_s5 + $0x2dc0] sm:$0xff] }
  0xcb   : > { %v1099_v56 = vld [vmem:[%s4310_s5 + $0x2e00] sm:$0xff]  ;;  %1098 = vst [vmem:[%s4315_s6 + $0x5b8] sm:$0xff] %v1097_v55 }
  0xcc   : > { %v1101_v57 = vld [vmem:[%s4310_s5 + $0x2e40] sm:$0xff]  ;;  %1100 = vst [vmem:[%s4315_s6 + $0x5c0] sm:$0xff] %v1099_v56 }
  0xcd   : > { %1102 = vst [vmem:[%s4315_s6 + $0x5c8] sm:$0xff] %v1101_v57  ;;  %v1103_v58 = vld [vmem:[%s4310_s5 + $0x2e80] sm:$0xff] }
  0xce   : > { %v1105_v59 = vld [vmem:[%s4310_s5 + $0x2ec0] sm:$0xff]  ;;  %1104 = vst [vmem:[%s4315_s6 + $0x5d0] sm:$0xff] %v1103_v58 }
  0xcf   : > { %v1107_v60 = vld [vmem:[%s4310_s5 + $0x2f00] sm:$0xff]  ;;  %1106 = vst [vmem:[%s4315_s6 + $0x5d8] sm:$0xff] %v1105_v59 }
  0xd0   : > { %1108 = vst [vmem:[%s4315_s6 + $0x5e0] sm:$0xff] %v1107_v60  ;;  %v1109_v61 = vld [vmem:[%s4310_s5 + $0x2f40] sm:$0xff] }
  0xd1   : > { %v1111_v62 = vld [vmem:[%s4310_s5 + $0x2f80] sm:$0xff]  ;;  %1110 = vst [vmem:[%s4315_s6 + $0x5e8] sm:$0xff] %v1109_v61 }
  0xd2   : > { %v1113_v63 = vld [vmem:[%s4310_s5 + $0x2fc0] sm:$0xff]  ;;  %1112 = vst [vmem:[%s4315_s6 + $0x5f0] sm:$0xff] %v1111_v62 }
  0xd3   : > { %1114 = vst [vmem:[%s4315_s6 + $0x5f8] sm:$0xff] %v1113_v63  ;;  %v1115_v0 = vld [vmem:[%s4310_s5 + $0x3000] sm:$0xff] }
  0xd4   : > { %v1117_v1 = vld [vmem:[%s4310_s5 + $0x3040] sm:$0xff]  ;;  %1116 = vst [vmem:[%s4315_s6 + $0x600] sm:$0xff] %v1115_v0 }
  0xd5   : > { %v1119_v2 = vld [vmem:[%s4310_s5 + $0x3080] sm:$0xff]  ;;  %1118 = vst [vmem:[%s4315_s6 + $0x608] sm:$0xff] %v1117_v1 }
  0xd6   : > { %1120 = vst [vmem:[%s4315_s6 + $0x610] sm:$0xff] %v1119_v2  ;;  %v1121_v3 = vld [vmem:[%s4310_s5 + $0x30c0] sm:$0xff] }
  0xd7   : > { %v1123_v4 = vld [vmem:[%s4310_s5 + $0x3100] sm:$0xff]  ;;  %1122 = vst [vmem:[%s4315_s6 + $0x618] sm:$0xff] %v1121_v3 }
  0xd8   : > { %v1125_v5 = vld [vmem:[%s4310_s5 + $0x3140] sm:$0xff]  ;;  %1124 = vst [vmem:[%s4315_s6 + $0x620] sm:$0xff] %v1123_v4 }
  0xd9   : > { %1126 = vst [vmem:[%s4315_s6 + $0x628] sm:$0xff] %v1125_v5  ;;  %v1127_v6 = vld [vmem:[%s4310_s5 + $0x3180] sm:$0xff] }
  0xda   : > { %v1129_v7 = vld [vmem:[%s4310_s5 + $0x31c0] sm:$0xff]  ;;  %1128 = vst [vmem:[%s4315_s6 + $0x630] sm:$0xff] %v1127_v6 }
  0xdb   : > { %v1131_v8 = vld [vmem:[%s4310_s5 + $0x3200] sm:$0xff]  ;;  %1130 = vst [vmem:[%s4315_s6 + $0x638] sm:$0xff] %v1129_v7 }
  0xdc   : > { %1132 = vst [vmem:[%s4315_s6 + $0x640] sm:$0xff] %v1131_v8  ;;  %v1133_v9 = vld [vmem:[%s4310_s5 + $0x3240] sm:$0xff] }
  0xdd   : > { %v1135_v10 = vld [vmem:[%s4310_s5 + $0x3280] sm:$0xff]  ;;  %1134 = vst [vmem:[%s4315_s6 + $0x648] sm:$0xff] %v1133_v9 }
  0xde   : > { %v1137_v11 = vld [vmem:[%s4310_s5 + $0x32c0] sm:$0xff]  ;;  %1136 = vst [vmem:[%s4315_s6 + $0x650] sm:$0xff] %v1135_v10 }
  0xdf   : > { %1138 = vst [vmem:[%s4315_s6 + $0x658] sm:$0xff] %v1137_v11  ;;  %v1139_v12 = vld [vmem:[%s4310_s5 + $0x3300] sm:$0xff] }
  0xe0   : > { %v1141_v13 = vld [vmem:[%s4310_s5 + $0x3340] sm:$0xff]  ;;  %1140 = vst [vmem:[%s4315_s6 + $0x660] sm:$0xff] %v1139_v12 }
  0xe1   : > { %v1143_v14 = vld [vmem:[%s4310_s5 + $0x3380] sm:$0xff]  ;;  %1142 = vst [vmem:[%s4315_s6 + $0x668] sm:$0xff] %v1141_v13 }
  0xe2   : > { %1144 = vst [vmem:[%s4315_s6 + $0x670] sm:$0xff] %v1143_v14  ;;  %v1145_v15 = vld [vmem:[%s4310_s5 + $0x33c0] sm:$0xff] }
  0xe3   : > { %v1147_v16 = vld [vmem:[%s4310_s5 + $0x3400] sm:$0xff]  ;;  %1146 = vst [vmem:[%s4315_s6 + $0x678] sm:$0xff] %v1145_v15 }
  0xe4   : > { %v1149_v17 = vld [vmem:[%s4310_s5 + $0x3440] sm:$0xff]  ;;  %1148 = vst [vmem:[%s4315_s6 + $0x680] sm:$0xff] %v1147_v16 }
  0xe5   : > { %1150 = vst [vmem:[%s4315_s6 + $0x688] sm:$0xff] %v1149_v17  ;;  %v1151_v18 = vld [vmem:[%s4310_s5 + $0x3480] sm:$0xff] }
  0xe6   : > { %v1153_v19 = vld [vmem:[%s4310_s5 + $0x34c0] sm:$0xff]  ;;  %1152 = vst [vmem:[%s4315_s6 + $0x690] sm:$0xff] %v1151_v18 }
  0xe7   : > { %v1155_v20 = vld [vmem:[%s4310_s5 + $0x3500] sm:$0xff]  ;;  %1154 = vst [vmem:[%s4315_s6 + $0x698] sm:$0xff] %v1153_v19 }
  0xe8   : > { %1156 = vst [vmem:[%s4315_s6 + $0x6a0] sm:$0xff] %v1155_v20  ;;  %v1157_v21 = vld [vmem:[%s4310_s5 + $0x3540] sm:$0xff] }
  0xe9   : > { %v1159_v22 = vld [vmem:[%s4310_s5 + $0x3580] sm:$0xff]  ;;  %1158 = vst [vmem:[%s4315_s6 + $0x6a8] sm:$0xff] %v1157_v21 }
  0xea   : > { %v1161_v23 = vld [vmem:[%s4310_s5 + $0x35c0] sm:$0xff]  ;;  %1160 = vst [vmem:[%s4315_s6 + $0x6b0] sm:$0xff] %v1159_v22 }
  0xeb   : > { %1162 = vst [vmem:[%s4315_s6 + $0x6b8] sm:$0xff] %v1161_v23  ;;  %v1163_v24 = vld [vmem:[%s4310_s5 + $0x3600] sm:$0xff] }
  0xec   : > { %v1165_v25 = vld [vmem:[%s4310_s5 + $0x3640] sm:$0xff]  ;;  %1164 = vst [vmem:[%s4315_s6 + $0x6c0] sm:$0xff] %v1163_v24 }
  0xed   : > { %v1167_v26 = vld [vmem:[%s4310_s5 + $0x3680] sm:$0xff]  ;;  %1166 = vst [vmem:[%s4315_s6 + $0x6c8] sm:$0xff] %v1165_v25 }
  0xee   : > { %1168 = vst [vmem:[%s4315_s6 + $0x6d0] sm:$0xff] %v1167_v26  ;;  %v1169_v27 = vld [vmem:[%s4310_s5 + $0x36c0] sm:$0xff] }
  0xef   : > { %v1171_v28 = vld [vmem:[%s4310_s5 + $0x3700] sm:$0xff]  ;;  %1170 = vst [vmem:[%s4315_s6 + $0x6d8] sm:$0xff] %v1169_v27 }
  0xf0   : > { %v1173_v29 = vld [vmem:[%s4310_s5 + $0x3740] sm:$0xff]  ;;  %1172 = vst [vmem:[%s4315_s6 + $0x6e0] sm:$0xff] %v1171_v28 }
  0xf1   : > { %1174 = vst [vmem:[%s4315_s6 + $0x6e8] sm:$0xff] %v1173_v29  ;;  %v1175_v30 = vld [vmem:[%s4310_s5 + $0x3780] sm:$0xff] }
  0xf2   : > { %v1177_v31 = vld [vmem:[%s4310_s5 + $0x37c0] sm:$0xff]  ;;  %1176 = vst [vmem:[%s4315_s6 + $0x6f0] sm:$0xff] %v1175_v30 }
  0xf3   : > { %v1179_v32 = vld [vmem:[%s4310_s5 + $0x3800] sm:$0xff]  ;;  %1178 = vst [vmem:[%s4315_s6 + $0x6f8] sm:$0xff] %v1177_v31 }
  0xf4   : > { %1180 = vst [vmem:[%s4315_s6 + $0x700] sm:$0xff] %v1179_v32  ;;  %v1181_v33 = vld [vmem:[%s4310_s5 + $0x3840] sm:$0xff] }
  0xf5   : > { %v1183_v34 = vld [vmem:[%s4310_s5 + $0x3880] sm:$0xff]  ;;  %1182 = vst [vmem:[%s4315_s6 + $0x708] sm:$0xff] %v1181_v33 }
  0xf6   : > { %v1185_v35 = vld [vmem:[%s4310_s5 + $0x38c0] sm:$0xff]  ;;  %1184 = vst [vmem:[%s4315_s6 + $0x710] sm:$0xff] %v1183_v34 }
  0xf7   : > { %1186 = vst [vmem:[%s4315_s6 + $0x718] sm:$0xff] %v1185_v35  ;;  %v1187_v36 = vld [vmem:[%s4310_s5 + $0x3900] sm:$0xff] }
  0xf8   : > { %v1189_v37 = vld [vmem:[%s4310_s5 + $0x3940] sm:$0xff]  ;;  %1188 = vst [vmem:[%s4315_s6 + $0x720] sm:$0xff] %v1187_v36 }
  0xf9   : > { %v1191_v38 = vld [vmem:[%s4310_s5 + $0x3980] sm:$0xff]  ;;  %1190 = vst [vmem:[%s4315_s6 + $0x728] sm:$0xff] %v1189_v37 }
  0xfa   : > { %1192 = vst [vmem:[%s4315_s6 + $0x730] sm:$0xff] %v1191_v38  ;;  %v1193_v39 = vld [vmem:[%s4310_s5 + $0x39c0] sm:$0xff] }
  0xfb   : > { %v1195_v40 = vld [vmem:[%s4310_s5 + $0x3a00] sm:$0xff]  ;;  %1194 = vst [vmem:[%s4315_s6 + $0x738] sm:$0xff] %v1193_v39 }
  0xfc   : > { %v1197_v41 = vld [vmem:[%s4310_s5 + $0x3a40] sm:$0xff]  ;;  %1196 = vst [vmem:[%s4315_s6 + $0x740] sm:$0xff] %v1195_v40 }
  0xfd   : > { %1198 = vst [vmem:[%s4315_s6 + $0x748] sm:$0xff] %v1197_v41  ;;  %v1199_v42 = vld [vmem:[%s4310_s5 + $0x3a80] sm:$0xff] }
  0xfe   : > { %v1201_v43 = vld [vmem:[%s4310_s5 + $0x3ac0] sm:$0xff]  ;;  %1200 = vst [vmem:[%s4315_s6 + $0x750] sm:$0xff] %v1199_v42 }
  0xff   : > { %v1203_v44 = vld [vmem:[%s4310_s5 + $0x3b00] sm:$0xff]  ;;  %1202 = vst [vmem:[%s4315_s6 + $0x758] sm:$0xff] %v1201_v43 }
 0x100   : > { %1204 = vst [vmem:[%s4315_s6 + $0x760] sm:$0xff] %v1203_v44  ;;  %v1205_v45 = vld [vmem:[%s4310_s5 + $0x3b40] sm:$0xff] }
 0x101   : > { %v1207_v46 = vld [vmem:[%s4310_s5 + $0x3b80] sm:$0xff]  ;;  %1206 = vst [vmem:[%s4315_s6 + $0x768] sm:$0xff] %v1205_v45 }
 0x102   : > { %v1209_v47 = vld [vmem:[%s4310_s5 + $0x3bc0] sm:$0xff]  ;;  %1208 = vst [vmem:[%s4315_s6 + $0x770] sm:$0xff] %v1207_v46 }
 0x103   : > { %1210 = vst [vmem:[%s4315_s6 + $0x778] sm:$0xff] %v1209_v47  ;;  %v1211_v48 = vld [vmem:[%s4310_s5 + $0x3c00] sm:$0xff] }
 0x104   : > { %v1213_v49 = vld [vmem:[%s4310_s5 + $0x3c40] sm:$0xff]  ;;  %1212 = vst [vmem:[%s4315_s6 + $0x780] sm:$0xff] %v1211_v48 }
 0x105   : > { %v1215_v50 = vld [vmem:[%s4310_s5 + $0x3c80] sm:$0xff]  ;;  %1214 = vst [vmem:[%s4315_s6 + $0x788] sm:$0xff] %v1213_v49 }
 0x106   : > { %1216 = vst [vmem:[%s4315_s6 + $0x790] sm:$0xff] %v1215_v50  ;;  %v1217_v51 = vld [vmem:[%s4310_s5 + $0x3cc0] sm:$0xff] }
 0x107   : > { %v1219_v52 = vld [vmem:[%s4310_s5 + $0x3d00] sm:$0xff]  ;;  %1218 = vst [vmem:[%s4315_s6 + $0x798] sm:$0xff] %v1217_v51 }
 0x108   : > { %v1221_v53 = vld [vmem:[%s4310_s5 + $0x3d40] sm:$0xff]  ;;  %1220 = vst [vmem:[%s4315_s6 + $0x7a0] sm:$0xff] %v1219_v52 }
 0x109   : > { %1222 = vst [vmem:[%s4315_s6 + $0x7a8] sm:$0xff] %v1221_v53  ;;  %v1223_v54 = vld [vmem:[%s4310_s5 + $0x3d80] sm:$0xff] }
 0x10a   : > { %v1225_v55 = vld [vmem:[%s4310_s5 + $0x3dc0] sm:$0xff]  ;;  %1224 = vst [vmem:[%s4315_s6 + $0x7b0] sm:$0xff] %v1223_v54 }
 0x10b   : > { %v1227_v56 = vld [vmem:[%s4310_s5 + $0x3e00] sm:$0xff]  ;;  %1226 = vst [vmem:[%s4315_s6 + $0x7b8] sm:$0xff] %v1225_v55 }
 0x10c   : > { %1228 = vst [vmem:[%s4315_s6 + $0x7c0] sm:$0xff] %v1227_v56  ;;  %v1229_v57 = vld [vmem:[%s4310_s5 + $0x3e40] sm:$0xff] }
 0x10d   : > { %v1231_v58 = vld [vmem:[%s4310_s5 + $0x3e80] sm:$0xff]  ;;  %1230 = vst [vmem:[%s4315_s6 + $0x7c8] sm:$0xff] %v1229_v57 }
 0x10e   : > { %v1233_v59 = vld [vmem:[%s4310_s5 + $0x3ec0] sm:$0xff]  ;;  %1232 = vst [vmem:[%s4315_s6 + $0x7d0] sm:$0xff] %v1231_v58 }
 0x10f   : > { %1234 = vst [vmem:[%s4315_s6 + $0x7d8] sm:$0xff] %v1233_v59  ;;  %v1235_v60 = vld [vmem:[%s4310_s5 + $0x3f00] sm:$0xff] }
 0x110   : > { %v1237_v61 = vld [vmem:[%s4310_s5 + $0x3f40] sm:$0xff]  ;;  %1236 = vst [vmem:[%s4315_s6 + $0x7e0] sm:$0xff] %v1235_v60 }
 0x111   : > { %v1239_v62 = vld [vmem:[%s4310_s5 + $0x3f80] sm:$0xff]  ;;  %1238 = vst [vmem:[%s4315_s6 + $0x7e8] sm:$0xff] %v1237_v61 }
 0x112   : > { %1240 = vst [vmem:[%s4315_s6 + $0x7f0] sm:$0xff] %v1239_v62  ;;  %v1241_v63 = vld [vmem:[%s4310_s5 + $0x3fc0] sm:$0xff] }
 0x113   : > { %1242 = vst [vmem:[%s4315_s6 + $0x7f8] sm:$0xff] %v1241_v63 }
 0x114 PF: > { %p3489_p8 = scmp.ge.s32.totalorder %s4235_s19, 1  ;;  %p1263_p9 = scmp.lt.s32.totalorder %s4235_s19, 9 }
 0x116   : > { %p1264_p10 = pnand %p3489_p8, %p1263_p9 }
 0x117   : > { %s1270_s7 = sand.u32 (!%p1264_p10), 1, %s4219_s15  }
 0x118   : > { %1267 = sbr.rel (%p1264_p10) target bundleno = 761 (0x2f9), region = 70  ;;  %s3490_s14 = sshll.u32 (!%p1264_p10), %s1270_s7, 11 }
 0x119   : > { %s4859_s23 = scalar_lea.vmem (!%p1264_p10), [#allocation2], %s3490_s14  ;;  %s3491_s21 = sshll.u32 (!%p1264_p10), %s1270_s7, 5 }
 0x11a   : > { %s1307_s22 = scalar_lea.vmem (!%p1264_p10), [#allocation3], %s3491_s21 }
 0x11d   : > { %v4832_v0 = vld [vmem:[%s5237_s0] sm:$0xff]  ;;  %v4842_v2 = vld [vmem:[%s5237_s0 + $0x8] sm:$0xff]  ;;  %v3813_v8 = vld [vmem:[%s4859_s23 + $0x74] ss:$8 sps:$4 sm:$0xff]   ;;  %s3772_s15 = sshll.u32 (%p4297_p6), %s4227_s17, 4 }
 0x11e   : > { %v4837_v1 = vld [vmem:[%s5237_s0 + $0x40] sm:$0xff]  ;;  %v4853_v5 = vld [vmem:[%s5237_s0 + $0x48] sm:$0xff]  ;;  %v3815_v9 = vld [vmem:[%s4859_s23 + $0x174] ss:$8 sps:$4 sm:$0xff]   ;;  %2960 = vmatprep.subr.bf16.mxu0 %v3813_v8  ;;  %s3356_s27 = scalar_lea.vmem (%p4297_p6), %s5241_s4, %s3772_s15 }
 0x11f   : > { %v3494_v3 = vcombine.low %v4832_v0, %v4837_v1  ;;  %v3495_v4 = vcombine.high %v4832_v0, %v4837_v1  ;;  %v3496_v6 = vcombine.low %v4842_v2, %v4853_v5  ;;  %v3497_v7 = vcombine.high %v4842_v2, %v4853_v5  ;;  %v3817_v10 = vld [vmem:[%s4859_s23 + $0x70] ss:$8 sps:$4 sm:$0xff]   ;;  %3003 = vmatprep.subr.bf16.mxu1 %v3815_v9  ;;  %v3819_v12 = vld [vmem:[%s4859_s23 + $0x64] ss:$8 sps:$4 sm:$0xff]   ;;  %v3823_v14 = vld [vmem:[%s4859_s23 + $0x60] ss:$8 sps:$4 sm:$0xff]  }
 0x120   : > { %v3818_v11 = vld [vmem:[%s4859_s23 + $0x170] ss:$8 sps:$4 sm:$0xff]   ;;  %2961 = vmatpush1.bf16.msra.mxu0 %v3817_v10  ;;  %v3821_v13 = vld [vmem:[%s4859_s23 + $0x164] ss:$8 sps:$4 sm:$0xff]   ;;  %v3824_v15 = vld [vmem:[%s4859_s23 + $0x160] ss:$8 sps:$4 sm:$0xff]  }
 0x121   : > { %2992 = vmatprep.mubr.bf16.mxu0 %v3495_v4  ;;  %3035 = vmatprep.mubr.bf16.mxu1 %v3497_v7  ;;  %v3825_v16 = vld [vmem:[%s4859_s23 + $0x54] ss:$8 sps:$4 sm:$0xff]   ;;  %v3829_v18 = vld [vmem:[%s4859_s23 + $0x50] ss:$8 sps:$4 sm:$0xff]   ;;  %v3831_v20 = vld [vmem:[%s4859_s23 + $0x44] ss:$8 sps:$4 sm:$0xff]  }
 0x122   : > { %3004 = vmatpush1.bf16.msra.mxu1 %v3818_v11  ;;  %2962 = vmatprep.subr.bf16.mxu0 %v3819_v12  ;;  %v3827_v17 = vld [vmem:[%s4859_s23 + $0x154] ss:$8 sps:$4 sm:$0xff]   ;;  %v3830_v19 = vld [vmem:[%s4859_s23 + $0x150] ss:$8 sps:$4 sm:$0xff]   ;;  %v3833_v21 = vld [vmem:[%s4859_s23 + $0x144] ss:$8 sps:$4 sm:$0xff]  }
 0x123   : > { %3005 = vmatprep.subr.bf16.mxu1 %v3821_v13  ;;  %v3835_v22 = vld [vmem:[%s4859_s23 + $0x40] ss:$8 sps:$4 sm:$0xff]   ;;  %v3837_v24 = vld [vmem:[%s4859_s23 + $0x34] ss:$8 sps:$4 sm:$0xff]   ;;  %v3841_v26 = vld [vmem:[%s4859_s23 + $0x30] ss:$8 sps:$4 sm:$0xff]  }
 0x124   : > { %2963 = vmatpush1.bf16.msra.mxu0 %v3823_v14  ;;  %v3836_v23 = vld [vmem:[%s4859_s23 + $0x140] ss:$8 sps:$4 sm:$0xff]   ;;  %v3839_v25 = vld [vmem:[%s4859_s23 + $0x134] ss:$8 sps:$4 sm:$0xff]   ;;  %v3842_v27 = vld [vmem:[%s4859_s23 + $0x130] ss:$8 sps:$4 sm:$0xff]  }
 0x125   : > { %2964 = vmatprep.subr.bf16.mxu0 %v3825_v16  ;;  %v3843_v28 = vld [vmem:[%s4859_s23 + $0x24] ss:$8 sps:$4 sm:$0xff]   ;;  %v3847_v30 = vld [vmem:[%s4859_s23 + $0x20] ss:$8 sps:$4 sm:$0xff]   ;;  %v3849_v32 = vld [vmem:[%s4859_s23 + $0x14] ss:$8 sps:$4 sm:$0xff]  }
 0x126   : > { %3006 = vmatpush1.bf16.msra.mxu1 %v3824_v15  ;;  %v3845_v29 = vld [vmem:[%s4859_s23 + $0x124] ss:$8 sps:$4 sm:$0xff]   ;;  %v3848_v31 = vld [vmem:[%s4859_s23 + $0x120] ss:$8 sps:$4 sm:$0xff]   ;;  %v3851_v33 = vld [vmem:[%s4859_s23 + $0x114] ss:$8 sps:$4 sm:$0xff]  }
 0x127   : > { %3007 = vmatprep.subr.bf16.mxu1 %v3827_v17  ;;  %v3853_v34 = vld [vmem:[%s4859_s23 + $0x10] ss:$8 sps:$4 sm:$0xff]   ;;  %v3855_v36 = vld [vmem:[%s4859_s23 + $0x4] ss:$8 sps:$4 sm:$0xff]   ;;  %v3859_v38 = vld [vmem:[%s4859_s23] ss:$8 sps:$4 sm:$0xff]  }
 0x128   : > { %2965 = vmatpush1.bf16.msra.mxu0 %v3829_v18  ;;  %v3854_v35 = vld [vmem:[%s4859_s23 + $0x110] ss:$8 sps:$4 sm:$0xff]   ;;  %v3857_v37 = vld [vmem:[%s4859_s23 + $0x104] ss:$8 sps:$4 sm:$0xff]   ;;  %v3860_v39 = vld [vmem:[%s4859_s23 + $0x100] ss:$8 sps:$4 sm:$0xff]  }
 0x129   : > { %2966 = vmatprep.subr.bf16.mxu0 %v3831_v20  ;;  %v3861_v40 = vld [vmem:[%s4859_s23 + $0xf4] ss:$8 sps:$4 sm:$0xff]   ;;  %v3865_v42 = vld [vmem:[%s4859_s23 + $0xf0] ss:$8 sps:$4 sm:$0xff]   ;;  %v3867_v44 = vld [vmem:[%s4859_s23 + $0xe4] ss:$8 sps:$4 sm:$0xff]  }
 0x12a   : > { %3008 = vmatpush1.bf16.msra.mxu1 %v3830_v19  ;;  %v3863_v41 = vld [vmem:[%s4859_s23 + $0x1f4] ss:$8 sps:$4 sm:$0xff]   ;;  %v3866_v43 = vld [vmem:[%s4859_s23 + $0x1f0] ss:$8 sps:$4 sm:$0xff]   ;;  %v3869_v45 = vld [vmem:[%s4859_s23 + $0x1e4] ss:$8 sps:$4 sm:$0xff]  }
 0x12b   : > { %3009 = vmatprep.subr.bf16.mxu1 %v3833_v21  ;;  %v3871_v46 = vld [vmem:[%s4859_s23 + $0xe0] ss:$8 sps:$4 sm:$0xff]   ;;  %v3873_v48 = vld [vmem:[%s4859_s23 + $0xd4] ss:$8 sps:$4 sm:$0xff]   ;;  %v3877_v50 = vld [vmem:[%s4859_s23 + $0xd0] ss:$8 sps:$4 sm:$0xff]  }
 0x12c   : > { %2967 = vmatpush1.bf16.msra.mxu0 %v3835_v22  ;;  %v3872_v47 = vld [vmem:[%s4859_s23 + $0x1e0] ss:$8 sps:$4 sm:$0xff]   ;;  %v3875_v49 = vld [vmem:[%s4859_s23 + $0x1d4] ss:$8 sps:$4 sm:$0xff]   ;;  %v3878_v51 = vld [vmem:[%s4859_s23 + $0x1d0] ss:$8 sps:$4 sm:$0xff]  }
 0x12d   : > { %2968 = vmatprep.subr.bf16.mxu0 %v3837_v24  ;;  %v3879_v52 = vld [vmem:[%s4859_s23 + $0xc4] ss:$8 sps:$4 sm:$0xff]   ;;  %v3883_v54 = vld [vmem:[%s4859_s23 + $0xc0] ss:$8 sps:$4 sm:$0xff]   ;;  %v3885_v56 = vld [vmem:[%s4859_s23 + $0xb4] ss:$8 sps:$4 sm:$0xff]  }
 0x12e   : > { %3010 = vmatpush1.bf16.msra.mxu1 %v3836_v23  ;;  %v3881_v53 = vld [vmem:[%s4859_s23 + $0x1c4] ss:$8 sps:$4 sm:$0xff]   ;;  %v3884_v55 = vld [vmem:[%s4859_s23 + $0x1c0] ss:$8 sps:$4 sm:$0xff]   ;;  %v3887_v57 = vld [vmem:[%s4859_s23 + $0x1b4] ss:$8 sps:$4 sm:$0xff]  }
 0x12f   : > { %3011 = vmatprep.subr.bf16.mxu1 %v3839_v25  ;;  %v3889_v58 = vld [vmem:[%s4859_s23 + $0xb0] ss:$8 sps:$4 sm:$0xff]   ;;  %v3891_v60 = vld [vmem:[%s4859_s23 + $0xa4] ss:$8 sps:$4 sm:$0xff]   ;;  %v3895_v62 = vld [vmem:[%s4859_s23 + $0xa0] ss:$8 sps:$4 sm:$0xff]  }
 0x130   : > { %2969 = vmatpush1.bf16.msra.mxu0 %v3841_v26  ;;  %v3890_v59 = vld [vmem:[%s4859_s23 + $0x1b0] ss:$8 sps:$4 sm:$0xff]   ;;  %v3893_v61 = vld [vmem:[%s4859_s23 + $0x1a4] ss:$8 sps:$4 sm:$0xff]   ;;  %v3896_v63 = vld [vmem:[%s4859_s23 + $0x1a0] ss:$8 sps:$4 sm:$0xff]  }
 0x131   : > { %2970 = vmatprep.subr.bf16.mxu0 %v3843_v28  ;;  %v3897_v4 = vld [vmem:[%s4859_s23 + $0x94] ss:$8 sps:$4 sm:$0xff]   ;;  %v3901_v8 = vld [vmem:[%s4859_s23 + $0x90] ss:$8 sps:$4 sm:$0xff]   ;;  %v3903_v10 = vld [vmem:[%s4859_s23 + $0x84] ss:$8 sps:$4 sm:$0xff]  }
 0x132   : > { %3012 = vmatpush1.bf16.msra.mxu1 %v3842_v27  ;;  %v3899_v7 = vld [vmem:[%s4859_s23 + $0x194] ss:$8 sps:$4 sm:$0xff]   ;;  %v3902_v9 = vld [vmem:[%s4859_s23 + $0x190] ss:$8 sps:$4 sm:$0xff]   ;;  %v3905_v11 = vld [vmem:[%s4859_s23 + $0x184] ss:$8 sps:$4 sm:$0xff]  }
 0x133   : > { %3013 = vmatprep.subr.bf16.mxu1 %v3845_v29  ;;  %v3907_v12 = vld [vmem:[%s4859_s23 + $0x80] ss:$8 sps:$4 sm:$0xff]   ;;  %v3911_v14 = vld [vmem:[%s4859_s23 + $0x274] ss:$8 sps:$4 sm:$0xff]   ;;  %v3909_v18 = vld [vmem:[%s4859_s23 + $0x270] ss:$8 sps:$4 sm:$0xff]  }
 0x134   : > { %2971 = vmatpush1.bf16.msra.mxu0 %v3847_v30  ;;  %v3908_v13 = vld [vmem:[%s4859_s23 + $0x180] ss:$8 sps:$4 sm:$0xff]   ;;  %v3914_v15 = vld [vmem:[%s4859_s23 + $0x374] ss:$8 sps:$4 sm:$0xff]   ;;  %v3912_v19 = vld [vmem:[%s4859_s23 + $0x370] ss:$8 sps:$4 sm:$0xff]  }
 0x135   : > { %2972 = vmatprep.subr.bf16.mxu0 %v3849_v32  ;;  %v4930_v16 = vld [vmem:[%s5237_s0 + $0x10] sm:$0xff]  ;;  %v3917_v20 = vld [vmem:[%s4859_s23 + $0x264] ss:$8 sps:$4 sm:$0xff]   ;;  %v3915_v23 = vld [vmem:[%s4859_s23 + $0x260] ss:$8 sps:$4 sm:$0xff]  }
 0x136   : > { %3014 = vmatpush1.bf16.msra.mxu1 %v3848_v31  ;;  %v4935_v17 = vld [vmem:[%s5237_s0 + $0x50] sm:$0xff]  ;;  %v3920_v21 = vld [vmem:[%s4859_s23 + $0x364] ss:$8 sps:$4 sm:$0xff]   ;;  %v3918_v24 = vld [vmem:[%s4859_s23 + $0x360] ss:$8 sps:$4 sm:$0xff]  }
 0x137   : > { %3015 = vmatprep.subr.bf16.mxu1 %v3851_v33  ;;  %v3499_v22 = vcombine.high %v4930_v16, %v4935_v17  ;;  %v3923_v25 = vld [vmem:[%s4859_s23 + $0x254] ss:$8 sps:$4 sm:$0xff]   ;;  %v3921_v0 = vld [vmem:[%s4859_s23 + $0x250] ss:$8 sps:$4 sm:$0xff]   ;;  %v3929_v2 = vld [vmem:[%s4859_s23 + $0x244] ss:$8 sps:$4 sm:$0xff]  }
 0x138   : > { %2973 = vmatpush1.bf16.msra.mxu0 %v3853_v34  ;;  %v3926_v26 = vld [vmem:[%s4859_s23 + $0x354] ss:$8 sps:$4 sm:$0xff]   ;;  %v3924_v1 = vld [vmem:[%s4859_s23 + $0x350] ss:$8 sps:$4 sm:$0xff]   ;;  %v3927_v5 = vld [vmem:[%s4859_s23 + $0x240] ss:$8 sps:$4 sm:$0xff]  }
 0x139   : > { %2974 = vmatprep.subr.bf16.mxu0 %v3855_v36  ;;  %v3935_v27 = vld [vmem:[%s4859_s23 + $0x234] ss:$8 sps:$4 sm:$0xff]   ;;  %v3933_v29 = vld [vmem:[%s4859_s23 + $0x230] ss:$8 sps:$4 sm:$0xff]   ;;  %v3941_v31 = vld [vmem:[%s4859_s23 + $0x224] ss:$8 sps:$4 sm:$0xff]  }
 0x13a   : > { %3016 = vmatpush1.bf16.msra.mxu1 %v3854_v35  ;;  %v3938_v28 = vld [vmem:[%s4859_s23 + $0x334] ss:$8 sps:$4 sm:$0xff]   ;;  %v3936_v30 = vld [vmem:[%s4859_s23 + $0x330] ss:$8 sps:$4 sm:$0xff]   ;;  %v3944_v32 = vld [vmem:[%s4859_s23 + $0x324] ss:$8 sps:$4 sm:$0xff]  }
 0x13b   : > { %3017 = vmatprep.subr.bf16.mxu1 %v3857_v37  ;;  %v4968_v33 = vld [vmem:[%s5237_s0 + $0x18] sm:$0xff]  ;;  %v3939_v34 = vld [vmem:[%s4859_s23 + $0x220] ss:$8 sps:$4 sm:$0xff]  }
 0x13c   : > { %2975 = vmatpush1.bf16.msra.mxu0 %v3859_v38  ;;  %v3942_v35 = vld [vmem:[%s4859_s23 + $0x320] ss:$8 sps:$4 sm:$0xff]   ;;  %v3947_v36 = vld [vmem:[%s4859_s23 + $0x214] ss:$8 sps:$4 sm:$0xff]  }
 0x13d   : > { %2976 = vmatprep.subr.bf16.mxu0 %v3861_v40  ;;  %v3950_v37 = vld [vmem:[%s4859_s23 + $0x314] ss:$8 sps:$4 sm:$0xff]   ;;  %v3945_v40 = vld [vmem:[%s4859_s23 + $0x210] ss:$8 sps:$4 sm:$0xff]  }
 0x13e   : > { %3018 = vmatpush1.bf16.msra.mxu1 %v3860_v39  ;;  %v4977_v38 = vld [vmem:[%s5237_s0 + $0x58] sm:$0xff] }
 0x13f   : > { %3019 = vmatprep.subr.bf16.mxu1 %v3863_v41  ;;  %v3501_v39 = vcombine.high %v4968_v33, %v4977_v38  ;;  %v3948_v41 = vld [vmem:[%s4859_s23 + $0x310] ss:$8 sps:$4 sm:$0xff]  }
 0x140   : > { %2977 = vmatpush2.bf16.msra.mxu0 %v3865_v42  ;;  %v3953_v42 = vld [vmem:[%s4859_s23 + $0x204] ss:$8 sps:$4 sm:$0xff]  }
 0x141   : > { %2978 = vmatprep.subr.bf16.mxu0 %v3867_v44  ;;  %v3951_v44 = vld [vmem:[%s4859_s23 + $0x200] ss:$8 sps:$4 sm:$0xff]  }
 0x142   : > { %3020 = vmatpush2.bf16.msra.mxu1 %v3866_v43  ;;  %v3956_v43 = vld [vmem:[%s4859_s23 + $0x304] ss:$8 sps:$4 sm:$0xff]  }
 0x143   : > { %3021 = vmatprep.subr.bf16.mxu1 %v3869_v45  ;;  %v3954_v45 = vld [vmem:[%s4859_s23 + $0x300] ss:$8 sps:$4 sm:$0xff]  }
 0x144   : > { %2979 = vmatpush2.bf16.msra.mxu0 %v3871_v46  ;;  %v3959_v46 = vld [vmem:[%s4859_s23 + $0x2f4] ss:$8 sps:$4 sm:$0xff]  }
 0x145   : > { %2980 = vmatprep.subr.bf16.mxu0 %v3873_v48  ;;  %v3957_v48 = vld [vmem:[%s4859_s23 + $0x2f0] ss:$8 sps:$4 sm:$0xff]  }
 0x146   : > { %3022 = vmatpush2.bf16.msra.mxu1 %v3872_v47  ;;  %v3962_v47 = vld [vmem:[%s4859_s23 + $0x3f4] ss:$8 sps:$4 sm:$0xff]  }
 0x147   : > { %3023 = vmatprep.subr.bf16.mxu1 %v3875_v49  ;;  %v3960_v49 = vld [vmem:[%s4859_s23 + $0x3f0] ss:$8 sps:$4 sm:$0xff]  }
 0x148   : > { %2981 = vmatpush2.bf16.msra.mxu0 %v3877_v50  ;;  %v3965_v50 = vld [vmem:[%s4859_s23 + $0x2e4] ss:$8 sps:$4 sm:$0xff]  }
 0x149   : > { %2982 = vmatprep.subr.bf16.mxu0 %v3879_v52  ;;  %v3963_v52 = vld [vmem:[%s4859_s23 + $0x2e0] ss:$8 sps:$4 sm:$0xff]  }
 0x14a   : > { %3024 = vmatpush2.bf16.msra.mxu1 %v3878_v51  ;;  %v3968_v51 = vld [vmem:[%s4859_s23 + $0x3e4] ss:$8 sps:$4 sm:$0xff]  }
 0x14b   : > { %3025 = vmatprep.subr.bf16.mxu1 %v3881_v53  ;;  %v3966_v53 = vld [vmem:[%s4859_s23 + $0x3e0] ss:$8 sps:$4 sm:$0xff]  }
 0x14c   : > { %2983 = vmatpush2.bf16.msra.mxu0 %v3883_v54  ;;  %v3971_v54 = vld [vmem:[%s4859_s23 + $0x2d4] ss:$8 sps:$4 sm:$0xff]  }
 0x14d   : > { %2984 = vmatprep.subr.bf16.mxu0 %v3885_v56  ;;  %v3969_v56 = vld [vmem:[%s4859_s23 + $0x2d0] ss:$8 sps:$4 sm:$0xff]  }
 0x14e   : > { %3026 = vmatpush2.bf16.msra.mxu1 %v3884_v55  ;;  %v3974_v55 = vld [vmem:[%s4859_s23 + $0x3d4] ss:$8 sps:$4 sm:$0xff]  }
 0x14f   : > { %3027 = vmatprep.subr.bf16.mxu1 %v3887_v57  ;;  %v3972_v57 = vld [vmem:[%s4859_s23 + $0x3d0] ss:$8 sps:$4 sm:$0xff]  }
 0x150   : > { %2985 = vmatpush2.bf16.msra.mxu0 %v3889_v58  ;;  %v3977_v58 = vld [vmem:[%s4859_s23 + $0x2c4] ss:$8 sps:$4 sm:$0xff]  }
 0x151   : > { %2986 = vmatprep.subr.bf16.mxu0 %v3891_v60  ;;  %v3975_v60 = vld [vmem:[%s4859_s23 + $0x2c0] ss:$8 sps:$4 sm:$0xff]  }
 0x152   : > { %3028 = vmatpush2.bf16.msra.mxu1 %v3890_v59  ;;  %v3980_v59 = vld [vmem:[%s4859_s23 + $0x3c4] ss:$8 sps:$4 sm:$0xff]  }
 0x153   : > { %3029 = vmatprep.subr.bf16.mxu1 %v3893_v61  ;;  %v3978_v61 = vld [vmem:[%s4859_s23 + $0x3c0] ss:$8 sps:$4 sm:$0xff]  }
 0x154   : > { %2987 = vmatpush2.bf16.msra.mxu0 %v3895_v62  ;;  %v3983_v62 = vld [vmem:[%s4859_s23 + $0x2b4] ss:$8 sps:$4 sm:$0xff]  }
 0x155   : > { %2988 = vmatprep.subr.bf16.mxu0 %v3897_v4  ;;  %v3981_v4 = vld [vmem:[%s4859_s23 + $0x2b0] ss:$8 sps:$4 sm:$0xff]  }
 0x156   : > { %3030 = vmatpush2.bf16.msra.mxu1 %v3896_v63  ;;  %v3986_v63 = vld [vmem:[%s4859_s23 + $0x3b4] ss:$8 sps:$4 sm:$0xff]  }
 0x157   : > { %3031 = vmatprep.subr.bf16.mxu1 %v3899_v7  ;;  %v3984_v7 = vld [vmem:[%s4859_s23 + $0x3b0] ss:$8 sps:$4 sm:$0xff]  }
 0x158   : > { %2989 = vmatpush2.bf16.msra.mxu0 %v3901_v8  ;;  %v3989_v8 = vld [vmem:[%s4859_s23 + $0x2a4] ss:$8 sps:$4 sm:$0xff]  }
 0x159   : > { %2990 = vmatprep.subr.bf16.mxu0 %v3903_v10  ;;  %v3987_v10 = vld [vmem:[%s4859_s23 + $0x2a0] ss:$8 sps:$4 sm:$0xff]  }
 0x15a   : > { %3032 = vmatpush2.bf16.msra.mxu1 %v3902_v9  ;;  %v3992_v9 = vld [vmem:[%s4859_s23 + $0x3a4] ss:$8 sps:$4 sm:$0xff]  }
 0x15b   : > { %3033 = vmatprep.subr.bf16.mxu1 %v3905_v11  ;;  %v3990_v11 = vld [vmem:[%s4859_s23 + $0x3a0] ss:$8 sps:$4 sm:$0xff]  }
 0x15c   : > { %2991 = vmatpush2.bf16.msra.mxu0 %v3907_v12  ;;  %v3995_v12 = vld [vmem:[%s4859_s23 + $0x294] ss:$8 sps:$4 sm:$0xff]  }
 0x15d   : > { %3046 = vmatprep.subr.bf16.mxu0 %v3911_v14  ;;  %v3993_v14 = vld [vmem:[%s4859_s23 + $0x290] ss:$8 sps:$4 sm:$0xff]  }
 0x15e   : > { %3034 = vmatpush2.bf16.msra.mxu1 %v3908_v13  ;;  %v3998_v13 = vld [vmem:[%s4859_s23 + $0x394] ss:$8 sps:$4 sm:$0xff]  }
 0x15f   : > { %3089 = vmatprep.subr.bf16.mxu1 %v3914_v15  ;;  %2993 = vmatmul.mubr.bf16.vlgmr.msra.gmra.mxu0 %v3494_v3  ;;  %v3932_v3 = vld [vmem:[%s4859_s23 + $0x344] ss:$8 sps:$4 sm:$0xff]   ;;  %v3996_v15 = vld [vmem:[%s4859_s23 + $0x390] ss:$8 sps:$4 sm:$0xff]  }
 0x160   : > { %3047 = vmatpush1.bf16.msra.mxu0 %v3909_v18  ;;  %3078 = vmatprep.mubr.bf16.mxu0 %v3499_v22  ;;  %v4001_v18 = vld [vmem:[%s4859_s23 + $0x284] ss:$8 sps:$4 sm:$0xff]   ;;  %v4007_v22 = vld [vmem:[%s4859_s23 + $0x474] ss:$8 sps:$4 sm:$0xff]  }
 0x161   : > { %3036 = vmatmul.mubr.bf16.vlgmr.msra.gmra.mxu1 %v3496_v6  ;;  %3048 = vmatprep.subr.bf16.mxu0 %v3917_v20  ;;  %v3930_v6 = vld [vmem:[%s4859_s23 + $0x340] ss:$8 sps:$4 sm:$0xff]  }
 0x162   : > { %3090 = vmatpush1.bf16.msra.mxu1 %v3912_v19  ;;  %3121 = vmatprep.mubr.bf16.mxu1 %v3501_v39  ;;  %v4004_v19 = vld [vmem:[%s4859_s23 + $0x384] ss:$8 sps:$4 sm:$0xff]   ;;  %v3999_v20 = vld [vmem:[%s4859_s23 + $0x280] ss:$8 sps:$4 sm:$0xff]   ;;  %v4034_v39 = vld [vmem:[%s4859_s23 + $0x534] ss:$8 sps:$4 sm:$0xff]  }
 0x163   : > { %3091 = vmatprep.subr.bf16.mxu1 %v3920_v21  ;;  %v4002_v21 = vld [vmem:[%s4859_s23 + $0x380] ss:$8 sps:$4 sm:$0xff]  }
 0x164   : > { %3049 = vmatpush1.bf16.msra.mxu0 %v3915_v23  ;;  %v4010_v23 = vld [vmem:[%s4859_s23 + $0x574] ss:$8 sps:$4 sm:$0xff]  }
 0x165   : > { %3050 = vmatprep.subr.bf16.mxu0 %v3923_v25  ;;  %v4008_v25 = vld [vmem:[%s4859_s23 + $0x570] ss:$8 sps:$4 sm:$0xff]  }
 0x166   : > { %3092 = vmatpush1.bf16.msra.mxu1 %v3918_v24  ;;  %v4005_v24 = vld [vmem:[%s4859_s23 + $0x470] ss:$8 sps:$4 sm:$0xff]  }
 0x167   : > { %3093 = vmatprep.subr.bf16.mxu1 %v3926_v26  ;;  %v3498_v26 = vcombine.low %v4930_v16, %v4935_v17  ;;  %v5042_v16 = vld [vmem:[%s5237_s0 + $0x28] sm:$0xff] }
 0x168   : > { %3051 = vmatpush1.bf16.msra.mxu0 %v3921_v0  ;;  %v3500_v0 = vcombine.low %v4968_v33, %v4977_v38  ;;  %v5047_v17 = vld [vmem:[%s5237_s0 + $0x68] sm:$0xff]  ;;  %v4020_v33 = vld [vmem:[%s4859_s23 + $0x550] ss:$8 sps:$4 sm:$0xff]   ;;  %v4031_v38 = vld [vmem:[%s4859_s23 + $0x434] ss:$8 sps:$4 sm:$0xff]  }
 0x169   : > { %3052 = vmatprep.subr.bf16.mxu0 %v3929_v2  ;;  %v4016_v2 = vld [vmem:[%s4859_s23 + $0x564] ss:$8 sps:$4 sm:$0xff]  }
 0x16a   : > { %3094 = vmatpush1.bf16.msra.mxu1 %v3924_v1  ;;  %v4013_v1 = vld [vmem:[%s4859_s23 + $0x464] ss:$8 sps:$4 sm:$0xff]  }
 0x16b   : > { %3095 = vmatprep.subr.bf16.mxu1 %v3932_v3  ;;  %v5032_v3 = vld [vmem:[%s5237_s0 + $0x20] sm:$0xff] }
 0x16c   : > { %3053 = vmatpush1.bf16.msra.mxu0 %v3927_v5  ;;  %v5037_v5 = vld [vmem:[%s5237_s0 + $0x60] sm:$0xff] }
 0x16d   : > { %3054 = vmatprep.subr.bf16.mxu0 %v3935_v27  ;;  %v3505_v27 = vcombine.high %v5042_v16, %v5047_v17 }
 0x16e   : > { %3096 = vmatpush1.bf16.msra.mxu1 %v3930_v6  ;;  %v3503_v6 = vcombine.high %v5032_v3, %v5037_v5 }
 0x16f   : > { %3097 = vmatprep.subr.bf16.mxu1 %v3938_v28  ;;  %v4011_v28 = vld [vmem:[%s4859_s23 + $0x460] ss:$8 sps:$4 sm:$0xff]  }
 0x170   : > { %3055 = vmatpush1.bf16.msra.mxu0 %v3933_v29  ;;  %v4014_v29 = vld [vmem:[%s4859_s23 + $0x560] ss:$8 sps:$4 sm:$0xff]  }
 0x171   : > { %3056 = vmatprep.subr.bf16.mxu0 %v3941_v31  ;;  %v4022_v31 = vld [vmem:[%s4859_s23 + $0x554] ss:$8 sps:$4 sm:$0xff]  }
 0x172   : > { %3098 = vmatpush1.bf16.msra.mxu1 %v3936_v30  ;;  %v4019_v30 = vld [vmem:[%s4859_s23 + $0x454] ss:$8 sps:$4 sm:$0xff]  }
 0x173   : > { %3099 = vmatprep.subr.bf16.mxu1 %v3944_v32  ;;  %v4017_v32 = vld [vmem:[%s4859_s23 + $0x450] ss:$8 sps:$4 sm:$0xff]  }
 0x174   : > { %3057 = vmatpush1.bf16.msra.mxu0 %v3939_v34  ;;  %v4025_v34 = vld [vmem:[%s4859_s23 + $0x444] ss:$8 sps:$4 sm:$0xff]  }
 0x175   : > { %3058 = vmatprep.subr.bf16.mxu0 %v3947_v36  ;;  %v4023_v36 = vld [vmem:[%s4859_s23 + $0x440] ss:$8 sps:$4 sm:$0xff]  }
 0x176   : > { %3100 = vmatpush1.bf16.msra.mxu1 %v3942_v35  ;;  %v4028_v35 = vld [vmem:[%s4859_s23 + $0x544] ss:$8 sps:$4 sm:$0xff]  }
 0x177   : > { %3101 = vmatprep.subr.bf16.mxu1 %v3950_v37  ;;  %v4026_v37 = vld [vmem:[%s4859_s23 + $0x540] ss:$8 sps:$4 sm:$0xff]  }
 0x178   : > { %3059 = vmatpush1.bf16.msra.mxu0 %v3945_v40  ;;  %v4029_v40 = vld [vmem:[%s4859_s23 + $0x430] ss:$8 sps:$4 sm:$0xff]  }
 0x179   : > { %3060 = vmatprep.subr.bf16.mxu0 %v3953_v42  ;;  %v4037_v42 = vld [vmem:[%s4859_s23 + $0x424] ss:$8 sps:$4 sm:$0xff]  }
 0x17a   : > { %3102 = vmatpush1.bf16.msra.mxu1 %v3948_v41  ;;  %v4032_v41 = vld [vmem:[%s4859_s23 + $0x530] ss:$8 sps:$4 sm:$0xff]  }
 0x17b   : > { %3103 = vmatprep.subr.bf16.mxu1 %v3956_v43  ;;  %v4040_v43 = vld [vmem:[%s4859_s23 + $0x524] ss:$8 sps:$4 sm:$0xff]  }
 0x17c   : > { %3061 = vmatpush1.bf16.msra.mxu0 %v3951_v44  ;;  %v4035_v44 = vld [vmem:[%s4859_s23 + $0x420] ss:$8 sps:$4 sm:$0xff]  }
 0x17d   : > { %3062 = vmatprep.subr.bf16.mxu0 %v3959_v46  ;;  %v4043_v46 = vld [vmem:[%s4859_s23 + $0x414] ss:$8 sps:$4 sm:$0xff]  }
 0x17e   : > { %3104 = vmatpush1.bf16.msra.mxu1 %v3954_v45  ;;  %v4038_v45 = vld [vmem:[%s4859_s23 + $0x520] ss:$8 sps:$4 sm:$0xff]  }
 0x17f   : > { %3105 = vmatprep.subr.bf16.mxu1 %v3962_v47  ;;  %v4046_v47 = vld [vmem:[%s4859_s23 + $0x514] ss:$8 sps:$4 sm:$0xff]  }
 0x180   : > { %3063 = vmatpush2.bf16.msra.mxu0 %v3957_v48  ;;  %v4041_v48 = vld [vmem:[%s4859_s23 + $0x410] ss:$8 sps:$4 sm:$0xff]  }
 0x181   : > { %3064 = vmatprep.subr.bf16.mxu0 %v3965_v50  ;;  %v4049_v50 = vld [vmem:[%s4859_s23 + $0x404] ss:$8 sps:$4 sm:$0xff]  }
 0x182   : > { %3106 = vmatpush2.bf16.msra.mxu1 %v3960_v49  ;;  %v4044_v49 = vld [vmem:[%s4859_s23 + $0x510] ss:$8 sps:$4 sm:$0xff]  }
 0x183   : > { %3107 = vmatprep.subr.bf16.mxu1 %v3968_v51  ;;  %v4052_v51 = vld [vmem:[%s4859_s23 + $0x504] ss:$8 sps:$4 sm:$0xff]  }
 0x184   : > { %3065 = vmatpush2.bf16.msra.mxu0 %v3963_v52  ;;  %v4047_v52 = vld [vmem:[%s4859_s23 + $0x400] ss:$8 sps:$4 sm:$0xff]  }
 0x185   : > { %3066 = vmatprep.subr.bf16.mxu0 %v3971_v54  ;;  %v4055_v54 = vld [vmem:[%s4859_s23 + $0x4f4] ss:$8 sps:$4 sm:$0xff]  }
 0x186   : > { %3108 = vmatpush2.bf16.msra.mxu1 %v3966_v53  ;;  %v4050_v53 = vld [vmem:[%s4859_s23 + $0x500] ss:$8 sps:$4 sm:$0xff]  }
 0x187   : > { %3109 = vmatprep.subr.bf16.mxu1 %v3974_v55  ;;  %v4058_v55 = vld [vmem:[%s4859_s23 + $0x5f4] ss:$8 sps:$4 sm:$0xff]  }
 0x188   : > { %3067 = vmatpush2.bf16.msra.mxu0 %v3969_v56  ;;  %v4053_v56 = vld [vmem:[%s4859_s23 + $0x4f0] ss:$8 sps:$4 sm:$0xff]  }
 0x189   : > { %3068 = vmatprep.subr.bf16.mxu0 %v3977_v58  ;;  %v4061_v58 = vld [vmem:[%s4859_s23 + $0x4e4] ss:$8 sps:$4 sm:$0xff]  }
 0x18a   : > { %3110 = vmatpush2.bf16.msra.mxu1 %v3972_v57  ;;  %v4056_v57 = vld [vmem:[%s4859_s23 + $0x5f0] ss:$8 sps:$4 sm:$0xff]  }
 0x18b   : > { %3111 = vmatprep.subr.bf16.mxu1 %v3980_v59  ;;  %v4064_v59 = vld [vmem:[%s4859_s23 + $0x5e4] ss:$8 sps:$4 sm:$0xff]  }
 0x18c   : > { %3069 = vmatpush2.bf16.msra.mxu0 %v3975_v60  ;;  %v4059_v60 = vld [vmem:[%s4859_s23 + $0x4e0] ss:$8 sps:$4 sm:$0xff]  }
 0x18d   : > { %3070 = vmatprep.subr.bf16.mxu0 %v3983_v62  ;;  %v4067_v62 = vld [vmem:[%s4859_s23 + $0x4d4] ss:$8 sps:$4 sm:$0xff]  }
 0x18e   : > { %3112 = vmatpush2.bf16.msra.mxu1 %v3978_v61  ;;  %v4062_v61 = vld [vmem:[%s4859_s23 + $0x5e0] ss:$8 sps:$4 sm:$0xff]  }
 0x18f   : > { %3113 = vmatprep.subr.bf16.mxu1 %v3986_v63  ;;  %v4070_v63 = vld [vmem:[%s4859_s23 + $0x5d4] ss:$8 sps:$4 sm:$0xff]  }
 0x190   : > { %3071 = vmatpush2.bf16.msra.mxu0 %v3981_v4  ;;  %v4065_v4 = vld [vmem:[%s4859_s23 + $0x4d0] ss:$8 sps:$4 sm:$0xff]  }
 0x191   : > { %3072 = vmatprep.subr.bf16.mxu0 %v3989_v8  ;;  %v4073_v8 = vld [vmem:[%s4859_s23 + $0x4c4] ss:$8 sps:$4 sm:$0xff]  }
 0x192   : > { %3114 = vmatpush2.bf16.msra.mxu1 %v3984_v7  ;;  %v4068_v7 = vld [vmem:[%s4859_s23 + $0x5d0] ss:$8 sps:$4 sm:$0xff]  }
 0x193   : > { %3115 = vmatprep.subr.bf16.mxu1 %v3992_v9  ;;  %v4076_v9 = vld [vmem:[%s4859_s23 + $0x5c4] ss:$8 sps:$4 sm:$0xff]  }
 0x194   : > { %3073 = vmatpush2.bf16.msra.mxu0 %v3987_v10  ;;  %v4071_v10 = vld [vmem:[%s4859_s23 + $0x4c0] ss:$8 sps:$4 sm:$0xff]  }
 0x195   : > { %3074 = vmatprep.subr.bf16.mxu0 %v3995_v12  ;;  %v4079_v12 = vld [vmem:[%s4859_s23 + $0x4b4] ss:$8 sps:$4 sm:$0xff]  }
 0x196   : > { %3116 = vmatpush2.bf16.msra.mxu1 %v3990_v11  ;;  %v4074_v11 = vld [vmem:[%s4859_s23 + $0x5c0] ss:$8 sps:$4 sm:$0xff]  }
 0x197   : > { %3117 = vmatprep.subr.bf16.mxu1 %v3998_v13  ;;  %v4082_v13 = vld [vmem:[%s4859_s23 + $0x5b4] ss:$8 sps:$4 sm:$0xff]  }
 0x198   : > { %3075 = vmatpush2.bf16.msra.mxu0 %v3993_v14  ;;  %v4077_v14 = vld [vmem:[%s4859_s23 + $0x4b0] ss:$8 sps:$4 sm:$0xff]  }
 0x199   : > { %3076 = vmatprep.subr.bf16.mxu0 %v4001_v18  ;;  %v4085_v18 = vld [vmem:[%s4859_s23 + $0x4a4] ss:$8 sps:$4 sm:$0xff]  }
 0x19a   : > { %3118 = vmatpush2.bf16.msra.mxu1 %v3996_v15  ;;  %v4080_v15 = vld [vmem:[%s4859_s23 + $0x5b0] ss:$8 sps:$4 sm:$0xff]  }
 0x19b   : > { %3119 = vmatprep.subr.bf16.mxu1 %v4004_v19  ;;  %v4088_v19 = vld [vmem:[%s4859_s23 + $0x5a4] ss:$8 sps:$4 sm:$0xff]  }
 0x19c   : > { %3077 = vmatpush2.bf16.msra.mxu0 %v3999_v20  ;;  %v4083_v20 = vld [vmem:[%s4859_s23 + $0x4a0] ss:$8 sps:$4 sm:$0xff]  }
 0x19d   : > { %3132 = vmatprep.subr.bf16.mxu0 %v4007_v22  ;;  %v4091_v22 = vld [vmem:[%s4859_s23 + $0x494] ss:$8 sps:$4 sm:$0xff]  }
 0x19e   : > { %3120 = vmatpush2.bf16.msra.mxu1 %v4002_v21  ;;  %v4086_v21 = vld [vmem:[%s4859_s23 + $0x5a0] ss:$8 sps:$4 sm:$0xff]  }
 0x19f   : > { %3175 = vmatprep.subr.bf16.mxu1 %v4010_v23  ;;  %3079 = vmatmul.mubr.bf16.vlgmr.msra.gmra.mxu0 %v3498_v26  ;;  %v4094_v23 = vld [vmem:[%s4859_s23 + $0x594] ss:$8 sps:$4 sm:$0xff]   ;;  %v4097_v26 = vld [vmem:[%s4859_s23 + $0x484] ss:$8 sps:$4 sm:$0xff]  }
 0x1a0   : > { %3133 = vmatpush1.bf16.msra.mxu0 %v4005_v24  ;;  %3164 = vmatprep.mubr.bf16.mxu0 %v3503_v6  ;;  %v4089_v24 = vld [vmem:[%s4859_s23 + $0x490] ss:$8 sps:$4 sm:$0xff]   ;;  %v4103_v6 = vld [vmem:[%s4859_s23 + $0x674] ss:$8 sps:$4 sm:$0xff]  }
 0x1a1   : > { %3122 = vmatmul.mubr.bf16.vlgmr.msra.gmra.mxu1 %v3500_v0  ;;  %3134 = vmatprep.subr.bf16.mxu0 %v4013_v1  ;;  %v4100_v0 = vld [vmem:[%s4859_s23 + $0x584] ss:$8 sps:$4 sm:$0xff]   ;;  %v4095_v1 = vld [vmem:[%s4859_s23 + $0x480] ss:$8 sps:$4 sm:$0xff]  }
 0x1a2   : > { %3176 = vmatpush1.bf16.msra.mxu1 %v4008_v25  ;;  %3207 = vmatprep.mubr.bf16.mxu1 %v3505_v27  ;;  %v4092_v25 = vld [vmem:[%s4859_s23 + $0x590] ss:$8 sps:$4 sm:$0xff]   ;;  %v4106_v27 = vld [vmem:[%s4859_s23 + $0x774] ss:$8 sps:$4 sm:$0xff]  }
 0x1a3   : > { %3177 = vmatprep.subr.bf16.mxu1 %v4016_v2  ;;  %v4098_v2 = vld [vmem:[%s4859_s23 + $0x580] ss:$8 sps:$4 sm:$0xff]  }
 0x1a4   : > { %3135 = vmatpush1.bf16.msra.mxu0 %v4011_v28  ;;  %v5116_v28 = vld [vmem:[%s5237_s0 + $0x30] sm:$0xff] }
 0x1a5   : > { %3136 = vmatprep.subr.bf16.mxu0 %v4019_v30  ;;  %v3504_v30 = vcombine.low %v5042_v16, %v5047_v17  ;;  %v4109_v16 = vld [vmem:[%s4859_s23 + $0x664] ss:$8 sps:$4 sm:$0xff]  }
 0x1a6   : > { %3178 = vmatpush1.bf16.msra.mxu1 %v4014_v29  ;;  %v3502_v29 = vcombine.low %v5032_v3, %v5037_v5  ;;  %v4101_v3 = vld [vmem:[%s4859_s23 + $0x670] ss:$8 sps:$4 sm:$0xff]   ;;  %v4112_v17 = vld [vmem:[%s4859_s23 + $0x764] ss:$8 sps:$4 sm:$0xff]  }
 0x1a7   : > { %3179 = vmatprep.subr.bf16.mxu1 %v4022_v31  ;;  %v5125_v31 = vld [vmem:[%s5237_s0 + $0x70] sm:$0xff] }
 0x1a8   : > { %3137 = vmatpush1.bf16.msra.mxu0 %v4017_v32  ;;  %v5130_v32 = vld [vmem:[%s5237_s0 + $0x38] sm:$0xff] }
 0x1a9   : > { %3138 = vmatprep.subr.bf16.mxu0 %v4025_v34  ;;  %v4104_v5 = vld [vmem:[%s4859_s23 + $0x770] ss:$8 sps:$4 sm:$0xff]   ;;  %v3507_v34 = vcombine.high %v5116_v28, %v5125_v31 }
 0x1aa   : > { %3180 = vmatpush1.bf16.msra.mxu1 %v4020_v33  ;;  %v5135_v33 = vld [vmem:[%s5237_s0 + $0x78] sm:$0xff] }
 0x1ab   : > { %3181 = vmatprep.subr.bf16.mxu1 %v4028_v35  ;;  %v3509_v35 = vcombine.high %v5130_v32, %v5135_v33 }
 0x1ac   : > { %3139 = vmatpush1.bf16.msra.mxu0 %v4023_v36  ;;  %v4107_v36 = vld [vmem:[%s4859_s23 + $0x660] ss:$8 sps:$4 sm:$0xff]  }
 0x1ad   : > { %3140 = vmatprep.subr.bf16.mxu0 %v4031_v38  ;;  %v4115_v38 = vld [vmem:[%s4859_s23 + $0x654] ss:$8 sps:$4 sm:$0xff]  }
 0x1ae   : > { %3182 = vmatpush1.bf16.msra.mxu1 %v4026_v37  ;;  %v4110_v37 = vld [vmem:[%s4859_s23 + $0x760] ss:$8 sps:$4 sm:$0xff]  }
 0x1af   : > { %3183 = vmatprep.subr.bf16.mxu1 %v4034_v39  ;;  %v4118_v39 = vld [vmem:[%s4859_s23 + $0x754] ss:$8 sps:$4 sm:$0xff]  }
 0x1b0   : > { %3141 = vmatpush1.bf16.msra.mxu0 %v4029_v40  ;;  %v4113_v40 = vld [vmem:[%s4859_s23 + $0x650] ss:$8 sps:$4 sm:$0xff]  }
 0x1b1   : > { %3142 = vmatprep.subr.bf16.mxu0 %v4037_v42  ;;  %v4121_v42 = vld [vmem:[%s4859_s23 + $0x644] ss:$8 sps:$4 sm:$0xff]  }
 0x1b2   : > { %3184 = vmatpush1.bf16.msra.mxu1 %v4032_v41  ;;  %v4116_v41 = vld [vmem:[%s4859_s23 + $0x750] ss:$8 sps:$4 sm:$0xff]  }
 0x1b3   : > { %3185 = vmatprep.subr.bf16.mxu1 %v4040_v43  ;;  %v4124_v43 = vld [vmem:[%s4859_s23 + $0x744] ss:$8 sps:$4 sm:$0xff]  }
 0x1b4   : > { %3143 = vmatpush1.bf16.msra.mxu0 %v4035_v44  ;;  %v4119_v44 = vld [vmem:[%s4859_s23 + $0x640] ss:$8 sps:$4 sm:$0xff]  }
 0x1b5   : > { %3144 = vmatprep.subr.bf16.mxu0 %v4043_v46  ;;  %v4127_v46 = vld [vmem:[%s4859_s23 + $0x634] ss:$8 sps:$4 sm:$0xff]  }
 0x1b6   : > { %3186 = vmatpush1.bf16.msra.mxu1 %v4038_v45  ;;  %v4122_v45 = vld [vmem:[%s4859_s23 + $0x740] ss:$8 sps:$4 sm:$0xff]  }
 0x1b7   : > { %3187 = vmatprep.subr.bf16.mxu1 %v4046_v47  ;;  %v4130_v47 = vld [vmem:[%s4859_s23 + $0x734] ss:$8 sps:$4 sm:$0xff]  }
 0x1b8   : > { %3145 = vmatpush1.bf16.msra.mxu0 %v4041_v48  ;;  %v4125_v48 = vld [vmem:[%s4859_s23 + $0x630] ss:$8 sps:$4 sm:$0xff]  }
 0x1b9   : > { %3146 = vmatprep.subr.bf16.mxu0 %v4049_v50  ;;  %v4133_v50 = vld [vmem:[%s4859_s23 + $0x624] ss:$8 sps:$4 sm:$0xff]  }
 0x1ba   : > { %3188 = vmatpush1.bf16.msra.mxu1 %v4044_v49  ;;  %v4128_v49 = vld [vmem:[%s4859_s23 + $0x730] ss:$8 sps:$4 sm:$0xff]  }
 0x1bb   : > { %3189 = vmatprep.subr.bf16.mxu1 %v4052_v51  ;;  %v4136_v51 = vld [vmem:[%s4859_s23 + $0x724] ss:$8 sps:$4 sm:$0xff]  }
 0x1bc   : > { %3147 = vmatpush1.bf16.msra.mxu0 %v4047_v52  ;;  %v4131_v52 = vld [vmem:[%s4859_s23 + $0x620] ss:$8 sps:$4 sm:$0xff]  }
 0x1bd   : > { %3148 = vmatprep.subr.bf16.mxu0 %v4055_v54  ;;  %v4139_v54 = vld [vmem:[%s4859_s23 + $0x614] ss:$8 sps:$4 sm:$0xff]  }
 0x1be   : > { %3190 = vmatpush1.bf16.msra.mxu1 %v4050_v53  ;;  %v4134_v53 = vld [vmem:[%s4859_s23 + $0x720] ss:$8 sps:$4 sm:$0xff]  }
 0x1bf   : > { %3191 = vmatprep.subr.bf16.mxu1 %v4058_v55  ;;  %v4142_v55 = vld [vmem:[%s4859_s23 + $0x714] ss:$8 sps:$4 sm:$0xff]  }
 0x1c0   : > { %3149 = vmatpush2.bf16.msra.mxu0 %v4053_v56  ;;  %v4137_v56 = vld [vmem:[%s4859_s23 + $0x610] ss:$8 sps:$4 sm:$0xff]  }
 0x1c1   : > { %3150 = vmatprep.subr.bf16.mxu0 %v4061_v58  ;;  %v4145_v58 = vld [vmem:[%s4859_s23 + $0x604] ss:$8 sps:$4 sm:$0xff]  }
 0x1c2   : > { %3192 = vmatpush2.bf16.msra.mxu1 %v4056_v57  ;;  %v4140_v57 = vld [vmem:[%s4859_s23 + $0x710] ss:$8 sps:$4 sm:$0xff]  }
 0x1c3   : > { %3193 = vmatprep.subr.bf16.mxu1 %v4064_v59  ;;  %v4148_v59 = vld [vmem:[%s4859_s23 + $0x704] ss:$8 sps:$4 sm:$0xff]  }
 0x1c4   : > { %3151 = vmatpush2.bf16.msra.mxu0 %v4059_v60  ;;  %v4143_v60 = vld [vmem:[%s4859_s23 + $0x600] ss:$8 sps:$4 sm:$0xff]  }
 0x1c5   : > { %3152 = vmatprep.subr.bf16.mxu0 %v4067_v62  ;;  %v4151_v62 = vld [vmem:[%s4859_s23 + $0x6f4] ss:$8 sps:$4 sm:$0xff]  }
 0x1c6   : > { %3194 = vmatpush2.bf16.msra.mxu1 %v4062_v61  ;;  %v4146_v61 = vld [vmem:[%s4859_s23 + $0x700] ss:$8 sps:$4 sm:$0xff]  }
 0x1c7   : > { %3195 = vmatprep.subr.bf16.mxu1 %v4070_v63  ;;  %v4154_v63 = vld [vmem:[%s4859_s23 + $0x7f4] ss:$8 sps:$4 sm:$0xff]  }
 0x1c8   : > { %3153 = vmatpush2.bf16.msra.mxu0 %v4065_v4  ;;  %v4149_v4 = vld [vmem:[%s4859_s23 + $0x6f0] ss:$8 sps:$4 sm:$0xff]  }
 0x1c9   : > { %3154 = vmatprep.subr.bf16.mxu0 %v4073_v8  ;;  %v4157_v8 = vld [vmem:[%s4859_s23 + $0x6e4] ss:$8 sps:$4 sm:$0xff]  }
 0x1ca   : > { %3196 = vmatpush2.bf16.msra.mxu1 %v4068_v7  ;;  %v4152_v7 = vld [vmem:[%s4859_s23 + $0x7f0] ss:$8 sps:$4 sm:$0xff]  }
 0x1cb   : > { %3197 = vmatprep.subr.bf16.mxu1 %v4076_v9  ;;  %v4160_v9 = vld [vmem:[%s4859_s23 + $0x7e4] ss:$8 sps:$4 sm:$0xff]  }
 0x1cc   : > { %3155 = vmatpush2.bf16.msra.mxu0 %v4071_v10  ;;  %v4155_v10 = vld [vmem:[%s4859_s23 + $0x6e0] ss:$8 sps:$4 sm:$0xff]  }
 0x1cd   : > { %3156 = vmatprep.subr.bf16.mxu0 %v4079_v12  ;;  %v4163_v12 = vld [vmem:[%s4859_s23 + $0x6d4] ss:$8 sps:$4 sm:$0xff]  }
 0x1ce   : > { %3198 = vmatpush2.bf16.msra.mxu1 %v4074_v11  ;;  %v4158_v11 = vld [vmem:[%s4859_s23 + $0x7e0] ss:$8 sps:$4 sm:$0xff]  }
 0x1cf   : > { %3199 = vmatprep.subr.bf16.mxu1 %v4082_v13  ;;  %v4166_v13 = vld [vmem:[%s4859_s23 + $0x7d4] ss:$8 sps:$4 sm:$0xff]  }
 0x1d0   : > { %3157 = vmatpush2.bf16.msra.mxu0 %v4077_v14  ;;  %v4161_v14 = vld [vmem:[%s4859_s23 + $0x6d0] ss:$8 sps:$4 sm:$0xff]  }
 0x1d1   : > { %3158 = vmatprep.subr.bf16.mxu0 %v4085_v18  ;;  %v4169_v18 = vld [vmem:[%s4859_s23 + $0x6c4] ss:$8 sps:$4 sm:$0xff]  }
 0x1d2   : > { %3200 = vmatpush2.bf16.msra.mxu1 %v4080_v15  ;;  %v4164_v15 = vld [vmem:[%s4859_s23 + $0x7d0] ss:$8 sps:$4 sm:$0xff]  }
 0x1d3   : > { %3201 = vmatprep.subr.bf16.mxu1 %v4088_v19  ;;  %v4172_v19 = vld [vmem:[%s4859_s23 + $0x7c4] ss:$8 sps:$4 sm:$0xff]  }
 0x1d4   : > { %3159 = vmatpush2.bf16.msra.mxu0 %v4083_v20  ;;  %v4167_v20 = vld [vmem:[%s4859_s23 + $0x6c0] ss:$8 sps:$4 sm:$0xff]  }
 0x1d5   : > { %3160 = vmatprep.subr.bf16.mxu0 %v4091_v22  ;;  %v4175_v22 = vld [vmem:[%s4859_s23 + $0x6b4] ss:$8 sps:$4 sm:$0xff]  }
 0x1d6   : > { %3202 = vmatpush2.bf16.msra.mxu1 %v4086_v21  ;;  %v4170_v21 = vld [vmem:[%s4859_s23 + $0x7c0] ss:$8 sps:$4 sm:$0xff]  }
 0x1d7   : > { %3203 = vmatprep.subr.bf16.mxu1 %v4094_v23  ;;  %v4178_v23 = vld [vmem:[%s4859_s23 + $0x7b4] ss:$8 sps:$4 sm:$0xff]  }
 0x1d8   : > { %3161 = vmatpush2.bf16.msra.mxu0 %v4089_v24  ;;  %v4173_v24 = vld [vmem:[%s4859_s23 + $0x6b0] ss:$8 sps:$4 sm:$0xff]  }
 0x1d9   : > { %3162 = vmatprep.subr.bf16.mxu0 %v4097_v26  ;;  %v4181_v26 = vld [vmem:[%s4859_s23 + $0x6a4] ss:$8 sps:$4 sm:$0xff]  }
 0x1da   : > { %3204 = vmatpush2.bf16.msra.mxu1 %v4092_v25  ;;  %v4176_v25 = vld [vmem:[%s4859_s23 + $0x7b0] ss:$8 sps:$4 sm:$0xff]  }
 0x1db   : > { %3205 = vmatprep.subr.bf16.mxu1 %v4100_v0  ;;  %v4184_v0 = vld [vmem:[%s4859_s23 + $0x7a4] ss:$8 sps:$4 sm:$0xff]  }
 0x1dc   : > { %3163 = vmatpush2.bf16.msra.mxu0 %v4095_v1  ;;  %v4179_v1 = vld [vmem:[%s4859_s23 + $0x6a0] ss:$8 sps:$4 sm:$0xff]  }
 0x1dd   : > { %3218 = vmatprep.subr.bf16.mxu0 %v4103_v6  ;;  %v4187_v6 = vld [vmem:[%s4859_s23 + $0x694] ss:$8 sps:$4 sm:$0xff]  }
 0x1de   : > { %3206 = vmatpush2.bf16.msra.mxu1 %v4098_v2  ;;  %v4182_v2 = vld [vmem:[%s4859_s23 + $0x7a0] ss:$8 sps:$4 sm:$0xff]  }
 0x1df   : > { %3261 = vmatprep.subr.bf16.mxu1 %v4106_v27  ;;  %3165 = vmatmul.mubr.bf16.vlgmr.msra.gmra.mxu0 %v3502_v29  ;;  %v4190_v27 = vld [vmem:[%s4859_s23 + $0x794] ss:$8 sps:$4 sm:$0xff]   ;;  %v4185_v29 = vld [vmem:[%s4859_s23 + $0x690] ss:$8 sps:$4 sm:$0xff]  }
 0x1e0   : > { %3219 = vmatpush1.bf16.msra.mxu0 %v4101_v3  ;;  %3250 = vmatprep.mubr.bf16.mxu0 %v3507_v34  ;;  %v4193_v3 = vld [vmem:[%s4859_s23 + $0x684] ss:$8 sps:$4 sm:$0xff]   ;;  %v3506_v34 = vcombine.low %v5116_v28, %v5125_v31 }
 0x1e1   : > { %3208 = vmatmul.mubr.bf16.vlgmr.msra.gmra.mxu1 %v3504_v30  ;;  %3220 = vmatprep.subr.bf16.mxu0 %v4109_v16  ;;  %v4188_v30 = vld [vmem:[%s4859_s23 + $0x790] ss:$8 sps:$4 sm:$0xff]   ;;  %v4191_v16 = vld [vmem:[%s4859_s23 + $0x680] ss:$8 sps:$4 sm:$0xff]  }
 0x1e2   : > { %3262 = vmatpush1.bf16.msra.mxu1 %v4104_v5  ;;  %3293 = vmatprep.mubr.bf16.mxu1 %v3509_v35  ;;  %v4196_v5 = vld [vmem:[%s4859_s23 + $0x784] ss:$8 sps:$4 sm:$0xff]   ;;  %v3508_v35 = vcombine.low %v5130_v32, %v5135_v33 }
 0x1e3   : > { %3263 = vmatprep.subr.bf16.mxu1 %v4112_v17  ;;  %v4194_v17 = vld [vmem:[%s4859_s23 + $0x780] ss:$8 sps:$4 sm:$0xff]   ;;  %s3492_s23 = sshll.u32 %s4227_s17, 1 }
 0x1e4   : > { %3221 = vmatpush1.bf16.msra.mxu0 %v4107_v36  ;;  %p1317_p11 = scmp.lt.s32.totalorder %s3492_s23, 15 }
 0x1e5   : > { %3222 = vmatprep.subr.bf16.mxu0 %v4115_v38 }
 0x1e6   : > { %3264 = vmatpush1.bf16.msra.mxu1 %v4110_v37  ;;  %s5250_s23 = smov (!%p1317_p11, %s3492_s23), 15 }
 0x1e7   : > { %3265 = vmatprep.subr.bf16.mxu1 %v4118_v39  ;;  %s1319_s11 = scalar_lea.vmem %s5239_s2, %s5250_s23  ;;  %s1324_s14 = scalar_lea.vmem %s5240_s3, %s5250_s23 }
 0x1e8   : > { %3223 = vmatpush1.bf16.msra.mxu0 %v4113_v40 }
 0x1e9   : > { %3224 = vmatprep.subr.bf16.mxu0 %v4121_v42 }
 0x1ea   : > { %3266 = vmatpush1.bf16.msra.mxu1 %v4116_v41 }
 0x1eb   : > { %3267 = vmatprep.subr.bf16.mxu1 %v4124_v43 }
 0x1ec   : > { %3225 = vmatpush1.bf16.msra.mxu0 %v4119_v44 }
 0x1ed   : > { %3226 = vmatprep.subr.bf16.mxu0 %v4127_v46 }
 0x1ee   : > { %3268 = vmatpush1.bf16.msra.mxu1 %v4122_v45 }
 0x1ef   : > { %3269 = vmatprep.subr.bf16.mxu1 %v4130_v47 }
 0x1f0   : > { %3227 = vmatpush1.bf16.msra.mxu0 %v4125_v48 }
 0x1f1   : > { %3228 = vmatprep.subr.bf16.mxu0 %v4133_v50 }
 0x1f2   : > { %3270 = vmatpush1.bf16.msra.mxu1 %v4128_v49 }
 0x1f3   : > { %3271 = vmatprep.subr.bf16.mxu1 %v4136_v51 }
 0x1f4   : > { %3229 = vmatpush1.bf16.msra.mxu0 %v4131_v52 }
 0x1f5   : > { %3230 = vmatprep.subr.bf16.mxu0 %v4139_v54 }
 0x1f6   : > { %3272 = vmatpush1.bf16.msra.mxu1 %v4134_v53  ;;  %v3306_v53 = vlaneseq }
 0x1f7   : > { %3273 = vmatprep.subr.bf16.mxu1 %v4142_v55 }
 0x1f8   : > { %3231 = vmatpush1.bf16.msra.mxu0 %v4137_v56 }
 0x1f9   : > { %3232 = vmatprep.subr.bf16.mxu0 %v4145_v58 }
 0x1fa   : > { %3274 = vmatpush1.bf16.msra.mxu1 %v4140_v57 }
 0x1fb   : > { %3275 = vmatprep.subr.bf16.mxu1 %v4148_v59 }
 0x1fc   : > { %3233 = vmatpush1.bf16.msra.mxu0 %v4143_v60 }
 0x1fd   : > { %3234 = vmatprep.subr.bf16.mxu0 %v4151_v62 }
 0x1fe   : > { %3276 = vmatpush1.bf16.msra.mxu1 %v4146_v61  ;;  %v3307_v61 = vshrl.u32 %v3306_v53, 7 }
 0x1ff   : > { %3277 = vmatprep.subr.bf16.mxu1 %v4154_v63 }
 0x200   : > { %3235 = vmatpush2.bf16.msra.mxu0 %v4149_v4 }
 0x201   : > { %3236 = vmatprep.subr.bf16.mxu0 %v4157_v8 }
 0x202   : > { %3278 = vmatpush2.bf16.msra.mxu1 %v4152_v7 }
 0x203   : > { %3279 = vmatprep.subr.bf16.mxu1 %v4160_v9 }
 0x204   : > { %3237 = vmatpush2.bf16.msra.mxu0 %v4155_v10 }
 0x205   : > { %3238 = vmatprep.subr.bf16.mxu0 %v4163_v12 }
 0x206   : > { %3280 = vmatpush2.bf16.msra.mxu1 %v4158_v11  ;;  %v3308_v11 = vsub.s32 0, %v3307_v61 }
 0x207   : > { %3281 = vmatprep.subr.bf16.mxu1 %v4166_v13 }
 0x208   : > { %3239 = vmatpush2.bf16.msra.mxu0 %v4161_v14  ;;  %v3304_v14 = vld [vmem:[%s1319_s11] sm:$0x3] }
 0x209   : > { %3240 = vmatprep.subr.bf16.mxu0 %v4169_v18 }
 0x20a   : > { %3282 = vmatpush2.bf16.msra.mxu1 %v4164_v15 }
 0x20b   : > { %3283 = vmatprep.subr.bf16.mxu1 %v4172_v19 }
 0x20c   : > { %3241 = vmatpush2.bf16.msra.mxu0 %v4167_v20  ;;  %v3320_v20 = vld [vmem:[%s1324_s14] sm:$0x3] }
 0x20d   : > { %3242 = vmatprep.subr.bf16.mxu0 %v4175_v22 }
 0x20e   : > { %3284 = vmatpush2.bf16.msra.mxu1 %v4170_v21  ;;  %v3312_v21 = vsub.s32 1, %v3307_v61 }
 0x20f   : > { %3285 = vmatprep.subr.bf16.mxu1 %v4178_v23 }
 0x210   : > { %3243 = vmatpush2.bf16.msra.mxu0 %v4173_v24 }
 0x211   : > { %3244 = vmatprep.subr.bf16.mxu0 %v4181_v26 }
 0x212   : > { %3286 = vmatpush2.bf16.msra.mxu1 %v4176_v25 }
 0x213   : > { %3287 = vmatprep.subr.bf16.mxu1 %v4184_v0  ;;  %v3309_v0 = vrot.slane %v3304_v14, %v3308_v11 }
 0x214   : > { %3245 = vmatpush2.bf16.msra.mxu0 %v4179_v1  ;;  %v3325_v1 = vrot.slane %v3320_v20, %v3308_v11 }
 0x215   : > { %3246 = vmatprep.subr.bf16.mxu0 %v4187_v6 }
 0x216   : > { %3288 = vmatpush2.bf16.msra.mxu1 %v4182_v2 }
 0x217   : > { %3289 = vmatprep.subr.bf16.mxu1 %v4190_v27 }
 0x218   : > { %3247 = vmatpush2.bf16.msra.mxu0 %v4185_v29 }
 0x219   : > { %3248 = vmatprep.subr.bf16.mxu0 %v4193_v3  ;;  %v3313_v3 = vrot.slane %v3304_v14, %v3312_v21 }
 0x21a   : > { %3290 = vmatpush2.bf16.msra.mxu1 %v4188_v30 }
 0x21b   : > { %3291 = vmatprep.subr.bf16.mxu1 %v4196_v5  ;;  %v3329_v5 = vrot.slane %v3320_v20, %v3312_v21 }
 0x21c   : > { %3249 = vmatpush2.bf16.msra.mxu0 %v4191_v16 }
 0x21e   : > { %3292 = vmatpush2.bf16.msra.mxu1 %v4194_v17 }
 0x21f   : > { %3251 = vmatmul.mubr.bf16.vlgmr.msra.gmra.mxu0 %v3506_v34  ;;  %v2994_v36 = vpop.f32.mrf.mxu0 }
 0x221   : > { %3294 = vmatmul.mubr.bf16.vlgmr.msra.gmra.mxu1 %v3508_v35  ;;  %v3037_v37 = vpop.f32.mrf.mxu1  ;;  %v2996_v38 = vpop.f32.mrf.mxu0 }
 0x222   : > { %v3038_v50 = vadd.f32 %v3037_v37, %v2994_v36 }
 0x223   : > { %v3039_v39 = vpop.f32.mrf.mxu1  ;;  %v2998_v40 = vpop.f32.mrf.mxu0 }
 0x224   : > { %v3040_v51 = vadd.f32 %v3039_v39, %v2996_v38 }
 0x225   : > { %v3041_v41 = vpop.f32.mrf.mxu1  ;;  %v3000_v42 = vpop.f32.mrf.mxu0 }
 0x226   : > { %v3042_v56 = vadd.f32 %v3041_v41, %v2998_v40 }
 0x227   : > { %v3043_v43 = vpop.f32.mrf.mxu1 }
 0x228   : > { %v3044_v58 = vadd.f32 %v3043_v43, %v3000_v42 }
 0x25f   : > { %v3080_v44 = vpop.f32.mrf.mxu0 }
 0x260   : > { %v3081_v52 = vadd.f32 %v3080_v44, %v3038_v50 }
 0x261   : > { %v3123_v45 = vpop.f32.mrf.mxu1  ;;  %v3082_v46 = vpop.f32.mrf.mxu0 }
 0x262   : > { %v3083_v57 = vadd.f32 %v3082_v46, %v3040_v51  ;;  %v3124_v59 = vadd.f32 %v3123_v45, %v3081_v52 }
 0x263   : > { %v3125_v28 = vpop.f32.mrf.mxu1  ;;  %v3084_v31 = vpop.f32.mrf.mxu0 }
 0x264   : > { %v3085_v60 = vadd.f32 %v3084_v31, %v3042_v56  ;;  %v3126_v4 = vadd.f32 %v3125_v28, %v3083_v57 }
 0x265   : > { %v3127_v47 = vpop.f32.mrf.mxu1  ;;  %v3086_v32 = vpop.f32.mrf.mxu0 }
 0x266   : > { %v3087_v7 = vadd.f32 %v3086_v32, %v3044_v58  ;;  %v3128_v9 = vadd.f32 %v3127_v47, %v3085_v60 }
 0x267   : > { %v3129_v33 = vpop.f32.mrf.mxu1 }
 0x268   : > { %v3130_v15 = vadd.f32 %v3129_v33, %v3087_v7 }
 0x29f   : > { %v3166_v48 = vpop.f32.mrf.mxu0 }
 0x2a0   : > { %v3167_v8 = vadd.f32 %v3166_v48, %v3124_v59 }
 0x2a1   : > { %v3209_v49 = vpop.f32.mrf.mxu1  ;;  %v3168_v54 = vpop.f32.mrf.mxu0 }
 0x2a2   : > { %v3169_v10 = vadd.f32 %v3168_v54, %v3126_v4  ;;  %v3210_v18 = vadd.f32 %v3209_v49, %v3167_v8 }
 0x2a3   : > { %v3211_v55 = vpop.f32.mrf.mxu1  ;;  %v3170_v62 = vpop.f32.mrf.mxu0 }
 0x2a4   : > { %v3171_v19 = vadd.f32 %v3170_v62, %v3128_v9  ;;  %v3212_v24 = vadd.f32 %v3211_v55, %v3169_v10 }
 0x2a5   : > { %v3213_v63 = vpop.f32.mrf.mxu1  ;;  %v3172_v12 = vpop.f32.mrf.mxu0 }
 0x2a6   : > { %v3173_v25 = vadd.f32 %v3172_v12, %v3130_v15  ;;  %v3214_v27 = vadd.f32 %v3213_v63, %v3171_v19 }
 0x2a7   : > { %v3215_v13 = vpop.f32.mrf.mxu1 }
 0x2a8   : > { %v3216_v34 = vadd.f32 %v3215_v13, %v3173_v25 }
 0x2df   : > { %v3252_v22 = vpop.f32.mrf.mxu0 }
 0x2e0   : > { %v3253_v26 = vadd.f32 %v3252_v22, %v3210_v18 }
 0x2e1   : > { %v3295_v23 = vpop.f32.mrf.mxu1  ;;  %v3254_v2 = vpop.f32.mrf.mxu0 }
 0x2e2   : > { %v3296_v29 = vadd.f32 %v3295_v23, %v3253_v26  ;;  %v3255_v30 = vadd.f32 %v3254_v2, %v3212_v24 }
 0x2e3   : > { %v3297_v6 = vpop.f32.mrf.mxu1  ;;  %v3256_v16 = vpop.f32.mrf.mxu0 }
 0x2e4   : > { %v3316_v35 = vmul.f32 %v3309_v0, %v3296_v29  ;;  %v3298_v36 = vadd.f32 %v3297_v6, %v3255_v30  ;;  %v3257_v37 = vadd.f32 %v3256_v16, %v3214_v27 }
 0x2e5   : > { %v3299_v17 = vpop.f32.mrf.mxu1  ;;  %v3258_v38 = vpop.f32.mrf.mxu0 }
 0x2e6   : > { %v3332_v39 = vadd.f32 %v3325_v1, %v3316_v35  ;;  %v3317_v40 = vmul.f32 %v3313_v3, %v3298_v36  ;;  %v3300_v41 = vadd.f32 %v3299_v17, %v3257_v37  ;;  %v3259_v42 = vadd.f32 %v3258_v38, %v3216_v34 }
 0x2e7   : > { %v3301_v43 = vpop.f32.mrf.mxu1 }
 0x2e8   : > { %v3336_v44 = vmax.f32 %v3332_v39, 0.0  ;;  %v3333_v45 = vadd.f32 %v3329_v5, %v3317_v40  ;;  %v3318_v46 = vmul.f32 %v3309_v0, %v3300_v41  ;;  %v3302_v28 = vadd.f32 %v3301_v43, %v3259_v42 }
 0x2ea   : > { %3340 = vst [vmem:[%s1307_s22] sm:$0xff] %v3336_v44  ;;  %v3337_v31 = vmax.f32 %v3333_v45, 0.0  ;;  %v3334_v47 = vadd.f32 %v3325_v1, %v3318_v46  ;;  %v3319_v32 = vmul.f32 %v3313_v3, %v3302_v28 }
 0x2ec   : > { %3341 = vst [vmem:[%s1307_s22 + $0x8] sm:$0xff] %v3337_v31  ;;  %v3338_v33 = vmax.f32 %v3334_v47, 0.0  ;;  %v3335_v48 = vadd.f32 %v3329_v5, %v3319_v32  ;;  %3350 = sbr.rel (!%p4297_p6) target bundleno = 761 (0x2f9), region = 78 }
 0x2ee   : > { %3342 = vst [vmem:[%s1307_s22 + $0x10] sm:$0xff] %v3338_v33  ;;  %v3339_v49 = vmax.f32 %v3335_v48, 0.0 }
 0x2f0   : > { %3343 = vst [vmem:[%s1307_s22 + $0x18] sm:$0xff] %v3339_v49 }
 0x2f1   : > { %v3369_v50 = vld [vmem:[%s1307_s22] sm:$0xff] }
 0x2f2   : > { %3370 = vst [vmem:[%s3356_s27] sm:$0xff] %v3369_v50 }
 0x2f3   : > { %v3371_v51 = vld [vmem:[%s1307_s22 + $0x8] sm:$0xff] }
 0x2f4   : > { %3372 = vst [vmem:[%s3356_s27 + $0x8] sm:$0xff] %v3371_v51 }
 0x2f5   : > { %v3373_v52 = vld [vmem:[%s1307_s22 + $0x10] sm:$0xff] }
 0x2f6   : > { %3374 = vst [vmem:[%s3356_s27 + $0x80] sm:$0xff] %v3373_v52 }
 0x2f7   : > { %v3375_v53 = vld [vmem:[%s1307_s22 + $0x18] sm:$0xff] }
 0x2f8   : > { %3376 = vst [vmem:[%s3356_s27 + $0x88] sm:$0xff] %v3375_v53 }
 0x2f9 PF: > { %s14_s19 = sadd.s32 1, %s4235_s19   ;;  %s5243_s15 = smov %s4223_s16 }
 0x2fa   : > { %p11_p12 = scmp.ge.s32.totalorder %s14_s19, 10   ;;  %s5244_s16 = smov %s4302_s25 }
 0x2fb   : > { %s5245_s17 = smov %s4231_s18  ;;  %s5246_s18 = smov %s5248_s20 }
 0x2fc   :  { %13 = sbr.rel (!%p11_p12) target bundleno = 3 (0x3), region = 141 }

// kernel: shufflenet2_forward.153
= control target key start
LH: loop header
LB: loop body
LE: loop exit
PB: predicated region body
PF: predicated region fallthrough
CT: control target
= control target key end

     0   :  { %s2409_s1 = inlined_call_operand.vmem [shape: bf16[2048,128], index: 1, kind: input, shape index: {}]   ;;  %s2410_s0 = inlined_call_operand.vmem [shape: bf16[16,2048], index: 0, kind: input, shape index: {}]   ;;  %s2411_s2 = inlined_call_operand.vmem [shape: f32[1,128], index: 2, kind: input, shape index: {}]   ;;  %s2412_s3 = inlined_call_operand.vmem [shape: f32[1,128], index: 3, kind: input, shape index: {}]   ;;  %s2413_s4 = inlined_call_operand.vmem [shape: f32[16,128], index: 4, kind: output, shape index: {}]  }
   0x1   :  { %v1812_v0 = vld [vmem:[%s2409_s1 + $0x78] sm:$0xff]   ;;  %v1816_v4 = vld [vmem:[%s2409_s1 + $0x70] sm:$0xff]   ;;  %v1820_v8 = vld [vmem:[%s2409_s1 + $0x68] sm:$0xff]  }
   0x2   :  { %v1813_v1 = vld [vmem:[%s2409_s1 + $0xf8] sm:$0xff]   ;;  %1636 = vmatprep.subr.bf16.mxu0 %v1812_v0  ;;  %v1817_v5 = vld [vmem:[%s2409_s1 + $0xf0] sm:$0xff]   ;;  %v1821_v9 = vld [vmem:[%s2409_s1 + $0xe8] sm:$0xff]  }
   0x3   :  { %v1814_v2 = vld [vmem:[%s2409_s1 + $0x38] sm:$0xff]   ;;  %1658 = vmatprep.subr.bf16.mxu1 %v1813_v1  ;;  %v1818_v6 = vld [vmem:[%s2409_s1 + $0x30] sm:$0xff]   ;;  %v1822_v10 = vld [vmem:[%s2409_s1 + $0x28] sm:$0xff]  }
   0x4   :  { %v1815_v3 = vld [vmem:[%s2409_s1 + $0xb8] sm:$0xff]   ;;  %1637 = vmatpush3.bf16.msra.mxu0 %v1814_v2  ;;  %v1819_v7 = vld [vmem:[%s2409_s1 + $0xb0] sm:$0xff]   ;;  %v1823_v11 = vld [vmem:[%s2409_s1 + $0xa8] sm:$0xff]  }
   0x5   :  { %1659 = vmatpush3.bf16.msra.mxu1 %v1815_v3  ;;  %1638 = vmatprep.subr.bf16.mxu0 %v1816_v4  ;;  %v1824_v12 = vld [vmem:[%s2409_s1 + $0x60] sm:$0xff]   ;;  %v1828_v16 = vld [vmem:[%s2409_s1 + $0x58] sm:$0xff]   ;;  %v1832_v20 = vld [vmem:[%s2409_s1 + $0x50] sm:$0xff]  }
   0x6   :  { %1660 = vmatprep.subr.bf16.mxu1 %v1817_v5  ;;  %v1825_v13 = vld [vmem:[%s2409_s1 + $0xe0] sm:$0xff]   ;;  %v1829_v17 = vld [vmem:[%s2409_s1 + $0xd8] sm:$0xff]   ;;  %v1833_v21 = vld [vmem:[%s2409_s1 + $0xd0] sm:$0xff]  }
   0x7   :  { %v1826_v14 = vld [vmem:[%s2409_s1 + $0x20] sm:$0xff]   ;;  %v1830_v18 = vld [vmem:[%s2409_s1 + $0x18] sm:$0xff]   ;;  %v1834_v22 = vld [vmem:[%s2409_s1 + $0x10] sm:$0xff]  }
   0x8   :  { %1639 = vmatpush3.bf16.msra.mxu0 %v1818_v6  ;;  %v1827_v15 = vld [vmem:[%s2409_s1 + $0xa0] sm:$0xff]   ;;  %v1831_v19 = vld [vmem:[%s2409_s1 + $0x98] sm:$0xff]   ;;  %v1835_v23 = vld [vmem:[%s2409_s1 + $0x90] sm:$0xff]  }
   0x9   :  { %1661 = vmatpush3.bf16.msra.mxu1 %v1819_v7  ;;  %1640 = vmatprep.subr.bf16.mxu0 %v1820_v8  ;;  %v1836_v24 = vld [vmem:[%s2409_s1 + $0x48] sm:$0xff]   ;;  %v1840_v28 = vld [vmem:[%s2409_s1 + $0x40] sm:$0xff]   ;;  %v1844_v40 = vld [vmem:[%s2409_s1 + $0x178] sm:$0xff]  }
   0xa   :  { %1662 = vmatprep.subr.bf16.mxu1 %v1821_v9  ;;  %v1837_v25 = vld [vmem:[%s2409_s1 + $0xc8] sm:$0xff]   ;;  %v1841_v29 = vld [vmem:[%s2409_s1 + $0xc0] sm:$0xff]   ;;  %v1845_v41 = vld [vmem:[%s2409_s1 + $0x1f8] sm:$0xff]  }
   0xb   :  { %v1838_v26 = vld [vmem:[%s2409_s1 + $0x8] sm:$0xff]   ;;  %v1842_v30 = vld [vmem:[%s2409_s1] sm:$0xff]   ;;  %v1846_v42 = vld [vmem:[%s2409_s1 + $0x138] sm:$0xff]  }
   0xc   :  { %1641 = vmatpush3.bf16.msra.mxu0 %v1822_v10  ;;  %v1839_v27 = vld [vmem:[%s2409_s1 + $0x88] sm:$0xff]   ;;  %v1843_v31 = vld [vmem:[%s2409_s1 + $0x80] sm:$0xff]   ;;  %v1847_v43 = vld [vmem:[%s2409_s1 + $0x1b8] sm:$0xff]  }
   0xd   :  { %1663 = vmatpush3.bf16.msra.mxu1 %v1823_v11  ;;  %1642 = vmatprep.subr.bf16.mxu0 %v1824_v12  ;;  %v18_v32 = vld [vmem:[%s2410_s0] sm:$0xff]  ;;  %v19_v34 = vld [vmem:[%s2410_s0 + $0x8] sm:$0xff]  ;;  %v1848_v44 = vld [vmem:[%s2409_s1 + $0x170] sm:$0xff]  }
   0xe   :  { %1664 = vmatprep.subr.bf16.mxu1 %v1825_v13  ;;  %v26_v33 = vld [vmem:[%s2410_s0 + $0x40] sm:$0xff]  ;;  %v27_v37 = vld [vmem:[%s2410_s0 + $0x48] sm:$0xff]  ;;  %v1849_v45 = vld [vmem:[%s2409_s1 + $0x1f0] sm:$0xff]  }
   0xf   :  { %v1490_v35 = vcombine.low %v18_v32, %v26_v33  ;;  %v1491_v36 = vcombine.high %v18_v32, %v26_v33  ;;  %v1492_v38 = vcombine.low %v19_v34, %v27_v37  ;;  %v1493_v39 = vcombine.high %v19_v34, %v27_v37  ;;  %v1850_v46 = vld [vmem:[%s2409_s1 + $0x130] sm:$0xff]   ;;  %v1852_v48 = vld [vmem:[%s2409_s1 + $0x168] sm:$0xff]   ;;  %v1856_v52 = vld [vmem:[%s2409_s1 + $0x160] sm:$0xff]  }
  0x10   :  { %1643 = vmatpush3.bf16.msra.mxu0 %v1826_v14  ;;  %v1851_v47 = vld [vmem:[%s2409_s1 + $0x1b0] sm:$0xff]   ;;  %v1853_v49 = vld [vmem:[%s2409_s1 + $0x1e8] sm:$0xff]   ;;  %v1857_v53 = vld [vmem:[%s2409_s1 + $0x1e0] sm:$0xff]  }
  0x11   :  { %1665 = vmatpush3.bf16.msra.mxu1 %v1827_v15  ;;  %1644 = vmatprep.subr.bf16.mxu0 %v1828_v16  ;;  %v1854_v50 = vld [vmem:[%s2409_s1 + $0x128] sm:$0xff]   ;;  %v1858_v54 = vld [vmem:[%s2409_s1 + $0x120] sm:$0xff]   ;;  %v1860_v56 = vld [vmem:[%s2409_s1 + $0x158] sm:$0xff]  }
  0x12   :  { %1666 = vmatprep.subr.bf16.mxu1 %v1829_v17  ;;  %1170 = vmatprep.mubr.bf16.mxu0 %v1491_v36  ;;  %v1855_v51 = vld [vmem:[%s2409_s1 + $0x1a8] sm:$0xff]   ;;  %v1859_v55 = vld [vmem:[%s2409_s1 + $0x1a0] sm:$0xff]   ;;  %v1861_v57 = vld [vmem:[%s2409_s1 + $0x1d8] sm:$0xff]  }
  0x13   :  { %1211 = vmatprep.mubr.bf16.mxu1 %v1493_v39  ;;  %v1862_v58 = vld [vmem:[%s2409_s1 + $0x118] sm:$0xff]   ;;  %v1864_v60 = vld [vmem:[%s2409_s1 + $0x150] sm:$0xff]   ;;  %v1868_v0 = vld [vmem:[%s2409_s1 + $0x148] sm:$0xff]  }
  0x14   :  { %1645 = vmatpush3.bf16.msra.mxu0 %v1830_v18  ;;  %v1863_v59 = vld [vmem:[%s2409_s1 + $0x198] sm:$0xff]   ;;  %v1865_v61 = vld [vmem:[%s2409_s1 + $0x1d0] sm:$0xff]   ;;  %v1869_v1 = vld [vmem:[%s2409_s1 + $0x1c8] sm:$0xff]  }
  0x15   :  { %1667 = vmatpush3.bf16.msra.mxu1 %v1831_v19  ;;  %1646 = vmatprep.subr.bf16.mxu0 %v1832_v20  ;;  %v1866_v62 = vld [vmem:[%s2409_s1 + $0x110] sm:$0xff]   ;;  %v1870_v2 = vld [vmem:[%s2409_s1 + $0x108] sm:$0xff]   ;;  %v1872_v4 = vld [vmem:[%s2409_s1 + $0x140] sm:$0xff]  }
  0x16   :  { %1668 = vmatprep.subr.bf16.mxu1 %v1833_v21  ;;  %v1867_v63 = vld [vmem:[%s2409_s1 + $0x190] sm:$0xff]   ;;  %v1871_v3 = vld [vmem:[%s2409_s1 + $0x188] sm:$0xff]   ;;  %v1873_v5 = vld [vmem:[%s2409_s1 + $0x1c0] sm:$0xff]  }
  0x17   :  { %v1874_v6 = vld [vmem:[%s2409_s1 + $0x100] sm:$0xff]   ;;  %v20_v8 = vld [vmem:[%s2410_s0 + $0x10] sm:$0xff]  ;;  %v21_v12 = vld [vmem:[%s2410_s0 + $0x18] sm:$0xff] }
  0x18   :  { %1647 = vmatpush3.bf16.msra.mxu0 %v1834_v22  ;;  %v1875_v7 = vld [vmem:[%s2409_s1 + $0x180] sm:$0xff]   ;;  %v28_v9 = vld [vmem:[%s2410_s0 + $0x50] sm:$0xff]  ;;  %v29_v13 = vld [vmem:[%s2410_s0 + $0x58] sm:$0xff] }
  0x19   :  { %1669 = vmatpush3.bf16.msra.mxu1 %v1835_v23  ;;  %1648 = vmatprep.subr.bf16.mxu0 %v1836_v24  ;;  %v1494_v10 = vcombine.low %v20_v8, %v28_v9  ;;  %v1495_v11 = vcombine.high %v20_v8, %v28_v9  ;;  %v1496_v14 = vcombine.low %v21_v12, %v29_v13  ;;  %v1876_v16 = vld [vmem:[%s2409_s1 + $0x278] sm:$0xff]   ;;  %v1880_v20 = vld [vmem:[%s2409_s1 + $0x270] sm:$0xff]   ;;  %v1884_v24 = vld [vmem:[%s2409_s1 + $0x268] sm:$0xff]  }
  0x1a   :  { %1670 = vmatprep.subr.bf16.mxu1 %v1837_v25  ;;  %v1497_v15 = vcombine.high %v21_v12, %v29_v13  ;;  %v1877_v17 = vld [vmem:[%s2409_s1 + $0x2f8] sm:$0xff]   ;;  %v1881_v21 = vld [vmem:[%s2409_s1 + $0x2f0] sm:$0xff]   ;;  %v1885_v25 = vld [vmem:[%s2409_s1 + $0x2e8] sm:$0xff]  }
  0x1b   :  { %v1878_v18 = vld [vmem:[%s2409_s1 + $0x238] sm:$0xff]   ;;  %v1882_v22 = vld [vmem:[%s2409_s1 + $0x230] sm:$0xff]  }
  0x1c   :  { %1649 = vmatpush3.bf16.msra.mxu0 %v1838_v26  ;;  %v1879_v19 = vld [vmem:[%s2409_s1 + $0x2b8] sm:$0xff]   ;;  %v1883_v23 = vld [vmem:[%s2409_s1 + $0x2b0] sm:$0xff]   ;;  %v1886_v26 = vld [vmem:[%s2409_s1 + $0x228] sm:$0xff]  }
  0x1d   :  { %1671 = vmatpush3.bf16.msra.mxu1 %v1839_v27  ;;  %1650 = vmatprep.subr.bf16.mxu0 %v1840_v28  ;;  %v1887_v27 = vld [vmem:[%s2409_s1 + $0x2a8] sm:$0xff]   ;;  %v1888_v28 = vld [vmem:[%s2409_s1 + $0x260] sm:$0xff]   ;;  %v1892_v32 = vld [vmem:[%s2409_s1 + $0x258] sm:$0xff]  }
  0x1e   :  { %1672 = vmatprep.subr.bf16.mxu1 %v1841_v29  ;;  %v1889_v29 = vld [vmem:[%s2409_s1 + $0x2e0] sm:$0xff]   ;;  %v1893_v33 = vld [vmem:[%s2409_s1 + $0x2d8] sm:$0xff]   ;;  %v1896_v36 = vld [vmem:[%s2409_s1 + $0x250] sm:$0xff]  }
  0x1f   :  { %v1894_v34 = vld [vmem:[%s2409_s1 + $0x218] sm:$0xff]   ;;  %v1897_v37 = vld [vmem:[%s2409_s1 + $0x2d0] sm:$0xff]  }
  0x20   :  { %1651 = vmatpush3.bf16.msra.mxu0 %v1842_v30  ;;  %v1890_v30 = vld [vmem:[%s2409_s1 + $0x220] sm:$0xff]   ;;  %v1899_v39 = vld [vmem:[%s2409_s1 + $0x290] sm:$0xff]   ;;  %v1924_v8 = vld [vmem:[%s2409_s1 + $0x358] sm:$0xff]  }
  0x21   :  { %1673 = vmatpush3.bf16.msra.mxu1 %v1843_v31  ;;  %1680 = vmatprep.subr.bf16.mxu0 %v1844_v40  ;;  %v1891_v31 = vld [vmem:[%s2409_s1 + $0x2a0] sm:$0xff]   ;;  %v1900_v40 = vld [vmem:[%s2409_s1 + $0x248] sm:$0xff]   ;;  %v1925_v9 = vld [vmem:[%s2409_s1 + $0x3d8] sm:$0xff]  }
  0x22   :  { %1702 = vmatprep.subr.bf16.mxu1 %v1845_v41  ;;  %v1901_v41 = vld [vmem:[%s2409_s1 + $0x2c8] sm:$0xff]   ;;  %v1928_v12 = vld [vmem:[%s2409_s1 + $0x350] sm:$0xff]  }
  0x23   :  { %1171 = vmatmul.mubr.bf16.vlgmr.msra.gmra.mxu0 %v1490_v35  ;;  %v1895_v35 = vld [vmem:[%s2409_s1 + $0x298] sm:$0xff]   ;;  %v1929_v13 = vld [vmem:[%s2409_s1 + $0x3d0] sm:$0xff]  }
  0x24   :  { %1212 = vmatmul.mubr.bf16.vlgmr.msra.gmra.mxu1 %v1492_v38  ;;  %1681 = vmatpush3.bf16.msra.mxu0 %v1846_v42  ;;  %v1898_v38 = vld [vmem:[%s2409_s1 + $0x210] sm:$0xff]   ;;  %v1902_v42 = vld [vmem:[%s2409_s1 + $0x208] sm:$0xff]  }
  0x25   :  { %1703 = vmatpush3.bf16.msra.mxu1 %v1847_v43  ;;  %1682 = vmatprep.subr.bf16.mxu0 %v1848_v44  ;;  %v1903_v43 = vld [vmem:[%s2409_s1 + $0x288] sm:$0xff]   ;;  %v1904_v44 = vld [vmem:[%s2409_s1 + $0x240] sm:$0xff]  }
  0x26   :  { %1704 = vmatprep.subr.bf16.mxu1 %v1849_v45  ;;  %1252 = vmatprep.mubr.bf16.mxu0 %v1495_v11  ;;  %v1905_v45 = vld [vmem:[%s2409_s1 + $0x2c0] sm:$0xff]   ;;  %v1927_v11 = vld [vmem:[%s2409_s1 + $0x398] sm:$0xff]  }
  0x27   :  { %1293 = vmatprep.mubr.bf16.mxu1 %v1497_v15  ;;  %v1931_v15 = vld [vmem:[%s2409_s1 + $0x390] sm:$0xff]  }
  0x28   :  { %1683 = vmatpush3.bf16.msra.mxu0 %v1850_v46  ;;  %v1906_v46 = vld [vmem:[%s2409_s1 + $0x200] sm:$0xff]  }
  0x29   :  { %1705 = vmatpush3.bf16.msra.mxu1 %v1851_v47  ;;  %1684 = vmatprep.subr.bf16.mxu0 %v1852_v48  ;;  %v1907_v47 = vld [vmem:[%s2409_s1 + $0x280] sm:$0xff]  }
  0x2a   :  { %1706 = vmatprep.subr.bf16.mxu1 %v1853_v49  ;;  %v22_v48 = vld [vmem:[%s2410_s0 + $0x20] sm:$0xff] }
  0x2b   :  { %v30_v49 = vld [vmem:[%s2410_s0 + $0x60] sm:$0xff] }
  0x2c   :  { %1685 = vmatpush3.bf16.msra.mxu0 %v1854_v50  ;;  %v23_v50 = vld [vmem:[%s2410_s0 + $0x28] sm:$0xff] }
  0x2d   :  { %1707 = vmatpush3.bf16.msra.mxu1 %v1855_v51  ;;  %1686 = vmatprep.subr.bf16.mxu0 %v1856_v52  ;;  %v31_v51 = vld [vmem:[%s2410_s0 + $0x68] sm:$0xff]  ;;  %v1498_v52 = vcombine.low %v22_v48, %v30_v49 }
  0x2e   :  { %1708 = vmatprep.subr.bf16.mxu1 %v1857_v53  ;;  %v1499_v53 = vcombine.high %v22_v48, %v30_v49 }
  0x30   :  { %1687 = vmatpush3.bf16.msra.mxu0 %v1858_v54  ;;  %v1500_v54 = vcombine.low %v23_v50, %v31_v51 }
  0x31   :  { %1709 = vmatpush3.bf16.msra.mxu1 %v1859_v55  ;;  %1688 = vmatprep.subr.bf16.mxu0 %v1860_v56  ;;  %v1501_v55 = vcombine.high %v23_v50, %v31_v51  ;;  %v1908_v56 = vld [vmem:[%s2409_s1 + $0x378] sm:$0xff]  }
  0x32   :  { %1710 = vmatprep.subr.bf16.mxu1 %v1861_v57  ;;  %v1909_v57 = vld [vmem:[%s2409_s1 + $0x3f8] sm:$0xff]  }
  0x34   :  { %1689 = vmatpush3.bf16.msra.mxu0 %v1862_v58  ;;  %v1910_v58 = vld [vmem:[%s2409_s1 + $0x338] sm:$0xff]  }
  0x35   :  { %1711 = vmatpush3.bf16.msra.mxu1 %v1863_v59  ;;  %1690 = vmatprep.subr.bf16.mxu0 %v1864_v60  ;;  %v1911_v59 = vld [vmem:[%s2409_s1 + $0x3b8] sm:$0xff]   ;;  %v1912_v60 = vld [vmem:[%s2409_s1 + $0x370] sm:$0xff]  }
  0x36   :  { %1712 = vmatprep.subr.bf16.mxu1 %v1865_v61  ;;  %v1913_v61 = vld [vmem:[%s2409_s1 + $0x3f0] sm:$0xff]  }
  0x38   :  { %1691 = vmatpush3.bf16.msra.mxu0 %v1866_v62  ;;  %v1914_v62 = vld [vmem:[%s2409_s1 + $0x330] sm:$0xff]  }
  0x39   :  { %1713 = vmatpush3.bf16.msra.mxu1 %v1867_v63  ;;  %1692 = vmatprep.subr.bf16.mxu0 %v1868_v0  ;;  %v1915_v63 = vld [vmem:[%s2409_s1 + $0x3b0] sm:$0xff]   ;;  %v1916_v0 = vld [vmem:[%s2409_s1 + $0x368] sm:$0xff]  }
  0x3a   :  { %1714 = vmatprep.subr.bf16.mxu1 %v1869_v1  ;;  %v1917_v1 = vld [vmem:[%s2409_s1 + $0x3e8] sm:$0xff]  }
  0x3c   :  { %1693 = vmatpush3.bf16.msra.mxu0 %v1870_v2  ;;  %v1918_v2 = vld [vmem:[%s2409_s1 + $0x328] sm:$0xff]  }
  0x3d   :  { %1715 = vmatpush3.bf16.msra.mxu1 %v1871_v3  ;;  %1694 = vmatprep.subr.bf16.mxu0 %v1872_v4  ;;  %v1919_v3 = vld [vmem:[%s2409_s1 + $0x3a8] sm:$0xff]   ;;  %v1920_v4 = vld [vmem:[%s2409_s1 + $0x360] sm:$0xff]  }
  0x3e   :  { %1716 = vmatprep.subr.bf16.mxu1 %v1873_v5  ;;  %v1921_v5 = vld [vmem:[%s2409_s1 + $0x3e0] sm:$0xff]  }
  0x40   :  { %1695 = vmatpush3.bf16.msra.mxu0 %v1874_v6  ;;  %v1922_v6 = vld [vmem:[%s2409_s1 + $0x320] sm:$0xff]  }
  0x41   :  { %1717 = vmatpush3.bf16.msra.mxu1 %v1875_v7  ;;  %1724 = vmatprep.subr.bf16.mxu0 %v1876_v16  ;;  %v1923_v7 = vld [vmem:[%s2409_s1 + $0x3a0] sm:$0xff]   ;;  %v1932_v16 = vld [vmem:[%s2409_s1 + $0x348] sm:$0xff]  }
  0x42   :  { %1746 = vmatprep.subr.bf16.mxu1 %v1877_v17  ;;  %v1933_v17 = vld [vmem:[%s2409_s1 + $0x3c8] sm:$0xff]  }
  0x43   :  { %1253 = vmatmul.mubr.bf16.vlgmr.msra.gmra.mxu0 %v1494_v10  ;;  %v1926_v10 = vld [vmem:[%s2409_s1 + $0x318] sm:$0xff]  }
  0x44   :  { %1294 = vmatmul.mubr.bf16.vlgmr.msra.gmra.mxu1 %v1496_v14  ;;  %1725 = vmatpush3.bf16.msra.mxu0 %v1878_v18  ;;  %v1930_v14 = vld [vmem:[%s2409_s1 + $0x310] sm:$0xff]   ;;  %v1934_v18 = vld [vmem:[%s2409_s1 + $0x308] sm:$0xff]  }
  0x45   :  { %1747 = vmatpush3.bf16.msra.mxu1 %v1879_v19  ;;  %1726 = vmatprep.subr.bf16.mxu0 %v1880_v20  ;;  %v1935_v19 = vld [vmem:[%s2409_s1 + $0x388] sm:$0xff]   ;;  %v1936_v20 = vld [vmem:[%s2409_s1 + $0x340] sm:$0xff]  }
  0x46   :  { %1748 = vmatprep.subr.bf16.mxu1 %v1881_v21  ;;  %1334 = vmatprep.mubr.bf16.mxu0 %v1499_v53  ;;  %v1937_v21 = vld [vmem:[%s2409_s1 + $0x3c0] sm:$0xff]  }
  0x47   :  { %1375 = vmatprep.mubr.bf16.mxu1 %v1501_v55 }
  0x48   :  { %1727 = vmatpush3.bf16.msra.mxu0 %v1882_v22  ;;  %v1938_v22 = vld [vmem:[%s2409_s1 + $0x300] sm:$0xff]  }
  0x49   :  { %1749 = vmatpush3.bf16.msra.mxu1 %v1883_v23  ;;  %1728 = vmatprep.subr.bf16.mxu0 %v1884_v24  ;;  %v1939_v23 = vld [vmem:[%s2409_s1 + $0x380] sm:$0xff]   ;;  %v24_v24 = vld [vmem:[%s2410_s0 + $0x30] sm:$0xff] }
  0x4a   :  { %1750 = vmatprep.subr.bf16.mxu1 %v1885_v25  ;;  %v32_v25 = vld [vmem:[%s2410_s0 + $0x70] sm:$0xff] }
  0x4c   :  { %1729 = vmatpush3.bf16.msra.mxu0 %v1886_v26  ;;  %v25_v26 = vld [vmem:[%s2410_s0 + $0x38] sm:$0xff] }
  0x4d   :  { %1751 = vmatpush3.bf16.msra.mxu1 %v1887_v27  ;;  %1730 = vmatprep.subr.bf16.mxu0 %v1888_v28  ;;  %v1502_v27 = vcombine.low %v24_v24, %v32_v25  ;;  %v1503_v28 = vcombine.high %v24_v24, %v32_v25 }
  0x4e   :  { %1752 = vmatprep.subr.bf16.mxu1 %v1889_v29  ;;  %v33_v29 = vld [vmem:[%s2410_s0 + $0x78] sm:$0xff] }
  0x50   :  { %1731 = vmatpush3.bf16.msra.mxu0 %v1890_v30  ;;  %v1504_v30 = vcombine.low %v25_v26, %v33_v29 }
  0x51   :  { %1753 = vmatpush3.bf16.msra.mxu1 %v1891_v31  ;;  %1732 = vmatprep.subr.bf16.mxu0 %v1892_v32  ;;  %v1505_v31 = vcombine.high %v25_v26, %v33_v29 }
  0x52   :  { %1754 = vmatprep.subr.bf16.mxu1 %v1893_v33 }
  0x54   :  { %1733 = vmatpush3.bf16.msra.mxu0 %v1894_v34 }
  0x55   :  { %1755 = vmatpush3.bf16.msra.mxu1 %v1895_v35  ;;  %1734 = vmatprep.subr.bf16.mxu0 %v1896_v36 }
  0x56   :  { %1756 = vmatprep.subr.bf16.mxu1 %v1897_v37 }
  0x58   :  { %1735 = vmatpush3.bf16.msra.mxu0 %v1898_v38 }
  0x59   :  { %1757 = vmatpush3.bf16.msra.mxu1 %v1899_v39  ;;  %1736 = vmatprep.subr.bf16.mxu0 %v1900_v40 }
  0x5a   :  { %1758 = vmatprep.subr.bf16.mxu1 %v1901_v41 }
  0x5c   :  { %1737 = vmatpush3.bf16.msra.mxu0 %v1902_v42 }
  0x5d   :  { %1759 = vmatpush3.bf16.msra.mxu1 %v1903_v43  ;;  %1738 = vmatprep.subr.bf16.mxu0 %v1904_v44 }
  0x5e   :  { %1760 = vmatprep.subr.bf16.mxu1 %v1905_v45 }
  0x60   :  { %1739 = vmatpush3.bf16.msra.mxu0 %v1906_v46 }
  0x61   :  { %1761 = vmatpush3.bf16.msra.mxu1 %v1907_v47  ;;  %1768 = vmatprep.subr.bf16.mxu0 %v1908_v56 }
  0x62   :  { %1790 = vmatprep.subr.bf16.mxu1 %v1909_v57 }
  0x63   :  { %1335 = vmatmul.mubr.bf16.vlgmr.msra.gmra.mxu0 %v1498_v52 }
  0x64   :  { %1376 = vmatmul.mubr.bf16.vlgmr.msra.gmra.mxu1 %v1500_v54  ;;  %1769 = vmatpush3.bf16.msra.mxu0 %v1910_v58 }
  0x65   :  { %1791 = vmatpush3.bf16.msra.mxu1 %v1911_v59  ;;  %1770 = vmatprep.subr.bf16.mxu0 %v1912_v60 }
  0x66   :  { %1792 = vmatprep.subr.bf16.mxu1 %v1913_v61  ;;  %1416 = vmatprep.mubr.bf16.mxu0 %v1503_v28  ;;  %v1635_v28 = vld [vmem:[%s2412_s3] ss:$0 sm:$0xff] }
  0x67   :  { %1457 = vmatprep.mubr.bf16.mxu1 %v1505_v31 }
  0x68   :  { %1771 = vmatpush3.bf16.msra.mxu0 %v1914_v62 }
  0x69   :  { %1793 = vmatpush3.bf16.msra.mxu1 %v1915_v63  ;;  %1772 = vmatprep.subr.bf16.mxu0 %v1916_v0 }
  0x6a   :  { %1794 = vmatprep.subr.bf16.mxu1 %v1917_v1 }
  0x6c   :  { %1773 = vmatpush3.bf16.msra.mxu0 %v1918_v2 }
  0x6d   :  { %1795 = vmatpush3.bf16.msra.mxu1 %v1919_v3  ;;  %1774 = vmatprep.subr.bf16.mxu0 %v1920_v4 }
  0x6e   :  { %1796 = vmatprep.subr.bf16.mxu1 %v1921_v5 }
  0x70   :  { %1775 = vmatpush3.bf16.msra.mxu0 %v1922_v6 }
  0x71   :  { %1797 = vmatpush3.bf16.msra.mxu1 %v1923_v7  ;;  %1776 = vmatprep.subr.bf16.mxu0 %v1924_v8 }
  0x72   :  { %1798 = vmatprep.subr.bf16.mxu1 %v1925_v9 }
  0x74   :  { %1777 = vmatpush3.bf16.msra.mxu0 %v1926_v10 }
  0x75   :  { %1799 = vmatpush3.bf16.msra.mxu1 %v1927_v11  ;;  %1778 = vmatprep.subr.bf16.mxu0 %v1928_v12 }
  0x76   :  { %1800 = vmatprep.subr.bf16.mxu1 %v1929_v13 }
  0x78   :  { %1779 = vmatpush3.bf16.msra.mxu0 %v1930_v14 }
  0x79   :  { %1801 = vmatpush3.bf16.msra.mxu1 %v1931_v15  ;;  %1780 = vmatprep.subr.bf16.mxu0 %v1932_v16 }
  0x7a   :  { %1802 = vmatprep.subr.bf16.mxu1 %v1933_v17 }
  0x7c   :  { %1781 = vmatpush3.bf16.msra.mxu0 %v1934_v18 }
  0x7d   :  { %1803 = vmatpush3.bf16.msra.mxu1 %v1935_v19  ;;  %1782 = vmatprep.subr.bf16.mxu0 %v1936_v20 }
  0x7e   :  { %1804 = vmatprep.subr.bf16.mxu1 %v1937_v21 }
  0x80   :  { %1783 = vmatpush3.bf16.msra.mxu0 %v1938_v22  ;;  %v1634_v22 = vld [vmem:[%s2411_s2] ss:$0 sm:$0xff] }
  0x81   :  { %1805 = vmatpush3.bf16.msra.mxu1 %v1939_v23 }
  0x83   :  { %1417 = vmatmul.mubr.bf16.vlgmr.msra.gmra.mxu0 %v1502_v27 }
  0x84   :  { %1458 = vmatmul.mubr.bf16.vlgmr.msra.gmra.mxu1 %v1504_v30 }
  0xe3   :  { %v1652_v32 = vpop.f32.mrf.mxu0 }
  0xe4   :  { %v1674_v33 = vpop.f32.mrf.mxu1 }
  0xe5   :  { %v1653_v34 = vpop.f32.mrf.mxu0 }
  0xe6   :  { %v1675_v35 = vpop.f32.mrf.mxu1  ;;  %v1654_v49 = vadd.f32 %v1653_v34, %v1652_v32 }
  0xe7   :  { %v1655_v36 = vpop.f32.mrf.mxu0  ;;  %v1676_v50 = vadd.f32 %v1675_v35, %v1674_v33 }
  0xe8   :  { %v1677_v37 = vpop.f32.mrf.mxu1 }
  0xe9   :  { %v1656_v38 = vpop.f32.mrf.mxu0  ;;  %v1214_v54 = vadd.f32 %v1676_v50, %v1654_v49 }
  0xea   :  { %v1678_v40 = vpop.f32.mrf.mxu1  ;;  %v1657_v55 = vadd.f32 %v1656_v38, %v1655_v36 }
  0xeb   :  { %v1679_v56 = vadd.f32 %v1678_v40, %v1677_v37 }
  0xed   :  { %v1217_v62 = vadd.f32 %v1679_v56, %v1657_v55 }
 0x103   :  { %v1696_v39 = vpop.f32.mrf.mxu0 }
 0x104   :  { %v1718_v41 = vpop.f32.mrf.mxu1 }
 0x105   :  { %v1697_v42 = vpop.f32.mrf.mxu0 }
 0x106   :  { %v1719_v43 = vpop.f32.mrf.mxu1  ;;  %v1698_v53 = vadd.f32 %v1697_v42, %v1696_v39 }
 0x107   :  { %v1699_v44 = vpop.f32.mrf.mxu0  ;;  %v1720_v60 = vadd.f32 %v1719_v43, %v1718_v41 }
 0x108   :  { %v1721_v45 = vpop.f32.mrf.mxu1  ;;  %v1255_v59 = vadd.f32 %v1698_v53, %v1214_v54 }
 0x109   :  { %v1700_v46 = vpop.f32.mrf.mxu0 }
 0x10a   :  { %v1722_v48 = vpop.f32.mrf.mxu1  ;;  %v1701_v61 = vadd.f32 %v1700_v46, %v1699_v44  ;;  %v1296_v2 = vadd.f32 %v1720_v60, %v1255_v59 }
 0x10b   :  { %v1723_v4 = vadd.f32 %v1722_v48, %v1721_v45 }
 0x10c   :  { %v1258_v3 = vadd.f32 %v1701_v61, %v1217_v62 }
 0x10e   :  { %v1299_v10 = vadd.f32 %v1723_v4, %v1258_v3 }
 0x123   :  { %v1740_v47 = vpop.f32.mrf.mxu0 }
 0x124   :  { %v1762_v51 = vpop.f32.mrf.mxu1 }
 0x125   :  { %v1741_v52 = vpop.f32.mrf.mxu0 }
 0x126   :  { %v1763_v57 = vpop.f32.mrf.mxu1  ;;  %v1742_v63 = vadd.f32 %v1741_v52, %v1740_v47 }
 0x127   :  { %v1743_v58 = vpop.f32.mrf.mxu0  ;;  %v1764_v6 = vadd.f32 %v1763_v57, %v1762_v51 }
 0x128   :  { %v1765_v0 = vpop.f32.mrf.mxu1  ;;  %v1337_v5 = vadd.f32 %v1742_v63, %v1296_v2 }
 0x129   :  { %v1744_v1 = vpop.f32.mrf.mxu0 }
 0x12a   :  { %v1745_v7 = vadd.f32 %v1744_v1, %v1743_v58  ;;  %v1766_v8 = vpop.f32.mrf.mxu1  ;;  %v1378_v13 = vadd.f32 %v1764_v6, %v1337_v5 }
 0x12b   :  { %v1767_v18 = vadd.f32 %v1766_v8, %v1765_v0 }
 0x12c   :  { %v1340_v14 = vadd.f32 %v1745_v7, %v1299_v10 }
 0x12e   :  { %v1381_v24 = vadd.f32 %v1767_v18, %v1340_v14 }
 0x143   :  { %v1784_v9 = vpop.f32.mrf.mxu0 }
 0x144   :  { %v1806_v11 = vpop.f32.mrf.mxu1 }
 0x145   :  { %v1785_v12 = vpop.f32.mrf.mxu0 }
 0x146   :  { %v1786_v15 = vadd.f32 %v1785_v12, %v1784_v9  ;;  %v1807_v16 = vpop.f32.mrf.mxu1 }
 0x147   :  { %v1787_v17 = vpop.f32.mrf.mxu0  ;;  %v1808_v20 = vadd.f32 %v1807_v16, %v1806_v11 }
 0x148   :  { %v1419_v19 = vadd.f32 %v1786_v15, %v1378_v13  ;;  %v1809_v21 = vpop.f32.mrf.mxu1 }
 0x149   :  { %v1788_v23 = vpop.f32.mrf.mxu0 }
 0x14a   :  { %v1460_v25 = vadd.f32 %v1808_v20, %v1419_v19  ;;  %v1789_v26 = vadd.f32 %v1788_v23, %v1787_v17  ;;  %v1810_v27 = vpop.f32.mrf.mxu1 }
 0x14b   :  { %v1811_v31 = vadd.f32 %v1810_v27, %v1809_v21 }
 0x14c   :  { %v1473_v29 = vmul.f32 %v1634_v22, %v1460_v25  ;;  %v1422_v30 = vadd.f32 %v1789_v26, %v1381_v24 }
 0x14e   :  { %v1482_v32 = vadd.f32 %v1635_v28, %v1473_v29  ;;  %v1463_v33 = vadd.f32 %v1811_v31, %v1422_v30 }
 0x150   :  { %1484 = vst [vmem:[%s2413_s4] sm:$0xff] %v1482_v32  ;;  %v1474_v34 = vmul.f32 %v1634_v22, %v1463_v33 }
 0x152   :  { %v1483_v35 = vadd.f32 %v1635_v28, %v1474_v34 }
 0x154   :  { %1485 = vst [vmem:[%s2413_s4 + $0x8] sm:$0xff] %v1483_v35 }

</bundles_post_ra>
